<compile_context>
chip_gen: v5e
topology: v5e:2x2
jax: 0.10.0
libtpu: 0.0.40
codegen_flags: <defaults>
</compile_context>

<pallas_src>
import math
from functools import partial

import jax
import jax.numpy as jnp
from jax import lax
from jax.experimental import pallas as pl
from jax.experimental.pallas import tpu as pltpu


# ------------------------------------------------------------------
# Fused multi-scale strided-conv kernel.
#   x_ref  : (1, S*S, Hp2, Wp2, Cin)  parity planes of the padded input
#   w_ref_i: (k_i*k_i, Cin, C_i)      per-scale weights, tap-major
#   b_ref  : (1, dim_out)             concatenated biases
#   o_ref  : (1, Ho, Wo, dim_out)     concatenated output (lane dense)
# ------------------------------------------------------------------
def _cross_embed_kernel(x_ref, *refs, convs, stride, Ho, Wo):
    n = len(convs)
    w_refs = refs[:n]
    b_ref = refs[n]
    o_ref = refs[n + 1]

    pieces = []
    for (k, off), w_ref in zip(convs, w_refs):
        c_out = w_ref.shape[-1]
        acc = jnp.zeros((Ho * Wo, c_out), jnp.float32)
        for dy in range(k):                       # static, small (k <= 8)
            ry = (dy + off) % stride
            ybase = (dy + off) // stride
            for dx in range(k):
                rx = (dx + off) % stride
                xbase = (dx + off) // stride
                pidx = ry * stride + rx
                # contiguous slice of one parity plane -> (Ho, Wo, Cin)
                patch = x_ref[0, pidx, ybase:ybase + Ho, xbase:xbase + Wo, :]
                patch = patch.reshape(Ho * Wo, patch.shape[-1]).astype(jnp.float32)
                w_tap = w_ref[dy * k + dx].astype(jnp.float32)        # (Cin, C_i)
                acc = acc + jnp.dot(patch, w_tap,
                                    preferred_element_type=jnp.float32)
        pieces.append(acc)

    y = jnp.concatenate(pieces, axis=-1) + b_ref[...].astype(jnp.float32)
    o_ref[0] = y.reshape(Ho, Wo, -1).astype(o_ref.dtype)


# ------------------------------------------------------------------
# Wrapper: NCHW in / NCHW out, all scales in one pallas_call.
# ------------------------------------------------------------------
def cross_embed_layer(x_nchw, params, *, stride=2):
    B, Cin, H, W = x_nchw.shape
    kernels = [int(p["kernel"]) for p in params]          # already sorted
    k_max = max(kernels)
    pad_max = (k_max - stride) // 2
    # all scales share the same output resolution (guaranteed by k % 2 == stride % 2)
    Ho = (H - stride) // stride + 1
    Wo = (W - stride) // stride + 1
    dim_out = sum(int(p["w"].shape[-1]) for p in params)

    # NCHW -> NHWC, zero-pad with the max padding; round padded spatial dims up
    # to a multiple of `stride` (extra rows/cols are never read by any tap).
    x = jnp.transpose(x_nchw, (0, 2, 3, 1))
    Hp, Wp = H + 2 * pad_max, W + 2 * pad_max
    Hp_r = -(-Hp // stride) * stride
    Wp_r = -(-Wp // stride) * stride
    x = jnp.pad(x, ((0, 0),
                    (pad_max, pad_max + (Hp_r - Hp)),
                    (pad_max, pad_max + (Wp_r - Wp)),
                    (0, 0)))
    Hp2, Wp2 = Hp_r // stride, Wp_r // stride
    # parity planes: planes[b, ry*S+rx, yy, xx, c] = xpad[b, yy*S+ry, xx*S+rx, c]
    planes = x.reshape(B, Hp2, stride, Wp2, stride, Cin)
    planes = jnp.transpose(planes, (0, 2, 4, 1, 3, 5))
    planes = planes.reshape(B, stride * stride, Hp2, Wp2, Cin)

    # per-scale (kernel size, offset of its smaller padding inside the max pad)
    convs = tuple((k, pad_max - (k - stride) // 2) for k in kernels)
    bias = jnp.concatenate([p["b"] for p in params]).reshape(1, dim_out)

    in_specs = [pl.BlockSpec((1, stride * stride, Hp2, Wp2, Cin),
                             lambda b: (b, 0, 0, 0, 0))]
    inputs = [planes]
    for p in params:
        k = int(p["kernel"])
        c_i = int(p["w"].shape[-1])
        in_specs.append(pl.BlockSpec((k * k, Cin, c_i), lambda b: (0, 0, 0)))
        inputs.append(p["w"])
    in_specs.append(pl.BlockSpec((1, dim_out), lambda b: (0, 0)))
    inputs.append(bias)

    out = pl.pallas_call(
        partial(_cross_embed_kernel, convs=convs, stride=stride, Ho=Ho, Wo=Wo),
        out_shape=jax.ShapeDtypeStruct((B, Ho, Wo, dim_out), x_nchw.dtype),
        grid=(B,),
        in_specs=in_specs,
        out_specs=pl.BlockSpec((1, Ho, Wo, dim_out), lambda b: (b, 0, 0, 0)),
        compiler_params=pltpu.CompilerParams(
            dimension_semantics=("parallel",)),
    )(*inputs)
    # TODO(synk): at production resolutions add an output row-strip grid axis
    # (input block kept resident, pl.ds row slices) so the per-batch block
    # stays under v7x's 64 MiB VMEM.
    return jnp.transpose(out, (0, 3, 1, 2))               # NHWC -> NCHW


# ------------------------------------------------------------------
# Parameters: torch Conv2d(dim_in, dim_scale, k, stride, padding=(k-stride)//2)
# weight (Cout, Cin, k, k) is stored tap-major as (k*k, Cin, Cout); bias kept.
# ------------------------------------------------------------------
def init_params(key, *, dim_in, kernel_sizes, dim_out=None, stride=2):
    dim_out = dim_in if dim_out is None else dim_out
    kernel_sizes = sorted(int(k) for k in kernel_sizes)
    assert all(k % 2 == stride % 2 for k in kernel_sizes)
    n = len(kernel_sizes)
    dim_scales = [int(dim_out / 2 ** i) for i in range(1, n)]
    dim_scales = dim_scales + [dim_out - sum(dim_scales)]
    assert all(c > 0 for c in dim_scales)

    params = []
    for k, c_i in zip(kernel_sizes, dim_scales):
        key, kw, kb = jax.random.split(key, 3)
        bound = 1.0 / math.sqrt(dim_in * k * k)            # torch default init range
        w = jax.random.uniform(kw, (k * k, dim_in, c_i), jnp.float32, -bound, bound)
        b = jax.random.uniform(kb, (c_i,), jnp.float32, -bound, bound)
        params.append(dict(kernel=k, w=w, b=b))
    return params


# ------------------------------------------------------------------
# Pure-JAX reference (same math as torch.nn.Conv2d + concat) for validation.
# ------------------------------------------------------------------
def _reference(x_nchw, params, stride):
    Cin = x_nchw.shape[1]
    outs = []
    for p in params:
        k = int(p["kernel"])
        pad = (k - stride) // 2
        w = p["w"].reshape(k, k, Cin, -1)                  # HWIO
        o = lax.conv_general_dilated(
            x_nchw, w, window_strides=(stride, stride),
            padding=((pad, pad), (pad, pad)),
            dimension_numbers=("NCHW", "HWIO", "NCHW"),
            precision=lax.Precision.HIGHEST)
        outs.append(o + p["b"].reshape(1, -1, 1, 1))
    return jnp.concatenate(outs, axis=1)


if __name__ == "__main__":
    B, dim_in, H, W = 2, 4, 16, 16
    dim_out = 8
    kernel_sizes = (2, 4, 8)
    stride = 2

    key = jax.random.PRNGKey(0)
    kx, kp = jax.random.split(key)
    x = jax.random.normal(kx, (B, dim_in, H, W), jnp.float32)    # NCHW like PyTorch
    params = init_params(kp, dim_in=dim_in, kernel_sizes=kernel_sizes,
                         dim_out=dim_out, stride=stride)

    fwd = jax.jit(lambda xx: cross_embed_layer(xx, params, stride=stride))
    y = fwd(x)
    jax.block_until_ready(y)

    assert y.shape == (B, dim_out, H // stride, W // stride) and y.dtype == x.dtype
    assert bool(jnp.all(jnp.isfinite(y)))

    y_ref = jax.jit(lambda xx: _reference(xx, params, stride))(x)
    jax.block_until_ready(y_ref)
    assert bool(jnp.allclose(y, y_ref, atol=1e-2, rtol=1e-2)), "mismatch vs XLA conv reference"

    print("KERNEL_OK")
</pallas_src>

<mosaic_0001>
module attributes {stable_mosaic.version = 11 : i64} {
  func.func @_cross_embed_kernel(%arg0: i32, %arg1: memref<1x4x11x11x4xf32, #tpu.memory_space<vmem>>, %arg2: memref<4x4x4xf32, #tpu.memory_space<vmem>>, %arg3: memref<16x4x2xf32, #tpu.memory_space<vmem>>, %arg4: memref<64x4x2xf32, #tpu.memory_space<vmem>>, %arg5: memref<1x8xf32, #tpu.memory_space<vmem>>, %arg6: memref<1x8x8x8xf32, #tpu.memory_space<vmem>>) attributes {dimension_semantics = [#tpu.dimension_semantics<parallel>], iteration_bounds = array<i64: 2>, scalar_prefetch = 0 : i64, scratch_operands = 0 : i64, tpu.core_type = #tpu.core_type<tc>, window_params = [{transform_indices = @transform_0, window_bounds = array<i64: 1, 4, 11, 11, 4>}, {pipeline_mode = #tpu.pipeline_mode<synchronous>, transform_indices = @transform_1, window_bounds = array<i64: 4, 4, 4>}, {pipeline_mode = #tpu.pipeline_mode<synchronous>, transform_indices = @transform_2, window_bounds = array<i64: 16, 4, 2>}, {pipeline_mode = #tpu.pipeline_mode<synchronous>, transform_indices = @transform_3, window_bounds = array<i64: 64, 4, 2>}, {pipeline_mode = #tpu.pipeline_mode<synchronous>, transform_indices = @transform_4, window_bounds = array<i64: 1, 8>}, {transform_indices = @transform_5, window_bounds = array<i64: 1, 8, 8, 8>}]} {
    %cst = arith.constant 0.000000e+00 : f32
    %0 = vector.broadcast %cst : f32 to vector<64x4xf32>
    %c0 = arith.constant 0 : index
    %c3 = arith.constant 3 : index
    %c1 = arith.constant 1 : index
    %c1_0 = arith.constant 1 : index
    %c0_1 = arith.constant 0 : index
    %1 = vector.load %arg1[%c0, %c3, %c1, %c1_0, %c0_1] : memref<1x4x11x11x4xf32, #tpu.memory_space<vmem>>, vector<1x1x8x8x4xf32>
    %2 = vector.shape_cast %1 : vector<1x1x8x8x4xf32> to vector<8x8x4xf32>
    %3 = vector.shape_cast %2 : vector<8x8x4xf32> to vector<64x4xf32>
    %c0_2 = arith.constant 0 : index
    %c0_3 = arith.constant 0 : index
    %c0_4 = arith.constant 0 : index
    %4 = vector.load %arg2[%c0_2, %c0_3, %c0_4] : memref<4x4x4xf32, #tpu.memory_space<vmem>>, vector<1x4x4xf32>
    %5 = vector.shape_cast %4 : vector<1x4x4xf32> to vector<4x4xf32>
    %cst_5 = arith.constant dense<0.000000e+00> : vector<64x4xf32>
    %6 = tpu.matmul %3, %5, %cst_5 {dimension_numbers = #tpu.dot_dimension_numbers<[1], [0], [0], [1], [0, 0, 1, 1], [], []>} : vector<64x4xf32>, vector<4x4xf32>, vector<64x4xf32> -> vector<64x4xf32>
    %7 = arith.addf %0, %6 : vector<64x4xf32>
    %c0_6 = arith.constant 0 : index
    %c2 = arith.constant 2 : index
    %c1_7 = arith.constant 1 : index
    %c2_8 = arith.constant 2 : index
    %c0_9 = arith.constant 0 : index
    %8 = vector.load %arg1[%c0_6, %c2, %c1_7, %c2_8, %c0_9] : memref<1x4x11x11x4xf32, #tpu.memory_space<vmem>>, vector<1x1x8x8x4xf32>
    %9 = vector.shape_cast %8 : vector<1x1x8x8x4xf32> to vector<8x8x4xf32>
    %10 = vector.shape_cast %9 : vector<8x8x4xf32> to vector<64x4xf32>
    %c1_10 = arith.constant 1 : index
    %c0_11 = arith.constant 0 : index
    %c0_12 = arith.constant 0 : index
    %11 = vector.load %arg2[%c1_10, %c0_11, %c0_12] : memref<4x4x4xf32, #tpu.memory_space<vmem>>, vector<1x4x4xf32>
    %12 = vector.shape_cast %11 : vector<1x4x4xf32> to vector<4x4xf32>
    %cst_13 = arith.constant dense<0.000000e+00> : vector<64x4xf32>
    %13 = tpu.matmul %10, %12, %cst_13 {dimension_numbers = #tpu.dot_dimension_numbers<[1], [0], [0], [1], [0, 0, 1, 1], [], []>} : vector<64x4xf32>, vector<4x4xf32>, vector<64x4xf32> -> vector<64x4xf32>
    %14 = arith.addf %7, %13 : vector<64x4xf32>
    %c0_14 = arith.constant 0 : index
    %c1_15 = arith.constant 1 : index
    %c2_16 = arith.constant 2 : index
    %c1_17 = arith.constant 1 : index
    %c0_18 = arith.constant 0 : index
    %15 = vector.load %arg1[%c0_14, %c1_15, %c2_16, %c1_17, %c0_18] : memref<1x4x11x11x4xf32, #tpu.memory_space<vmem>>, vector<1x1x8x8x4xf32>
    %16 = vector.shape_cast %15 : vector<1x1x8x8x4xf32> to vector<8x8x4xf32>
    %17 = vector.shape_cast %16 : vector<8x8x4xf32> to vector<64x4xf32>
    %c2_19 = arith.constant 2 : index
    %c0_20 = arith.constant 0 : index
    %c0_21 = arith.constant 0 : index
    %18 = vector.load %arg2[%c2_19, %c0_20, %c0_21] : memref<4x4x4xf32, #tpu.memory_space<vmem>>, vector<1x4x4xf32>
    %19 = vector.shape_cast %18 : vector<1x4x4xf32> to vector<4x4xf32>
    %cst_22 = arith.constant dense<0.000000e+00> : vector<64x4xf32>
    %20 = tpu.matmul %17, %19, %cst_22 {dimension_numbers = #tpu.dot_dimension_numbers<[1], [0], [0], [1], [0, 0, 1, 1], [], []>} : vector<64x4xf32>, vector<4x4xf32>, vector<64x4xf32> -> vector<64x4xf32>
    %21 = arith.addf %14, %20 : vector<64x4xf32>
    %c0_23 = arith.constant 0 : index
    %c0_24 = arith.constant 0 : index
    %c2_25 = arith.constant 2 : index
    %c2_26 = arith.constant 2 : index
    %c0_27 = arith.constant 0 : index
    %22 = vector.load %arg1[%c0_23, %c0_24, %c2_25, %c2_26, %c0_27] : memref<1x4x11x11x4xf32, #tpu.memory_space<vmem>>, vector<1x1x8x8x4xf32>
    %23 = vector.shape_cast %22 : vector<1x1x8x8x4xf32> to vector<8x8x4xf32>
    %24 = vector.shape_cast %23 : vector<8x8x4xf32> to vector<64x4xf32>
    %c3_28 = arith.constant 3 : index
    %c0_29 = arith.constant 0 : index
    %c0_30 = arith.constant 0 : index
    %25 = vector.load %arg2[%c3_28, %c0_29, %c0_30] : memref<4x4x4xf32, #tpu.memory_space<vmem>>, vector<1x4x4xf32>
    %26 = vector.shape_cast %25 : vector<1x4x4xf32> to vector<4x4xf32>
    %cst_31 = arith.constant dense<0.000000e+00> : vector<64x4xf32>
    %27 = tpu.matmul %24, %26, %cst_31 {dimension_numbers = #tpu.dot_dimension_numbers<[1], [0], [0], [1], [0, 0, 1, 1], [], []>} : vector<64x4xf32>, vector<4x4xf32>, vector<64x4xf32> -> vector<64x4xf32>
    %28 = arith.addf %21, %27 : vector<64x4xf32>
    %cst_32 = arith.constant 0.000000e+00 : f32
    %29 = vector.broadcast %cst_32 : f32 to vector<64x2xf32>
    %c0_33 = arith.constant 0 : index
    %c0_34 = arith.constant 0 : index
    %c1_35 = arith.constant 1 : index
    %c1_36 = arith.constant 1 : index
    %c0_37 = arith.constant 0 : index
    %30 = vector.load %arg1[%c0_33, %c0_34, %c1_35, %c1_36, %c0_37] : memref<1x4x11x11x4xf32, #tpu.memory_space<vmem>>, vector<1x1x8x8x4xf32>
    %31 = vector.shape_cast %30 : vector<1x1x8x8x4xf32> to vector<8x8x4xf32>
    %32 = vector.shape_cast %31 : vector<8x8x4xf32> to vector<64x4xf32>
    %c0_38 = arith.constant 0 : index
    %c0_39 = arith.constant 0 : index
    %c0_40 = arith.constant 0 : index
    %33 = vector.load %arg3[%c0_38, %c0_39, %c0_40] : memref<16x4x2xf32, #tpu.memory_space<vmem>>, vector<1x4x2xf32>
    %34 = vector.shape_cast %33 : vector<1x4x2xf32> to vector<4x2xf32>
    %cst_41 = arith.constant dense<0.000000e+00> : vector<64x2xf32>
    %35 = tpu.matmul %32, %34, %cst_41 {dimension_numbers = #tpu.dot_dimension_numbers<[1], [0], [0], [1], [0, 0, 1, 1], [], []>} : vector<64x4xf32>, vector<4x2xf32>, vector<64x2xf32> -> vector<64x2xf32>
    %36 = arith.addf %29, %35 : vector<64x2xf32>
    %c0_42 = arith.constant 0 : index
    %c1_43 = arith.constant 1 : index
    %c1_44 = arith.constant 1 : index
    %c1_45 = arith.constant 1 : index
    %c0_46 = arith.constant 0 : index
    %37 = vector.load %arg1[%c0_42, %c1_43, %c1_44, %c1_45, %c0_46] : memref<1x4x11x11x4xf32, #tpu.memory_space<vmem>>, vector<1x1x8x8x4xf32>
    %38 = vector.shape_cast %37 : vector<1x1x8x8x4xf32> to vector<8x8x4xf32>
    %39 = vector.shape_cast %38 : vector<8x8x4xf32> to vector<64x4xf32>
    %c1_47 = arith.constant 1 : index
    %c0_48 = arith.constant 0 : index
    %c0_49 = arith.constant 0 : index
    %40 = vector.load %arg3[%c1_47, %c0_48, %c0_49] : memref<16x4x2xf32, #tpu.memory_space<vmem>>, vector<1x4x2xf32>
    %41 = vector.shape_cast %40 : vector<1x4x2xf32> to vector<4x2xf32>
    %cst_50 = arith.constant dense<0.000000e+00> : vector<64x2xf32>
    %42 = tpu.matmul %39, %41, %cst_50 {dimension_numbers = #tpu.dot_dimension_numbers<[1], [0], [0], [1], [0, 0, 1, 1], [], []>} : vector<64x4xf32>, vector<4x2xf32>, vector<64x2xf32> -> vector<64x2xf32>
    %43 = arith.addf %36, %42 : vector<64x2xf32>
    %c0_51 = arith.constant 0 : index
    %c0_52 = arith.constant 0 : index
    %c1_53 = arith.constant 1 : index
    %c2_54 = arith.constant 2 : index
    %c0_55 = arith.constant 0 : index
    %44 = vector.load %arg1[%c0_51, %c0_52, %c1_53, %c2_54, %c0_55] : memref<1x4x11x11x4xf32, #tpu.memory_space<vmem>>, vector<1x1x8x8x4xf32>
    %45 = vector.shape_cast %44 : vector<1x1x8x8x4xf32> to vector<8x8x4xf32>
    %46 = vector.shape_cast %45 : vector<8x8x4xf32> to vector<64x4xf32>
    %c2_56 = arith.constant 2 : index
    %c0_57 = arith.constant 0 : index
    %c0_58 = arith.constant 0 : index
    %47 = vector.load %arg3[%c2_56, %c0_57, %c0_58] : memref<16x4x2xf32, #tpu.memory_space<vmem>>, vector<1x4x2xf32>
    %48 = vector.shape_cast %47 : vector<1x4x2xf32> to vector<4x2xf32>
    %cst_59 = arith.constant dense<0.000000e+00> : vector<64x2xf32>
    %49 = tpu.matmul %46, %48, %cst_59 {dimension_numbers = #tpu.dot_dimension_numbers<[1], [0], [0], [1], [0, 0, 1, 1], [], []>} : vector<64x4xf32>, vector<4x2xf32>, vector<64x2xf32> -> vector<64x2xf32>
    %50 = arith.addf %43, %49 : vector<64x2xf32>
    %c0_60 = arith.constant 0 : index
    %c1_61 = arith.constant 1 : index
    %c1_62 = arith.constant 1 : index
    %c2_63 = arith.constant 2 : index
    %c0_64 = arith.constant 0 : index
    %51 = vector.load %arg1[%c0_60, %c1_61, %c1_62, %c2_63, %c0_64] : memref<1x4x11x11x4xf32, #tpu.memory_space<vmem>>, vector<1x1x8x8x4xf32>
    %52 = vector.shape_cast %51 : vector<1x1x8x8x4xf32> to vector<8x8x4xf32>
    %53 = vector.shape_cast %52 : vector<8x8x4xf32> to vector<64x4xf32>
    %c3_65 = arith.constant 3 : index
    %c0_66 = arith.constant 0 : index
    %c0_67 = arith.constant 0 : index
    %54 = vector.load %arg3[%c3_65, %c0_66, %c0_67] : memref<16x4x2xf32, #tpu.memory_space<vmem>>, vector<1x4x2xf32>
    %55 = vector.shape_cast %54 : vector<1x4x2xf32> to vector<4x2xf32>
    %cst_68 = arith.constant dense<0.000000e+00> : vector<64x2xf32>
    %56 = tpu.matmul %53, %55, %cst_68 {dimension_numbers = #tpu.dot_dimension_numbers<[1], [0], [0], [1], [0, 0, 1, 1], [], []>} : vector<64x4xf32>, vector<4x2xf32>, vector<64x2xf32> -> vector<64x2xf32>
    %57 = arith.addf %50, %56 : vector<64x2xf32>
    %c0_69 = arith.constant 0 : index
    %c2_70 = arith.constant 2 : index
    %c1_71 = arith.constant 1 : index
    %c1_72 = arith.constant 1 : index
    %c0_73 = arith.constant 0 : index
    %58 = vector.load %arg1[%c0_69, %c2_70, %c1_71, %c1_72, %c0_73] : memref<1x4x11x11x4xf32, #tpu.memory_space<vmem>>, vector<1x1x8x8x4xf32>
    %59 = vector.shape_cast %58 : vector<1x1x8x8x4xf32> to vector<8x8x4xf32>
    %60 = vector.shape_cast %59 : vector<8x8x4xf32> to vector<64x4xf32>
    %c4 = arith.constant 4 : index
    %c0_74 = arith.constant 0 : index
    %c0_75 = arith.constant 0 : index
    %61 = vector.load %arg3[%c4, %c0_74, %c0_75] : memref<16x4x2xf32, #tpu.memory_space<vmem>>, vector<1x4x2xf32>
    %62 = vector.shape_cast %61 : vector<1x4x2xf32> to vector<4x2xf32>
    %cst_76 = arith.constant dense<0.000000e+00> : vector<64x2xf32>
    %63 = tpu.matmul %60, %62, %cst_76 {dimension_numbers = #tpu.dot_dimension_numbers<[1], [0], [0], [1], [0, 0, 1, 1], [], []>} : vector<64x4xf32>, vector<4x2xf32>, vector<64x2xf32> -> vector<64x2xf32>
    %64 = arith.addf %57, %63 : vector<64x2xf32>
    %c0_77 = arith.constant 0 : index
    %c3_78 = arith.constant 3 : index
    %c1_79 = arith.constant 1 : index
    %c1_80 = arith.constant 1 : index
    %c0_81 = arith.constant 0 : index
    %65 = vector.load %arg1[%c0_77, %c3_78, %c1_79, %c1_80, %c0_81] : memref<1x4x11x11x4xf32, #tpu.memory_space<vmem>>, vector<1x1x8x8x4xf32>
    %66 = vector.shape_cast %65 : vector<1x1x8x8x4xf32> to vector<8x8x4xf32>
    %67 = vector.shape_cast %66 : vector<8x8x4xf32> to vector<64x4xf32>
    %c5 = arith.constant 5 : index
    %c0_82 = arith.constant 0 : index
    %c0_83 = arith.constant 0 : index
    %68 = vector.load %arg3[%c5, %c0_82, %c0_83] : memref<16x4x2xf32, #tpu.memory_space<vmem>>, vector<1x4x2xf32>
    %69 = vector.shape_cast %68 : vector<1x4x2xf32> to vector<4x2xf32>
    %cst_84 = arith.constant dense<0.000000e+00> : vector<64x2xf32>
    %70 = tpu.matmul %67, %69, %cst_84 {dimension_numbers = #tpu.dot_dimension_numbers<[1], [0], [0], [1], [0, 0, 1, 1], [], []>} : vector<64x4xf32>, vector<4x2xf32>, vector<64x2xf32> -> vector<64x2xf32>
    %71 = arith.addf %64, %70 : vector<64x2xf32>
    %c0_85 = arith.constant 0 : index
    %c2_86 = arith.constant 2 : index
    %c1_87 = arith.constant 1 : index
    %c2_88 = arith.constant 2 : index
    %c0_89 = arith.constant 0 : index
    %72 = vector.load %arg1[%c0_85, %c2_86, %c1_87, %c2_88, %c0_89] : memref<1x4x11x11x4xf32, #tpu.memory_space<vmem>>, vector<1x1x8x8x4xf32>
    %73 = vector.shape_cast %72 : vector<1x1x8x8x4xf32> to vector<8x8x4xf32>
    %74 = vector.shape_cast %73 : vector<8x8x4xf32> to vector<64x4xf32>
    %c6 = arith.constant 6 : index
    %c0_90 = arith.constant 0 : index
    %c0_91 = arith.constant 0 : index
    %75 = vector.load %arg3[%c6, %c0_90, %c0_91] : memref<16x4x2xf32, #tpu.memory_space<vmem>>, vector<1x4x2xf32>
    %76 = vector.shape_cast %75 : vector<1x4x2xf32> to vector<4x2xf32>
    %cst_92 = arith.constant dense<0.000000e+00> : vector<64x2xf32>
    %77 = tpu.matmul %74, %76, %cst_92 {dimension_numbers = #tpu.dot_dimension_numbers<[1], [0], [0], [1], [0, 0, 1, 1], [], []>} : vector<64x4xf32>, vector<4x2xf32>, vector<64x2xf32> -> vector<64x2xf32>
    %78 = arith.addf %71, %77 : vector<64x2xf32>
    %c0_93 = arith.constant 0 : index
    %c3_94 = arith.constant 3 : index
    %c1_95 = arith.constant 1 : index
    %c2_96 = arith.constant 2 : index
    %c0_97 = arith.constant 0 : index
    %79 = vector.load %arg1[%c0_93, %c3_94, %c1_95, %c2_96, %c0_97] : memref<1x4x11x11x4xf32, #tpu.memory_space<vmem>>, vector<1x1x8x8x4xf32>
    %80 = vector.shape_cast %79 : vector<1x1x8x8x4xf32> to vector<8x8x4xf32>
    %81 = vector.shape_cast %80 : vector<8x8x4xf32> to vector<64x4xf32>
    %c7 = arith.constant 7 : index
    %c0_98 = arith.constant 0 : index
    %c0_99 = arith.constant 0 : index
    %82 = vector.load %arg3[%c7, %c0_98, %c0_99] : memref<16x4x2xf32, #tpu.memory_space<vmem>>, vector<1x4x2xf32>
    %83 = vector.shape_cast %82 : vector<1x4x2xf32> to vector<4x2xf32>
    %cst_100 = arith.constant dense<0.000000e+00> : vector<64x2xf32>
    %84 = tpu.matmul %81, %83, %cst_100 {dimension_numbers = #tpu.dot_dimension_numbers<[1], [0], [0], [1], [0, 0, 1, 1], [], []>} : vector<64x4xf32>, vector<4x2xf32>, vector<64x2xf32> -> vector<64x2xf32>
    %85 = arith.addf %78, %84 : vector<64x2xf32>
    %c0_101 = arith.constant 0 : index
    %c0_102 = arith.constant 0 : index
    %c2_103 = arith.constant 2 : index
    %c1_104 = arith.constant 1 : index
    %c0_105 = arith.constant 0 : index
    %86 = vector.load %arg1[%c0_101, %c0_102, %c2_103, %c1_104, %c0_105] : memref<1x4x11x11x4xf32, #tpu.memory_space<vmem>>, vector<1x1x8x8x4xf32>
    %87 = vector.shape_cast %86 : vector<1x1x8x8x4xf32> to vector<8x8x4xf32>
    %88 = vector.shape_cast %87 : vector<8x8x4xf32> to vector<64x4xf32>
    %c8 = arith.constant 8 : index
    %c0_106 = arith.constant 0 : index
    %c0_107 = arith.constant 0 : index
    %89 = vector.load %arg3[%c8, %c0_106, %c0_107] : memref<16x4x2xf32, #tpu.memory_space<vmem>>, vector<1x4x2xf32>
    %90 = vector.shape_cast %89 : vector<1x4x2xf32> to vector<4x2xf32>
    %cst_108 = arith.constant dense<0.000000e+00> : vector<64x2xf32>
    %91 = tpu.matmul %88, %90, %cst_108 {dimension_numbers = #tpu.dot_dimension_numbers<[1], [0], [0], [1], [0, 0, 1, 1], [], []>} : vector<64x4xf32>, vector<4x2xf32>, vector<64x2xf32> -> vector<64x2xf32>
    %92 = arith.addf %85, %91 : vector<64x2xf32>
    %c0_109 = arith.constant 0 : index
    %c1_110 = arith.constant 1 : index
    %c2_111 = arith.constant 2 : index
    %c1_112 = arith.constant 1 : index
    %c0_113 = arith.constant 0 : index
    %93 = vector.load %arg1[%c0_109, %c1_110, %c2_111, %c1_112, %c0_113] : memref<1x4x11x11x4xf32, #tpu.memory_space<vmem>>, vector<1x1x8x8x4xf32>
    %94 = vector.shape_cast %93 : vector<1x1x8x8x4xf32> to vector<8x8x4xf32>
    %95 = vector.shape_cast %94 : vector<8x8x4xf32> to vector<64x4xf32>
    %c9 = arith.constant 9 : index
    %c0_114 = arith.constant 0 : index
    %c0_115 = arith.constant 0 : index
    %96 = vector.load %arg3[%c9, %c0_114, %c0_115] : memref<16x4x2xf32, #tpu.memory_space<vmem>>, vector<1x4x2xf32>
    %97 = vector.shape_cast %96 : vector<1x4x2xf32> to vector<4x2xf32>
    %cst_116 = arith.constant dense<0.000000e+00> : vector<64x2xf32>
    %98 = tpu.matmul %95, %97, %cst_116 {dimension_numbers = #tpu.dot_dimension_numbers<[1], [0], [0], [1], [0, 0, 1, 1], [], []>} : vector<64x4xf32>, vector<4x2xf32>, vector<64x2xf32> -> vector<64x2xf32>
    %99 = arith.addf %92, %98 : vector<64x2xf32>
    %c0_117 = arith.constant 0 : index
    %c0_118 = arith.constant 0 : index
    %c2_119 = arith.constant 2 : index
    %c2_120 = arith.constant 2 : index
    %c0_121 = arith.constant 0 : index
    %100 = vector.load %arg1[%c0_117, %c0_118, %c2_119, %c2_120, %c0_121] : memref<1x4x11x11x4xf32, #tpu.memory_space<vmem>>, vector<1x1x8x8x4xf32>
    %101 = vector.shape_cast %100 : vector<1x1x8x8x4xf32> to vector<8x8x4xf32>
    %102 = vector.shape_cast %101 : vector<8x8x4xf32> to vector<64x4xf32>
    %c10 = arith.constant 10 : index
    %c0_122 = arith.constant 0 : index
    %c0_123 = arith.constant 0 : index
    %103 = vector.load %arg3[%c10, %c0_122, %c0_123] : memref<16x4x2xf32, #tpu.memory_space<vmem>>, vector<1x4x2xf32>
    %104 = vector.shape_cast %103 : vector<1x4x2xf32> to vector<4x2xf32>
    %cst_124 = arith.constant dense<0.000000e+00> : vector<64x2xf32>
    %105 = tpu.matmul %102, %104, %cst_124 {dimension_numbers = #tpu.dot_dimension_numbers<[1], [0], [0], [1], [0, 0, 1, 1], [], []>} : vector<64x4xf32>, vector<4x2xf32>, vector<64x2xf32> -> vector<64x2xf32>
    %106 = arith.addf %99, %105 : vector<64x2xf32>
    %c0_125 = arith.constant 0 : index
    %c1_126 = arith.constant 1 : index
    %c2_127 = arith.constant 2 : index
    %c2_128 = arith.constant 2 : index
    %c0_129 = arith.constant 0 : index
    %107 = vector.load %arg1[%c0_125, %c1_126, %c2_127, %c2_128, %c0_129] : memref<1x4x11x11x4xf32, #tpu.memory_space<vmem>>, vector<1x1x8x8x4xf32>
    %108 = vector.shape_cast %107 : vector<1x1x8x8x4xf32> to vector<8x8x4xf32>
    %109 = vector.shape_cast %108 : vector<8x8x4xf32> to vector<64x4xf32>
    %c11 = arith.constant 11 : index
    %c0_130 = arith.constant 0 : index
    %c0_131 = arith.constant 0 : index
    %110 = vector.load %arg3[%c11, %c0_130, %c0_131] : memref<16x4x2xf32, #tpu.memory_space<vmem>>, vector<1x4x2xf32>
    %111 = vector.shape_cast %110 : vector<1x4x2xf32> to vector<4x2xf32>
    %cst_132 = arith.constant dense<0.000000e+00> : vector<64x2xf32>
    %112 = tpu.matmul %109, %111, %cst_132 {dimension_numbers = #tpu.dot_dimension_numbers<[1], [0], [0], [1], [0, 0, 1, 1], [], []>} : vector<64x4xf32>, vector<4x2xf32>, vector<64x2xf32> -> vector<64x2xf32>
    %113 = arith.addf %106, %112 : vector<64x2xf32>
    %c0_133 = arith.constant 0 : index
    %c2_134 = arith.constant 2 : index
    %c2_135 = arith.constant 2 : index
    %c1_136 = arith.constant 1 : index
    %c0_137 = arith.constant 0 : index
    %114 = vector.load %arg1[%c0_133, %c2_134, %c2_135, %c1_136, %c0_137] : memref<1x4x11x11x4xf32, #tpu.memory_space<vmem>>, vector<1x1x8x8x4xf32>
    %115 = vector.shape_cast %114 : vector<1x1x8x8x4xf32> to vector<8x8x4xf32>
    %116 = vector.shape_cast %115 : vector<8x8x4xf32> to vector<64x4xf32>
    %c12 = arith.constant 12 : index
    %c0_138 = arith.constant 0 : index
    %c0_139 = arith.constant 0 : index
    %117 = vector.load %arg3[%c12, %c0_138, %c0_139] : memref<16x4x2xf32, #tpu.memory_space<vmem>>, vector<1x4x2xf32>
    %118 = vector.shape_cast %117 : vector<1x4x2xf32> to vector<4x2xf32>
    %cst_140 = arith.constant dense<0.000000e+00> : vector<64x2xf32>
    %119 = tpu.matmul %116, %118, %cst_140 {dimension_numbers = #tpu.dot_dimension_numbers<[1], [0], [0], [1], [0, 0, 1, 1], [], []>} : vector<64x4xf32>, vector<4x2xf32>, vector<64x2xf32> -> vector<64x2xf32>
    %120 = arith.addf %113, %119 : vector<64x2xf32>
    %c0_141 = arith.constant 0 : index
    %c3_142 = arith.constant 3 : index
    %c2_143 = arith.constant 2 : index
    %c1_144 = arith.constant 1 : index
    %c0_145 = arith.constant 0 : index
    %121 = vector.load %arg1[%c0_141, %c3_142, %c2_143, %c1_144, %c0_145] : memref<1x4x11x11x4xf32, #tpu.memory_space<vmem>>, vector<1x1x8x8x4xf32>
    %122 = vector.shape_cast %121 : vector<1x1x8x8x4xf32> to vector<8x8x4xf32>
    %123 = vector.shape_cast %122 : vector<8x8x4xf32> to vector<64x4xf32>
    %c13 = arith.constant 13 : index
    %c0_146 = arith.constant 0 : index
    %c0_147 = arith.constant 0 : index
    %124 = vector.load %arg3[%c13, %c0_146, %c0_147] : memref<16x4x2xf32, #tpu.memory_space<vmem>>, vector<1x4x2xf32>
    %125 = vector.shape_cast %124 : vector<1x4x2xf32> to vector<4x2xf32>
    %cst_148 = arith.constant dense<0.000000e+00> : vector<64x2xf32>
    %126 = tpu.matmul %123, %125, %cst_148 {dimension_numbers = #tpu.dot_dimension_numbers<[1], [0], [0], [1], [0, 0, 1, 1], [], []>} : vector<64x4xf32>, vector<4x2xf32>, vector<64x2xf32> -> vector<64x2xf32>
    %127 = arith.addf %120, %126 : vector<64x2xf32>
    %c0_149 = arith.constant 0 : index
    %c2_150 = arith.constant 2 : index
    %c2_151 = arith.constant 2 : index
    %c2_152 = arith.constant 2 : index
    %c0_153 = arith.constant 0 : index
    %128 = vector.load %arg1[%c0_149, %c2_150, %c2_151, %c2_152, %c0_153] : memref<1x4x11x11x4xf32, #tpu.memory_space<vmem>>, vector<1x1x8x8x4xf32>
    %129 = vector.shape_cast %128 : vector<1x1x8x8x4xf32> to vector<8x8x4xf32>
    %130 = vector.shape_cast %129 : vector<8x8x4xf32> to vector<64x4xf32>
    %c14 = arith.constant 14 : index
    %c0_154 = arith.constant 0 : index
    %c0_155 = arith.constant 0 : index
    %131 = vector.load %arg3[%c14, %c0_154, %c0_155] : memref<16x4x2xf32, #tpu.memory_space<vmem>>, vector<1x4x2xf32>
    %132 = vector.shape_cast %131 : vector<1x4x2xf32> to vector<4x2xf32>
    %cst_156 = arith.constant dense<0.000000e+00> : vector<64x2xf32>
    %133 = tpu.matmul %130, %132, %cst_156 {dimension_numbers = #tpu.dot_dimension_numbers<[1], [0], [0], [1], [0, 0, 1, 1], [], []>} : vector<64x4xf32>, vector<4x2xf32>, vector<64x2xf32> -> vector<64x2xf32>
    %134 = arith.addf %127, %133 : vector<64x2xf32>
    %c0_157 = arith.constant 0 : index
    %c3_158 = arith.constant 3 : index
    %c2_159 = arith.constant 2 : index
    %c2_160 = arith.constant 2 : index
    %c0_161 = arith.constant 0 : index
    %135 = vector.load %arg1[%c0_157, %c3_158, %c2_159, %c2_160, %c0_161] : memref<1x4x11x11x4xf32, #tpu.memory_space<vmem>>, vector<1x1x8x8x4xf32>
    %136 = vector.shape_cast %135 : vector<1x1x8x8x4xf32> to vector<8x8x4xf32>
    %137 = vector.shape_cast %136 : vector<8x8x4xf32> to vector<64x4xf32>
    %c15 = arith.constant 15 : index
    %c0_162 = arith.constant 0 : index
    %c0_163 = arith.constant 0 : index
    %138 = vector.load %arg3[%c15, %c0_162, %c0_163] : memref<16x4x2xf32, #tpu.memory_space<vmem>>, vector<1x4x2xf32>
    %139 = vector.shape_cast %138 : vector<1x4x2xf32> to vector<4x2xf32>
    %cst_164 = arith.constant dense<0.000000e+00> : vector<64x2xf32>
    %140 = tpu.matmul %137, %139, %cst_164 {dimension_numbers = #tpu.dot_dimension_numbers<[1], [0], [0], [1], [0, 0, 1, 1], [], []>} : vector<64x4xf32>, vector<4x2xf32>, vector<64x2xf32> -> vector<64x2xf32>
    %141 = arith.addf %134, %140 : vector<64x2xf32>
    %cst_165 = arith.constant 0.000000e+00 : f32
    %142 = vector.broadcast %cst_165 : f32 to vector<64x2xf32>
    %c0_166 = arith.constant 0 : index
    %c0_167 = arith.constant 0 : index
    %c0_168 = arith.constant 0 : index
    %c0_169 = arith.constant 0 : index
    %c0_170 = arith.constant 0 : index
    %143 = vector.load %arg1[%c0_166, %c0_167, %c0_168, %c0_169, %c0_170] : memref<1x4x11x11x4xf32, #tpu.memory_space<vmem>>, vector<1x1x8x8x4xf32>
    %144 = vector.shape_cast %143 : vector<1x1x8x8x4xf32> to vector<8x8x4xf32>
    %145 = vector.shape_cast %144 : vector<8x8x4xf32> to vector<64x4xf32>
    %c0_171 = arith.constant 0 : index
    %c0_172 = arith.constant 0 : index
    %c0_173 = arith.constant 0 : index
    %146 = vector.load %arg4[%c0_171, %c0_172, %c0_173] : memref<64x4x2xf32, #tpu.memory_space<vmem>>, vector<1x4x2xf32>
    %147 = vector.shape_cast %146 : vector<1x4x2xf32> to vector<4x2xf32>
    %cst_174 = arith.constant dense<0.000000e+00> : vector<64x2xf32>
    %148 = tpu.matmul %145, %147, %cst_174 {dimension_numbers = #tpu.dot_dimension_numbers<[1], [0], [0], [1], [0, 0, 1, 1], [], []>} : vector<64x4xf32>, vector<4x2xf32>, vector<64x2xf32> -> vector<64x2xf32>
    %149 = arith.addf %142, %148 : vector<64x2xf32>
    %c0_175 = arith.constant 0 : index
    %c1_176 = arith.constant 1 : index
    %c0_177 = arith.constant 0 : index
    %c0_178 = arith.constant 0 : index
    %c0_179 = arith.constant 0 : index
    %150 = vector.load %arg1[%c0_175, %c1_176, %c0_177, %c0_178, %c0_179] : memref<1x4x11x11x4xf32, #tpu.memory_space<vmem>>, vector<1x1x8x8x4xf32>
    %151 = vector.shape_cast %150 : vector<1x1x8x8x4xf32> to vector<8x8x4xf32>
    %152 = vector.shape_cast %151 : vector<8x8x4xf32> to vector<64x4xf32>
    %c1_180 = arith.constant 1 : index
    %c0_181 = arith.constant 0 : index
    %c0_182 = arith.constant 0 : index
    %153 = vector.load %arg4[%c1_180, %c0_181, %c0_182] : memref<64x4x2xf32, #tpu.memory_space<vmem>>, vector<1x4x2xf32>
    %154 = vector.shape_cast %153 : vector<1x4x2xf32> to vector<4x2xf32>
    %cst_183 = arith.constant dense<0.000000e+00> : vector<64x2xf32>
    %155 = tpu.matmul %152, %154, %cst_183 {dimension_numbers = #tpu.dot_dimension_numbers<[1], [0], [0], [1], [0, 0, 1, 1], [], []>} : vector<64x4xf32>, vector<4x2xf32>, vector<64x2xf32> -> vector<64x2xf32>
    %156 = arith.addf %149, %155 : vector<64x2xf32>
    %c0_184 = arith.constant 0 : index
    %c0_185 = arith.constant 0 : index
    %c0_186 = arith.constant 0 : index
    %c1_187 = arith.constant 1 : index
    %c0_188 = arith.constant 0 : index
    %157 = vector.load %arg1[%c0_184, %c0_185, %c0_186, %c1_187, %c0_188] : memref<1x4x11x11x4xf32, #tpu.memory_space<vmem>>, vector<1x1x8x8x4xf32>
    %158 = vector.shape_cast %157 : vector<1x1x8x8x4xf32> to vector<8x8x4xf32>
    %159 = vector.shape_cast %158 : vector<8x8x4xf32> to vector<64x4xf32>
    %c2_189 = arith.constant 2 : index
    %c0_190 = arith.constant 0 : index
    %c0_191 = arith.constant 0 : index
    %160 = vector.load %arg4[%c2_189, %c0_190, %c0_191] : memref<64x4x2xf32, #tpu.memory_space<vmem>>, vector<1x4x2xf32>
    %161 = vector.shape_cast %160 : vector<1x4x2xf32> to vector<4x2xf32>
    %cst_192 = arith.constant dense<0.000000e+00> : vector<64x2xf32>
    %162 = tpu.matmul %159, %161, %cst_192 {dimension_numbers = #tpu.dot_dimension_numbers<[1], [0], [0], [1], [0, 0, 1, 1], [], []>} : vector<64x4xf32>, vector<4x2xf32>, vector<64x2xf32> -> vector<64x2xf32>
    %163 = arith.addf %156, %162 : vector<64x2xf32>
    %c0_193 = arith.constant 0 : index
    %c1_194 = arith.constant 1 : index
    %c0_195 = arith.constant 0 : index
    %c1_196 = arith.constant 1 : index
    %c0_197 = arith.constant 0 : index
    %164 = vector.load %arg1[%c0_193, %c1_194, %c0_195, %c1_196, %c0_197] : memref<1x4x11x11x4xf32, #tpu.memory_space<vmem>>, vector<1x1x8x8x4xf32>
    %165 = vector.shape_cast %164 : vector<1x1x8x8x4xf32> to vector<8x8x4xf32>
    %166 = vector.shape_cast %165 : vector<8x8x4xf32> to vector<64x4xf32>
    %c3_198 = arith.constant 3 : index
    %c0_199 = arith.constant 0 : index
    %c0_200 = arith.constant 0 : index
    %167 = vector.load %arg4[%c3_198, %c0_199, %c0_200] : memref<64x4x2xf32, #tpu.memory_space<vmem>>, vector<1x4x2xf32>
    %168 = vector.shape_cast %167 : vector<1x4x2xf32> to vector<4x2xf32>
    %cst_201 = arith.constant dense<0.000000e+00> : vector<64x2xf32>
    %169 = tpu.matmul %166, %168, %cst_201 {dimension_numbers = #tpu.dot_dimension_numbers<[1], [0], [0], [1], [0, 0, 1, 1], [], []>} : vector<64x4xf32>, vector<4x2xf32>, vector<64x2xf32> -> vector<64x2xf32>
    %170 = arith.addf %163, %169 : vector<64x2xf32>
    %c0_202 = arith.constant 0 : index
    %c0_203 = arith.constant 0 : index
    %c0_204 = arith.constant 0 : index
    %c2_205 = arith.constant 2 : index
    %c0_206 = arith.constant 0 : index
    %171 = vector.load %arg1[%c0_202, %c0_203, %c0_204, %c2_205, %c0_206] : memref<1x4x11x11x4xf32, #tpu.memory_space<vmem>>, vector<1x1x8x8x4xf32>
    %172 = vector.shape_cast %171 : vector<1x1x8x8x4xf32> to vector<8x8x4xf32>
    %173 = vector.shape_cast %172 : vector<8x8x4xf32> to vector<64x4xf32>
    %c4_207 = arith.constant 4 : index
    %c0_208 = arith.constant 0 : index
    %c0_209 = arith.constant 0 : index
    %174 = vector.load %arg4[%c4_207, %c0_208, %c0_209] : memref<64x4x2xf32, #tpu.memory_space<vmem>>, vector<1x4x2xf32>
    %175 = vector.shape_cast %174 : vector<1x4x2xf32> to vector<4x2xf32>
    %cst_210 = arith.constant dense<0.000000e+00> : vector<64x2xf32>
    %176 = tpu.matmul %173, %175, %cst_210 {dimension_numbers = #tpu.dot_dimension_numbers<[1], [0], [0], [1], [0, 0, 1, 1], [], []>} : vector<64x4xf32>, vector<4x2xf32>, vector<64x2xf32> -> vector<64x2xf32>
    %177 = arith.addf %170, %176 : vector<64x2xf32>
    %c0_211 = arith.constant 0 : index
    %c1_212 = arith.constant 1 : index
    %c0_213 = arith.constant 0 : index
    %c2_214 = arith.constant 2 : index
    %c0_215 = arith.constant 0 : index
    %178 = vector.load %arg1[%c0_211, %c1_212, %c0_213, %c2_214, %c0_215] : memref<1x4x11x11x4xf32, #tpu.memory_space<vmem>>, vector<1x1x8x8x4xf32>
    %179 = vector.shape_cast %178 : vector<1x1x8x8x4xf32> to vector<8x8x4xf32>
    %180 = vector.shape_cast %179 : vector<8x8x4xf32> to vector<64x4xf32>
    %c5_216 = arith.constant 5 : index
    %c0_217 = arith.constant 0 : index
    %c0_218 = arith.constant 0 : index
    %181 = vector.load %arg4[%c5_216, %c0_217, %c0_218] : memref<64x4x2xf32, #tpu.memory_space<vmem>>, vector<1x4x2xf32>
    %182 = vector.shape_cast %181 : vector<1x4x2xf32> to vector<4x2xf32>
    %cst_219 = arith.constant dense<0.000000e+00> : vector<64x2xf32>
    %183 = tpu.matmul %180, %182, %cst_219 {dimension_numbers = #tpu.dot_dimension_numbers<[1], [0], [0], [1], [0, 0, 1, 1], [], []>} : vector<64x4xf32>, vector<4x2xf32>, vector<64x2xf32> -> vector<64x2xf32>
    %184 = arith.addf %177, %183 : vector<64x2xf32>
    %c0_220 = arith.constant 0 : index
    %c0_221 = arith.constant 0 : index
    %c0_222 = arith.constant 0 : index
    %c3_223 = arith.constant 3 : index
    %c0_224 = arith.constant 0 : index
    %185 = vector.load %arg1[%c0_220, %c0_221, %c0_222, %c3_223, %c0_224] : memref<1x4x11x11x4xf32, #tpu.memory_space<vmem>>, vector<1x1x8x8x4xf32>
    %186 = vector.shape_cast %185 : vector<1x1x8x8x4xf32> to vector<8x8x4xf32>
    %187 = vector.shape_cast %186 : vector<8x8x4xf32> to vector<64x4xf32>
    %c6_225 = arith.constant 6 : index
    %c0_226 = arith.constant 0 : index
    %c0_227 = arith.constant 0 : index
    %188 = vector.load %arg4[%c6_225, %c0_226, %c0_227] : memref<64x4x2xf32, #tpu.memory_space<vmem>>, vector<1x4x2xf32>
    %189 = vector.shape_cast %188 : vector<1x4x2xf32> to vector<4x2xf32>
    %cst_228 = arith.constant dense<0.000000e+00> : vector<64x2xf32>
    %190 = tpu.matmul %187, %189, %cst_228 {dimension_numbers = #tpu.dot_dimension_numbers<[1], [0], [0], [1], [0, 0, 1, 1], [], []>} : vector<64x4xf32>, vector<4x2xf32>, vector<64x2xf32> -> vector<64x2xf32>
    %191 = arith.addf %184, %190 : vector<64x2xf32>
    %c0_229 = arith.constant 0 : index
    %c1_230 = arith.constant 1 : index
    %c0_231 = arith.constant 0 : index
    %c3_232 = arith.constant 3 : index
    %c0_233 = arith.constant 0 : index
    %192 = vector.load %arg1[%c0_229, %c1_230, %c0_231, %c3_232, %c0_233] : memref<1x4x11x11x4xf32, #tpu.memory_space<vmem>>, vector<1x1x8x8x4xf32>
    %193 = vector.shape_cast %192 : vector<1x1x8x8x4xf32> to vector<8x8x4xf32>
    %194 = vector.shape_cast %193 : vector<8x8x4xf32> to vector<64x4xf32>
    %c7_234 = arith.constant 7 : index
    %c0_235 = arith.constant 0 : index
    %c0_236 = arith.constant 0 : index
    %195 = vector.load %arg4[%c7_234, %c0_235, %c0_236] : memref<64x4x2xf32, #tpu.memory_space<vmem>>, vector<1x4x2xf32>
    %196 = vector.shape_cast %195 : vector<1x4x2xf32> to vector<4x2xf32>
    %cst_237 = arith.constant dense<0.000000e+00> : vector<64x2xf32>
    %197 = tpu.matmul %194, %196, %cst_237 {dimension_numbers = #tpu.dot_dimension_numbers<[1], [0], [0], [1], [0, 0, 1, 1], [], []>} : vector<64x4xf32>, vector<4x2xf32>, vector<64x2xf32> -> vector<64x2xf32>
    %198 = arith.addf %191, %197 : vector<64x2xf32>
    %c0_238 = arith.constant 0 : index
    %c2_239 = arith.constant 2 : index
    %c0_240 = arith.constant 0 : index
    %c0_241 = arith.constant 0 : index
    %c0_242 = arith.constant 0 : index
    %199 = vector.load %arg1[%c0_238, %c2_239, %c0_240, %c0_241, %c0_242] : memref<1x4x11x11x4xf32, #tpu.memory_space<vmem>>, vector<1x1x8x8x4xf32>
    %200 = vector.shape_cast %199 : vector<1x1x8x8x4xf32> to vector<8x8x4xf32>
    %201 = vector.shape_cast %200 : vector<8x8x4xf32> to vector<64x4xf32>
    %c8_243 = arith.constant 8 : index
    %c0_244 = arith.constant 0 : index
    %c0_245 = arith.constant 0 : index
    %202 = vector.load %arg4[%c8_243, %c0_244, %c0_245] : memref<64x4x2xf32, #tpu.memory_space<vmem>>, vector<1x4x2xf32>
    %203 = vector.shape_cast %202 : vector<1x4x2xf32> to vector<4x2xf32>
    %cst_246 = arith.constant dense<0.000000e+00> : vector<64x2xf32>
    %204 = tpu.matmul %201, %203, %cst_246 {dimension_numbers = #tpu.dot_dimension_numbers<[1], [0], [0], [1], [0, 0, 1, 1], [], []>} : vector<64x4xf32>, vector<4x2xf32>, vector<64x2xf32> -> vector<64x2xf32>
    %205 = arith.addf %198, %204 : vector<64x2xf32>
    %c0_247 = arith.constant 0 : index
    %c3_248 = arith.constant 3 : index
    %c0_249 = arith.constant 0 : index
    %c0_250 = arith.constant 0 : index
    %c0_251 = arith.constant 0 : index
    %206 = vector.load %arg1[%c0_247, %c3_248, %c0_249, %c0_250, %c0_251] : memref<1x4x11x11x4xf32, #tpu.memory_space<vmem>>, vector<1x1x8x8x4xf32>
    %207 = vector.shape_cast %206 : vector<1x1x8x8x4xf32> to vector<8x8x4xf32>
    %208 = vector.shape_cast %207 : vector<8x8x4xf32> to vector<64x4xf32>
    %c9_252 = arith.constant 9 : index
    %c0_253 = arith.constant 0 : index
    %c0_254 = arith.constant 0 : index
    %209 = vector.load %arg4[%c9_252, %c0_253, %c0_254] : memref<64x4x2xf32, #tpu.memory_space<vmem>>, vector<1x4x2xf32>
    %210 = vector.shape_cast %209 : vector<1x4x2xf32> to vector<4x2xf32>
    %cst_255 = arith.constant dense<0.000000e+00> : vector<64x2xf32>
    %211 = tpu.matmul %208, %210, %cst_255 {dimension_numbers = #tpu.dot_dimension_numbers<[1], [0], [0], [1], [0, 0, 1, 1], [], []>} : vector<64x4xf32>, vector<4x2xf32>, vector<64x2xf32> -> vector<64x2xf32>
    %212 = arith.addf %205, %211 : vector<64x2xf32>
    %c0_256 = arith.constant 0 : index
    %c2_257 = arith.constant 2 : index
    %c0_258 = arith.constant 0 : index
    %c1_259 = arith.constant 1 : index
    %c0_260 = arith.constant 0 : index
    %213 = vector.load %arg1[%c0_256, %c2_257, %c0_258, %c1_259, %c0_260] : memref<1x4x11x11x4xf32, #tpu.memory_space<vmem>>, vector<1x1x8x8x4xf32>
    %214 = vector.shape_cast %213 : vector<1x1x8x8x4xf32> to vector<8x8x4xf32>
    %215 = vector.shape_cast %214 : vector<8x8x4xf32> to vector<64x4xf32>
    %c10_261 = arith.constant 10 : index
    %c0_262 = arith.constant 0 : index
    %c0_263 = arith.constant 0 : index
    %216 = vector.load %arg4[%c10_261, %c0_262, %c0_263] : memref<64x4x2xf32, #tpu.memory_space<vmem>>, vector<1x4x2xf32>
    %217 = vector.shape_cast %216 : vector<1x4x2xf32> to vector<4x2xf32>
    %cst_264 = arith.constant dense<0.000000e+00> : vector<64x2xf32>
    %218 = tpu.matmul %215, %217, %cst_264 {dimension_numbers = #tpu.dot_dimension_numbers<[1], [0], [0], [1], [0, 0, 1, 1], [], []>} : vector<64x4xf32>, vector<4x2xf32>, vector<64x2xf32> -> vector<64x2xf32>
    %219 = arith.addf %212, %218 : vector<64x2xf32>
    %c0_265 = arith.constant 0 : index
    %c3_266 = arith.constant 3 : index
    %c0_267 = arith.constant 0 : index
    %c1_268 = arith.constant 1 : index
    %c0_269 = arith.constant 0 : index
    %220 = vector.load %arg1[%c0_265, %c3_266, %c0_267, %c1_268, %c0_269] : memref<1x4x11x11x4xf32, #tpu.memory_space<vmem>>, vector<1x1x8x8x4xf32>
    %221 = vector.shape_cast %220 : vector<1x1x8x8x4xf32> to vector<8x8x4xf32>
    %222 = vector.shape_cast %221 : vector<8x8x4xf32> to vector<64x4xf32>
    %c11_270 = arith.constant 11 : index
    %c0_271 = arith.constant 0 : index
    %c0_272 = arith.constant 0 : index
    %223 = vector.load %arg4[%c11_270, %c0_271, %c0_272] : memref<64x4x2xf32, #tpu.memory_space<vmem>>, vector<1x4x2xf32>
    %224 = vector.shape_cast %223 : vector<1x4x2xf32> to vector<4x2xf32>
    %cst_273 = arith.constant dense<0.000000e+00> : vector<64x2xf32>
    %225 = tpu.matmul %222, %224, %cst_273 {dimension_numbers = #tpu.dot_dimension_numbers<[1], [0], [0], [1], [0, 0, 1, 1], [], []>} : vector<64x4xf32>, vector<4x2xf32>, vector<64x2xf32> -> vector<64x2xf32>
    %226 = arith.addf %219, %225 : vector<64x2xf32>
    %c0_274 = arith.constant 0 : index
    %c2_275 = arith.constant 2 : index
    %c0_276 = arith.constant 0 : index
    %c2_277 = arith.constant 2 : index
    %c0_278 = arith.constant 0 : index
    %227 = vector.load %arg1[%c0_274, %c2_275, %c0_276, %c2_277, %c0_278] : memref<1x4x11x11x4xf32, #tpu.memory_space<vmem>>, vector<1x1x8x8x4xf32>
    %228 = vector.shape_cast %227 : vector<1x1x8x8x4xf32> to vector<8x8x4xf32>
    %229 = vector.shape_cast %228 : vector<8x8x4xf32> to vector<64x4xf32>
    %c12_279 = arith.constant 12 : index
    %c0_280 = arith.constant 0 : index
    %c0_281 = arith.constant 0 : index
    %230 = vector.load %arg4[%c12_279, %c0_280, %c0_281] : memref<64x4x2xf32, #tpu.memory_space<vmem>>, vector<1x4x2xf32>
    %231 = vector.shape_cast %230 : vector<1x4x2xf32> to vector<4x2xf32>
    %cst_282 = arith.constant dense<0.000000e+00> : vector<64x2xf32>
    %232 = tpu.matmul %229, %231, %cst_282 {dimension_numbers = #tpu.dot_dimension_numbers<[1], [0], [0], [1], [0, 0, 1, 1], [], []>} : vector<64x4xf32>, vector<4x2xf32>, vector<64x2xf32> -> vector<64x2xf32>
    %233 = arith.addf %226, %232 : vector<64x2xf32>
    %c0_283 = arith.constant 0 : index
    %c3_284 = arith.constant 3 : index
    %c0_285 = arith.constant 0 : index
    %c2_286 = arith.constant 2 : index
    %c0_287 = arith.constant 0 : index
    %234 = vector.load %arg1[%c0_283, %c3_284, %c0_285, %c2_286, %c0_287] : memref<1x4x11x11x4xf32, #tpu.memory_space<vmem>>, vector<1x1x8x8x4xf32>
    %235 = vector.shape_cast %234 : vector<1x1x8x8x4xf32> to vector<8x8x4xf32>
    %236 = vector.shape_cast %235 : vector<8x8x4xf32> to vector<64x4xf32>
    %c13_288 = arith.constant 13 : index
    %c0_289 = arith.constant 0 : index
    %c0_290 = arith.constant 0 : index
    %237 = vector.load %arg4[%c13_288, %c0_289, %c0_290] : memref<64x4x2xf32, #tpu.memory_space<vmem>>, vector<1x4x2xf32>
    %238 = vector.shape_cast %237 : vector<1x4x2xf32> to vector<4x2xf32>
    %cst_291 = arith.constant dense<0.000000e+00> : vector<64x2xf32>
    %239 = tpu.matmul %236, %238, %cst_291 {dimension_numbers = #tpu.dot_dimension_numbers<[1], [0], [0], [1], [0, 0, 1, 1], [], []>} : vector<64x4xf32>, vector<4x2xf32>, vector<64x2xf32> -> vector<64x2xf32>
    %240 = arith.addf %233, %239 : vector<64x2xf32>
    %c0_292 = arith.constant 0 : index
    %c2_293 = arith.constant 2 : index
    %c0_294 = arith.constant 0 : index
    %c3_295 = arith.constant 3 : index
    %c0_296 = arith.constant 0 : index
    %241 = vector.load %arg1[%c0_292, %c2_293, %c0_294, %c3_295, %c0_296] : memref<1x4x11x11x4xf32, #tpu.memory_space<vmem>>, vector<1x1x8x8x4xf32>
    %242 = vector.shape_cast %241 : vector<1x1x8x8x4xf32> to vector<8x8x4xf32>
    %243 = vector.shape_cast %242 : vector<8x8x4xf32> to vector<64x4xf32>
    %c14_297 = arith.constant 14 : index
    %c0_298 = arith.constant 0 : index
    %c0_299 = arith.constant 0 : index
    %244 = vector.load %arg4[%c14_297, %c0_298, %c0_299] : memref<64x4x2xf32, #tpu.memory_space<vmem>>, vector<1x4x2xf32>
    %245 = vector.shape_cast %244 : vector<1x4x2xf32> to vector<4x2xf32>
    %cst_300 = arith.constant dense<0.000000e+00> : vector<64x2xf32>
    %246 = tpu.matmul %243, %245, %cst_300 {dimension_numbers = #tpu.dot_dimension_numbers<[1], [0], [0], [1], [0, 0, 1, 1], [], []>} : vector<64x4xf32>, vector<4x2xf32>, vector<64x2xf32> -> vector<64x2xf32>
    %247 = arith.addf %240, %246 : vector<64x2xf32>
    %c0_301 = arith.constant 0 : index
    %c3_302 = arith.constant 3 : index
    %c0_303 = arith.constant 0 : index
    %c3_304 = arith.constant 3 : index
    %c0_305 = arith.constant 0 : index
    %248 = vector.load %arg1[%c0_301, %c3_302, %c0_303, %c3_304, %c0_305] : memref<1x4x11x11x4xf32, #tpu.memory_space<vmem>>, vector<1x1x8x8x4xf32>
    %249 = vector.shape_cast %248 : vector<1x1x8x8x4xf32> to vector<8x8x4xf32>
    %250 = vector.shape_cast %249 : vector<8x8x4xf32> to vector<64x4xf32>
    %c15_306 = arith.constant 15 : index
    %c0_307 = arith.constant 0 : index
    %c0_308 = arith.constant 0 : index
    %251 = vector.load %arg4[%c15_306, %c0_307, %c0_308] : memref<64x4x2xf32, #tpu.memory_space<vmem>>, vector<1x4x2xf32>
    %252 = vector.shape_cast %251 : vector<1x4x2xf32> to vector<4x2xf32>
    %cst_309 = arith.constant dense<0.000000e+00> : vector<64x2xf32>
    %253 = tpu.matmul %250, %252, %cst_309 {dimension_numbers = #tpu.dot_dimension_numbers<[1], [0], [0], [1], [0, 0, 1, 1], [], []>} : vector<64x4xf32>, vector<4x2xf32>, vector<64x2xf32> -> vector<64x2xf32>
    %254 = arith.addf %247, %253 : vector<64x2xf32>
    %c0_310 = arith.constant 0 : index
    %c0_311 = arith.constant 0 : index
    %c1_312 = arith.constant 1 : index
    %c0_313 = arith.constant 0 : index
    %c0_314 = arith.constant 0 : index
    %255 = vector.load %arg1[%c0_310, %c0_311, %c1_312, %c0_313, %c0_314] : memref<1x4x11x11x4xf32, #tpu.memory_space<vmem>>, vector<1x1x8x8x4xf32>
    %256 = vector.shape_cast %255 : vector<1x1x8x8x4xf32> to vector<8x8x4xf32>
    %257 = vector.shape_cast %256 : vector<8x8x4xf32> to vector<64x4xf32>
    %c16 = arith.constant 16 : index
    %c0_315 = arith.constant 0 : index
    %c0_316 = arith.constant 0 : index
    %258 = vector.load %arg4[%c16, %c0_315, %c0_316] : memref<64x4x2xf32, #tpu.memory_space<vmem>>, vector<1x4x2xf32>
    %259 = vector.shape_cast %258 : vector<1x4x2xf32> to vector<4x2xf32>
    %cst_317 = arith.constant dense<0.000000e+00> : vector<64x2xf32>
    %260 = tpu.matmul %257, %259, %cst_317 {dimension_numbers = #tpu.dot_dimension_numbers<[1], [0], [0], [1], [0, 0, 1, 1], [], []>} : vector<64x4xf32>, vector<4x2xf32>, vector<64x2xf32> -> vector<64x2xf32>
    %261 = arith.addf %254, %260 : vector<64x2xf32>
    %c0_318 = arith.constant 0 : index
    %c1_319 = arith.constant 1 : index
    %c1_320 = arith.constant 1 : index
    %c0_321 = arith.constant 0 : index
    %c0_322 = arith.constant 0 : index
    %262 = vector.load %arg1[%c0_318, %c1_319, %c1_320, %c0_321, %c0_322] : memref<1x4x11x11x4xf32, #tpu.memory_space<vmem>>, vector<1x1x8x8x4xf32>
    %263 = vector.shape_cast %262 : vector<1x1x8x8x4xf32> to vector<8x8x4xf32>
    %264 = vector.shape_cast %263 : vector<8x8x4xf32> to vector<64x4xf32>
    %c17 = arith.constant 17 : index
    %c0_323 = arith.constant 0 : index
    %c0_324 = arith.constant 0 : index
    %265 = vector.load %arg4[%c17, %c0_323, %c0_324] : memref<64x4x2xf32, #tpu.memory_space<vmem>>, vector<1x4x2xf32>
    %266 = vector.shape_cast %265 : vector<1x4x2xf32> to vector<4x2xf32>
    %cst_325 = arith.constant dense<0.000000e+00> : vector<64x2xf32>
    %267 = tpu.matmul %264, %266, %cst_325 {dimension_numbers = #tpu.dot_dimension_numbers<[1], [0], [0], [1], [0, 0, 1, 1], [], []>} : vector<64x4xf32>, vector<4x2xf32>, vector<64x2xf32> -> vector<64x2xf32>
    %268 = arith.addf %261, %267 : vector<64x2xf32>
    %c0_326 = arith.constant 0 : index
    %c0_327 = arith.constant 0 : index
    %c1_328 = arith.constant 1 : index
    %c1_329 = arith.constant 1 : index
    %c0_330 = arith.constant 0 : index
    %269 = vector.load %arg1[%c0_326, %c0_327, %c1_328, %c1_329, %c0_330] : memref<1x4x11x11x4xf32, #tpu.memory_space<vmem>>, vector<1x1x8x8x4xf32>
    %270 = vector.shape_cast %269 : vector<1x1x8x8x4xf32> to vector<8x8x4xf32>
    %271 = vector.shape_cast %270 : vector<8x8x4xf32> to vector<64x4xf32>
    %c18 = arith.constant 18 : index
    %c0_331 = arith.constant 0 : index
    %c0_332 = arith.constant 0 : index
    %272 = vector.load %arg4[%c18, %c0_331, %c0_332] : memref<64x4x2xf32, #tpu.memory_space<vmem>>, vector<1x4x2xf32>
    %273 = vector.shape_cast %272 : vector<1x4x2xf32> to vector<4x2xf32>
    %cst_333 = arith.constant dense<0.000000e+00> : vector<64x2xf32>
    %274 = tpu.matmul %271, %273, %cst_333 {dimension_numbers = #tpu.dot_dimension_numbers<[1], [0], [0], [1], [0, 0, 1, 1], [], []>} : vector<64x4xf32>, vector<4x2xf32>, vector<64x2xf32> -> vector<64x2xf32>
    %275 = arith.addf %268, %274 : vector<64x2xf32>
    %c0_334 = arith.constant 0 : index
    %c1_335 = arith.constant 1 : index
    %c1_336 = arith.constant 1 : index
    %c1_337 = arith.constant 1 : index
    %c0_338 = arith.constant 0 : index
    %276 = vector.load %arg1[%c0_334, %c1_335, %c1_336, %c1_337, %c0_338] : memref<1x4x11x11x4xf32, #tpu.memory_space<vmem>>, vector<1x1x8x8x4xf32>
    %277 = vector.shape_cast %276 : vector<1x1x8x8x4xf32> to vector<8x8x4xf32>
    %278 = vector.shape_cast %277 : vector<8x8x4xf32> to vector<64x4xf32>
    %c19 = arith.constant 19 : index
    %c0_339 = arith.constant 0 : index
    %c0_340 = arith.constant 0 : index
    %279 = vector.load %arg4[%c19, %c0_339, %c0_340] : memref<64x4x2xf32, #tpu.memory_space<vmem>>, vector<1x4x2xf32>
    %280 = vector.shape_cast %279 : vector<1x4x2xf32> to vector<4x2xf32>
    %cst_341 = arith.constant dense<0.000000e+00> : vector<64x2xf32>
    %281 = tpu.matmul %278, %280, %cst_341 {dimension_numbers = #tpu.dot_dimension_numbers<[1], [0], [0], [1], [0, 0, 1, 1], [], []>} : vector<64x4xf32>, vector<4x2xf32>, vector<64x2xf32> -> vector<64x2xf32>
    %282 = arith.addf %275, %281 : vector<64x2xf32>
    %c0_342 = arith.constant 0 : index
    %c0_343 = arith.constant 0 : index
    %c1_344 = arith.constant 1 : index
    %c2_345 = arith.constant 2 : index
    %c0_346 = arith.constant 0 : index
    %283 = vector.load %arg1[%c0_342, %c0_343, %c1_344, %c2_345, %c0_346] : memref<1x4x11x11x4xf32, #tpu.memory_space<vmem>>, vector<1x1x8x8x4xf32>
    %284 = vector.shape_cast %283 : vector<1x1x8x8x4xf32> to vector<8x8x4xf32>
    %285 = vector.shape_cast %284 : vector<8x8x4xf32> to vector<64x4xf32>
    %c20 = arith.constant 20 : index
    %c0_347 = arith.constant 0 : index
    %c0_348 = arith.constant 0 : index
    %286 = vector.load %arg4[%c20, %c0_347, %c0_348] : memref<64x4x2xf32, #tpu.memory_space<vmem>>, vector<1x4x2xf32>
    %287 = vector.shape_cast %286 : vector<1x4x2xf32> to vector<4x2xf32>
    %cst_349 = arith.constant dense<0.000000e+00> : vector<64x2xf32>
    %288 = tpu.matmul %285, %287, %cst_349 {dimension_numbers = #tpu.dot_dimension_numbers<[1], [0], [0], [1], [0, 0, 1, 1], [], []>} : vector<64x4xf32>, vector<4x2xf32>, vector<64x2xf32> -> vector<64x2xf32>
    %289 = arith.addf %282, %288 : vector<64x2xf32>
    %c0_350 = arith.constant 0 : index
    %c1_351 = arith.constant 1 : index
    %c1_352 = arith.constant 1 : index
    %c2_353 = arith.constant 2 : index
    %c0_354 = arith.constant 0 : index
    %290 = vector.load %arg1[%c0_350, %c1_351, %c1_352, %c2_353, %c0_354] : memref<1x4x11x11x4xf32, #tpu.memory_space<vmem>>, vector<1x1x8x8x4xf32>
    %291 = vector.shape_cast %290 : vector<1x1x8x8x4xf32> to vector<8x8x4xf32>
    %292 = vector.shape_cast %291 : vector<8x8x4xf32> to vector<64x4xf32>
    %c21 = arith.constant 21 : index
    %c0_355 = arith.constant 0 : index
    %c0_356 = arith.constant 0 : index
    %293 = vector.load %arg4[%c21, %c0_355, %c0_356] : memref<64x4x2xf32, #tpu.memory_space<vmem>>, vector<1x4x2xf32>
    %294 = vector.shape_cast %293 : vector<1x4x2xf32> to vector<4x2xf32>
    %cst_357 = arith.constant dense<0.000000e+00> : vector<64x2xf32>
    %295 = tpu.matmul %292, %294, %cst_357 {dimension_numbers = #tpu.dot_dimension_numbers<[1], [0], [0], [1], [0, 0, 1, 1], [], []>} : vector<64x4xf32>, vector<4x2xf32>, vector<64x2xf32> -> vector<64x2xf32>
    %296 = arith.addf %289, %295 : vector<64x2xf32>
    %c0_358 = arith.constant 0 : index
    %c0_359 = arith.constant 0 : index
    %c1_360 = arith.constant 1 : index
    %c3_361 = arith.constant 3 : index
    %c0_362 = arith.constant 0 : index
    %297 = vector.load %arg1[%c0_358, %c0_359, %c1_360, %c3_361, %c0_362] : memref<1x4x11x11x4xf32, #tpu.memory_space<vmem>>, vector<1x1x8x8x4xf32>
    %298 = vector.shape_cast %297 : vector<1x1x8x8x4xf32> to vector<8x8x4xf32>
    %299 = vector.shape_cast %298 : vector<8x8x4xf32> to vector<64x4xf32>
    %c22 = arith.constant 22 : index
    %c0_363 = arith.constant 0 : index
    %c0_364 = arith.constant 0 : index
    %300 = vector.load %arg4[%c22, %c0_363, %c0_364] : memref<64x4x2xf32, #tpu.memory_space<vmem>>, vector<1x4x2xf32>
    %301 = vector.shape_cast %300 : vector<1x4x2xf32> to vector<4x2xf32>
    %cst_365 = arith.constant dense<0.000000e+00> : vector<64x2xf32>
    %302 = tpu.matmul %299, %301, %cst_365 {dimension_numbers = #tpu.dot_dimension_numbers<[1], [0], [0], [1], [0, 0, 1, 1], [], []>} : vector<64x4xf32>, vector<4x2xf32>, vector<64x2xf32> -> vector<64x2xf32>
    %303 = arith.addf %296, %302 : vector<64x2xf32>
    %c0_366 = arith.constant 0 : index
    %c1_367 = arith.constant 1 : index
    %c1_368 = arith.constant 1 : index
    %c3_369 = arith.constant 3 : index
    %c0_370 = arith.constant 0 : index
    %304 = vector.load %arg1[%c0_366, %c1_367, %c1_368, %c3_369, %c0_370] : memref<1x4x11x11x4xf32, #tpu.memory_space<vmem>>, vector<1x1x8x8x4xf32>
    %305 = vector.shape_cast %304 : vector<1x1x8x8x4xf32> to vector<8x8x4xf32>
    %306 = vector.shape_cast %305 : vector<8x8x4xf32> to vector<64x4xf32>
    %c23 = arith.constant 23 : index
    %c0_371 = arith.constant 0 : index
    %c0_372 = arith.constant 0 : index
    %307 = vector.load %arg4[%c23, %c0_371, %c0_372] : memref<64x4x2xf32, #tpu.memory_space<vmem>>, vector<1x4x2xf32>
    %308 = vector.shape_cast %307 : vector<1x4x2xf32> to vector<4x2xf32>
    %cst_373 = arith.constant dense<0.000000e+00> : vector<64x2xf32>
    %309 = tpu.matmul %306, %308, %cst_373 {dimension_numbers = #tpu.dot_dimension_numbers<[1], [0], [0], [1], [0, 0, 1, 1], [], []>} : vector<64x4xf32>, vector<4x2xf32>, vector<64x2xf32> -> vector<64x2xf32>
    %310 = arith.addf %303, %309 : vector<64x2xf32>
    %c0_374 = arith.constant 0 : index
    %c2_375 = arith.constant 2 : index
    %c1_376 = arith.constant 1 : index
    %c0_377 = arith.constant 0 : index
    %c0_378 = arith.constant 0 : index
    %311 = vector.load %arg1[%c0_374, %c2_375, %c1_376, %c0_377, %c0_378] : memref<1x4x11x11x4xf32, #tpu.memory_space<vmem>>, vector<1x1x8x8x4xf32>
    %312 = vector.shape_cast %311 : vector<1x1x8x8x4xf32> to vector<8x8x4xf32>
    %313 = vector.shape_cast %312 : vector<8x8x4xf32> to vector<64x4xf32>
    %c24 = arith.constant 24 : index
    %c0_379 = arith.constant 0 : index
    %c0_380 = arith.constant 0 : index
    %314 = vector.load %arg4[%c24, %c0_379, %c0_380] : memref<64x4x2xf32, #tpu.memory_space<vmem>>, vector<1x4x2xf32>
    %315 = vector.shape_cast %314 : vector<1x4x2xf32> to vector<4x2xf32>
    %cst_381 = arith.constant dense<0.000000e+00> : vector<64x2xf32>
    %316 = tpu.matmul %313, %315, %cst_381 {dimension_numbers = #tpu.dot_dimension_numbers<[1], [0], [0], [1], [0, 0, 1, 1], [], []>} : vector<64x4xf32>, vector<4x2xf32>, vector<64x2xf32> -> vector<64x2xf32>
    %317 = arith.addf %310, %316 : vector<64x2xf32>
    %c0_382 = arith.constant 0 : index
    %c3_383 = arith.constant 3 : index
    %c1_384 = arith.constant 1 : index
    %c0_385 = arith.constant 0 : index
    %c0_386 = arith.constant 0 : index
    %318 = vector.load %arg1[%c0_382, %c3_383, %c1_384, %c0_385, %c0_386] : memref<1x4x11x11x4xf32, #tpu.memory_space<vmem>>, vector<1x1x8x8x4xf32>
    %319 = vector.shape_cast %318 : vector<1x1x8x8x4xf32> to vector<8x8x4xf32>
    %320 = vector.shape_cast %319 : vector<8x8x4xf32> to vector<64x4xf32>
    %c25 = arith.constant 25 : index
    %c0_387 = arith.constant 0 : index
    %c0_388 = arith.constant 0 : index
    %321 = vector.load %arg4[%c25, %c0_387, %c0_388] : memref<64x4x2xf32, #tpu.memory_space<vmem>>, vector<1x4x2xf32>
    %322 = vector.shape_cast %321 : vector<1x4x2xf32> to vector<4x2xf32>
    %cst_389 = arith.constant dense<0.000000e+00> : vector<64x2xf32>
    %323 = tpu.matmul %320, %322, %cst_389 {dimension_numbers = #tpu.dot_dimension_numbers<[1], [0], [0], [1], [0, 0, 1, 1], [], []>} : vector<64x4xf32>, vector<4x2xf32>, vector<64x2xf32> -> vector<64x2xf32>
    %324 = arith.addf %317, %323 : vector<64x2xf32>
    %c0_390 = arith.constant 0 : index
    %c2_391 = arith.constant 2 : index
    %c1_392 = arith.constant 1 : index
    %c1_393 = arith.constant 1 : index
    %c0_394 = arith.constant 0 : index
    %325 = vector.load %arg1[%c0_390, %c2_391, %c1_392, %c1_393, %c0_394] : memref<1x4x11x11x4xf32, #tpu.memory_space<vmem>>, vector<1x1x8x8x4xf32>
    %326 = vector.shape_cast %325 : vector<1x1x8x8x4xf32> to vector<8x8x4xf32>
    %327 = vector.shape_cast %326 : vector<8x8x4xf32> to vector<64x4xf32>
    %c26 = arith.constant 26 : index
    %c0_395 = arith.constant 0 : index
    %c0_396 = arith.constant 0 : index
    %328 = vector.load %arg4[%c26, %c0_395, %c0_396] : memref<64x4x2xf32, #tpu.memory_space<vmem>>, vector<1x4x2xf32>
    %329 = vector.shape_cast %328 : vector<1x4x2xf32> to vector<4x2xf32>
    %cst_397 = arith.constant dense<0.000000e+00> : vector<64x2xf32>
    %330 = tpu.matmul %327, %329, %cst_397 {dimension_numbers = #tpu.dot_dimension_numbers<[1], [0], [0], [1], [0, 0, 1, 1], [], []>} : vector<64x4xf32>, vector<4x2xf32>, vector<64x2xf32> -> vector<64x2xf32>
    %331 = arith.addf %324, %330 : vector<64x2xf32>
    %c0_398 = arith.constant 0 : index
    %c3_399 = arith.constant 3 : index
    %c1_400 = arith.constant 1 : index
    %c1_401 = arith.constant 1 : index
    %c0_402 = arith.constant 0 : index
    %332 = vector.load %arg1[%c0_398, %c3_399, %c1_400, %c1_401, %c0_402] : memref<1x4x11x11x4xf32, #tpu.memory_space<vmem>>, vector<1x1x8x8x4xf32>
    %333 = vector.shape_cast %332 : vector<1x1x8x8x4xf32> to vector<8x8x4xf32>
    %334 = vector.shape_cast %333 : vector<8x8x4xf32> to vector<64x4xf32>
    %c27 = arith.constant 27 : index
    %c0_403 = arith.constant 0 : index
    %c0_404 = arith.constant 0 : index
    %335 = vector.load %arg4[%c27, %c0_403, %c0_404] : memref<64x4x2xf32, #tpu.memory_space<vmem>>, vector<1x4x2xf32>
    %336 = vector.shape_cast %335 : vector<1x4x2xf32> to vector<4x2xf32>
    %cst_405 = arith.constant dense<0.000000e+00> : vector<64x2xf32>
    %337 = tpu.matmul %334, %336, %cst_405 {dimension_numbers = #tpu.dot_dimension_numbers<[1], [0], [0], [1], [0, 0, 1, 1], [], []>} : vector<64x4xf32>, vector<4x2xf32>, vector<64x2xf32> -> vector<64x2xf32>
    %338 = arith.addf %331, %337 : vector<64x2xf32>
    %c0_406 = arith.constant 0 : index
    %c2_407 = arith.constant 2 : index
    %c1_408 = arith.constant 1 : index
    %c2_409 = arith.constant 2 : index
    %c0_410 = arith.constant 0 : index
    %339 = vector.load %arg1[%c0_406, %c2_407, %c1_408, %c2_409, %c0_410] : memref<1x4x11x11x4xf32, #tpu.memory_space<vmem>>, vector<1x1x8x8x4xf32>
    %340 = vector.shape_cast %339 : vector<1x1x8x8x4xf32> to vector<8x8x4xf32>
    %341 = vector.shape_cast %340 : vector<8x8x4xf32> to vector<64x4xf32>
    %c28 = arith.constant 28 : index
    %c0_411 = arith.constant 0 : index
    %c0_412 = arith.constant 0 : index
    %342 = vector.load %arg4[%c28, %c0_411, %c0_412] : memref<64x4x2xf32, #tpu.memory_space<vmem>>, vector<1x4x2xf32>
    %343 = vector.shape_cast %342 : vector<1x4x2xf32> to vector<4x2xf32>
    %cst_413 = arith.constant dense<0.000000e+00> : vector<64x2xf32>
    %344 = tpu.matmul %341, %343, %cst_413 {dimension_numbers = #tpu.dot_dimension_numbers<[1], [0], [0], [1], [0, 0, 1, 1], [], []>} : vector<64x4xf32>, vector<4x2xf32>, vector<64x2xf32> -> vector<64x2xf32>
    %345 = arith.addf %338, %344 : vector<64x2xf32>
    %c0_414 = arith.constant 0 : index
    %c3_415 = arith.constant 3 : index
    %c1_416 = arith.constant 1 : index
    %c2_417 = arith.constant 2 : index
    %c0_418 = arith.constant 0 : index
    %346 = vector.load %arg1[%c0_414, %c3_415, %c1_416, %c2_417, %c0_418] : memref<1x4x11x11x4xf32, #tpu.memory_space<vmem>>, vector<1x1x8x8x4xf32>
    %347 = vector.shape_cast %346 : vector<1x1x8x8x4xf32> to vector<8x8x4xf32>
    %348 = vector.shape_cast %347 : vector<8x8x4xf32> to vector<64x4xf32>
    %c29 = arith.constant 29 : index
    %c0_419 = arith.constant 0 : index
    %c0_420 = arith.constant 0 : index
    %349 = vector.load %arg4[%c29, %c0_419, %c0_420] : memref<64x4x2xf32, #tpu.memory_space<vmem>>, vector<1x4x2xf32>
    %350 = vector.shape_cast %349 : vector<1x4x2xf32> to vector<4x2xf32>
    %cst_421 = arith.constant dense<0.000000e+00> : vector<64x2xf32>
    %351 = tpu.matmul %348, %350, %cst_421 {dimension_numbers = #tpu.dot_dimension_numbers<[1], [0], [0], [1], [0, 0, 1, 1], [], []>} : vector<64x4xf32>, vector<4x2xf32>, vector<64x2xf32> -> vector<64x2xf32>
    %352 = arith.addf %345, %351 : vector<64x2xf32>
    %c0_422 = arith.constant 0 : index
    %c2_423 = arith.constant 2 : index
    %c1_424 = arith.constant 1 : index
    %c3_425 = arith.constant 3 : index
    %c0_426 = arith.constant 0 : index
    %353 = vector.load %arg1[%c0_422, %c2_423, %c1_424, %c3_425, %c0_426] : memref<1x4x11x11x4xf32, #tpu.memory_space<vmem>>, vector<1x1x8x8x4xf32>
    %354 = vector.shape_cast %353 : vector<1x1x8x8x4xf32> to vector<8x8x4xf32>
    %355 = vector.shape_cast %354 : vector<8x8x4xf32> to vector<64x4xf32>
    %c30 = arith.constant 30 : index
    %c0_427 = arith.constant 0 : index
    %c0_428 = arith.constant 0 : index
    %356 = vector.load %arg4[%c30, %c0_427, %c0_428] : memref<64x4x2xf32, #tpu.memory_space<vmem>>, vector<1x4x2xf32>
    %357 = vector.shape_cast %356 : vector<1x4x2xf32> to vector<4x2xf32>
    %cst_429 = arith.constant dense<0.000000e+00> : vector<64x2xf32>
    %358 = tpu.matmul %355, %357, %cst_429 {dimension_numbers = #tpu.dot_dimension_numbers<[1], [0], [0], [1], [0, 0, 1, 1], [], []>} : vector<64x4xf32>, vector<4x2xf32>, vector<64x2xf32> -> vector<64x2xf32>
    %359 = arith.addf %352, %358 : vector<64x2xf32>
    %c0_430 = arith.constant 0 : index
    %c3_431 = arith.constant 3 : index
    %c1_432 = arith.constant 1 : index
    %c3_433 = arith.constant 3 : index
    %c0_434 = arith.constant 0 : index
    %360 = vector.load %arg1[%c0_430, %c3_431, %c1_432, %c3_433, %c0_434] : memref<1x4x11x11x4xf32, #tpu.memory_space<vmem>>, vector<1x1x8x8x4xf32>
    %361 = vector.shape_cast %360 : vector<1x1x8x8x4xf32> to vector<8x8x4xf32>
    %362 = vector.shape_cast %361 : vector<8x8x4xf32> to vector<64x4xf32>
    %c31 = arith.constant 31 : index
    %c0_435 = arith.constant 0 : index
    %c0_436 = arith.constant 0 : index
    %363 = vector.load %arg4[%c31, %c0_435, %c0_436] : memref<64x4x2xf32, #tpu.memory_space<vmem>>, vector<1x4x2xf32>
    %364 = vector.shape_cast %363 : vector<1x4x2xf32> to vector<4x2xf32>
    %cst_437 = arith.constant dense<0.000000e+00> : vector<64x2xf32>
    %365 = tpu.matmul %362, %364, %cst_437 {dimension_numbers = #tpu.dot_dimension_numbers<[1], [0], [0], [1], [0, 0, 1, 1], [], []>} : vector<64x4xf32>, vector<4x2xf32>, vector<64x2xf32> -> vector<64x2xf32>
    %366 = arith.addf %359, %365 : vector<64x2xf32>
    %c0_438 = arith.constant 0 : index
    %c0_439 = arith.constant 0 : index
    %c2_440 = arith.constant 2 : index
    %c0_441 = arith.constant 0 : index
    %c0_442 = arith.constant 0 : index
    %367 = vector.load %arg1[%c0_438, %c0_439, %c2_440, %c0_441, %c0_442] : memref<1x4x11x11x4xf32, #tpu.memory_space<vmem>>, vector<1x1x8x8x4xf32>
    %368 = vector.shape_cast %367 : vector<1x1x8x8x4xf32> to vector<8x8x4xf32>
    %369 = vector.shape_cast %368 : vector<8x8x4xf32> to vector<64x4xf32>
    %c32 = arith.constant 32 : index
    %c0_443 = arith.constant 0 : index
    %c0_444 = arith.constant 0 : index
    %370 = vector.load %arg4[%c32, %c0_443, %c0_444] : memref<64x4x2xf32, #tpu.memory_space<vmem>>, vector<1x4x2xf32>
    %371 = vector.shape_cast %370 : vector<1x4x2xf32> to vector<4x2xf32>
    %cst_445 = arith.constant dense<0.000000e+00> : vector<64x2xf32>
    %372 = tpu.matmul %369, %371, %cst_445 {dimension_numbers = #tpu.dot_dimension_numbers<[1], [0], [0], [1], [0, 0, 1, 1], [], []>} : vector<64x4xf32>, vector<4x2xf32>, vector<64x2xf32> -> vector<64x2xf32>
    %373 = arith.addf %366, %372 : vector<64x2xf32>
    %c0_446 = arith.constant 0 : index
    %c1_447 = arith.constant 1 : index
    %c2_448 = arith.constant 2 : index
    %c0_449 = arith.constant 0 : index
    %c0_450 = arith.constant 0 : index
    %374 = vector.load %arg1[%c0_446, %c1_447, %c2_448, %c0_449, %c0_450] : memref<1x4x11x11x4xf32, #tpu.memory_space<vmem>>, vector<1x1x8x8x4xf32>
    %375 = vector.shape_cast %374 : vector<1x1x8x8x4xf32> to vector<8x8x4xf32>
    %376 = vector.shape_cast %375 : vector<8x8x4xf32> to vector<64x4xf32>
    %c33 = arith.constant 33 : index
    %c0_451 = arith.constant 0 : index
    %c0_452 = arith.constant 0 : index
    %377 = vector.load %arg4[%c33, %c0_451, %c0_452] : memref<64x4x2xf32, #tpu.memory_space<vmem>>, vector<1x4x2xf32>
    %378 = vector.shape_cast %377 : vector<1x4x2xf32> to vector<4x2xf32>
    %cst_453 = arith.constant dense<0.000000e+00> : vector<64x2xf32>
    %379 = tpu.matmul %376, %378, %cst_453 {dimension_numbers = #tpu.dot_dimension_numbers<[1], [0], [0], [1], [0, 0, 1, 1], [], []>} : vector<64x4xf32>, vector<4x2xf32>, vector<64x2xf32> -> vector<64x2xf32>
    %380 = arith.addf %373, %379 : vector<64x2xf32>
    %c0_454 = arith.constant 0 : index
    %c0_455 = arith.constant 0 : index
    %c2_456 = arith.constant 2 : index
    %c1_457 = arith.constant 1 : index
    %c0_458 = arith.constant 0 : index
    %381 = vector.load %arg1[%c0_454, %c0_455, %c2_456, %c1_457, %c0_458] : memref<1x4x11x11x4xf32, #tpu.memory_space<vmem>>, vector<1x1x8x8x4xf32>
    %382 = vector.shape_cast %381 : vector<1x1x8x8x4xf32> to vector<8x8x4xf32>
    %383 = vector.shape_cast %382 : vector<8x8x4xf32> to vector<64x4xf32>
    %c34 = arith.constant 34 : index
    %c0_459 = arith.constant 0 : index
    %c0_460 = arith.constant 0 : index
    %384 = vector.load %arg4[%c34, %c0_459, %c0_460] : memref<64x4x2xf32, #tpu.memory_space<vmem>>, vector<1x4x2xf32>
    %385 = vector.shape_cast %384 : vector<1x4x2xf32> to vector<4x2xf32>
    %cst_461 = arith.constant dense<0.000000e+00> : vector<64x2xf32>
    %386 = tpu.matmul %383, %385, %cst_461 {dimension_numbers = #tpu.dot_dimension_numbers<[1], [0], [0], [1], [0, 0, 1, 1], [], []>} : vector<64x4xf32>, vector<4x2xf32>, vector<64x2xf32> -> vector<64x2xf32>
    %387 = arith.addf %380, %386 : vector<64x2xf32>
    %c0_462 = arith.constant 0 : index
    %c1_463 = arith.constant 1 : index
    %c2_464 = arith.constant 2 : index
    %c1_465 = arith.constant 1 : index
    %c0_466 = arith.constant 0 : index
    %388 = vector.load %arg1[%c0_462, %c1_463, %c2_464, %c1_465, %c0_466] : memref<1x4x11x11x4xf32, #tpu.memory_space<vmem>>, vector<1x1x8x8x4xf32>
    %389 = vector.shape_cast %388 : vector<1x1x8x8x4xf32> to vector<8x8x4xf32>
    %390 = vector.shape_cast %389 : vector<8x8x4xf32> to vector<64x4xf32>
    %c35 = arith.constant 35 : index
    %c0_467 = arith.constant 0 : index
    %c0_468 = arith.constant 0 : index
    %391 = vector.load %arg4[%c35, %c0_467, %c0_468] : memref<64x4x2xf32, #tpu.memory_space<vmem>>, vector<1x4x2xf32>
    %392 = vector.shape_cast %391 : vector<1x4x2xf32> to vector<4x2xf32>
    %cst_469 = arith.constant dense<0.000000e+00> : vector<64x2xf32>
    %393 = tpu.matmul %390, %392, %cst_469 {dimension_numbers = #tpu.dot_dimension_numbers<[1], [0], [0], [1], [0, 0, 1, 1], [], []>} : vector<64x4xf32>, vector<4x2xf32>, vector<64x2xf32> -> vector<64x2xf32>
    %394 = arith.addf %387, %393 : vector<64x2xf32>
    %c0_470 = arith.constant 0 : index
    %c0_471 = arith.constant 0 : index
    %c2_472 = arith.constant 2 : index
    %c2_473 = arith.constant 2 : index
    %c0_474 = arith.constant 0 : index
    %395 = vector.load %arg1[%c0_470, %c0_471, %c2_472, %c2_473, %c0_474] : memref<1x4x11x11x4xf32, #tpu.memory_space<vmem>>, vector<1x1x8x8x4xf32>
    %396 = vector.shape_cast %395 : vector<1x1x8x8x4xf32> to vector<8x8x4xf32>
    %397 = vector.shape_cast %396 : vector<8x8x4xf32> to vector<64x4xf32>
    %c36 = arith.constant 36 : index
    %c0_475 = arith.constant 0 : index
    %c0_476 = arith.constant 0 : index
    %398 = vector.load %arg4[%c36, %c0_475, %c0_476] : memref<64x4x2xf32, #tpu.memory_space<vmem>>, vector<1x4x2xf32>
    %399 = vector.shape_cast %398 : vector<1x4x2xf32> to vector<4x2xf32>
    %cst_477 = arith.constant dense<0.000000e+00> : vector<64x2xf32>
    %400 = tpu.matmul %397, %399, %cst_477 {dimension_numbers = #tpu.dot_dimension_numbers<[1], [0], [0], [1], [0, 0, 1, 1], [], []>} : vector<64x4xf32>, vector<4x2xf32>, vector<64x2xf32> -> vector<64x2xf32>
    %401 = arith.addf %394, %400 : vector<64x2xf32>
    %c0_478 = arith.constant 0 : index
    %c1_479 = arith.constant 1 : index
    %c2_480 = arith.constant 2 : index
    %c2_481 = arith.constant 2 : index
    %c0_482 = arith.constant 0 : index
    %402 = vector.load %arg1[%c0_478, %c1_479, %c2_480, %c2_481, %c0_482] : memref<1x4x11x11x4xf32, #tpu.memory_space<vmem>>, vector<1x1x8x8x4xf32>
    %403 = vector.shape_cast %402 : vector<1x1x8x8x4xf32> to vector<8x8x4xf32>
    %404 = vector.shape_cast %403 : vector<8x8x4xf32> to vector<64x4xf32>
    %c37 = arith.constant 37 : index
    %c0_483 = arith.constant 0 : index
    %c0_484 = arith.constant 0 : index
    %405 = vector.load %arg4[%c37, %c0_483, %c0_484] : memref<64x4x2xf32, #tpu.memory_space<vmem>>, vector<1x4x2xf32>
    %406 = vector.shape_cast %405 : vector<1x4x2xf32> to vector<4x2xf32>
    %cst_485 = arith.constant dense<0.000000e+00> : vector<64x2xf32>
    %407 = tpu.matmul %404, %406, %cst_485 {dimension_numbers = #tpu.dot_dimension_numbers<[1], [0], [0], [1], [0, 0, 1, 1], [], []>} : vector<64x4xf32>, vector<4x2xf32>, vector<64x2xf32> -> vector<64x2xf32>
    %408 = arith.addf %401, %407 : vector<64x2xf32>
    %c0_486 = arith.constant 0 : index
    %c0_487 = arith.constant 0 : index
    %c2_488 = arith.constant 2 : index
    %c3_489 = arith.constant 3 : index
    %c0_490 = arith.constant 0 : index
    %409 = vector.load %arg1[%c0_486, %c0_487, %c2_488, %c3_489, %c0_490] : memref<1x4x11x11x4xf32, #tpu.memory_space<vmem>>, vector<1x1x8x8x4xf32>
    %410 = vector.shape_cast %409 : vector<1x1x8x8x4xf32> to vector<8x8x4xf32>
    %411 = vector.shape_cast %410 : vector<8x8x4xf32> to vector<64x4xf32>
    %c38 = arith.constant 38 : index
    %c0_491 = arith.constant 0 : index
    %c0_492 = arith.constant 0 : index
    %412 = vector.load %arg4[%c38, %c0_491, %c0_492] : memref<64x4x2xf32, #tpu.memory_space<vmem>>, vector<1x4x2xf32>
    %413 = vector.shape_cast %412 : vector<1x4x2xf32> to vector<4x2xf32>
    %cst_493 = arith.constant dense<0.000000e+00> : vector<64x2xf32>
    %414 = tpu.matmul %411, %413, %cst_493 {dimension_numbers = #tpu.dot_dimension_numbers<[1], [0], [0], [1], [0, 0, 1, 1], [], []>} : vector<64x4xf32>, vector<4x2xf32>, vector<64x2xf32> -> vector<64x2xf32>
    %415 = arith.addf %408, %414 : vector<64x2xf32>
    %c0_494 = arith.constant 0 : index
    %c1_495 = arith.constant 1 : index
    %c2_496 = arith.constant 2 : index
    %c3_497 = arith.constant 3 : index
    %c0_498 = arith.constant 0 : index
    %416 = vector.load %arg1[%c0_494, %c1_495, %c2_496, %c3_497, %c0_498] : memref<1x4x11x11x4xf32, #tpu.memory_space<vmem>>, vector<1x1x8x8x4xf32>
    %417 = vector.shape_cast %416 : vector<1x1x8x8x4xf32> to vector<8x8x4xf32>
    %418 = vector.shape_cast %417 : vector<8x8x4xf32> to vector<64x4xf32>
    %c39 = arith.constant 39 : index
    %c0_499 = arith.constant 0 : index
    %c0_500 = arith.constant 0 : index
    %419 = vector.load %arg4[%c39, %c0_499, %c0_500] : memref<64x4x2xf32, #tpu.memory_space<vmem>>, vector<1x4x2xf32>
    %420 = vector.shape_cast %419 : vector<1x4x2xf32> to vector<4x2xf32>
    %cst_501 = arith.constant dense<0.000000e+00> : vector<64x2xf32>
    %421 = tpu.matmul %418, %420, %cst_501 {dimension_numbers = #tpu.dot_dimension_numbers<[1], [0], [0], [1], [0, 0, 1, 1], [], []>} : vector<64x4xf32>, vector<4x2xf32>, vector<64x2xf32> -> vector<64x2xf32>
    %422 = arith.addf %415, %421 : vector<64x2xf32>
    %c0_502 = arith.constant 0 : index
    %c2_503 = arith.constant 2 : index
    %c2_504 = arith.constant 2 : index
    %c0_505 = arith.constant 0 : index
    %c0_506 = arith.constant 0 : index
    %423 = vector.load %arg1[%c0_502, %c2_503, %c2_504, %c0_505, %c0_506] : memref<1x4x11x11x4xf32, #tpu.memory_space<vmem>>, vector<1x1x8x8x4xf32>
    %424 = vector.shape_cast %423 : vector<1x1x8x8x4xf32> to vector<8x8x4xf32>
    %425 = vector.shape_cast %424 : vector<8x8x4xf32> to vector<64x4xf32>
    %c40 = arith.constant 40 : index
    %c0_507 = arith.constant 0 : index
    %c0_508 = arith.constant 0 : index
    %426 = vector.load %arg4[%c40, %c0_507, %c0_508] : memref<64x4x2xf32, #tpu.memory_space<vmem>>, vector<1x4x2xf32>
    %427 = vector.shape_cast %426 : vector<1x4x2xf32> to vector<4x2xf32>
    %cst_509 = arith.constant dense<0.000000e+00> : vector<64x2xf32>
    %428 = tpu.matmul %425, %427, %cst_509 {dimension_numbers = #tpu.dot_dimension_numbers<[1], [0], [0], [1], [0, 0, 1, 1], [], []>} : vector<64x4xf32>, vector<4x2xf32>, vector<64x2xf32> -> vector<64x2xf32>
    %429 = arith.addf %422, %428 : vector<64x2xf32>
    %c0_510 = arith.constant 0 : index
    %c3_511 = arith.constant 3 : index
    %c2_512 = arith.constant 2 : index
    %c0_513 = arith.constant 0 : index
    %c0_514 = arith.constant 0 : index
    %430 = vector.load %arg1[%c0_510, %c3_511, %c2_512, %c0_513, %c0_514] : memref<1x4x11x11x4xf32, #tpu.memory_space<vmem>>, vector<1x1x8x8x4xf32>
    %431 = vector.shape_cast %430 : vector<1x1x8x8x4xf32> to vector<8x8x4xf32>
    %432 = vector.shape_cast %431 : vector<8x8x4xf32> to vector<64x4xf32>
    %c41 = arith.constant 41 : index
    %c0_515 = arith.constant 0 : index
    %c0_516 = arith.constant 0 : index
    %433 = vector.load %arg4[%c41, %c0_515, %c0_516] : memref<64x4x2xf32, #tpu.memory_space<vmem>>, vector<1x4x2xf32>
    %434 = vector.shape_cast %433 : vector<1x4x2xf32> to vector<4x2xf32>
    %cst_517 = arith.constant dense<0.000000e+00> : vector<64x2xf32>
    %435 = tpu.matmul %432, %434, %cst_517 {dimension_numbers = #tpu.dot_dimension_numbers<[1], [0], [0], [1], [0, 0, 1, 1], [], []>} : vector<64x4xf32>, vector<4x2xf32>, vector<64x2xf32> -> vector<64x2xf32>
    %436 = arith.addf %429, %435 : vector<64x2xf32>
    %c0_518 = arith.constant 0 : index
    %c2_519 = arith.constant 2 : index
    %c2_520 = arith.constant 2 : index
    %c1_521 = arith.constant 1 : index
    %c0_522 = arith.constant 0 : index
    %437 = vector.load %arg1[%c0_518, %c2_519, %c2_520, %c1_521, %c0_522] : memref<1x4x11x11x4xf32, #tpu.memory_space<vmem>>, vector<1x1x8x8x4xf32>
    %438 = vector.shape_cast %437 : vector<1x1x8x8x4xf32> to vector<8x8x4xf32>
    %439 = vector.shape_cast %438 : vector<8x8x4xf32> to vector<64x4xf32>
    %c42 = arith.constant 42 : index
    %c0_523 = arith.constant 0 : index
    %c0_524 = arith.constant 0 : index
    %440 = vector.load %arg4[%c42, %c0_523, %c0_524] : memref<64x4x2xf32, #tpu.memory_space<vmem>>, vector<1x4x2xf32>
    %441 = vector.shape_cast %440 : vector<1x4x2xf32> to vector<4x2xf32>
    %cst_525 = arith.constant dense<0.000000e+00> : vector<64x2xf32>
    %442 = tpu.matmul %439, %441, %cst_525 {dimension_numbers = #tpu.dot_dimension_numbers<[1], [0], [0], [1], [0, 0, 1, 1], [], []>} : vector<64x4xf32>, vector<4x2xf32>, vector<64x2xf32> -> vector<64x2xf32>
    %443 = arith.addf %436, %442 : vector<64x2xf32>
    %c0_526 = arith.constant 0 : index
    %c3_527 = arith.constant 3 : index
    %c2_528 = arith.constant 2 : index
    %c1_529 = arith.constant 1 : index
    %c0_530 = arith.constant 0 : index
    %444 = vector.load %arg1[%c0_526, %c3_527, %c2_528, %c1_529, %c0_530] : memref<1x4x11x11x4xf32, #tpu.memory_space<vmem>>, vector<1x1x8x8x4xf32>
    %445 = vector.shape_cast %444 : vector<1x1x8x8x4xf32> to vector<8x8x4xf32>
    %446 = vector.shape_cast %445 : vector<8x8x4xf32> to vector<64x4xf32>
    %c43 = arith.constant 43 : index
    %c0_531 = arith.constant 0 : index
    %c0_532 = arith.constant 0 : index
    %447 = vector.load %arg4[%c43, %c0_531, %c0_532] : memref<64x4x2xf32, #tpu.memory_space<vmem>>, vector<1x4x2xf32>
    %448 = vector.shape_cast %447 : vector<1x4x2xf32> to vector<4x2xf32>
    %cst_533 = arith.constant dense<0.000000e+00> : vector<64x2xf32>
    %449 = tpu.matmul %446, %448, %cst_533 {dimension_numbers = #tpu.dot_dimension_numbers<[1], [0], [0], [1], [0, 0, 1, 1], [], []>} : vector<64x4xf32>, vector<4x2xf32>, vector<64x2xf32> -> vector<64x2xf32>
    %450 = arith.addf %443, %449 : vector<64x2xf32>
    %c0_534 = arith.constant 0 : index
    %c2_535 = arith.constant 2 : index
    %c2_536 = arith.constant 2 : index
    %c2_537 = arith.constant 2 : index
    %c0_538 = arith.constant 0 : index
    %451 = vector.load %arg1[%c0_534, %c2_535, %c2_536, %c2_537, %c0_538] : memref<1x4x11x11x4xf32, #tpu.memory_space<vmem>>, vector<1x1x8x8x4xf32>
    %452 = vector.shape_cast %451 : vector<1x1x8x8x4xf32> to vector<8x8x4xf32>
    %453 = vector.shape_cast %452 : vector<8x8x4xf32> to vector<64x4xf32>
    %c44 = arith.constant 44 : index
    %c0_539 = arith.constant 0 : index
    %c0_540 = arith.constant 0 : index
    %454 = vector.load %arg4[%c44, %c0_539, %c0_540] : memref<64x4x2xf32, #tpu.memory_space<vmem>>, vector<1x4x2xf32>
    %455 = vector.shape_cast %454 : vector<1x4x2xf32> to vector<4x2xf32>
    %cst_541 = arith.constant dense<0.000000e+00> : vector<64x2xf32>
    %456 = tpu.matmul %453, %455, %cst_541 {dimension_numbers = #tpu.dot_dimension_numbers<[1], [0], [0], [1], [0, 0, 1, 1], [], []>} : vector<64x4xf32>, vector<4x2xf32>, vector<64x2xf32> -> vector<64x2xf32>
    %457 = arith.addf %450, %456 : vector<64x2xf32>
    %c0_542 = arith.constant 0 : index
    %c3_543 = arith.constant 3 : index
    %c2_544 = arith.constant 2 : index
    %c2_545 = arith.constant 2 : index
    %c0_546 = arith.constant 0 : index
    %458 = vector.load %arg1[%c0_542, %c3_543, %c2_544, %c2_545, %c0_546] : memref<1x4x11x11x4xf32, #tpu.memory_space<vmem>>, vector<1x1x8x8x4xf32>
    %459 = vector.shape_cast %458 : vector<1x1x8x8x4xf32> to vector<8x8x4xf32>
    %460 = vector.shape_cast %459 : vector<8x8x4xf32> to vector<64x4xf32>
    %c45 = arith.constant 45 : index
    %c0_547 = arith.constant 0 : index
    %c0_548 = arith.constant 0 : index
    %461 = vector.load %arg4[%c45, %c0_547, %c0_548] : memref<64x4x2xf32, #tpu.memory_space<vmem>>, vector<1x4x2xf32>
    %462 = vector.shape_cast %461 : vector<1x4x2xf32> to vector<4x2xf32>
    %cst_549 = arith.constant dense<0.000000e+00> : vector<64x2xf32>
    %463 = tpu.matmul %460, %462, %cst_549 {dimension_numbers = #tpu.dot_dimension_numbers<[1], [0], [0], [1], [0, 0, 1, 1], [], []>} : vector<64x4xf32>, vector<4x2xf32>, vector<64x2xf32> -> vector<64x2xf32>
    %464 = arith.addf %457, %463 : vector<64x2xf32>
    %c0_550 = arith.constant 0 : index
    %c2_551 = arith.constant 2 : index
    %c2_552 = arith.constant 2 : index
    %c3_553 = arith.constant 3 : index
    %c0_554 = arith.constant 0 : index
    %465 = vector.load %arg1[%c0_550, %c2_551, %c2_552, %c3_553, %c0_554] : memref<1x4x11x11x4xf32, #tpu.memory_space<vmem>>, vector<1x1x8x8x4xf32>
    %466 = vector.shape_cast %465 : vector<1x1x8x8x4xf32> to vector<8x8x4xf32>
    %467 = vector.shape_cast %466 : vector<8x8x4xf32> to vector<64x4xf32>
    %c46 = arith.constant 46 : index
    %c0_555 = arith.constant 0 : index
    %c0_556 = arith.constant 0 : index
    %468 = vector.load %arg4[%c46, %c0_555, %c0_556] : memref<64x4x2xf32, #tpu.memory_space<vmem>>, vector<1x4x2xf32>
    %469 = vector.shape_cast %468 : vector<1x4x2xf32> to vector<4x2xf32>
    %cst_557 = arith.constant dense<0.000000e+00> : vector<64x2xf32>
    %470 = tpu.matmul %467, %469, %cst_557 {dimension_numbers = #tpu.dot_dimension_numbers<[1], [0], [0], [1], [0, 0, 1, 1], [], []>} : vector<64x4xf32>, vector<4x2xf32>, vector<64x2xf32> -> vector<64x2xf32>
    %471 = arith.addf %464, %470 : vector<64x2xf32>
    %c0_558 = arith.constant 0 : index
    %c3_559 = arith.constant 3 : index
    %c2_560 = arith.constant 2 : index
    %c3_561 = arith.constant 3 : index
    %c0_562 = arith.constant 0 : index
    %472 = vector.load %arg1[%c0_558, %c3_559, %c2_560, %c3_561, %c0_562] : memref<1x4x11x11x4xf32, #tpu.memory_space<vmem>>, vector<1x1x8x8x4xf32>
    %473 = vector.shape_cast %472 : vector<1x1x8x8x4xf32> to vector<8x8x4xf32>
    %474 = vector.shape_cast %473 : vector<8x8x4xf32> to vector<64x4xf32>
    %c47 = arith.constant 47 : index
    %c0_563 = arith.constant 0 : index
    %c0_564 = arith.constant 0 : index
    %475 = vector.load %arg4[%c47, %c0_563, %c0_564] : memref<64x4x2xf32, #tpu.memory_space<vmem>>, vector<1x4x2xf32>
    %476 = vector.shape_cast %475 : vector<1x4x2xf32> to vector<4x2xf32>
    %cst_565 = arith.constant dense<0.000000e+00> : vector<64x2xf32>
    %477 = tpu.matmul %474, %476, %cst_565 {dimension_numbers = #tpu.dot_dimension_numbers<[1], [0], [0], [1], [0, 0, 1, 1], [], []>} : vector<64x4xf32>, vector<4x2xf32>, vector<64x2xf32> -> vector<64x2xf32>
    %478 = arith.addf %471, %477 : vector<64x2xf32>
    %c0_566 = arith.constant 0 : index
    %c0_567 = arith.constant 0 : index
    %c3_568 = arith.constant 3 : index
    %c0_569 = arith.constant 0 : index
    %c0_570 = arith.constant 0 : index
    %479 = vector.load %arg1[%c0_566, %c0_567, %c3_568, %c0_569, %c0_570] : memref<1x4x11x11x4xf32, #tpu.memory_space<vmem>>, vector<1x1x8x8x4xf32>
    %480 = vector.shape_cast %479 : vector<1x1x8x8x4xf32> to vector<8x8x4xf32>
    %481 = vector.shape_cast %480 : vector<8x8x4xf32> to vector<64x4xf32>
    %c48 = arith.constant 48 : index
    %c0_571 = arith.constant 0 : index
    %c0_572 = arith.constant 0 : index
    %482 = vector.load %arg4[%c48, %c0_571, %c0_572] : memref<64x4x2xf32, #tpu.memory_space<vmem>>, vector<1x4x2xf32>
    %483 = vector.shape_cast %482 : vector<1x4x2xf32> to vector<4x2xf32>
    %cst_573 = arith.constant dense<0.000000e+00> : vector<64x2xf32>
    %484 = tpu.matmul %481, %483, %cst_573 {dimension_numbers = #tpu.dot_dimension_numbers<[1], [0], [0], [1], [0, 0, 1, 1], [], []>} : vector<64x4xf32>, vector<4x2xf32>, vector<64x2xf32> -> vector<64x2xf32>
    %485 = arith.addf %478, %484 : vector<64x2xf32>
    %c0_574 = arith.constant 0 : index
    %c1_575 = arith.constant 1 : index
    %c3_576 = arith.constant 3 : index
    %c0_577 = arith.constant 0 : index
    %c0_578 = arith.constant 0 : index
    %486 = vector.load %arg1[%c0_574, %c1_575, %c3_576, %c0_577, %c0_578] : memref<1x4x11x11x4xf32, #tpu.memory_space<vmem>>, vector<1x1x8x8x4xf32>
    %487 = vector.shape_cast %486 : vector<1x1x8x8x4xf32> to vector<8x8x4xf32>
    %488 = vector.shape_cast %487 : vector<8x8x4xf32> to vector<64x4xf32>
    %c49 = arith.constant 49 : index
    %c0_579 = arith.constant 0 : index
    %c0_580 = arith.constant 0 : index
    %489 = vector.load %arg4[%c49, %c0_579, %c0_580] : memref<64x4x2xf32, #tpu.memory_space<vmem>>, vector<1x4x2xf32>
    %490 = vector.shape_cast %489 : vector<1x4x2xf32> to vector<4x2xf32>
    %cst_581 = arith.constant dense<0.000000e+00> : vector<64x2xf32>
    %491 = tpu.matmul %488, %490, %cst_581 {dimension_numbers = #tpu.dot_dimension_numbers<[1], [0], [0], [1], [0, 0, 1, 1], [], []>} : vector<64x4xf32>, vector<4x2xf32>, vector<64x2xf32> -> vector<64x2xf32>
    %492 = arith.addf %485, %491 : vector<64x2xf32>
    %c0_582 = arith.constant 0 : index
    %c0_583 = arith.constant 0 : index
    %c3_584 = arith.constant 3 : index
    %c1_585 = arith.constant 1 : index
    %c0_586 = arith.constant 0 : index
    %493 = vector.load %arg1[%c0_582, %c0_583, %c3_584, %c1_585, %c0_586] : memref<1x4x11x11x4xf32, #tpu.memory_space<vmem>>, vector<1x1x8x8x4xf32>
    %494 = vector.shape_cast %493 : vector<1x1x8x8x4xf32> to vector<8x8x4xf32>
    %495 = vector.shape_cast %494 : vector<8x8x4xf32> to vector<64x4xf32>
    %c50 = arith.constant 50 : index
    %c0_587 = arith.constant 0 : index
    %c0_588 = arith.constant 0 : index
    %496 = vector.load %arg4[%c50, %c0_587, %c0_588] : memref<64x4x2xf32, #tpu.memory_space<vmem>>, vector<1x4x2xf32>
    %497 = vector.shape_cast %496 : vector<1x4x2xf32> to vector<4x2xf32>
    %cst_589 = arith.constant dense<0.000000e+00> : vector<64x2xf32>
    %498 = tpu.matmul %495, %497, %cst_589 {dimension_numbers = #tpu.dot_dimension_numbers<[1], [0], [0], [1], [0, 0, 1, 1], [], []>} : vector<64x4xf32>, vector<4x2xf32>, vector<64x2xf32> -> vector<64x2xf32>
    %499 = arith.addf %492, %498 : vector<64x2xf32>
    %c0_590 = arith.constant 0 : index
    %c1_591 = arith.constant 1 : index
    %c3_592 = arith.constant 3 : index
    %c1_593 = arith.constant 1 : index
    %c0_594 = arith.constant 0 : index
    %500 = vector.load %arg1[%c0_590, %c1_591, %c3_592, %c1_593, %c0_594] : memref<1x4x11x11x4xf32, #tpu.memory_space<vmem>>, vector<1x1x8x8x4xf32>
    %501 = vector.shape_cast %500 : vector<1x1x8x8x4xf32> to vector<8x8x4xf32>
    %502 = vector.shape_cast %501 : vector<8x8x4xf32> to vector<64x4xf32>
    %c51 = arith.constant 51 : index
    %c0_595 = arith.constant 0 : index
    %c0_596 = arith.constant 0 : index
    %503 = vector.load %arg4[%c51, %c0_595, %c0_596] : memref<64x4x2xf32, #tpu.memory_space<vmem>>, vector<1x4x2xf32>
    %504 = vector.shape_cast %503 : vector<1x4x2xf32> to vector<4x2xf32>
    %cst_597 = arith.constant dense<0.000000e+00> : vector<64x2xf32>
    %505 = tpu.matmul %502, %504, %cst_597 {dimension_numbers = #tpu.dot_dimension_numbers<[1], [0], [0], [1], [0, 0, 1, 1], [], []>} : vector<64x4xf32>, vector<4x2xf32>, vector<64x2xf32> -> vector<64x2xf32>
    %506 = arith.addf %499, %505 : vector<64x2xf32>
    %c0_598 = arith.constant 0 : index
    %c0_599 = arith.constant 0 : index
    %c3_600 = arith.constant 3 : index
    %c2_601 = arith.constant 2 : index
    %c0_602 = arith.constant 0 : index
    %507 = vector.load %arg1[%c0_598, %c0_599, %c3_600, %c2_601, %c0_602] : memref<1x4x11x11x4xf32, #tpu.memory_space<vmem>>, vector<1x1x8x8x4xf32>
    %508 = vector.shape_cast %507 : vector<1x1x8x8x4xf32> to vector<8x8x4xf32>
    %509 = vector.shape_cast %508 : vector<8x8x4xf32> to vector<64x4xf32>
    %c52 = arith.constant 52 : index
    %c0_603 = arith.constant 0 : index
    %c0_604 = arith.constant 0 : index
    %510 = vector.load %arg4[%c52, %c0_603, %c0_604] : memref<64x4x2xf32, #tpu.memory_space<vmem>>, vector<1x4x2xf32>
    %511 = vector.shape_cast %510 : vector<1x4x2xf32> to vector<4x2xf32>
    %cst_605 = arith.constant dense<0.000000e+00> : vector<64x2xf32>
    %512 = tpu.matmul %509, %511, %cst_605 {dimension_numbers = #tpu.dot_dimension_numbers<[1], [0], [0], [1], [0, 0, 1, 1], [], []>} : vector<64x4xf32>, vector<4x2xf32>, vector<64x2xf32> -> vector<64x2xf32>
    %513 = arith.addf %506, %512 : vector<64x2xf32>
    %c0_606 = arith.constant 0 : index
    %c1_607 = arith.constant 1 : index
    %c3_608 = arith.constant 3 : index
    %c2_609 = arith.constant 2 : index
    %c0_610 = arith.constant 0 : index
    %514 = vector.load %arg1[%c0_606, %c1_607, %c3_608, %c2_609, %c0_610] : memref<1x4x11x11x4xf32, #tpu.memory_space<vmem>>, vector<1x1x8x8x4xf32>
    %515 = vector.shape_cast %514 : vector<1x1x8x8x4xf32> to vector<8x8x4xf32>
    %516 = vector.shape_cast %515 : vector<8x8x4xf32> to vector<64x4xf32>
    %c53 = arith.constant 53 : index
    %c0_611 = arith.constant 0 : index
    %c0_612 = arith.constant 0 : index
    %517 = vector.load %arg4[%c53, %c0_611, %c0_612] : memref<64x4x2xf32, #tpu.memory_space<vmem>>, vector<1x4x2xf32>
    %518 = vector.shape_cast %517 : vector<1x4x2xf32> to vector<4x2xf32>
    %cst_613 = arith.constant dense<0.000000e+00> : vector<64x2xf32>
    %519 = tpu.matmul %516, %518, %cst_613 {dimension_numbers = #tpu.dot_dimension_numbers<[1], [0], [0], [1], [0, 0, 1, 1], [], []>} : vector<64x4xf32>, vector<4x2xf32>, vector<64x2xf32> -> vector<64x2xf32>
    %520 = arith.addf %513, %519 : vector<64x2xf32>
    %c0_614 = arith.constant 0 : index
    %c0_615 = arith.constant 0 : index
    %c3_616 = arith.constant 3 : index
    %c3_617 = arith.constant 3 : index
    %c0_618 = arith.constant 0 : index
    %521 = vector.load %arg1[%c0_614, %c0_615, %c3_616, %c3_617, %c0_618] : memref<1x4x11x11x4xf32, #tpu.memory_space<vmem>>, vector<1x1x8x8x4xf32>
    %522 = vector.shape_cast %521 : vector<1x1x8x8x4xf32> to vector<8x8x4xf32>
    %523 = vector.shape_cast %522 : vector<8x8x4xf32> to vector<64x4xf32>
    %c54 = arith.constant 54 : index
    %c0_619 = arith.constant 0 : index
    %c0_620 = arith.constant 0 : index
    %524 = vector.load %arg4[%c54, %c0_619, %c0_620] : memref<64x4x2xf32, #tpu.memory_space<vmem>>, vector<1x4x2xf32>
    %525 = vector.shape_cast %524 : vector<1x4x2xf32> to vector<4x2xf32>
    %cst_621 = arith.constant dense<0.000000e+00> : vector<64x2xf32>
    %526 = tpu.matmul %523, %525, %cst_621 {dimension_numbers = #tpu.dot_dimension_numbers<[1], [0], [0], [1], [0, 0, 1, 1], [], []>} : vector<64x4xf32>, vector<4x2xf32>, vector<64x2xf32> -> vector<64x2xf32>
    %527 = arith.addf %520, %526 : vector<64x2xf32>
    %c0_622 = arith.constant 0 : index
    %c1_623 = arith.constant 1 : index
    %c3_624 = arith.constant 3 : index
    %c3_625 = arith.constant 3 : index
    %c0_626 = arith.constant 0 : index
    %528 = vector.load %arg1[%c0_622, %c1_623, %c3_624, %c3_625, %c0_626] : memref<1x4x11x11x4xf32, #tpu.memory_space<vmem>>, vector<1x1x8x8x4xf32>
    %529 = vector.shape_cast %528 : vector<1x1x8x8x4xf32> to vector<8x8x4xf32>
    %530 = vector.shape_cast %529 : vector<8x8x4xf32> to vector<64x4xf32>
    %c55 = arith.constant 55 : index
    %c0_627 = arith.constant 0 : index
    %c0_628 = arith.constant 0 : index
    %531 = vector.load %arg4[%c55, %c0_627, %c0_628] : memref<64x4x2xf32, #tpu.memory_space<vmem>>, vector<1x4x2xf32>
    %532 = vector.shape_cast %531 : vector<1x4x2xf32> to vector<4x2xf32>
    %cst_629 = arith.constant dense<0.000000e+00> : vector<64x2xf32>
    %533 = tpu.matmul %530, %532, %cst_629 {dimension_numbers = #tpu.dot_dimension_numbers<[1], [0], [0], [1], [0, 0, 1, 1], [], []>} : vector<64x4xf32>, vector<4x2xf32>, vector<64x2xf32> -> vector<64x2xf32>
    %534 = arith.addf %527, %533 : vector<64x2xf32>
    %c0_630 = arith.constant 0 : index
    %c2_631 = arith.constant 2 : index
    %c3_632 = arith.constant 3 : index
    %c0_633 = arith.constant 0 : index
    %c0_634 = arith.constant 0 : index
    %535 = vector.load %arg1[%c0_630, %c2_631, %c3_632, %c0_633, %c0_634] : memref<1x4x11x11x4xf32, #tpu.memory_space<vmem>>, vector<1x1x8x8x4xf32>
    %536 = vector.shape_cast %535 : vector<1x1x8x8x4xf32> to vector<8x8x4xf32>
    %537 = vector.shape_cast %536 : vector<8x8x4xf32> to vector<64x4xf32>
    %c56 = arith.constant 56 : index
    %c0_635 = arith.constant 0 : index
    %c0_636 = arith.constant 0 : index
    %538 = vector.load %arg4[%c56, %c0_635, %c0_636] : memref<64x4x2xf32, #tpu.memory_space<vmem>>, vector<1x4x2xf32>
    %539 = vector.shape_cast %538 : vector<1x4x2xf32> to vector<4x2xf32>
    %cst_637 = arith.constant dense<0.000000e+00> : vector<64x2xf32>
    %540 = tpu.matmul %537, %539, %cst_637 {dimension_numbers = #tpu.dot_dimension_numbers<[1], [0], [0], [1], [0, 0, 1, 1], [], []>} : vector<64x4xf32>, vector<4x2xf32>, vector<64x2xf32> -> vector<64x2xf32>
    %541 = arith.addf %534, %540 : vector<64x2xf32>
    %c0_638 = arith.constant 0 : index
    %c3_639 = arith.constant 3 : index
    %c3_640 = arith.constant 3 : index
    %c0_641 = arith.constant 0 : index
    %c0_642 = arith.constant 0 : index
    %542 = vector.load %arg1[%c0_638, %c3_639, %c3_640, %c0_641, %c0_642] : memref<1x4x11x11x4xf32, #tpu.memory_space<vmem>>, vector<1x1x8x8x4xf32>
    %543 = vector.shape_cast %542 : vector<1x1x8x8x4xf32> to vector<8x8x4xf32>
    %544 = vector.shape_cast %543 : vector<8x8x4xf32> to vector<64x4xf32>
    %c57 = arith.constant 57 : index
    %c0_643 = arith.constant 0 : index
    %c0_644 = arith.constant 0 : index
    %545 = vector.load %arg4[%c57, %c0_643, %c0_644] : memref<64x4x2xf32, #tpu.memory_space<vmem>>, vector<1x4x2xf32>
    %546 = vector.shape_cast %545 : vector<1x4x2xf32> to vector<4x2xf32>
    %cst_645 = arith.constant dense<0.000000e+00> : vector<64x2xf32>
    %547 = tpu.matmul %544, %546, %cst_645 {dimension_numbers = #tpu.dot_dimension_numbers<[1], [0], [0], [1], [0, 0, 1, 1], [], []>} : vector<64x4xf32>, vector<4x2xf32>, vector<64x2xf32> -> vector<64x2xf32>
    %548 = arith.addf %541, %547 : vector<64x2xf32>
    %c0_646 = arith.constant 0 : index
    %c2_647 = arith.constant 2 : index
    %c3_648 = arith.constant 3 : index
    %c1_649 = arith.constant 1 : index
    %c0_650 = arith.constant 0 : index
    %549 = vector.load %arg1[%c0_646, %c2_647, %c3_648, %c1_649, %c0_650] : memref<1x4x11x11x4xf32, #tpu.memory_space<vmem>>, vector<1x1x8x8x4xf32>
    %550 = vector.shape_cast %549 : vector<1x1x8x8x4xf32> to vector<8x8x4xf32>
    %551 = vector.shape_cast %550 : vector<8x8x4xf32> to vector<64x4xf32>
    %c58 = arith.constant 58 : index
    %c0_651 = arith.constant 0 : index
    %c0_652 = arith.constant 0 : index
    %552 = vector.load %arg4[%c58, %c0_651, %c0_652] : memref<64x4x2xf32, #tpu.memory_space<vmem>>, vector<1x4x2xf32>
    %553 = vector.shape_cast %552 : vector<1x4x2xf32> to vector<4x2xf32>
    %cst_653 = arith.constant dense<0.000000e+00> : vector<64x2xf32>
    %554 = tpu.matmul %551, %553, %cst_653 {dimension_numbers = #tpu.dot_dimension_numbers<[1], [0], [0], [1], [0, 0, 1, 1], [], []>} : vector<64x4xf32>, vector<4x2xf32>, vector<64x2xf32> -> vector<64x2xf32>
    %555 = arith.addf %548, %554 : vector<64x2xf32>
    %c0_654 = arith.constant 0 : index
    %c3_655 = arith.constant 3 : index
    %c3_656 = arith.constant 3 : index
    %c1_657 = arith.constant 1 : index
    %c0_658 = arith.constant 0 : index
    %556 = vector.load %arg1[%c0_654, %c3_655, %c3_656, %c1_657, %c0_658] : memref<1x4x11x11x4xf32, #tpu.memory_space<vmem>>, vector<1x1x8x8x4xf32>
    %557 = vector.shape_cast %556 : vector<1x1x8x8x4xf32> to vector<8x8x4xf32>
    %558 = vector.shape_cast %557 : vector<8x8x4xf32> to vector<64x4xf32>
    %c59 = arith.constant 59 : index
    %c0_659 = arith.constant 0 : index
    %c0_660 = arith.constant 0 : index
    %559 = vector.load %arg4[%c59, %c0_659, %c0_660] : memref<64x4x2xf32, #tpu.memory_space<vmem>>, vector<1x4x2xf32>
    %560 = vector.shape_cast %559 : vector<1x4x2xf32> to vector<4x2xf32>
    %cst_661 = arith.constant dense<0.000000e+00> : vector<64x2xf32>
    %561 = tpu.matmul %558, %560, %cst_661 {dimension_numbers = #tpu.dot_dimension_numbers<[1], [0], [0], [1], [0, 0, 1, 1], [], []>} : vector<64x4xf32>, vector<4x2xf32>, vector<64x2xf32> -> vector<64x2xf32>
    %562 = arith.addf %555, %561 : vector<64x2xf32>
    %c0_662 = arith.constant 0 : index
    %c2_663 = arith.constant 2 : index
    %c3_664 = arith.constant 3 : index
    %c2_665 = arith.constant 2 : index
    %c0_666 = arith.constant 0 : index
    %563 = vector.load %arg1[%c0_662, %c2_663, %c3_664, %c2_665, %c0_666] : memref<1x4x11x11x4xf32, #tpu.memory_space<vmem>>, vector<1x1x8x8x4xf32>
    %564 = vector.shape_cast %563 : vector<1x1x8x8x4xf32> to vector<8x8x4xf32>
    %565 = vector.shape_cast %564 : vector<8x8x4xf32> to vector<64x4xf32>
    %c60 = arith.constant 60 : index
    %c0_667 = arith.constant 0 : index
    %c0_668 = arith.constant 0 : index
    %566 = vector.load %arg4[%c60, %c0_667, %c0_668] : memref<64x4x2xf32, #tpu.memory_space<vmem>>, vector<1x4x2xf32>
    %567 = vector.shape_cast %566 : vector<1x4x2xf32> to vector<4x2xf32>
    %cst_669 = arith.constant dense<0.000000e+00> : vector<64x2xf32>
    %568 = tpu.matmul %565, %567, %cst_669 {dimension_numbers = #tpu.dot_dimension_numbers<[1], [0], [0], [1], [0, 0, 1, 1], [], []>} : vector<64x4xf32>, vector<4x2xf32>, vector<64x2xf32> -> vector<64x2xf32>
    %569 = arith.addf %562, %568 : vector<64x2xf32>
    %c0_670 = arith.constant 0 : index
    %c3_671 = arith.constant 3 : index
    %c3_672 = arith.constant 3 : index
    %c2_673 = arith.constant 2 : index
    %c0_674 = arith.constant 0 : index
    %570 = vector.load %arg1[%c0_670, %c3_671, %c3_672, %c2_673, %c0_674] : memref<1x4x11x11x4xf32, #tpu.memory_space<vmem>>, vector<1x1x8x8x4xf32>
    %571 = vector.shape_cast %570 : vector<1x1x8x8x4xf32> to vector<8x8x4xf32>
    %572 = vector.shape_cast %571 : vector<8x8x4xf32> to vector<64x4xf32>
    %c61 = arith.constant 61 : index
    %c0_675 = arith.constant 0 : index
    %c0_676 = arith.constant 0 : index
    %573 = vector.load %arg4[%c61, %c0_675, %c0_676] : memref<64x4x2xf32, #tpu.memory_space<vmem>>, vector<1x4x2xf32>
    %574 = vector.shape_cast %573 : vector<1x4x2xf32> to vector<4x2xf32>
    %cst_677 = arith.constant dense<0.000000e+00> : vector<64x2xf32>
    %575 = tpu.matmul %572, %574, %cst_677 {dimension_numbers = #tpu.dot_dimension_numbers<[1], [0], [0], [1], [0, 0, 1, 1], [], []>} : vector<64x4xf32>, vector<4x2xf32>, vector<64x2xf32> -> vector<64x2xf32>
    %576 = arith.addf %569, %575 : vector<64x2xf32>
    %c0_678 = arith.constant 0 : index
    %c2_679 = arith.constant 2 : index
    %c3_680 = arith.constant 3 : index
    %c3_681 = arith.constant 3 : index
    %c0_682 = arith.constant 0 : index
    %577 = vector.load %arg1[%c0_678, %c2_679, %c3_680, %c3_681, %c0_682] : memref<1x4x11x11x4xf32, #tpu.memory_space<vmem>>, vector<1x1x8x8x4xf32>
    %578 = vector.shape_cast %577 : vector<1x1x8x8x4xf32> to vector<8x8x4xf32>
    %579 = vector.shape_cast %578 : vector<8x8x4xf32> to vector<64x4xf32>
    %c62 = arith.constant 62 : index
    %c0_683 = arith.constant 0 : index
    %c0_684 = arith.constant 0 : index
    %580 = vector.load %arg4[%c62, %c0_683, %c0_684] : memref<64x4x2xf32, #tpu.memory_space<vmem>>, vector<1x4x2xf32>
    %581 = vector.shape_cast %580 : vector<1x4x2xf32> to vector<4x2xf32>
    %cst_685 = arith.constant dense<0.000000e+00> : vector<64x2xf32>
    %582 = tpu.matmul %579, %581, %cst_685 {dimension_numbers = #tpu.dot_dimension_numbers<[1], [0], [0], [1], [0, 0, 1, 1], [], []>} : vector<64x4xf32>, vector<4x2xf32>, vector<64x2xf32> -> vector<64x2xf32>
    %583 = arith.addf %576, %582 : vector<64x2xf32>
    %c0_686 = arith.constant 0 : index
    %c3_687 = arith.constant 3 : index
    %c3_688 = arith.constant 3 : index
    %c3_689 = arith.constant 3 : index
    %c0_690 = arith.constant 0 : index
    %584 = vector.load %arg1[%c0_686, %c3_687, %c3_688, %c3_689, %c0_690] : memref<1x4x11x11x4xf32, #tpu.memory_space<vmem>>, vector<1x1x8x8x4xf32>
    %585 = vector.shape_cast %584 : vector<1x1x8x8x4xf32> to vector<8x8x4xf32>
    %586 = vector.shape_cast %585 : vector<8x8x4xf32> to vector<64x4xf32>
    %c63 = arith.constant 63 : index
    %c0_691 = arith.constant 0 : index
    %c0_692 = arith.constant 0 : index
    %587 = vector.load %arg4[%c63, %c0_691, %c0_692] : memref<64x4x2xf32, #tpu.memory_space<vmem>>, vector<1x4x2xf32>
    %588 = vector.shape_cast %587 : vector<1x4x2xf32> to vector<4x2xf32>
    %cst_693 = arith.constant dense<0.000000e+00> : vector<64x2xf32>
    %589 = tpu.matmul %586, %588, %cst_693 {dimension_numbers = #tpu.dot_dimension_numbers<[1], [0], [0], [1], [0, 0, 1, 1], [], []>} : vector<64x4xf32>, vector<4x2xf32>, vector<64x2xf32> -> vector<64x2xf32>
    %590 = arith.addf %583, %589 : vector<64x2xf32>
    %591 = tpu.concatenate %28, %141, %590 in 1 : vector<64x4xf32>, vector<64x2xf32>, vector<64x2xf32> -> vector<64x8xf32>
    %c0_694 = arith.constant 0 : index
    %c0_695 = arith.constant 0 : index
    %592 = vector.load %arg5[%c0_694, %c0_695] : memref<1x8xf32, #tpu.memory_space<vmem>>, vector<1x8xf32>
    %593 = vector.broadcast %592 : vector<1x8xf32> to vector<64x8xf32>
    %594 = arith.addf %591, %593 : vector<64x8xf32>
    %595 = vector.shape_cast %594 : vector<64x8xf32> to vector<8x8x8xf32>
    %c0_696 = arith.constant 0 : index
    %c0_697 = arith.constant 0 : index
    %c0_698 = arith.constant 0 : index
    %c0_699 = arith.constant 0 : index
    %596 = vector.load %arg6[%c0_696, %c0_697, %c0_698, %c0_699] : memref<1x8x8x8xf32, #tpu.memory_space<vmem>>, vector<1x8x8x8xf32>
    %597 = vector.shape_cast %596 : vector<1x8x8x8xf32> to vector<8x8x8xf32>
    %598 = vector.shape_cast %595 : vector<8x8x8xf32> to vector<1x8x8x8xf32>
    tpu.vector_store %arg6[%c0_696, %c0_697, %c0_698, %c0_699], %598 {strides = array<i32>} : memref<1x8x8x8xf32, #tpu.memory_space<vmem>>, vector<1x8x8x8xf32>,
    return
  }
  func.func @transform_0(%arg0: i32) -> (i32, i32, i32, i32, i32) {
    %c0_i32 = arith.constant 0 : i32
    %c0_i32_0 = arith.constant 0 : i32
    %c0_i32_1 = arith.constant 0 : i32
    %c0_i32_2 = arith.constant 0 : i32
    %c0_i32_3 = arith.constant 0 : i32
    return %arg0, %c0_i32, %c0_i32_0, %c0_i32_1, %c0_i32_2 : i32, i32, i32, i32, i32
  }
  func.func @transform_1(%arg0: i32) -> (i32, i32, i32) {
    %c0_i32 = arith.constant 0 : i32
    %c0_i32_0 = arith.constant 0 : i32
    %c0_i32_1 = arith.constant 0 : i32
    %c0_i32_2 = arith.constant 0 : i32
    return %c0_i32, %c0_i32_0, %c0_i32_1 : i32, i32, i32
  }
  func.func @transform_2(%arg0: i32) -> (i32, i32, i32) {
    %c0_i32 = arith.constant 0 : i32
    %c0_i32_0 = arith.constant 0 : i32
    %c0_i32_1 = arith.constant 0 : i32
    %c0_i32_2 = arith.constant 0 : i32
    return %c0_i32, %c0_i32_0, %c0_i32_1 : i32, i32, i32
  }
  func.func @transform_3(%arg0: i32) -> (i32, i32, i32) {
    %c0_i32 = arith.constant 0 : i32
    %c0_i32_0 = arith.constant 0 : i32
    %c0_i32_1 = arith.constant 0 : i32
    %c0_i32_2 = arith.constant 0 : i32
    return %c0_i32, %c0_i32_0, %c0_i32_1 : i32, i32, i32
  }
  func.func @transform_4(%arg0: i32) -> (i32, i32) {
    %c0_i32 = arith.constant 0 : i32
    %c0_i32_0 = arith.constant 0 : i32
    %c0_i32_1 = arith.constant 0 : i32
    return %c0_i32, %c0_i32_0 : i32, i32
  }
  func.func @transform_5(%arg0: i32) -> (i32, i32, i32, i32) {
    %c0_i32 = arith.constant 0 : i32
    %c0_i32_0 = arith.constant 0 : i32
    %c0_i32_1 = arith.constant 0 : i32
    %c0_i32_2 = arith.constant 0 : i32
    return %arg0, %c0_i32, %c0_i32_0, %c0_i32_1 : i32, i32, i32, i32
  }
}

</mosaic_0001>

<bundles_post_ra>
// kernel: _lambda_.1
= control target key start
LH: loop header
LB: loop body
LE: loop exit
PB: predicated region body
PF: predicated region fallthrough
CT: control target
= control target key end

     0   :  { %s8384_s18 = smov 0   ;;  %s11301_s0 = inlined_call_operand.vmem [shape: f32[2,4,11,11,4], index: 0, kind: input, shape index: {}]   ;;  %s11302_s1 = inlined_call_operand.vmem [shape: f32[4,4,4], index: 1, kind: input, shape index: {}]   ;;  %s11303_s2 = inlined_call_operand.vmem [shape: f32[16,4,2], index: 2, kind: input, shape index: {}]   ;;  %s11304_s3 = inlined_call_operand.vmem [shape: f32[64,4,2], index: 3, kind: input, shape index: {}]   ;;  %s11305_s4 = inlined_call_operand.vmem [shape: f32[1,8], index: 4, kind: input, shape index: {}]   ;;  %s11306_s5 = inlined_call_operand.vmem [shape: f32[2,8,8,8], index: 5, kind: output, shape index: {}]  }
   0x1 LB: > { %s6932_s19 = sadd.s32 4294967295, %s8350_s18   ;;  %p6936_p0 = scmp.ge.s32.totalorder %s8350_s18, 1  ;;  %s8350_s18 = sphi %s8384_s18, %s15_s18  }
   0x2   : > { %p187_p1 = scmp.lt.s32.totalorder %s8350_s18, 3 }
   0x4   : > { %p188_p2 = pnand %p6936_p0, %p187_p1 }
   0x6   : > { %191 = sbr.rel (%p188_p2) target bundleno = 1610 (0x64a), region = 40 }
   0xb   : > { %v6956_v0 = vld [vmem:[%s11302_s1 + $0x4] sm:$0xf]  ;;  %vm271_vm0 = vcmask 1043456   ;;  %v6983_v1 = vld [vmem:[%s11302_s1 + $0x8] sm:$0xf]  ;;  %p215_p3 = scmp.lt.s32.totalorder %s6932_s19, 1 }
   0xc   : > { %6957 = vmatpush.msk.msra.mxu0 %vm271_vm0, %v6956_v0  ;;  %6984 = vmatpush.msk.msra.mxu2 %vm271_vm0, %v6983_v1  ;;  %v7054_v2 = vld [vmem:[%s11303_s2 + $0x8] sm:$0xf]  ;;  %v234_v3 = vld [vmem:[%s11302_s1] sm:$0xf]  ;;  %v7001_v4 = vld [vmem:[%s11302_s1 + $0xc] sm:$0xf] }
   0xd   : > { %s11457_s19 = smov (!%p215_p3, %s6932_s19), 1  ;;  %6966 = vmatpush.msk.msra.mxu1 %vm271_vm0, %v234_v3  ;;  %v7027_v5 = vld [vmem:[%s11303_s2 + $0x4] sm:$0xf]  ;;  %7002 = vmatpush.msk.msra.mxu3 %vm271_vm0, %v7001_v4  ;;  %v7072_v6 = vld [vmem:[%s11303_s2 + $0xc] sm:$0xf]  ;;  %vm246_vm1 = vcmask 31744  }
   0xe   : > { %7055 = vmatpush.msk.msrb.mxu2 %vm271_vm0, %v7054_v2  ;;  %7028 = vmatpush.msk.msrb.mxu0 %vm271_vm0, %v7027_v5  ;;  %v567_v7 = vld [vmem:[%s11303_s2] sm:$0xf]  ;;  %s8260_s11 = smul.u32 704, %s11457_s19  ;;  %v7110_v28 = vld [vmem:[%s11303_s2 + $0x18] sm:$0xf]  ;;  %s8352_s21 = smov 4  }
   0xf   : > { %7073 = vmatpush.msk.msrb.mxu3 %vm271_vm0, %v7072_v6  ;;  %7037 = vmatpush.msk.msrb.mxu1 %vm271_vm0, %v567_v7  ;;  %v7090_v29 = vld [vmem:[%s11303_s2 + $0x10] sm:$0xf]  ;;  %v7128_v30 = vld [vmem:[%s11303_s2 + $0x1c] sm:$0xf]  ;;  %v7100_v31 = vld [vmem:[%s11303_s2 + $0x14] sm:$0xf] }
  0x10   : > { %s8430_s14 = scalar_lea.vmem %s11301_s0, %s8260_s11  ;;  %v7166_v56 = vld [vmem:[%s11303_s2 + $0x28] sm:$0xf]  ;;  %v7146_v57 = vld [vmem:[%s11303_s2 + $0x20] sm:$0xf]  ;;  %v7184_v58 = vld [vmem:[%s11303_s2 + $0x2c] sm:$0xf] }
  0x11   : > { %v8433_v8 = vld [vmem:[%s8430_s14 + $0x172] sm:$0xff]  ;;  %v8439_v10 = vld [vmem:[%s8430_s14 + $0x221] sm:$0xff]  ;;  %s8259_s13 = sshll.u32 %s11457_s19, 6  ;;  %vm6847_vm2 = vcmask 48128   ;;  %vm6868_vm3 = vcmask 64512  }
  0x12   : > { %v8436_v9 = vld [vmem:[%s8430_s14 + $0xd1] sm:$0xff]  ;;  %6958 = vmatmul.msk.f32.vlgmr.msra.gmra.mxu0 %vm246_vm1, %v8433_v8  ;;  %v8446_v11 = vld [vmem:[%s8430_s14 + $0x22] sm:$0xff]  ;;  %6967 = vmatmul.msk.f32.vlgmr.msra.gmra.mxu1 %vm246_vm1, %v8439_v10 }
  0x13   : > { %6985 = vmatmul.msk.f32.vlgmr.msra.gmra.mxu2 %vm246_vm1, %v8436_v9  ;;  %7003 = vmatmul.msk.f32.vlgmr.msra.gmra.mxu3 %vm246_vm1, %v8446_v11  ;;  %v8453_v12 = vld [vmem:[%s8430_s14 + $0x182] sm:$0xff]  ;;  %v8459_v14 = vld [vmem:[%s8430_s14 + $0x231] sm:$0xff] }
  0x14   : > { %v8456_v13 = vld [vmem:[%s8430_s14 + $0xe1] sm:$0xff]  ;;  %v8462_v15 = vld [vmem:[%s8430_s14 + $0x32] sm:$0xff]  ;;  %7111 = vmatpush.msk.msra.mxu2 %vm271_vm0, %v7110_v28  ;;  %7091 = vmatpush.msk.msra.mxu0 %vm271_vm0, %v7090_v29 }
  0x15   : > { %v8473_v16 = vld [vmem:[%s8430_s14 + $0x192] sm:$0xff]  ;;  %v8479_v18 = vld [vmem:[%s8430_s14 + $0x241] sm:$0xff]  ;;  %7129 = vmatpush.msk.msra.mxu3 %vm271_vm0, %v7128_v30  ;;  %7101 = vmatpush.msk.msra.mxu1 %vm271_vm0, %v7100_v31 }
  0x16   : > { %v8476_v17 = vld [vmem:[%s8430_s14 + $0xf1] sm:$0xff]  ;;  %v8482_v19 = vld [vmem:[%s8430_s14 + $0x42] sm:$0xff] }
  0x17   : > { %v8493_v20 = vld [vmem:[%s8430_s14 + $0x1a2] sm:$0xff]  ;;  %v8499_v22 = vld [vmem:[%s8430_s14 + $0x251] sm:$0xff] }
  0x18   : > { %v8496_v21 = vld [vmem:[%s8430_s14 + $0x101] sm:$0xff]  ;;  %v8502_v23 = vld [vmem:[%s8430_s14 + $0x52] sm:$0xff] }
  0x19   : > { %v8513_v24 = vld [vmem:[%s8430_s14 + $0x1b2] sm:$0xff]  ;;  %v8519_v26 = vld [vmem:[%s8430_s14 + $0x261] sm:$0xff] }
  0x1a   : > { %6959 = vmatmul.msk.f32.gmra.mxu0 %vm246_vm1, %v8453_v12  ;;  %6968 = vmatmul.msk.f32.gmra.mxu1 %vm246_vm1, %v8459_v14  ;;  %v8516_v25 = vld [vmem:[%s8430_s14 + $0x111] sm:$0xff]  ;;  %v8522_v27 = vld [vmem:[%s8430_s14 + $0x62] sm:$0xff] }
  0x1b   : > { %6986 = vmatmul.msk.f32.gmra.mxu2 %vm246_vm1, %v8456_v13  ;;  %7004 = vmatmul.msk.f32.gmra.mxu3 %vm246_vm1, %v8462_v15  ;;  %v8549_v32 = vld [vmem:[%s8430_s14 + $0x1c2] sm:$0xff]  ;;  %v8555_v34 = vld [vmem:[%s8430_s14 + $0x271] sm:$0xff] }
  0x1c   : > { %v8552_v33 = vld [vmem:[%s8430_s14 + $0x121] sm:$0xff]  ;;  %v8558_v35 = vld [vmem:[%s8430_s14 + $0x72] sm:$0xff] }
  0x1d   : > { %v8569_v36 = vld [vmem:[%s8430_s14 + $0x1d2] sm:$0xff]  ;;  %v8575_v38 = vld [vmem:[%s8430_s14 + $0x281] sm:$0xff] }
  0x1e   : > { %v8572_v37 = vld [vmem:[%s8430_s14 + $0x131] sm:$0xff]  ;;  %v8578_v39 = vld [vmem:[%s8430_s14 + $0x82] sm:$0xff] }
  0x1f   : > { %v8589_v40 = vld [vmem:[%s8430_s14 + $0x1e2] sm:$0xff]  ;;  %v8595_v42 = vld [vmem:[%s8430_s14 + $0x291] sm:$0xff] }
  0x20   : > { %v8592_v41 = vld [vmem:[%s8430_s14 + $0x141] sm:$0xff]  ;;  %v8598_v43 = vld [vmem:[%s8430_s14 + $0x92] sm:$0xff] }
  0x21   : > { %v8609_v44 = vld [vmem:[%s8430_s14 + $0xc1] sm:$0xff]  ;;  %v7046_v45 = vld [vmem:[%s8430_s14 + $0x12] sm:$0xff] }
  0x22   : > { %6960 = vmatmul.msk.f32.gmra.mxu0 %vm246_vm1, %v8473_v16  ;;  %6969 = vmatmul.msk.f32.gmra.mxu1 %vm246_vm1, %v8479_v18  ;;  %11350 = vst [vmem:[#allocation2_spill] sm:$0xff] %v8609_v44  ;;  %v8613_v46 = vld [vmem:[%s8430_s14 + $0x11] sm:$0xff]  ;;  %v7064_v47 = vld [vmem:[%s8430_s14 + $0xc2] sm:$0xff] }
  0x23   : > { %6987 = vmatmul.msk.f32.gmra.mxu2 %vm246_vm1, %v8476_v17  ;;  %7005 = vmatmul.msk.f32.gmra.mxu3 %vm246_vm1, %v8482_v19  ;;  %11351 = vst [vmem:[#allocation3_spill] sm:$0xff] %v8613_v46  ;;  %v8623_v48 = vld [vmem:[%s8430_s14 + $0x21] sm:$0xff]  ;;  %v8626_v49 = vld [vmem:[%s8430_s14 + $0xd2] sm:$0xff] }
  0x24   : > { %v8637_v50 = vld [vmem:[%s8430_s14 + $0x31] sm:$0xff]  ;;  %v8640_v51 = vld [vmem:[%s8430_s14 + $0xe2] sm:$0xff] }
  0x25   : > { %v8651_v52 = vld [vmem:[%s8430_s14 + $0x41] sm:$0xff]  ;;  %v8654_v53 = vld [vmem:[%s8430_s14 + $0xf2] sm:$0xff] }
  0x26   : > { %v8665_v54 = vld [vmem:[%s8430_s14 + $0x51] sm:$0xff]  ;;  %v8668_v55 = vld [vmem:[%s8430_s14 + $0x102] sm:$0xff] }
  0x27   : > { %v7156_v59 = vld [vmem:[%s11303_s2 + $0x24] sm:$0xf]  ;;  %v8698_v61 = vld [vmem:[%s8430_s14 + $0x112] sm:$0xff] }
  0x28   : > { %v8695_v60 = vld [vmem:[%s8430_s14 + $0x61] sm:$0xff]  ;;  %v8709_v62 = vld [vmem:[%s8430_s14 + $0x71] sm:$0xff] }
  0x29   : > { %v8712_v63 = vld [vmem:[%s8430_s14 + $0x122] sm:$0xff]  ;;  %v8726_v1 = vld [vmem:[%s8430_s14 + $0x132] sm:$0xff] }
  0x2a   : > { %6961 = vmatmul.msk.f32.gmra.mxu0 %vm246_vm1, %v8493_v20  ;;  %6970 = vmatmul.msk.f32.gmra.mxu1 %vm246_vm1, %v8499_v22  ;;  %v8723_v0 = vld [vmem:[%s8430_s14 + $0x81] sm:$0xff]  ;;  %v7082_v3 = vld [vmem:[%s8430_s14 + $0x171] sm:$0xff] }
  0x2b   : > { %6988 = vmatmul.msk.f32.gmra.mxu2 %vm246_vm1, %v8496_v21  ;;  %7006 = vmatmul.msk.f32.gmra.mxu3 %vm246_vm1, %v8502_v23  ;;  %v7120_v5 = vld [vmem:[%s8430_s14 + $0x222] sm:$0xff] }
  0x2c   : > { %v8745_v31 = vld [vmem:[%s8430_s14 + $0x181] sm:$0xff] }
  0x32   : > { %6962 = vmatmul.msk.f32.gmra.mxu0 %vm246_vm1, %v8513_v24  ;;  %6971 = vmatmul.msk.f32.gmra.mxu1 %vm246_vm1, %v8519_v26 }
  0x33   : > { %6989 = vmatmul.msk.f32.gmra.mxu2 %vm246_vm1, %v8516_v25  ;;  %7007 = vmatmul.msk.f32.gmra.mxu3 %vm246_vm1, %v8522_v27 }
  0x3a   : > { %6963 = vmatmul.msk.f32.gmra.mxu0 %vm246_vm1, %v8549_v32  ;;  %6972 = vmatmul.msk.f32.gmra.mxu1 %vm246_vm1, %v8555_v34 }
  0x3b   : > { %6990 = vmatmul.msk.f32.gmra.mxu2 %vm246_vm1, %v8552_v33  ;;  %7008 = vmatmul.msk.f32.gmra.mxu3 %vm246_vm1, %v8558_v35 }
  0x42   : > { %6964 = vmatmul.msk.f32.gmra.mxu0 %vm246_vm1, %v8569_v36  ;;  %6973 = vmatmul.msk.f32.gmra.mxu1 %vm246_vm1, %v8575_v38 }
  0x43   : > { %6991 = vmatmul.msk.f32.gmra.mxu2 %vm246_vm1, %v8572_v37  ;;  %7009 = vmatmul.msk.f32.gmra.mxu3 %vm246_vm1, %v8578_v39 }
  0x4a   : > { %6965 = vmatmul.msk.f32.gmra.mxu0 %vm246_vm1, %v8589_v40  ;;  %6974 = vmatmul.msk.f32.gmra.mxu1 %vm246_vm1, %v8595_v42 }
  0x4b   : > { %6992 = vmatmul.msk.f32.gmra.mxu2 %vm246_vm1, %v8592_v41  ;;  %7010 = vmatmul.msk.f32.gmra.mxu3 %vm246_vm1, %v8598_v43 }
  0x52   : > { %7029 = vmatmul.msk.f32.vlgmr.msrb.gmra.mxu0 %vm246_vm1, %v8609_v44  ;;  %7038 = vmatmul.msk.f32.vlgmr.msrb.gmra.mxu1 %vm246_vm1, %v8613_v46  ;;  %v8824_v46 = vld [vmem:[%s8430_s14 + $0x1c1] sm:$0xff] }
  0x53   : > { %7056 = vmatmul.msk.f32.vlgmr.msrb.gmra.mxu2 %vm246_vm1, %v7046_v45  ;;  %7074 = vmatmul.msk.f32.vlgmr.msrb.gmra.mxu3 %vm246_vm1, %v7064_v47  ;;  %11356 = vst [vmem:[#allocation8_spill] sm:$0xff] %v8824_v46 }
  0x54   : > { %7167 = vmatpush.msk.msrb.mxu2 %vm271_vm0, %v7166_v56  ;;  %7147 = vmatpush.msk.msrb.mxu0 %vm271_vm0, %v7146_v57  ;;  %v8750_v56 = vld [vmem:[%s8430_s14 + $0x232] sm:$0xff] }
  0x55   : > { %7185 = vmatpush.msk.msrb.mxu3 %vm271_vm0, %v7184_v58  ;;  %7157 = vmatpush.msk.msrb.mxu1 %vm271_vm0, %v7156_v59 }
  0x5a   : > { %7030 = vmatmul.msk.f32.gmra.mxu0 %vm246_vm1, %v8436_v9  ;;  %7039 = vmatmul.msk.f32.gmra.mxu1 %vm246_vm1, %v8623_v48 }
  0x5b   : > { %7057 = vmatmul.msk.f32.gmra.mxu2 %vm246_vm1, %v8446_v11  ;;  %7075 = vmatmul.msk.f32.gmra.mxu3 %vm246_vm1, %v8626_v49 }
  0x62   : > { %7031 = vmatmul.msk.f32.gmra.mxu0 %vm246_vm1, %v8456_v13  ;;  %7040 = vmatmul.msk.f32.gmra.mxu1 %vm246_vm1, %v8637_v50 }
  0x63   : > { %7058 = vmatmul.msk.f32.gmra.mxu2 %vm246_vm1, %v8462_v15  ;;  %7076 = vmatmul.msk.f32.gmra.mxu3 %vm246_vm1, %v8640_v51 }
  0x6a   : > { %7032 = vmatmul.msk.f32.gmra.mxu0 %vm246_vm1, %v8476_v17  ;;  %7041 = vmatmul.msk.f32.gmra.mxu1 %vm246_vm1, %v8651_v52 }
  0x6b   : > { %7059 = vmatmul.msk.f32.gmra.mxu2 %vm246_vm1, %v8482_v19  ;;  %7077 = vmatmul.msk.f32.gmra.mxu3 %vm246_vm1, %v8654_v53 }
  0x72   : > { %7033 = vmatmul.msk.f32.gmra.mxu0 %vm246_vm1, %v8496_v21  ;;  %7042 = vmatmul.msk.f32.gmra.mxu1 %vm246_vm1, %v8665_v54 }
  0x73   : > { %7060 = vmatmul.msk.f32.gmra.mxu2 %vm246_vm1, %v8502_v23  ;;  %7078 = vmatmul.msk.f32.gmra.mxu3 %vm246_vm1, %v8668_v55 }
  0x7a   : > { %7034 = vmatmul.msk.f32.gmra.mxu0 %vm246_vm1, %v8516_v25  ;;  %7043 = vmatmul.msk.f32.gmra.mxu1 %vm246_vm1, %v8695_v60 }
  0x7b   : > { %7061 = vmatmul.msk.f32.gmra.mxu2 %vm246_vm1, %v8522_v27  ;;  %7079 = vmatmul.msk.f32.gmra.mxu3 %vm246_vm1, %v8698_v61 }
  0x82   : > { %7035 = vmatmul.msk.f32.gmra.mxu0 %vm246_vm1, %v8552_v33  ;;  %7044 = vmatmul.msk.f32.gmra.mxu1 %vm246_vm1, %v8709_v62 }
  0x83   : > { %7062 = vmatmul.msk.f32.gmra.mxu2 %vm246_vm1, %v8558_v35  ;;  %7080 = vmatmul.msk.f32.gmra.mxu3 %vm246_vm1, %v8712_v63 }
  0x8a   : > { %7036 = vmatmul.msk.f32.gmra.mxu0 %vm246_vm1, %v8572_v37  ;;  %7045 = vmatmul.msk.f32.gmra.mxu1 %vm246_vm1, %v8723_v0 }
  0x8b   : > { %7063 = vmatmul.msk.f32.gmra.mxu2 %vm246_vm1, %v8578_v39  ;;  %7081 = vmatmul.msk.f32.gmra.mxu3 %vm246_vm1, %v8726_v1 }
  0x8f   : > { %v292_v2 = vpop.f32.mrf.mxu0  ;;  %v360_v4 = vpop.f32.mrf.mxu1 }
  0x90   : > { %v361_v6 = vadd.f32 %v360_v4, %v292_v2  ;;  %v8761_v2 = vld [vmem:[%s8430_s14 + $0x191] sm:$0xff] }
  0x92   : > { %7092 = vmatmul.msk.f32.vlgmr.msra.gmra.mxu0 %vm246_vm1, %v7082_v3  ;;  %7102 = vmatmul.msk.f32.vlgmr.msra.gmra.mxu1 %vm246_vm1, %v8439_v10 }
  0x93   : > { %7112 = vmatmul.msk.f32.vlgmr.msra.gmra.mxu2 %vm246_vm1, %v8433_v8  ;;  %7130 = vmatmul.msk.f32.vlgmr.msra.gmra.mxu3 %vm246_vm1, %v7120_v5  ;;  %v8766_v5 = vld [vmem:[%s8430_s14 + $0x242] sm:$0xff] }
  0x96   : > { %v439_v7 = vpop.f32.mrf.mxu2  ;;  %v526_v29 = vpop.f32.mrf.mxu3 }
  0x97   : > { %v463_v28 = vadd.f32 %v439_v7, %v361_v6  ;;  %v295_v30 = vpop.f32.mrf.mxu0  ;;  %v363_v47 = vpop.f32.mrf.mxu1 }
  0x98   : > { %v364_v8 = vadd.f32 %v363_v47, %v295_v30  ;;  %v8777_v47 = vld [vmem:[%s8430_s14 + $0x1a1] sm:$0xff] }
  0x99   : > { %v8747_v45 = vadd.f32 %v526_v29, %v463_v28 }
  0x9a   : > { %7093 = vmatmul.msk.f32.gmra.mxu0 %vm246_vm1, %v8745_v31  ;;  %7103 = vmatmul.msk.f32.gmra.mxu1 %vm246_vm1, %v8459_v14 }
  0x9b   : > { %11352 = vst [vmem:[#allocation4_spill] sm:$0xff] %v8747_v45  ;;  %7113 = vmatmul.msk.f32.gmra.mxu2 %vm246_vm1, %v8453_v12  ;;  %7131 = vmatmul.msk.f32.gmra.mxu3 %vm246_vm1, %v8750_v56  ;;  %v7220_v45 = vld [vmem:[%s11303_s2 + $0x34] sm:$0xf] }
  0x9c   : > { %7221 = vmatpush.msk.msra.mxu1 %vm271_vm0, %v7220_v45 }
  0x9e   : > { %v442_v10 = vpop.f32.mrf.mxu2  ;;  %v529_v58 = vpop.f32.mrf.mxu3 }
  0x9f   : > { %v464_v57 = vadd.f32 %v442_v10, %v364_v8  ;;  %v298_v59 = vpop.f32.mrf.mxu0  ;;  %v366_v4 = vpop.f32.mrf.mxu1 }
  0xa0   : > { %v367_v6 = vadd.f32 %v366_v4, %v298_v59 }
  0xa1   : > { %v8763_v3 = vadd.f32 %v529_v58, %v464_v57  ;;  %v8782_v57 = vld [vmem:[%s8430_s14 + $0x252] sm:$0xff] }
  0xa2   : > { %7094 = vmatmul.msk.f32.gmra.mxu0 %vm246_vm1, %v8761_v2  ;;  %7104 = vmatmul.msk.f32.gmra.mxu1 %vm246_vm1, %v8479_v18 }
  0xa3   : > { %11353 = vst [vmem:[#allocation5_spill] sm:$0xff] %v8763_v3  ;;  %7114 = vmatmul.msk.f32.gmra.mxu2 %vm246_vm1, %v8473_v16  ;;  %7132 = vmatmul.msk.f32.gmra.mxu3 %vm246_vm1, %v8766_v5  ;;  %v8798_v3 = vld [vmem:[%s8430_s14 + $0x262] sm:$0xff] }
  0xa6   : > { %v445_v7 = vpop.f32.mrf.mxu2  ;;  %v532_v29 = vpop.f32.mrf.mxu3 }
  0xa7   : > { %v465_v28 = vadd.f32 %v445_v7, %v367_v6  ;;  %v301_v30 = vpop.f32.mrf.mxu0  ;;  %v369_v10 = vpop.f32.mrf.mxu1 }
  0xa8   : > { %v370_v58 = vadd.f32 %v369_v10, %v301_v30  ;;  %v7238_v30 = vld [vmem:[%s11303_s2 + $0x38] sm:$0xf]  ;;  %v7202_v10 = vld [vmem:[%s11303_s2 + $0x30] sm:$0xf] }
  0xa9   : > { %v8779_v8 = vadd.f32 %v532_v29, %v465_v28  ;;  %v8793_v28 = vld [vmem:[%s8430_s14 + $0x1b1] sm:$0xff]  ;;  %7239 = vmatpush.msk.msra.mxu2 %vm271_vm0, %v7238_v30  ;;  %7203 = vmatpush.msk.msra.mxu0 %vm271_vm0, %v7202_v10 }
  0xaa   : > { %7095 = vmatmul.msk.f32.gmra.mxu0 %vm246_vm1, %v8777_v47  ;;  %7105 = vmatmul.msk.f32.gmra.mxu1 %vm246_vm1, %v8499_v22  ;;  %v8830_v30 = vld [vmem:[%s8430_s14 + $0x272] sm:$0xff] }
  0xab   : > { %11354 = vst [vmem:[#allocation6_spill] sm:$0xff] %v8779_v8  ;;  %7115 = vmatmul.msk.f32.gmra.mxu2 %vm246_vm1, %v8493_v20  ;;  %7133 = vmatmul.msk.f32.gmra.mxu3 %vm246_vm1, %v8782_v57 }
  0xac   : > { %11358 = vst [vmem:[#allocation10_spill] sm:$0xff] %v8830_v30 }
  0xae   : > { %v448_v59 = vpop.f32.mrf.mxu2  ;;  %v535_v6 = vpop.f32.mrf.mxu3 }
  0xaf   : > { %v466_v4 = vadd.f32 %v448_v59, %v370_v58  ;;  %v304_v7 = vpop.f32.mrf.mxu0  ;;  %v372_v8 = vpop.f32.mrf.mxu1  ;;  %v7256_v58 = vld [vmem:[%s11303_s2 + $0x3c] sm:$0xf] }
  0xb0   : > { %v373_v59 = vadd.f32 %v372_v8, %v304_v7  ;;  %7257 = vmatpush.msk.msra.mxu3 %vm271_vm0, %v7256_v58 }
  0xb1   : > { %v8795_v29 = vadd.f32 %v535_v6, %v466_v4 }
  0xb2   : > { %7096 = vmatmul.msk.f32.gmra.mxu0 %vm246_vm1, %v8793_v28  ;;  %7106 = vmatmul.msk.f32.gmra.mxu1 %vm246_vm1, %v8519_v26 }
  0xb3   : > { %11355 = vst [vmem:[#allocation7_spill] sm:$0xff] %v8795_v29  ;;  %7116 = vmatmul.msk.f32.gmra.mxu2 %vm246_vm1, %v8513_v24  ;;  %7134 = vmatmul.msk.f32.gmra.mxu3 %vm246_vm1, %v8798_v3 }
  0xb6   : > { %v451_v4 = vpop.f32.mrf.mxu2  ;;  %v538_v29 = vpop.f32.mrf.mxu3 }
  0xb7   : > { %v467_v6 = vadd.f32 %v451_v4, %v373_v59  ;;  %v307_v44 = vpop.f32.mrf.mxu0  ;;  %v375_v7 = vpop.f32.mrf.mxu1  ;;  %v8841_v4 = vld [vmem:[%s8430_s14 + $0x1d1] sm:$0xff] }
  0xb8   : > { %v376_v10 = vadd.f32 %v375_v7, %v307_v44  ;;  %11359 = vst [vmem:[#allocation11_spill] sm:$0xff] %v8841_v4 }
  0xb9   : > { %v8827_v8 = vadd.f32 %v538_v29, %v467_v6 }
  0xba   : > { %7097 = vmatmul.msk.f32.gmra.mxu0 %vm246_vm1, %v8824_v46  ;;  %7107 = vmatmul.msk.f32.gmra.mxu1 %vm246_vm1, %v8555_v34  ;;  %v8846_v46 = vld [vmem:[%s8430_s14 + $0x282] sm:$0xff] }
  0xbb   : > { %11357 = vst [vmem:[#allocation9_spill] sm:$0xff] %v8827_v8  ;;  %7117 = vmatmul.msk.f32.gmra.mxu2 %vm246_vm1, %v8549_v32  ;;  %7135 = vmatmul.msk.f32.gmra.mxu3 %vm246_vm1, %v8830_v30 }
  0xbe   : > { %v454_v45 = vpop.f32.mrf.mxu2  ;;  %v541_v29 = vpop.f32.mrf.mxu3 }
  0xbf   : > { %v468_v58 = vadd.f32 %v454_v45, %v376_v10  ;;  %v310_v59 = vpop.f32.mrf.mxu0  ;;  %v378_v8 = vpop.f32.mrf.mxu1 }
  0xc0   : > { %v379_v44 = vadd.f32 %v378_v8, %v310_v59 }
  0xc1   : > { %v8843_v6 = vadd.f32 %v541_v29, %v468_v58  ;;  %v8857_v29 = vld [vmem:[%s8430_s14 + $0x1e1] sm:$0xff] }
  0xc2   : > { %7098 = vmatmul.msk.f32.gmra.mxu0 %vm246_vm1, %v8841_v4  ;;  %7108 = vmatmul.msk.f32.gmra.mxu1 %vm246_vm1, %v8575_v38  ;;  %v8862_v4 = vld [vmem:[%s8430_s14 + $0x292] sm:$0xff] }
  0xc3   : > { %11360 = vst [vmem:[#allocation12_spill] sm:$0xff] %v8843_v6  ;;  %7118 = vmatmul.msk.f32.gmra.mxu2 %vm246_vm1, %v8569_v36  ;;  %7136 = vmatmul.msk.f32.gmra.mxu3 %vm246_vm1, %v8846_v46 }
  0xc4   : > { %11362 = vst [vmem:[#allocation14_spill] sm:$0xff] %v8862_v4 }
  0xc6   : > { %v457_v7 = vpop.f32.mrf.mxu2  ;;  %v544_v45 = vpop.f32.mrf.mxu3 }
  0xc7   : > { %v469_v10 = vadd.f32 %v457_v7, %v379_v44  ;;  %v313_v58 = vpop.f32.mrf.mxu0  ;;  %v381_v30 = vpop.f32.mrf.mxu1 }
  0xc8   : > { %v382_v8 = vadd.f32 %v381_v30, %v313_v58 }
  0xc9   : > { %v8859_v6 = vadd.f32 %v544_v45, %v469_v10 }
  0xca   : > { %7099 = vmatmul.msk.f32.gmra.mxu0 %vm246_vm1, %v8857_v29  ;;  %7109 = vmatmul.msk.f32.gmra.mxu1 %vm246_vm1, %v8595_v42 }
  0xcb   : > { %11361 = vst [vmem:[#allocation13_spill] sm:$0xff] %v8859_v6  ;;  %7119 = vmatmul.msk.f32.gmra.mxu2 %vm246_vm1, %v8589_v40  ;;  %7137 = vmatmul.msk.f32.gmra.mxu3 %vm246_vm1, %v8862_v4 }
  0xce   : > { %v460_v59 = vpop.f32.mrf.mxu2  ;;  %v547_v7 = vpop.f32.mrf.mxu3 }
  0xcf   : > { %v470_v44 = vadd.f32 %v460_v59, %v382_v8  ;;  %v623_v10 = vpop.f32.mrf.mxu0  ;;  %v691_v6 = vpop.f32.mrf.mxu1 }
  0xd0   : > { %v692_v30 = vadd.f32 %v691_v6, %v623_v10 }
  0xd1   : > { %v8872_v45 = vadd.f32 %v547_v7, %v470_v44 }
  0xd2   : > { %7148 = vmatmul.msk.f32.vlgmr.msrb.gmra.mxu0 %vm246_vm1, %v8623_v48  ;;  %7158 = vmatmul.msk.f32.vlgmr.msrb.gmra.mxu1 %vm246_vm1, %v8436_v9 }
  0xd3   : > { %11363 = vst [vmem:[#allocation15_spill] sm:$0xff] %v8872_v45  ;;  %7168 = vmatmul.msk.f32.vlgmr.msrb.gmra.mxu2 %vm246_vm1, %v8446_v11  ;;  %7186 = vmatmul.msk.f32.vlgmr.msrb.gmra.mxu3 %vm246_vm1, %v8626_v49 }
  0xd6   : > { %v769_v58 = vpop.f32.mrf.mxu2  ;;  %v855_v59 = vpop.f32.mrf.mxu3 }
  0xd7   : > { %v793_v8 = vadd.f32 %v769_v58, %v692_v30  ;;  %v626_v4 = vpop.f32.mrf.mxu0  ;;  %v694_v7 = vpop.f32.mrf.mxu1 }
  0xd8   : > { %v695_v9 = vadd.f32 %v694_v7, %v626_v4 }
  0xd9   : > { %v8882_v44 = vadd.f32 %v855_v59, %v793_v8 }
  0xda   : > { %7149 = vmatmul.msk.f32.gmra.mxu0 %vm246_vm1, %v8637_v50  ;;  %7159 = vmatmul.msk.f32.gmra.mxu1 %vm246_vm1, %v8456_v13 }
  0xdb   : > { %7169 = vmatmul.msk.f32.gmra.mxu2 %vm246_vm1, %v8462_v15  ;;  %7187 = vmatmul.msk.f32.gmra.mxu3 %vm246_vm1, %v8640_v51 }
  0xde   : > { %v772_v11 = vpop.f32.mrf.mxu2  ;;  %v858_v6 = vpop.f32.mrf.mxu3 }
  0xdf   : > { %v794_v49 = vadd.f32 %v772_v11, %v695_v9  ;;  %v629_v10 = vpop.f32.mrf.mxu0  ;;  %v697_v58 = vpop.f32.mrf.mxu1 }
  0xe0   : > { %v698_v13 = vadd.f32 %v697_v58, %v629_v10 }
  0xe1   : > { %v8892_v30 = vadd.f32 %v858_v6, %v794_v49 }
  0xe2   : > { %7150 = vmatmul.msk.f32.gmra.mxu0 %vm246_vm1, %v8651_v52  ;;  %7160 = vmatmul.msk.f32.gmra.mxu1 %vm246_vm1, %v8476_v17 }
  0xe3   : > { %7170 = vmatmul.msk.f32.gmra.mxu2 %vm246_vm1, %v8482_v19  ;;  %7188 = vmatmul.msk.f32.gmra.mxu3 %vm246_vm1, %v8654_v53 }
  0xe6   : > { %v775_v15 = vpop.f32.mrf.mxu2  ;;  %v861_v4 = vpop.f32.mrf.mxu3 }
  0xe7   : > { %v795_v51 = vadd.f32 %v775_v15, %v698_v13  ;;  %v632_v8 = vpop.f32.mrf.mxu0  ;;  %v700_v7 = vpop.f32.mrf.mxu1 }
  0xe8   : > { %v701_v17 = vadd.f32 %v700_v7, %v632_v8 }
  0xe9   : > { %v8902_v59 = vadd.f32 %v861_v4, %v795_v51 }
  0xea   : > { %7151 = vmatmul.msk.f32.gmra.mxu0 %vm246_vm1, %v8665_v54  ;;  %7161 = vmatmul.msk.f32.gmra.mxu1 %vm246_vm1, %v8496_v21  ;;  %v7293_v21 = vld [vmem:[%s11304_s3 + $0x8] sm:$0xf] }
  0xeb   : > { %7171 = vmatmul.msk.f32.gmra.mxu2 %vm246_vm1, %v8502_v23  ;;  %7189 = vmatmul.msk.f32.gmra.mxu3 %vm246_vm1, %v8668_v55  ;;  %v7274_v23 = vld [vmem:[%s11304_s3 + $0x4] sm:$0xf]  ;;  %v7311_v55 = vld [vmem:[%s11304_s3 + $0xc] sm:$0xf] }
  0xec   : > { %7294 = vmatpush.msk.msrb.mxu2 %vm271_vm0, %v7293_v21  ;;  %7275 = vmatpush.msk.msrb.mxu0 %vm271_vm0, %v7274_v23  ;;  %v7145_v21 = vld [vmem:[%s8430_s14 + $0x91] sm:$0xff] }
  0xed   : > { %7312 = vmatpush.msk.msrb.mxu3 %vm271_vm0, %v7311_v55 }
  0xee   : > { %v778_v19 = vpop.f32.mrf.mxu2  ;;  %v864_v9 = vpop.f32.mrf.mxu3 }
  0xef   : > { %v796_v53 = vadd.f32 %v778_v19, %v701_v17  ;;  %v635_v11 = vpop.f32.mrf.mxu0  ;;  %v703_v6 = vpop.f32.mrf.mxu1 }
  0xf0   : > { %v704_v10 = vadd.f32 %v703_v6, %v635_v11 }
  0xf1   : > { %v8912_v49 = vadd.f32 %v864_v9, %v796_v53 }
  0xf2   : > { %7152 = vmatmul.msk.f32.gmra.mxu0 %vm246_vm1, %v8695_v60  ;;  %7162 = vmatmul.msk.f32.gmra.mxu1 %vm246_vm1, %v8516_v25 }
  0xf3   : > { %7172 = vmatmul.msk.f32.gmra.mxu2 %vm246_vm1, %v8522_v27  ;;  %7190 = vmatmul.msk.f32.gmra.mxu3 %vm246_vm1, %v8698_v61  ;;  %v1801_v61 = vld [vmem:[%s11304_s3] sm:$0xf] }
  0xf4   : > { %7284 = vmatpush.msk.msrb.mxu1 %vm271_vm0, %v1801_v61 }
  0xf6   : > { %v781_v27 = vpop.f32.mrf.mxu2  ;;  %v867_v58 = vpop.f32.mrf.mxu3 }
  0xf7   : > { %v797_v25 = vadd.f32 %v781_v27, %v704_v10  ;;  %v638_v13 = vpop.f32.mrf.mxu0  ;;  %v706_v51 = vpop.f32.mrf.mxu1  ;;  %v7183_v10 = vld [vmem:[%s8430_s14 + $0x142] sm:$0xff] }
  0xf8   : > { %v707_v4 = vadd.f32 %v706_v51, %v638_v13 }
  0xf9   : > { %v8938_v15 = vadd.f32 %v867_v58, %v797_v25 }
  0xfa   : > { %7153 = vmatmul.msk.f32.gmra.mxu0 %vm246_vm1, %v8709_v62  ;;  %7163 = vmatmul.msk.f32.gmra.mxu1 %vm246_vm1, %v8552_v33 }
  0xfb   : > { %7173 = vmatmul.msk.f32.gmra.mxu2 %vm246_vm1, %v8558_v35  ;;  %7191 = vmatmul.msk.f32.gmra.mxu3 %vm246_vm1, %v8712_v63 }
  0xfe   : > { %v784_v8 = vpop.f32.mrf.mxu2  ;;  %v870_v17 = vpop.f32.mrf.mxu3 }
  0xff   : > { %v798_v7 = vadd.f32 %v784_v8, %v707_v4  ;;  %v641_v19 = vpop.f32.mrf.mxu0  ;;  %v709_v9 = vpop.f32.mrf.mxu1 }
 0x100   : > { %v710_v33 = vadd.f32 %v709_v9, %v641_v19 }
 0x101   : > { %v8948_v53 = vadd.f32 %v870_v17, %v798_v7 }
 0x102   : > { %7154 = vmatmul.msk.f32.gmra.mxu0 %vm246_vm1, %v8723_v0  ;;  %7164 = vmatmul.msk.f32.gmra.mxu1 %vm246_vm1, %v8572_v37 }
 0x103   : > { %7174 = vmatmul.msk.f32.gmra.mxu2 %vm246_vm1, %v8578_v39  ;;  %7192 = vmatmul.msk.f32.gmra.mxu3 %vm246_vm1, %v8726_v1 }
 0x106   : > { %v787_v35 = vpop.f32.mrf.mxu2  ;;  %v873_v11 = vpop.f32.mrf.mxu3 }
 0x107   : > { %v799_v63 = vadd.f32 %v787_v35, %v710_v33  ;;  %v644_v6 = vpop.f32.mrf.mxu0  ;;  %v712_v55 = vpop.f32.mrf.mxu1 }
 0x108   : > { %v713_v37 = vadd.f32 %v712_v55, %v644_v6 }
 0x109   : > { %v8959_v23 = vadd.f32 %v873_v11, %v799_v63 }
 0x10a   : > { %7155 = vmatmul.msk.f32.gmra.mxu0 %vm246_vm1, %v7145_v21  ;;  %7165 = vmatmul.msk.f32.gmra.mxu1 %vm246_vm1, %v8592_v41 }
 0x10b   : > { %7175 = vmatmul.msk.f32.gmra.mxu2 %vm246_vm1, %v8598_v43  ;;  %7193 = vmatmul.msk.f32.gmra.mxu3 %vm246_vm1, %v7183_v10 }
 0x10e   : > { %v790_v39 = vpop.f32.mrf.mxu2  ;;  %v876_v1 = vpop.f32.mrf.mxu3 }
 0x10f   : > { %v800_v0 = vadd.f32 %v790_v39, %v713_v37  ;;  %v941_v27 = vpop.f32.mrf.mxu0  ;;  %v995_v61 = vpop.f32.mrf.mxu1  ;;  %v7339_v37 = vld [vmem:[%s11304_s3 + $0x14] sm:$0xf] }
 0x110   : > { %v965_v58 = vadd.f32 %v941_v27, %v8882_v44 }
 0x111   : > { %v8968_v25 = vadd.f32 %v876_v1, %v800_v0 }
 0x112   : > { %7204 = vmatmul.msk.f32.vlgmr.msra.gmra.mxu0 %vm246_vm1, %v8745_v31  ;;  %7222 = vmatmul.msk.f32.vlgmr.msra.gmra.mxu1 %vm246_vm1, %v8459_v14  ;;  %v1019_v41 = vadd.f32 %v995_v61, %v965_v58  ;;  %v11366_v58 = vld [vmem:[#allocation11_spill] sm:$0xff] }
 0x113   : > { %7240 = vmatmul.msk.f32.vlgmr.msra.gmra.mxu2 %vm246_vm1, %v8453_v12  ;;  %7258 = vmatmul.msk.f32.vlgmr.msra.gmra.mxu3 %vm246_vm1, %v8750_v56 }
 0x114   : > { %7340 = vmatpush.msk.msra.mxu1 %vm271_vm0, %v7339_v37 }
 0x116   : > { %v1049_v43 = vpop.f32.mrf.mxu2  ;;  %v1135_v51 = vpop.f32.mrf.mxu3 }
 0x117   : > { %v1073_v13 = vadd.f32 %v1049_v43, %v1019_v41  ;;  %v944_v4 = vpop.f32.mrf.mxu0  ;;  %v998_v7 = vpop.f32.mrf.mxu1 }
 0x118   : > { %v966_v44 = vadd.f32 %v944_v4, %v8892_v30 }
 0x119   : > { %v8980_v8 = vadd.f32 %v1135_v51, %v1073_v13 }
 0x11a   : > { %7205 = vmatmul.msk.f32.gmra.mxu0 %vm246_vm1, %v8761_v2  ;;  %7223 = vmatmul.msk.f32.gmra.mxu1 %vm246_vm1, %v8479_v18  ;;  %v1020_v12 = vadd.f32 %v998_v7, %v966_v44 }
 0x11b   : > { %7241 = vmatmul.msk.f32.gmra.mxu2 %vm246_vm1, %v8473_v16  ;;  %7259 = vmatmul.msk.f32.gmra.mxu3 %vm246_vm1, %v8766_v5 }
 0x11e   : > { %v1052_v14 = vpop.f32.mrf.mxu2  ;;  %v1138_v56 = vpop.f32.mrf.mxu3 }
 0x11f   : > { %v1074_v31 = vadd.f32 %v1052_v14, %v1020_v12  ;;  %v947_v30 = vpop.f32.mrf.mxu0  ;;  %v1001_v9 = vpop.f32.mrf.mxu1  ;;  %v7201_v14 = vld [vmem:[%s8430_s14 + $0x1f1] sm:$0xff] }
 0x120   : > { %v967_v17 = vadd.f32 %v947_v30, %v8902_v59  ;;  %v7219_v30 = vld [vmem:[%s8430_s14 + $0x2a1] sm:$0xff] }
 0x121   : > { %v8991_v19 = vadd.f32 %v1138_v56, %v1074_v31  ;;  %v7237_v31 = vld [vmem:[%s8430_s14 + $0x1f2] sm:$0xff] }
 0x122   : > { %7206 = vmatmul.msk.f32.gmra.mxu0 %vm246_vm1, %v8777_v47  ;;  %7224 = vmatmul.msk.f32.gmra.mxu1 %vm246_vm1, %v8499_v22  ;;  %v1021_v16 = vadd.f32 %v1001_v9, %v967_v17 }
 0x123   : > { %7242 = vmatmul.msk.f32.gmra.mxu2 %vm246_vm1, %v8493_v20  ;;  %7260 = vmatmul.msk.f32.gmra.mxu3 %vm246_vm1, %v8782_v57 }
 0x126   : > { %v1055_v18 = vpop.f32.mrf.mxu2  ;;  %v1141_v5 = vpop.f32.mrf.mxu3 }
 0x127   : > { %v1075_v2 = vadd.f32 %v1055_v18, %v1021_v16  ;;  %v950_v59 = vpop.f32.mrf.mxu0  ;;  %v1004_v63 = vpop.f32.mrf.mxu1 }
 0x128   : > { %v968_v33 = vadd.f32 %v950_v59, %v8912_v49 }
 0x129   : > { %v9002_v35 = vadd.f32 %v1141_v5, %v1075_v2  ;;  %v7266_v2 = vld [vmem:[%s8430_s14 + $0xb0] sm:$0xff]  ;;  %v1949_v5 = vld [vmem:[%s8430_s14 + $0x1] sm:$0xff] }
 0x12a   : > { %7207 = vmatmul.msk.f32.gmra.mxu0 %vm246_vm1, %v8793_v28  ;;  %7225 = vmatmul.msk.f32.gmra.mxu1 %vm246_vm1, %v8519_v26  ;;  %v1022_v20 = vadd.f32 %v1004_v63, %v968_v33  ;;  %v11364_v28 = vld [vmem:[#allocation8_spill] sm:$0xff]  ;;  %v11365_v26 = vld [vmem:[#allocation10_spill] sm:$0xff] }
 0x12b   : > { %7243 = vmatmul.msk.f32.gmra.mxu2 %vm246_vm1, %v8513_v24  ;;  %7261 = vmatmul.msk.f32.gmra.mxu3 %vm246_vm1, %v8798_v3  ;;  %v7349_v24 = vld [vmem:[%s11304_s3 + $0x18] sm:$0xf]  ;;  %v7321_v3 = vld [vmem:[%s11304_s3 + $0x10] sm:$0xf]  ;;  %v1793_v63 = vld [vmem:[%s8430_s14] sm:$0xff] }
 0x12c   : > { %7350 = vmatpush.msk.msra.mxu2 %vm271_vm0, %v7349_v24  ;;  %7322 = vmatpush.msk.msra.mxu0 %vm271_vm0, %v7321_v3  ;;  %v11369_v24 = vld [vmem:[#allocation2_spill] sm:$0xff] }
 0x12e   : > { %v1058_v22 = vpop.f32.mrf.mxu2  ;;  %v1144_v57 = vpop.f32.mrf.mxu3 }
 0x12f   : > { %v1076_v47 = vadd.f32 %v1058_v22, %v1022_v20  ;;  %v953_v49 = vpop.f32.mrf.mxu0  ;;  %v1007_v21 = vpop.f32.mrf.mxu1  ;;  %v7303_v20 = vld [vmem:[%s8430_s14 + $0xb1] sm:$0xff] }
 0x130   : > { %v969_v11 = vadd.f32 %v953_v49, %v8938_v15  ;;  %v7367_v15 = vld [vmem:[%s11304_s3 + $0x1c] sm:$0xf]  ;;  %v7267_v49 = vld [vmem:[%s8430_s14 + $0xc0] sm:$0xff] }
 0x131   : > { %v9013_v6 = vadd.f32 %v1144_v57, %v1076_v47  ;;  %7368 = vmatpush.msk.msra.mxu3 %vm271_vm0, %v7367_v15 }
 0x132   : > { %7208 = vmatmul.msk.f32.gmra.mxu0 %vm246_vm1, %v11364_v28  ;;  %7226 = vmatmul.msk.f32.gmra.mxu1 %vm246_vm1, %v8555_v34  ;;  %v1023_v55 = vadd.f32 %v1007_v21, %v969_v11  ;;  %v1794_v21 = vld [vmem:[%s8430_s14 + $0x10] sm:$0xff]  ;;  %v11368_v28 = vld [vmem:[#allocation3_spill] sm:$0xff] }
 0x133   : > { %7244 = vmatmul.msk.f32.gmra.mxu2 %vm246_vm1, %v8549_v32  ;;  %7262 = vmatmul.msk.f32.gmra.mxu3 %vm246_vm1, %v11365_v26 }
 0x136   : > { %v1061_v32 = vpop.f32.mrf.mxu2  ;;  %v1147_v10 = vpop.f32.mrf.mxu3 }
 0x137   : > { %v1077_v34 = vadd.f32 %v1061_v32, %v1023_v55  ;;  %v956_v39 = vpop.f32.mrf.mxu0  ;;  %v1010_v27 = vpop.f32.mrf.mxu1  ;;  %v7268_v55 = vld [vmem:[%s8430_s14 + $0xd0] sm:$0xff] }
 0x138   : > { %v970_v0 = vadd.f32 %v956_v39, %v8948_v53 }
 0x139   : > { %v9040_v1 = vadd.f32 %v1147_v10, %v1077_v34  ;;  %v1795_v34 = vld [vmem:[%s8430_s14 + $0x20] sm:$0xff]  ;;  %v7305_v10 = vld [vmem:[%s8430_s14 + $0xd1] sm:$0xff] }
 0x13a   : > { %7209 = vmatmul.msk.f32.gmra.mxu0 %vm246_vm1, %v11366_v58  ;;  %7227 = vmatmul.msk.f32.gmra.mxu1 %vm246_vm1, %v8575_v38  ;;  %v1024_v61 = vadd.f32 %v1010_v27, %v970_v0  ;;  %v7269_v27 = vld [vmem:[%s8430_s14 + $0xe0] sm:$0xff] }
 0x13b   : > { %7245 = vmatmul.msk.f32.gmra.mxu2 %vm246_vm1, %v8569_v36  ;;  %7263 = vmatmul.msk.f32.gmra.mxu3 %vm246_vm1, %v8846_v46  ;;  %v11367_v36 = vld [vmem:[#allocation14_spill] sm:$0xff] }
 0x13e   : > { %v1064_v41 = vpop.f32.mrf.mxu2  ;;  %v1150_v53 = vpop.f32.mrf.mxu3 }
 0x13f   : > { %v1078_v43 = vadd.f32 %v1064_v41, %v1024_v61  ;;  %v959_v13 = vpop.f32.mrf.mxu0  ;;  %v1013_v44 = vpop.f32.mrf.mxu1  ;;  %v1796_v61 = vld [vmem:[%s8430_s14 + $0x30] sm:$0xff]  ;;  %v7306_v41 = vld [vmem:[%s8430_s14 + $0xe1] sm:$0xff] }
 0x140   : > { %v971_v51 = vadd.f32 %v959_v13, %v8959_v23  ;;  %v7270_v13 = vld [vmem:[%s8430_s14 + $0xf0] sm:$0xff] }
 0x141   : > { %v9051_v4 = vadd.f32 %v1150_v53, %v1078_v43 }
 0x142   : > { %7210 = vmatmul.msk.f32.gmra.mxu0 %vm246_vm1, %v8857_v29  ;;  %7228 = vmatmul.msk.f32.gmra.mxu1 %vm246_vm1, %v8595_v42  ;;  %v1025_v38 = vadd.f32 %v1013_v44, %v971_v51  ;;  %v7255_v42 = vld [vmem:[%s8430_s14 + $0x2a2] sm:$0xff] }
 0x143   : > { %7246 = vmatmul.msk.f32.gmra.mxu2 %vm246_vm1, %v8589_v40  ;;  %7264 = vmatmul.msk.f32.gmra.mxu3 %vm246_vm1, %v11367_v36  ;;  %v1797_v44 = vld [vmem:[%s8430_s14 + $0x40] sm:$0xff]  ;;  %v7307_v36 = vld [vmem:[%s8430_s14 + $0xf1] sm:$0xff] }
 0x146   : > { %v1067_v46 = vpop.f32.mrf.mxu2  ;;  %v1153_v7 = vpop.f32.mrf.mxu3 }
 0x147   : > { %v1079_v23 = vadd.f32 %v1067_v46, %v1025_v38  ;;  %v962_v12 = vpop.f32.mrf.mxu0  ;;  %v1016_v40 = vpop.f32.mrf.mxu1  ;;  %v7385_v38 = vld [vmem:[%s11304_s3 + $0x20] sm:$0xf]  ;;  %v7439_v46 = vld [vmem:[%s11304_s3 + $0x2c] sm:$0xf] }
 0x148   : > { %v972_v29 = vadd.f32 %v962_v12, %v8968_v25 }
 0x149   : > { %v9064_v56 = vadd.f32 %v1153_v7, %v1079_v23  ;;  %v7403_v7 = vld [vmem:[%s11304_s3 + $0x24] sm:$0xf] }
 0x14a   : > { %7211 = vmatmul.msk.f32.gmra.mxu0 %vm246_vm1, %v7201_v14  ;;  %7229 = vmatmul.msk.f32.gmra.mxu1 %vm246_vm1, %v7219_v30  ;;  %v1026_v17 = vadd.f32 %v1016_v40, %v972_v29  ;;  %v7271_v14 = vld [vmem:[%s8430_s14 + $0x100] sm:$0xff]  ;;  %v1798_v29 = vld [vmem:[%s8430_s14 + $0x50] sm:$0xff] }
 0x14b   : > { %7247 = vmatmul.msk.f32.gmra.mxu2 %vm246_vm1, %v7237_v31  ;;  %7265 = vmatmul.msk.f32.gmra.mxu3 %vm246_vm1, %v7255_v42  ;;  %v7308_v40 = vld [vmem:[%s8430_s14 + $0x101] sm:$0xff] }
 0x14e   : > { %v1070_v9 = vpop.f32.mrf.mxu2  ;;  %v1156_v25 = vpop.f32.mrf.mxu3 }
 0x14f   : > { %v1080_v16 = vadd.f32 %v1070_v9, %v1026_v17  ;;  %v9072_v18 = vpop.f32.mrf.mxu0  ;;  %v9078_v33 = vpop.f32.mrf.mxu1  ;;  %v7272_v9 = vld [vmem:[%s8430_s14 + $0x110] sm:$0xff] }
 0x151   : > { %v9076_v59 = vadd.f32 %v1156_v25, %v1080_v16  ;;  %v1799_v25 = vld [vmem:[%s8430_s14 + $0x60] sm:$0xff] }
 0x152   : > { %7276 = vmatmul.msk.f32.vlgmr.msrb.gmra.mxu0 %vm246_vm1, %v7266_v2  ;;  %7285 = vmatmul.msk.f32.vlgmr.msrb.gmra.mxu1 %vm246_vm1, %v1793_v63  ;;  %v7309_v2 = vld [vmem:[%s8430_s14 + $0x111] sm:$0xff] }
 0x153   : > { %7295 = vmatmul.msk.f32.vlgmr.msrb.gmra.mxu2 %vm246_vm1, %v1949_v5  ;;  %7313 = vmatmul.msk.f32.vlgmr.msrb.gmra.mxu3 %vm246_vm1, %v7303_v20 }
 0x154   : > { %7386 = vmatpush.msk.msrb.mxu0 %vm271_vm0, %v7385_v38  ;;  %7440 = vmatpush.msk.msrb.mxu3 %vm271_vm0, %v7439_v46  ;;  %v2122_v46 = vld [vmem:[%s8430_s14 + $0x12] sm:$0xff] }
 0x155   : > { %7404 = vmatpush.msk.msrb.mxu1 %vm271_vm0, %v7403_v7  ;;  %v2294_v7 = vld [vmem:[%s8430_s14 + $0x13] sm:$0xff] }
 0x156   : > { %v9086_v22 = vpop.f32.mrf.mxu2  ;;  %v9088_v47 = vpop.f32.mrf.mxu3 }
 0x157   : > { %v9090_v57 = vpop.f32.mrf.mxu0  ;;  %v9093_v11 = vpop.f32.mrf.mxu1 }
 0x15a   : > { %7277 = vmatmul.msk.f32.gmra.mxu0 %vm246_vm1, %v7267_v49  ;;  %7286 = vmatmul.msk.f32.gmra.mxu1 %vm246_vm1, %v1794_v21  ;;  %v7273_v49 = vld [vmem:[%s8430_s14 + $0x120] sm:$0xff] }
 0x15b   : > { %7296 = vmatmul.msk.f32.gmra.mxu2 %vm246_vm1, %v11368_v28  ;;  %7314 = vmatmul.msk.f32.gmra.mxu3 %vm246_vm1, %v11369_v24  ;;  %v7310_v24 = vld [vmem:[%s8430_s14 + $0x121] sm:$0xff] }
 0x15e   : > { %v9102_v26 = vpop.f32.mrf.mxu2  ;;  %v9104_v3 = vpop.f32.mrf.mxu3 }
 0x15f   : > { %v9106_v15 = vpop.f32.mrf.mxu0  ;;  %v9109_v32 = vpop.f32.mrf.mxu1 }
 0x162   : > { %7278 = vmatmul.msk.f32.gmra.mxu0 %vm246_vm1, %v7268_v55  ;;  %7287 = vmatmul.msk.f32.gmra.mxu1 %vm246_vm1, %v1795_v34 }
 0x163   : > { %7297 = vmatmul.msk.f32.gmra.mxu2 %vm246_vm1, %v8623_v48  ;;  %7315 = vmatmul.msk.f32.gmra.mxu3 %vm246_vm1, %v7305_v10  ;;  %v2121_v10 = vld [vmem:[%s8430_s14 + $0x2] sm:$0xff] }
 0x166   : > { %v9118_v37 = vpop.f32.mrf.mxu2  ;;  %v9120_v39 = vpop.f32.mrf.mxu3 }
 0x167   : > { %v9122_v0 = vpop.f32.mrf.mxu0  ;;  %v9125_v58 = vpop.f32.mrf.mxu1 }
 0x16a   : > { %7279 = vmatmul.msk.f32.gmra.mxu0 %vm246_vm1, %v7269_v27  ;;  %7288 = vmatmul.msk.f32.gmra.mxu1 %vm246_vm1, %v1796_v61  ;;  %v2293_v27 = vld [vmem:[%s8430_s14 + $0x3] sm:$0xff] }
 0x16b   : > { %7298 = vmatmul.msk.f32.gmra.mxu2 %vm246_vm1, %v8637_v50  ;;  %7316 = vmatmul.msk.f32.gmra.mxu3 %vm246_vm1, %v7306_v41  ;;  %v7421_v50 = vld [vmem:[%s11304_s3 + $0x28] sm:$0xf] }
 0x16c   : > { %7422 = vmatpush.msk.msrb.mxu2 %vm271_vm0, %v7421_v50 }
 0x16e   : > { %v9134_v48 = vpop.f32.mrf.mxu2  ;;  %v9136_v43 = vpop.f32.mrf.mxu3 }
 0x16f   : > { %v9138_v53 = vpop.f32.mrf.mxu0  ;;  %v9141_v51 = vpop.f32.mrf.mxu1 }
 0x172   : > { %7280 = vmatmul.msk.f32.gmra.mxu0 %vm246_vm1, %v7270_v13  ;;  %7289 = vmatmul.msk.f32.gmra.mxu1 %vm246_vm1, %v1797_v44  ;;  %v7331_v13 = vld [vmem:[%s8430_s14 + $0xb2] sm:$0xff] }
 0x173   : > { %7299 = vmatmul.msk.f32.gmra.mxu2 %vm246_vm1, %v8651_v52  ;;  %7317 = vmatmul.msk.f32.gmra.mxu3 %vm246_vm1, %v7307_v36  ;;  %v7359_v44 = vld [vmem:[%s8430_s14 + $0xb3] sm:$0xff] }
 0x176   : > { %v9161_v52 = vpop.f32.mrf.mxu2  ;;  %v9164_v23 = vpop.f32.mrf.mxu3 }
 0x177   : > { %v9169_v12 = vpop.f32.mrf.mxu0  ;;  %v9173_v31 = vpop.f32.mrf.mxu1 }
 0x17a   : > { %7281 = vmatmul.msk.f32.gmra.mxu0 %vm246_vm1, %v7271_v14  ;;  %7290 = vmatmul.msk.f32.gmra.mxu1 %vm246_vm1, %v1798_v29 }
 0x17b   : > { %7300 = vmatmul.msk.f32.gmra.mxu2 %vm246_vm1, %v8665_v54  ;;  %7318 = vmatmul.msk.f32.gmra.mxu3 %vm246_vm1, %v7308_v40  ;;  %v1245_v54 = vadd.f32 %v9072_v18, %v8980_v8  ;;  %v1246_v8 = vadd.f32 %v9090_v57, %v8991_v19  ;;  %v1247_v19 = vadd.f32 %v9106_v15, %v9002_v35 }
 0x17d   : > { %v1299_v21 = vadd.f32 %v9078_v33, %v1245_v54  ;;  %v1300_v61 = vadd.f32 %v9093_v11, %v1246_v8  ;;  %v1301_v14 = vadd.f32 %v9109_v32, %v1247_v19 }
 0x17e   : > { %v9182_v30 = vpop.f32.mrf.mxu2  ;;  %v9184_v42 = vpop.f32.mrf.mxu3 }
 0x17f   : > { %v9186_v17 = vpop.f32.mrf.mxu0  ;;  %v9189_v16 = vpop.f32.mrf.mxu1  ;;  %v1353_v55 = vadd.f32 %v9086_v22, %v1299_v21  ;;  %v1354_v36 = vadd.f32 %v9102_v26, %v1300_v61  ;;  %v1355_v35 = vadd.f32 %v9118_v37, %v1301_v14  ;;  %v2297_v14 = vld [vmem:[%s8430_s14 + $0x43] sm:$0xff] }
 0x181   : > { %v1439_v33 = vadd.f32 %v9088_v47, %v1353_v55  ;;  %v1440_v11 = vadd.f32 %v9104_v3, %v1354_v36  ;;  %v1248_v3 = vadd.f32 %v9122_v0, %v9013_v6  ;;  %v1441_v37 = vadd.f32 %v9120_v39, %v1355_v35  ;;  %v7361_v6 = vld [vmem:[%s8430_s14 + $0xd3] sm:$0xff] }
 0x182   : > { %7282 = vmatmul.msk.f32.gmra.mxu0 %vm246_vm1, %v7272_v9  ;;  %7291 = vmatmul.msk.f32.gmra.mxu1 %vm246_vm1, %v1799_v25  ;;  %v7332_v25 = vld [vmem:[%s8430_s14 + $0xc2] sm:$0xff]  ;;  %v1249_v39 = vadd.f32 %v9138_v53, %v9040_v1  ;;  %v7363_v35 = vld [vmem:[%s8430_s14 + $0xf3] sm:$0xff] }
 0x183   : > { %7301 = vmatmul.msk.f32.gmra.mxu2 %vm246_vm1, %v8695_v60  ;;  %7319 = vmatmul.msk.f32.gmra.mxu3 %vm246_vm1, %v7309_v2  ;;  %v1800_v60 = vld [vmem:[%s8430_s14 + $0x70] sm:$0xff]  ;;  %v7360_v2 = vld [vmem:[%s8430_s14 + $0xc3] sm:$0xff]  ;;  %v1302_v55 = vadd.f32 %v9125_v58, %v1248_v3  ;;  %v7511_v3 = vld [vmem:[%s11304_s3 + $0x3c] sm:$0xf] }
 0x184   : > { %v1303_v36 = vadd.f32 %v9141_v51, %v1249_v39  ;;  %v7362_v1 = vld [vmem:[%s8430_s14 + $0xe3] sm:$0xff] }
 0x185   : > { %v1356_v0 = vadd.f32 %v9134_v48, %v1302_v55 }
 0x186   : > { %v9200_v5 = vpop.f32.mrf.mxu2  ;;  %v9202_v63 = vpop.f32.mrf.mxu3  ;;  %v1357_v53 = vadd.f32 %v9161_v52, %v1303_v36 }
 0x187   : > { %v9204_v20 = vpop.f32.mrf.mxu0  ;;  %v9208_v28 = vpop.f32.mrf.mxu1  ;;  %v1442_v61 = vadd.f32 %v9136_v43, %v1356_v0  ;;  %v1250_v43 = vadd.f32 %v9169_v12, %v9051_v4  ;;  %v1251_v12 = vadd.f32 %v9186_v17, %v9064_v56 }
 0x18a   : > { %7283 = vmatmul.msk.f32.gmra.mxu0 %vm246_vm1, %v7273_v49  ;;  %7292 = vmatmul.msk.f32.gmra.mxu1 %vm246_vm1, %v1800_v60  ;;  %v2123_v60 = vld [vmem:[%s8430_s14 + $0x22] sm:$0xff] }
 0x18b   : > { %7302 = vmatmul.msk.f32.gmra.mxu2 %vm246_vm1, %v8709_v62  ;;  %7320 = vmatmul.msk.f32.gmra.mxu3 %vm246_vm1, %v7310_v24  ;;  %v2295_v24 = vld [vmem:[%s8430_s14 + $0x23] sm:$0xff] }
 0x18e   : > { %v9220_v18 = vpop.f32.mrf.mxu2  ;;  %v9223_v34 = vpop.f32.mrf.mxu3 }
 0x18f   : > { %v1502_v22 = vpop.f32.mrf.mxu0  ;;  %v1589_v62 = vpop.f32.mrf.mxu1 }
 0x190   : > { %v1526_v41 = vadd.f32 %v1502_v22, %v1439_v33 }
 0x192   : > { %7323 = vmatmul.msk.f32.vlgmr.msra.gmra.mxu0 %vm246_vm1, %v2121_v10  ;;  %7341 = vmatmul.msk.f32.vlgmr.msra.gmra.mxu1 %vm246_vm1, %v7331_v13  ;;  %v1613_v47 = vadd.f32 %v1589_v62, %v1526_v41  ;;  %v7333_v10 = vld [vmem:[%s8430_s14 + $0xd2] sm:$0xff] }
 0x193   : > { %7351 = vmatmul.msk.f32.vlgmr.msra.gmra.mxu2 %vm246_vm1, %v2293_v27  ;;  %7369 = vmatmul.msk.f32.vlgmr.msra.gmra.mxu3 %vm246_vm1, %v7359_v44  ;;  %v2124_v13 = vld [vmem:[%s8430_s14 + $0x32] sm:$0xff] }
 0x194   : > { %v2296_v44 = vld [vmem:[%s8430_s14 + $0x33] sm:$0xff]  ;;  %7512 = vmatpush.msk.msra.mxu3 %vm271_vm0, %v7511_v3 }
 0x196   : > { %v1675_v57 = vpop.f32.mrf.mxu2  ;;  %v1761_v38 = vpop.f32.mrf.mxu3 }
 0x197   : > { %v1699_v50 = vadd.f32 %v1675_v57, %v1613_v47  ;;  %v1505_v26 = vpop.f32.mrf.mxu0  ;;  %v1592_v40 = vpop.f32.mrf.mxu1 }
 0x198   : > { %v1527_v29 = vadd.f32 %v1505_v26, %v1440_v11  ;;  %v7334_v11 = vld [vmem:[%s8430_s14 + $0xe2] sm:$0xff] }
 0x199   : > { %v1785_v9 = vadd.f32 %v1761_v38, %v1699_v50  ;;  %v1443_v38 = vadd.f32 %v9164_v23, %v1357_v53  ;;  %v7493_v23 = vld [vmem:[%s11304_s3 + $0x38] sm:$0xf] }
 0x19a   : > { %7324 = vmatmul.msk.f32.gmra.mxu0 %vm246_vm1, %v2122_v46  ;;  %7342 = vmatmul.msk.f32.gmra.mxu1 %vm246_vm1, %v7332_v25  ;;  %v1614_v15 = vadd.f32 %v1592_v40, %v1527_v29  ;;  %v1304_v29 = vadd.f32 %v9173_v31, %v1250_v43 }
 0x19b   : > { %7352 = vmatmul.msk.f32.gmra.mxu2 %vm246_vm1, %v2294_v7  ;;  %6783 = vrot.lane.b32.xlu0 %v1785_v9, %s8352_s21  ;;  %v2125_v7 = vld [vmem:[%s8430_s14 + $0x42] sm:$0xff] }
 0x19c   : > { %7370 = vmatmul.msk.f32.gmra.mxu3 %vm246_vm1, %v7360_v2  ;;  %v7335_v2 = vld [vmem:[%s8430_s14 + $0xf2] sm:$0xff]  ;;  %v1358_v4 = vadd.f32 %v9182_v30, %v1304_v29  ;;  %7494 = vmatpush.msk.msra.mxu2 %vm271_vm0, %v7493_v23 }
 0x19d   : > { %v7457_v30 = vld [vmem:[%s11304_s3 + $0x30] sm:$0xf] }
 0x19e   : > { %v1678_v32 = vpop.f32.mrf.mxu2  ;;  %v1764_v49 = vpop.f32.mrf.mxu3  ;;  %7458 = vmatpush.msk.msra.mxu0 %vm271_vm0, %v7457_v30  ;;  %v1444_v56 = vadd.f32 %v9184_v42, %v1358_v4  ;;  %v7364_v42 = vld [vmem:[%s8430_s14 + $0x103] sm:$0xff]  ;;  %v7414_v30 = vld [vmem:[%s8430_s14 + $0x171] sm:$0xff] }
 0x19f   : > { %v1700_v54 = vadd.f32 %v1678_v32, %v1614_v15  ;;  %v1508_v21 = vpop.f32.mrf.mxu0  ;;  %v1595_v22 = vpop.f32.mrf.mxu1 }
 0x1a0   : > { %v1528_v8 = vadd.f32 %v1508_v21, %v1441_v37  ;;  %v7475_v37 = vld [vmem:[%s11304_s3 + $0x34] sm:$0xf] }
 0x1a1   : > { %v1786_v33 = vadd.f32 %v1764_v49, %v1700_v54  ;;  %v2126_v49 = vld [vmem:[%s8430_s14 + $0x52] sm:$0xff]  ;;  %7476 = vmatpush.msk.msra.mxu1 %vm271_vm0, %v7475_v37 }
 0x1a2   : > { %7325 = vmatmul.msk.f32.gmra.mxu0 %vm246_vm1, %v2123_v60  ;;  %7343 = vmatmul.msk.f32.gmra.mxu1 %vm246_vm1, %v7333_v10  ;;  %v1615_v58 = vadd.f32 %v1595_v22, %v1528_v8  ;;  %v2298_v21 = vld [vmem:[%s8430_s14 + $0x53] sm:$0xff]  ;;  %v1305_v60 = vadd.f32 %v9189_v16, %v1251_v12  ;;  %v1252_v16 = vadd.f32 %v9204_v20, %v9076_v59 }
 0x1a3   : > { %7353 = vmatmul.msk.f32.gmra.mxu2 %vm246_vm1, %v2295_v24  ;;  %6785 = vrot.lane.b32.xlu0 %v1786_v33, %s8352_s21  ;;  %v7336_v33 = vld [vmem:[%s8430_s14 + $0x102] sm:$0xff]  ;;  %v7337_v59 = vld [vmem:[%s8430_s14 + $0x112] sm:$0xff] }
 0x1a4   : > { %7371 = vmatmul.msk.f32.gmra.mxu3 %vm246_vm1, %v7361_v6  ;;  %v1359_v22 = vadd.f32 %v9200_v5, %v1305_v60  ;;  %v9331_v20 = vld [vmem:[%s8430_s14 + $0x113] sm:$0xff]  ;;  %v9383_v60 = vld [vmem:[%s8430_s14 + $0x180] sm:$0xff] }
 0x1a6   : > { %v1681_v27 = vpop.f32.mrf.mxu2  ;;  %v1767_v41 = vpop.f32.mrf.mxu3  ;;  %v1445_v0 = vadd.f32 %v9202_v63, %v1359_v22 }
 0x1a7   : > { %v1701_v48 = vadd.f32 %v1681_v27, %v1615_v58  ;;  %v1511_v62 = vpop.f32.mrf.mxu0  ;;  %v1598_v47 = vpop.f32.mrf.mxu1  ;;  %v2127_v27 = vld [vmem:[%s8430_s14 + $0x62] sm:$0xff] }
 0x1a8   : > { %v1529_v19 = vadd.f32 %v1511_v62, %v1442_v61  ;;  %v9326_v61 = vld [vmem:[%s8430_s14 + $0x63] sm:$0xff] }
 0x1a9   : > { %v1787_v57 = vadd.f32 %v1767_v41, %v1701_v48  ;;  %v1306_v48 = vadd.f32 %v9208_v28, %v1252_v16 }
 0x1aa   : > { %7326 = vmatmul.msk.f32.gmra.mxu0 %vm246_vm1, %v2124_v13  ;;  %7344 = vmatmul.msk.f32.gmra.mxu1 %vm246_vm1, %v7334_v11  ;;  %v1616_v51 = vadd.f32 %v1598_v47, %v1529_v19  ;;  %v9344_v11 = vld [vmem:[%s8430_s14 + $0x73] sm:$0xff] }
 0x1ab   : > { %7354 = vmatmul.msk.f32.gmra.mxu2 %vm246_vm1, %v2296_v44  ;;  %6787 = vrot.lane.b32.xlu1 %v1787_v57, %s8352_s21  ;;  %v1360_v44 = vadd.f32 %v9220_v18, %v1306_v48  ;;  %v2128_v57 = vld [vmem:[%s8430_s14 + $0x72] sm:$0xff]  ;;  %v9405_v48 = vld [vmem:[%s8430_s14 + $0x240] sm:$0xff] }
 0x1ac   : > { %7372 = vmatmul.msk.f32.gmra.mxu3 %vm246_vm1, %v7362_v1 }
 0x1ad   : > { %v1446_v36 = vadd.f32 %v9223_v34, %v1360_v44 }
 0x1ae   : > { %v1684_v50 = vpop.f32.mrf.mxu2  ;;  %v1770_v26 = vpop.f32.mrf.mxu3 }
 0x1af   : > { %v1702_v52 = vadd.f32 %v1684_v50, %v1616_v51  ;;  %v1514_v46 = vpop.f32.mrf.mxu0  ;;  %v1601_v25 = vpop.f32.mrf.mxu1  ;;  %v7338_v51 = vld [vmem:[%s8430_s14 + $0x122] sm:$0xff] }
 0x1b0   : > { %v1530_v40 = vadd.f32 %v1514_v46, %v1443_v38  ;;  %v9348_v50 = vld [vmem:[%s8430_s14 + $0x123] sm:$0xff] }
 0x1b1   : > { %v1788_v9 = vadd.f32 %v1770_v26, %v1702_v52 }
 0x1b2   : > { %7327 = vmatmul.msk.f32.gmra.mxu0 %vm246_vm1, %v2125_v7  ;;  %7345 = vmatmul.msk.f32.gmra.mxu1 %vm246_vm1, %v7335_v2  ;;  %v1617_v31 = vadd.f32 %v1601_v25, %v1530_v40  ;;  %v7377_v7 = vld [vmem:[%s8430_s14 + $0x160] sm:$0xff]  ;;  %v7431_v25 = vld [vmem:[%s8430_s14 + $0x211] sm:$0xff] }
 0x1b3   : > { %7355 = vmatmul.msk.f32.gmra.mxu2 %vm246_vm1, %v2297_v14  ;;  %6789 = vrot.lane.b32.xlu1 %v1788_v9, %s8352_s21  ;;  %v7413_v14 = vld [vmem:[%s8430_s14 + $0x161] sm:$0xff]  ;;  %v7395_v9 = vld [vmem:[%s8430_s14 + $0x210] sm:$0xff] }
 0x1b4   : > { %7373 = vmatmul.msk.f32.gmra.mxu3 %vm246_vm1, %v7363_v35 }
 0x1b6   : > { %v1687_v15 = vpop.f32.mrf.mxu2  ;;  %v1773_v32 = vpop.f32.mrf.mxu3 }
 0x1b7   : > { %v1703_v17 = vadd.f32 %v1687_v15, %v1617_v31  ;;  %v1517_v54 = vpop.f32.mrf.mxu0  ;;  %v1604_v55 = vpop.f32.mrf.mxu1  ;;  %v9367_v31 = vld [vmem:[%s8430_s14 + $0x170] sm:$0xff] }
 0x1b8   : > { %v1531_v24 = vadd.f32 %v1517_v54, %v1444_v56  ;;  %v9373_v56 = vld [vmem:[%s8430_s14 + $0x220] sm:$0xff] }
 0x1b9   : > { %v1789_v8 = vadd.f32 %v1773_v32, %v1703_v17  ;;  %v7432_v17 = vld [vmem:[%s8430_s14 + $0x221] sm:$0xff] }
 0x1ba   : > { %7328 = vmatmul.msk.f32.gmra.mxu0 %vm246_vm1, %v2126_v49  ;;  %7346 = vmatmul.msk.f32.gmra.mxu1 %vm246_vm1, %v7336_v33  ;;  %v1618_v10 = vadd.f32 %v1604_v55, %v1531_v24  ;;  %v7415_v24 = vld [vmem:[%s8430_s14 + $0x181] sm:$0xff]  ;;  %v9389_v33 = vld [vmem:[%s8430_s14 + $0x230] sm:$0xff] }
 0x1bb   : > { %7356 = vmatmul.msk.f32.gmra.mxu2 %vm246_vm1, %v2298_v21  ;;  %6791 = vrot.lane.b32.xlu2 %v1789_v8, %s8352_s21 }
 0x1bc   : > { %7374 = vmatmul.msk.f32.gmra.mxu3 %vm246_vm1, %v7364_v42  ;;  %v7433_v42 = vld [vmem:[%s8430_s14 + $0x231] sm:$0xff] }
 0x1be   : > { %v1690_v6 = vpop.f32.mrf.mxu2  ;;  %v1776_v39 = vpop.f32.mrf.mxu3 }
 0x1bf   : > { %v1704_v5 = vadd.f32 %v1690_v6, %v1618_v10  ;;  %v1520_v58 = vpop.f32.mrf.mxu0  ;;  %v1607_v13 = vpop.f32.mrf.mxu1 }
 0x1c0   : > { %v1532_v41 = vadd.f32 %v1520_v58, %v1445_v0 }
 0x1c1   : > { %v1790_v62 = vadd.f32 %v1776_v39, %v1704_v5  ;;  %v9399_v5 = vld [vmem:[%s8430_s14 + $0x190] sm:$0xff] }
 0x1c2   : > { %7329 = vmatmul.msk.f32.gmra.mxu0 %vm246_vm1, %v2127_v27  ;;  %7347 = vmatmul.msk.f32.gmra.mxu1 %vm246_vm1, %v7337_v59  ;;  %v1619_v63 = vadd.f32 %v1607_v13, %v1532_v41  ;;  %v7416_v39 = vld [vmem:[%s8430_s14 + $0x191] sm:$0xff]  ;;  %v7434_v41 = vld [vmem:[%s8430_s14 + $0x241] sm:$0xff] }
 0x1c3   : > { %7357 = vmatmul.msk.f32.gmra.mxu2 %vm246_vm1, %v9326_v61  ;;  %6793 = vrot.lane.b32.xlu2 %v1790_v62, %s8352_s21 }
 0x1c4   : > { %7375 = vmatmul.msk.f32.gmra.mxu3 %vm246_vm1, %v9331_v20 }
 0x1c6   : > { %v1693_v28 = vpop.f32.mrf.mxu2  ;;  %v1779_v18 = vpop.f32.mrf.mxu3 }
 0x1c7   : > { %v1705_v19 = vadd.f32 %v1693_v28, %v1619_v63  ;;  %v1523_v47 = vpop.f32.mrf.mxu0  ;;  %v1610_v43 = vpop.f32.mrf.mxu1  ;;  %v9415_v28 = vld [vmem:[%s8430_s14 + $0x1a0] sm:$0xff] }
 0x1c8   : > { %v1533_v1 = vadd.f32 %v1523_v47, %v1446_v36  ;;  %v7417_v36 = vld [vmem:[%s8430_s14 + $0x1a1] sm:$0xff]  ;;  %v9421_v47 = vld [vmem:[%s8430_s14 + $0x250] sm:$0xff] }
 0x1c9   : > { %v1791_v53 = vadd.f32 %v1779_v18, %v1705_v19 }
 0x1ca   : > { %7330 = vmatmul.msk.f32.gmra.mxu0 %vm246_vm1, %v2128_v57  ;;  %7348 = vmatmul.msk.f32.gmra.mxu1 %vm246_vm1, %v7338_v51  ;;  %v1620_v34 = vadd.f32 %v1610_v43, %v1533_v1  ;;  %v7435_v57 = vld [vmem:[%s8430_s14 + $0x251] sm:$0xff]  ;;  %v7557_v1 = vld [vmem:[%s11304_s3 + $0x48] sm:$0xf]  ;;  %v7529_v43 = vld [vmem:[%s11304_s3 + $0x40] sm:$0xf] }
 0x1cb   : > { %7358 = vmatmul.msk.f32.gmra.mxu2 %vm246_vm1, %v9344_v11  ;;  %6795 = vrot.lane.b32.xlu0 %v1791_v53, %s8352_s21  ;;  %v7567_v51 = vld [vmem:[%s11304_s3 + $0x4c] sm:$0xf] }
 0x1cc   : > { %7376 = vmatmul.msk.f32.gmra.mxu3 %vm246_vm1, %v9348_v50 }
 0x1ce   : > { %v1696_v38 = vpop.f32.mrf.mxu2  ;;  %v1782_v26 = vpop.f32.mrf.mxu3 }
 0x1cf   : > { %v1706_v52 = vadd.f32 %v1696_v38, %v1620_v34  ;;  %v1857_v46 = vpop.f32.mrf.mxu0  ;;  %v1925_v40 = vpop.f32.mrf.mxu1 }
 0x1d0   : > { %v1926_v2 = vadd.f32 %v1925_v40, %v1857_v46  ;;  %v9443_v46 = vld [vmem:[%s8430_s14 + $0x1b0] sm:$0xff] }
 0x1d1   : > { %v1792_v29 = vadd.f32 %v1782_v26, %v1706_v52 }
 0x1d2   : > { %7387 = vmatmul.msk.f32.vlgmr.msrb.gmra.mxu0 %vm246_vm1, %v7377_v7  ;;  %7405 = vmatmul.msk.f32.vlgmr.msrb.gmra.mxu1 %vm246_vm1, %v7395_v9  ;;  %v7418_v7 = vld [vmem:[%s8430_s14 + $0x1b1] sm:$0xff]  ;;  %v9452_v9 = vld [vmem:[%s8430_s14 + $0x260] sm:$0xff] }
 0x1d3   : > { %7423 = vmatmul.msk.f32.vlgmr.msrb.gmra.mxu2 %vm246_vm1, %v7413_v14  ;;  %6797 = vrot.lane.b32.xlu1 %v1792_v29, %s8352_s21  ;;  %v7547_v14 = vld [vmem:[%s11304_s3 + $0x44] sm:$0xf]  ;;  %s11260_s21 = scalar_lea.vmem %s11306_s5, %s8259_s13 }
 0x1d4   : > { %7441 = vmatmul.msk.f32.vlgmr.msrb.gmra.mxu3 %vm246_vm1, %v7431_v25  ;;  %7558 = vmatpush.msk.msrb.mxu2 %vm271_vm0, %v7557_v1  ;;  %v7436_v25 = vld [vmem:[%s8430_s14 + $0x261] sm:$0xff] }
 0x1d5   : > { %7530 = vmatpush.msk.msrb.mxu0 %vm271_vm0, %v7529_v43  ;;  %7568 = vmatpush.msk.msrb.mxu3 %vm271_vm0, %v7567_v51 }
 0x1d6   : > { %v2003_v35 = vpop.f32.mrf.mxu2  ;;  %v2089_v23 = vpop.f32.mrf.mxu3  ;;  %7548 = vmatpush.msk.msrb.mxu1 %vm271_vm0, %v7547_v14  ;;  %v7450_v14 = vld [vmem:[%s8430_s14 + $0x172] sm:$0xff] }
 0x1d7   : > { %v2027_v4 = vadd.f32 %v2003_v35, %v1926_v2  ;;  %v1860_v12 = vpop.f32.mrf.mxu0  ;;  %v1928_v15 = vpop.f32.mrf.mxu1 }
 0x1d8   : > { %v1929_v32 = vadd.f32 %v1928_v15, %v1860_v12  ;;  %v7419_v15 = vld [vmem:[%s8430_s14 + $0x1c1] sm:$0xff] }
 0x1d9   : > { %v9370_v3 = vadd.f32 %v2089_v23, %v2027_v4 }
 0x1da   : > { %7388 = vmatmul.msk.f32.gmra.mxu0 %vm246_vm1, %v9367_v31  ;;  %7406 = vmatmul.msk.f32.gmra.mxu1 %vm246_vm1, %v9373_v56 }
 0x1db   : > { %7424 = vmatmul.msk.f32.gmra.mxu2 %vm246_vm1, %v7414_v30  ;;  %v9463_v30 = vld [vmem:[%s8430_s14 + $0x1c0] sm:$0xff] }
 0x1dc   : > { %7442 = vmatmul.msk.f32.gmra.mxu3 %vm246_vm1, %v7432_v17 }
 0x1de   : > { %v2006_v37 = vpop.f32.mrf.mxu2  ;;  %v2092_v49 = vpop.f32.mrf.mxu3 }
 0x1df   : > { %v2028_v54 = vadd.f32 %v2006_v37, %v1929_v32  ;;  %v1863_v21 = vpop.f32.mrf.mxu0  ;;  %v1931_v8 = vpop.f32.mrf.mxu1  ;;  %v9469_v37 = vld [vmem:[%s8430_s14 + $0x270] sm:$0xff] }
 0x1e0   : > { %v1932_v22 = vadd.f32 %v1931_v8, %v1863_v21 }
 0x1e1   : > { %v9386_v55 = vadd.f32 %v2092_v49, %v2028_v54  ;;  %v7437_v54 = vld [vmem:[%s8430_s14 + $0x271] sm:$0xff] }
 0x1e2   : > { %7389 = vmatmul.msk.f32.gmra.mxu0 %vm246_vm1, %v9383_v60  ;;  %7407 = vmatmul.msk.f32.gmra.mxu1 %vm246_vm1, %v9389_v33 }
 0x1e3   : > { %7425 = vmatmul.msk.f32.gmra.mxu2 %vm246_vm1, %v7415_v24 }
 0x1e4   : > { %7443 = vmatmul.msk.f32.gmra.mxu3 %vm246_vm1, %v7433_v42 }
 0x1e6   : > { %v2009_v16 = vpop.f32.mrf.mxu2  ;;  %v2095_v6 = vpop.f32.mrf.mxu3 }
 0x1e7   : > { %v2029_v10 = vadd.f32 %v2009_v16, %v1932_v22  ;;  %v1866_v0 = vpop.f32.mrf.mxu0  ;;  %v1934_v27 = vpop.f32.mrf.mxu1  ;;  %v9479_v22 = vld [vmem:[%s8430_s14 + $0x1d0] sm:$0xff] }
 0x1e8   : > { %v1935_v62 = vadd.f32 %v1934_v27, %v1866_v0  ;;  %v7420_v16 = vld [vmem:[%s8430_s14 + $0x1d1] sm:$0xff]  ;;  %v9485_v0 = vld [vmem:[%s8430_s14 + $0x280] sm:$0xff] }
 0x1e9   : > { %v9402_v58 = vadd.f32 %v2095_v6, %v2029_v10 }
 0x1ea   : > { %7390 = vmatmul.msk.f32.gmra.mxu0 %vm246_vm1, %v9399_v5  ;;  %7408 = vmatmul.msk.f32.gmra.mxu1 %vm246_vm1, %v9405_v48 }
 0x1eb   : > { %7426 = vmatmul.msk.f32.gmra.mxu2 %vm246_vm1, %v7416_v39  ;;  %v7438_v39 = vld [vmem:[%s8430_s14 + $0x281] sm:$0xff] }
 0x1ec   : > { %7444 = vmatmul.msk.f32.gmra.mxu3 %vm246_vm1, %v7434_v41 }
 0x1ee   : > { %v2012_v13 = vpop.f32.mrf.mxu2  ;;  %v2098_v44 = vpop.f32.mrf.mxu3 }
 0x1ef   : > { %v2030_v59 = vadd.f32 %v2012_v13, %v1935_v62  ;;  %v1869_v63 = vpop.f32.mrf.mxu0  ;;  %v1937_v18 = vpop.f32.mrf.mxu1 }
 0x1f0   : > { %v1938_v53 = vadd.f32 %v1937_v18, %v1869_v63  ;;  %v7485_v63 = vld [vmem:[%s8430_s14 + $0x163] sm:$0xff] }
 0x1f1   : > { %v9418_v19 = vadd.f32 %v2098_v44, %v2030_v59  ;;  %v7449_v44 = vld [vmem:[%s8430_s14 + $0x162] sm:$0xff] }
 0x1f2   : > { %7391 = vmatmul.msk.f32.gmra.mxu0 %vm246_vm1, %v9415_v28  ;;  %7409 = vmatmul.msk.f32.gmra.mxu1 %vm246_vm1, %v9421_v47 }
 0x1f3   : > { %7427 = vmatmul.msk.f32.gmra.mxu2 %vm246_vm1, %v7417_v36 }
 0x1f4   : > { %7445 = vmatmul.msk.f32.gmra.mxu3 %vm246_vm1, %v7435_v57  ;;  %v7467_v57 = vld [vmem:[%s8430_s14 + $0x212] sm:$0xff] }
 0x1f6   : > { %v2015_v34 = vpop.f32.mrf.mxu2  ;;  %v2101_v52 = vpop.f32.mrf.mxu3 }
 0x1f7   : > { %v2031_v38 = vadd.f32 %v2015_v34, %v1938_v53  ;;  %v1872_v26 = vpop.f32.mrf.mxu0  ;;  %v1940_v40 = vpop.f32.mrf.mxu1  ;;  %v7503_v53 = vld [vmem:[%s8430_s14 + $0x213] sm:$0xff] }
 0x1f8   : > { %v1941_v2 = vadd.f32 %v1940_v40, %v1872_v26  ;;  %v11370_v34 = vld [vmem:[#allocation9_spill] sm:$0xff] }
 0x1f9   : > { %v9449_v29 = vadd.f32 %v2101_v52, %v2031_v38  ;;  %v9511_v40 = vld [vmem:[%s8430_s14 + $0x173] sm:$0xff] }
 0x1fa   : > { %7392 = vmatmul.msk.f32.gmra.mxu0 %vm246_vm1, %v9443_v46  ;;  %7410 = vmatmul.msk.f32.gmra.mxu1 %vm246_vm1, %v9452_v9 }
 0x1fb   : > { %7428 = vmatmul.msk.f32.gmra.mxu2 %vm246_vm1, %v7418_v7 }
 0x1fc   : > { %7446 = vmatmul.msk.f32.gmra.mxu3 %vm246_vm1, %v7436_v25 }
 0x1fe   : > { %v2018_v35 = vpop.f32.mrf.mxu2  ;;  %v2104_v23 = vpop.f32.mrf.mxu3 }
 0x1ff   : > { %v2032_v4 = vadd.f32 %v2018_v35, %v1941_v2  ;;  %v1875_v12 = vpop.f32.mrf.mxu0  ;;  %v1943_v32 = vpop.f32.mrf.mxu1  ;;  %v7468_v2 = vld [vmem:[%s8430_s14 + $0x222] sm:$0xff] }
 0x200   : > { %v1944_v49 = vadd.f32 %v1943_v32, %v1875_v12  ;;  %v11372_v32 = vld [vmem:[#allocation12_spill] sm:$0xff] }
 0x201   : > { %v9466_v17 = vadd.f32 %v2104_v23, %v2032_v4  ;;  %v9518_v23 = vld [vmem:[%s8430_s14 + $0x223] sm:$0xff] }
 0x202   : > { %7393 = vmatmul.msk.f32.gmra.mxu0 %vm246_vm1, %v9463_v30  ;;  %7411 = vmatmul.msk.f32.gmra.mxu1 %vm246_vm1, %v9469_v37 }
 0x203   : > { %7429 = vmatmul.msk.f32.gmra.mxu2 %vm246_vm1, %v7419_v15 }
 0x204   : > { %7447 = vmatmul.msk.f32.gmra.mxu3 %vm246_vm1, %v7437_v54 }
 0x206   : > { %v2021_v21 = vpop.f32.mrf.mxu2  ;;  %v2107_v8 = vpop.f32.mrf.mxu3 }
 0x207   : > { %v2033_v24 = vadd.f32 %v2021_v21, %v1944_v49  ;;  %v1878_v42 = vpop.f32.mrf.mxu0  ;;  %v1946_v6 = vpop.f32.mrf.mxu1 }
 0x208   : > { %v1947_v27 = vadd.f32 %v1946_v6, %v1878_v42  ;;  %v9532_v42 = vld [vmem:[%s8430_s14 + $0x183] sm:$0xff]  ;;  %v7469_v6 = vld [vmem:[%s8430_s14 + $0x232] sm:$0xff] }
 0x209   : > { %v9482_v10 = vadd.f32 %v2107_v8, %v2033_v24  ;;  %v7451_v8 = vld [vmem:[%s8430_s14 + $0x182] sm:$0xff] }
 0x20a   : > { %7394 = vmatmul.msk.f32.gmra.mxu0 %vm246_vm1, %v9479_v22  ;;  %7412 = vmatmul.msk.f32.gmra.mxu1 %vm246_vm1, %v9485_v0 }
 0x20b   : > { %7430 = vmatmul.msk.f32.gmra.mxu2 %vm246_vm1, %v7420_v16 }
 0x20c   : > { %7448 = vmatmul.msk.f32.gmra.mxu3 %vm246_vm1, %v7438_v39 }
 0x20e   : > { %v2024_v41 = vpop.f32.mrf.mxu2  ;;  %v2110_v13 = vpop.f32.mrf.mxu3 }
 0x20f   : > { %v2034_v62 = vadd.f32 %v2024_v41, %v1947_v27  ;;  %v2175_v59 = vpop.f32.mrf.mxu0  ;;  %v2261_v18 = vpop.f32.mrf.mxu1  ;;  %v9539_v41 = vld [vmem:[%s8430_s14 + $0x233] sm:$0xff] }
 0x210   : > { %v2199_v1 = vadd.f32 %v2175_v59, %v9370_v3 }
 0x211   : > { %v9496_v36 = vadd.f32 %v2110_v13, %v2034_v62 }
 0x212   : > { %7459 = vmatmul.msk.f32.vlgmr.msra.gmra.mxu0 %vm246_vm1, %v7449_v44  ;;  %7477 = vmatmul.msk.f32.vlgmr.msra.gmra.mxu1 %vm246_vm1, %v7467_v57  ;;  %v2285_v43 = vadd.f32 %v2261_v18, %v2199_v1  ;;  %v9549_v18 = vld [vmem:[%s8430_s14 + $0x193] sm:$0xff]  ;;  %v7470_v1 = vld [vmem:[%s8430_s14 + $0x242] sm:$0xff] }
 0x213   : > { %7495 = vmatmul.msk.f32.vlgmr.msra.gmra.mxu2 %vm246_vm1, %v7485_v63  ;;  %v7452_v63 = vld [vmem:[%s8430_s14 + $0x192] sm:$0xff] }
 0x214   : > { %7513 = vmatmul.msk.f32.vlgmr.msra.gmra.mxu3 %vm246_vm1, %v7503_v53 }
 0x215   : > { %v6792_v51 = vpop.permute.xlu2 %6791 }
 0x216   : > { %v9507_v38 = vsel %vm246_vm1, %v11370_v34, %v6792_v51  ;;  %v2347_v52 = vpop.f32.mrf.mxu2  ;;  %v2433_v26 = vpop.f32.mrf.mxu3  ;;  %v9556_v51 = vld [vmem:[%s8430_s14 + $0x243] sm:$0xff] }
 0x217   : > { %11371 = vst [vmem:[#allocation8_spill] sm:$0xff] %v9507_v38  ;;  %v2371_v3 = vadd.f32 %v2347_v52, %v2285_v43  ;;  %v2178_v7 = vpop.f32.mrf.mxu0  ;;  %v2264_v25 = vpop.f32.mrf.mxu1  ;;  %v9740_v38 = vld [vmem:[%s8430_s14 + $0x51] sm:$0xff] }
 0x218   : > { %v2200_v35 = vadd.f32 %v2178_v7, %v9386_v55  ;;  %v7453_v7 = vld [vmem:[%s8430_s14 + $0x1a2] sm:$0xff]  ;;  %11378 = vst [vmem:[#allocation9_spill] sm:$0xff] %v9740_v38 }
 0x219   : > { %v9515_v4 = vadd.f32 %v2433_v26, %v2371_v3 }
 0x21a   : > { %7460 = vmatmul.msk.f32.gmra.mxu0 %vm246_vm1, %v7450_v14  ;;  %7478 = vmatmul.msk.f32.gmra.mxu1 %vm246_vm1, %v7468_v2  ;;  %v2286_v12 = vadd.f32 %v2264_v25, %v2200_v35  ;;  %v9566_v14 = vld [vmem:[%s8430_s14 + $0x1a3] sm:$0xff]  ;;  %v7471_v2 = vld [vmem:[%s8430_s14 + $0x252] sm:$0xff] }
 0x21b   : > { %7496 = vmatmul.msk.f32.gmra.mxu2 %vm246_vm1, %v9511_v40 }
 0x21c   : > { %7514 = vmatmul.msk.f32.gmra.mxu3 %vm246_vm1, %v9518_v23 }
 0x21d   : > { %v6794_v15 = vpop.permute.xlu2 %6793 }
 0x21e   : > { %v9528_v55 = vsel %vm246_vm1, %v11372_v32, %v6794_v15  ;;  %v2350_v54 = vpop.f32.mrf.mxu2  ;;  %v9573_v15 = vld [vmem:[%s8430_s14 + $0x253] sm:$0xff] }
 0x21f   : > { %11373 = vst [vmem:[#allocation10_spill] sm:$0xff] %v9528_v55  ;;  %v2372_v49 = vadd.f32 %v2350_v54, %v2286_v12  ;;  %v2181_v21 = vpop.f32.mrf.mxu0  ;;  %v2436_v24 = vpop.f32.mrf.mxu3  ;;  %v7605_v32 = vld [vmem:[%s11304_s3 + $0x58] sm:$0xf]  ;;  %v7623_v54 = vld [vmem:[%s11304_s3 + $0x5c] sm:$0xf] }
 0x220   : > { %v2267_v16 = vpop.f32.mrf.mxu1  ;;  %v2201_v39 = vadd.f32 %v2181_v21, %v9402_v58  ;;  %7606 = vmatpush.msk.msra.mxu2 %vm271_vm0, %v7605_v32  ;;  %7624 = vmatpush.msk.msra.mxu3 %vm271_vm0, %v7623_v54 }
 0x221   : > { %v9536_v27 = vadd.f32 %v2436_v24, %v2372_v49 }
 0x222   : > { %7461 = vmatmul.msk.f32.gmra.mxu0 %vm246_vm1, %v7451_v8  ;;  %7479 = vmatmul.msk.f32.gmra.mxu1 %vm246_vm1, %v7469_v6  ;;  %v2287_v62 = vadd.f32 %v2267_v16, %v2201_v39  ;;  %v7454_v6 = vld [vmem:[%s8430_s14 + $0x1b2] sm:$0xff] }
 0x223   : > { %7497 = vmatmul.msk.f32.gmra.mxu2 %vm246_vm1, %v9532_v42  ;;  %v9595_v39 = vld [vmem:[%s8430_s14 + $0x1b3] sm:$0xff] }
 0x224   : > { %7515 = vmatmul.msk.f32.gmra.mxu3 %vm246_vm1, %v9539_v41 }
 0x226   : > { %v2353_v13 = vpop.f32.mrf.mxu2 }
 0x227   : > { %v2373_v59 = vadd.f32 %v2353_v13, %v2287_v62  ;;  %v2184_v44 = vpop.f32.mrf.mxu0  ;;  %v2439_v58 = vpop.f32.mrf.mxu3  ;;  %v7587_v62 = vld [vmem:[%s11304_s3 + $0x54] sm:$0xf] }
 0x228   : > { %v2270_v57 = vpop.f32.mrf.mxu1  ;;  %v2202_v53 = vadd.f32 %v2184_v44, %v9418_v19  ;;  %7588 = vmatpush.msk.msra.mxu1 %vm271_vm0, %v7587_v62  ;;  %v9640_v62 = vld [vmem:[%s8430_s14 + $0x283] sm:$0xff] }
 0x229   : > { %v9553_v43 = vadd.f32 %v2439_v58, %v2373_v59  ;;  %v7472_v59 = vld [vmem:[%s8430_s14 + $0x262] sm:$0xff] }
 0x22a   : > { %7462 = vmatmul.msk.f32.gmra.mxu0 %vm246_vm1, %v7452_v63  ;;  %7480 = vmatmul.msk.f32.gmra.mxu1 %vm246_vm1, %v7470_v1  ;;  %v2288_v34 = vadd.f32 %v2270_v57, %v2202_v53  ;;  %v9606_v63 = vld [vmem:[%s8430_s14 + $0x263] sm:$0xff] }
 0x22b   : > { %7498 = vmatmul.msk.f32.gmra.mxu2 %vm246_vm1, %v9549_v18 }
 0x22c   : > { %7516 = vmatmul.msk.f32.gmra.mxu3 %vm246_vm1, %v9556_v51 }
 0x22e   : > { %v2356_v52 = vpop.f32.mrf.mxu2 }
 0x22f   : > { %v2374_v26 = vadd.f32 %v2356_v52, %v2288_v34  ;;  %v2187_v3 = vpop.f32.mrf.mxu0  ;;  %v2442_v19 = vpop.f32.mrf.mxu3  ;;  %v7455_v52 = vld [vmem:[%s8430_s14 + $0x1c2] sm:$0xff] }
 0x230   : > { %v2273_v25 = vpop.f32.mrf.mxu1  ;;  %v2203_v35 = vadd.f32 %v2187_v3, %v9449_v29  ;;  %v7577_v29 = vld [vmem:[%s11304_s3 + $0x50] sm:$0xf] }
 0x231   : > { %v9570_v12 = vadd.f32 %v2442_v19, %v2374_v26  ;;  %7578 = vmatpush.msk.msra.mxu0 %vm271_vm0, %v7577_v29  ;;  %v9616_v26 = vld [vmem:[%s8430_s14 + $0x1c3] sm:$0xff]  ;;  %v7473_v19 = vld [vmem:[%s8430_s14 + $0x272] sm:$0xff] }
 0x232   : > { %7463 = vmatmul.msk.f32.gmra.mxu0 %vm246_vm1, %v7453_v7  ;;  %7481 = vmatmul.msk.f32.gmra.mxu1 %vm246_vm1, %v7471_v2  ;;  %v2289_v49 = vadd.f32 %v2273_v25, %v2203_v35  ;;  %v9623_v2 = vld [vmem:[%s8430_s14 + $0x273] sm:$0xff] }
 0x233   : > { %7499 = vmatmul.msk.f32.gmra.mxu2 %vm246_vm1, %v9566_v14 }
 0x234   : > { %7517 = vmatmul.msk.f32.gmra.mxu3 %vm246_vm1, %v9573_v15 }
 0x236   : > { %v2359_v21 = vpop.f32.mrf.mxu2 }
 0x237   : > { %v2375_v24 = vadd.f32 %v2359_v21, %v2289_v49  ;;  %v2190_v8 = vpop.f32.mrf.mxu0  ;;  %v2445_v16 = vpop.f32.mrf.mxu3  ;;  %v7456_v49 = vld [vmem:[%s8430_s14 + $0x1d2] sm:$0xff] }
 0x238   : > { %v2276_v13 = vpop.f32.mrf.mxu1  ;;  %v2204_v44 = vadd.f32 %v2190_v8, %v9466_v17  ;;  %v9633_v21 = vld [vmem:[%s8430_s14 + $0x1d3] sm:$0xff]  ;;  %v7474_v8 = vld [vmem:[%s8430_s14 + $0x282] sm:$0xff] }
 0x239   : > { %v9603_v58 = vadd.f32 %v2445_v16, %v2375_v24 }
 0x23a   : > { %7464 = vmatmul.msk.f32.gmra.mxu0 %vm246_vm1, %v7454_v6  ;;  %7482 = vmatmul.msk.f32.gmra.mxu1 %vm246_vm1, %v7472_v59  ;;  %v2290_v57 = vadd.f32 %v2276_v13, %v2204_v44 }
 0x23b   : > { %7500 = vmatmul.msk.f32.gmra.mxu2 %vm246_vm1, %v9595_v39 }
 0x23c   : > { %7518 = vmatmul.msk.f32.gmra.mxu3 %vm246_vm1, %v9606_v63 }
 0x23e   : > { %v2362_v1 = vpop.f32.mrf.mxu2 }
 0x23f   : > { %v2376_v53 = vadd.f32 %v2362_v1, %v2290_v57  ;;  %v2193_v34 = vpop.f32.mrf.mxu0  ;;  %v2448_v17 = vpop.f32.mrf.mxu3  ;;  %v7521_v1 = vld [vmem:[%s8430_s14 + $0x10] sm:$0xff] }
 0x240   : > { %v2279_v3 = vpop.f32.mrf.mxu1  ;;  %v2205_v7 = vadd.f32 %v2193_v34, %v9482_v10  ;;  %v7539_v34 = vld [vmem:[%s8430_s14 + $0xc0] sm:$0xff] }
 0x241   : > { %v9620_v25 = vadd.f32 %v2448_v17, %v2376_v53 }
 0x242   : > { %7465 = vmatmul.msk.f32.gmra.mxu0 %vm246_vm1, %v7455_v52  ;;  %7483 = vmatmul.msk.f32.gmra.mxu1 %vm246_vm1, %v7473_v19  ;;  %v2291_v35 = vadd.f32 %v2279_v3, %v2205_v7  ;;  %v8272_v3 = vld [vmem:[%s8430_s14 + $0x11] sm:$0xff]  ;;  %v8273_v19 = vld [vmem:[%s8430_s14 + $0xc1] sm:$0xff] }
 0x243   : > { %7501 = vmatmul.msk.f32.gmra.mxu2 %vm246_vm1, %v9616_v26 }
 0x244   : > { %7519 = vmatmul.msk.f32.gmra.mxu3 %vm246_vm1, %v9623_v2 }
 0x246   : > { %v2365_v32 = vpop.f32.mrf.mxu2 }
 0x247   : > { %v2377_v29 = vadd.f32 %v2365_v32, %v2291_v35  ;;  %v2196_v54 = vpop.f32.mrf.mxu0  ;;  %v2451_v10 = vpop.f32.mrf.mxu3 }
 0x248   : > { %v2282_v24 = vpop.f32.mrf.mxu1  ;;  %v2206_v16 = vadd.f32 %v2196_v54, %v9496_v36 }
 0x249   : > { %v9637_v6 = vadd.f32 %v2451_v10, %v2377_v29  ;;  %v9660_v10 = vld [vmem:[%s8430_s14 + $0x20] sm:$0xff] }
 0x24a   : > { %7466 = vmatmul.msk.f32.gmra.mxu0 %vm246_vm1, %v7456_v49  ;;  %7484 = vmatmul.msk.f32.gmra.mxu1 %vm246_vm1, %v7474_v8  ;;  %v2292_v13 = vadd.f32 %v2282_v24, %v2206_v16  ;;  %v9663_v49 = vld [vmem:[%s8430_s14 + $0xd0] sm:$0xff]  ;;  %v9671_v16 = vld [vmem:[%s8430_s14 + $0x21] sm:$0xff] }
 0x24b   : > { %7502 = vmatmul.msk.f32.gmra.mxu2 %vm246_vm1, %v9633_v21 }
 0x24c   : > { %7520 = vmatmul.msk.f32.gmra.mxu3 %vm246_vm1, %v9640_v62 }
 0x24e   : > { %v2368_v59 = vpop.f32.mrf.mxu2 }
 0x24f   : > { %v2378_v44 = vadd.f32 %v2368_v59, %v2292_v13  ;;  %v2454_v36 = vpop.f32.mrf.mxu3  ;;  %v2520_v57 = vpop.f32.mrf.mxu0  ;;  %v9678_v13 = vld [vmem:[%s8430_s14 + $0xd1] sm:$0xff] }
 0x250   : > { %v2607_v53 = vpop.f32.mrf.mxu1  ;;  %v2544_v52 = vadd.f32 %v2520_v57, %v9515_v4 }
 0x251   : > { %v9650_v17 = vadd.f32 %v2454_v36, %v2378_v44 }
 0x252   : > { %7531 = vmatmul.msk.f32.vlgmr.msrb.gmra.mxu0 %vm246_vm1, %v7521_v1  ;;  %7549 = vmatmul.msk.f32.vlgmr.msrb.gmra.mxu1 %vm246_vm1, %v7539_v34  ;;  %v2631_v7 = vadd.f32 %v2607_v53, %v2544_v52  ;;  %v9683_v1 = vld [vmem:[%s8430_s14 + $0x30] sm:$0xff]  ;;  %v9686_v34 = vld [vmem:[%s8430_s14 + $0xe0] sm:$0xff] }
 0x253   : > { %7559 = vmatmul.msk.f32.vlgmr.msrb.gmra.mxu2 %vm246_vm1, %v8272_v3 }
 0x254   : > { %7569 = vmatmul.msk.f32.vlgmr.msrb.gmra.mxu3 %vm246_vm1, %v8273_v19  ;;  %v9694_v19 = vld [vmem:[%s8430_s14 + $0x31] sm:$0xff] }
 0x256   : > { %v2693_v35 = vpop.f32.mrf.mxu2 }
 0x257   : > { %v2717_v32 = vadd.f32 %v2693_v35, %v2631_v7  ;;  %v2523_v29 = vpop.f32.mrf.mxu0  ;;  %v2779_v54 = vpop.f32.mrf.mxu3  ;;  %v9701_v7 = vld [vmem:[%s8430_s14 + $0xe1] sm:$0xff] }
 0x258   : > { %v2610_v4 = vpop.f32.mrf.mxu1  ;;  %v2545_v24 = vadd.f32 %v2523_v29, %v9536_v27 }
 0x259   : > { %v9666_v8 = vadd.f32 %v2779_v54, %v2717_v32 }
 0x25a   : > { %7532 = vmatmul.msk.f32.gmra.mxu0 %vm246_vm1, %v9660_v10  ;;  %7550 = vmatmul.msk.f32.gmra.mxu1 %vm246_vm1, %v9663_v49  ;;  %v2632_v27 = vadd.f32 %v2610_v4, %v2545_v24  ;;  %v9706_v4 = vld [vmem:[%s8430_s14 + $0x40] sm:$0xff] }
 0x25b   : > { %7560 = vmatmul.msk.f32.gmra.mxu2 %vm246_vm1, %v9671_v16 }
 0x25c   : > { %7570 = vmatmul.msk.f32.gmra.mxu3 %vm246_vm1, %v9678_v13 }
 0x25e   : > { %v2696_v59 = vpop.f32.mrf.mxu2 }
 0x25f   : > { %v2718_v44 = vadd.f32 %v2696_v59, %v2632_v27  ;;  %v2526_v36 = vpop.f32.mrf.mxu0  ;;  %v2782_v57 = vpop.f32.mrf.mxu3  ;;  %v9709_v27 = vld [vmem:[%s8430_s14 + $0xf0] sm:$0xff] }
 0x260   : > { %v2613_v53 = vpop.f32.mrf.mxu1  ;;  %v2546_v52 = vadd.f32 %v2526_v36, %v9553_v43  ;;  %11374 = vst [vmem:[#allocation11_spill] sm:$0xff] %v9709_v27  ;;  %v9717_v36 = vld [vmem:[%s8430_s14 + $0x41] sm:$0xff] }
 0x261   : > { %v9689_v3 = vadd.f32 %v2782_v57, %v2718_v44  ;;  %v9724_v57 = vld [vmem:[%s8430_s14 + $0xf1] sm:$0xff] }
 0x262   : > { %7533 = vmatmul.msk.f32.gmra.mxu0 %vm246_vm1, %v9683_v1  ;;  %7551 = vmatmul.msk.f32.gmra.mxu1 %vm246_vm1, %v9686_v34  ;;  %v2633_v43 = vadd.f32 %v2613_v53, %v2546_v52  ;;  %11375 = vst [vmem:[#allocation14_spill] sm:$0xff] %v9724_v57 }
 0x263   : > { %7561 = vmatmul.msk.f32.gmra.mxu2 %vm246_vm1, %v9694_v19 }
 0x264   : > { %7571 = vmatmul.msk.f32.gmra.mxu3 %vm246_vm1, %v9701_v7 }
 0x266   : > { %v2699_v35 = vpop.f32.mrf.mxu2 }
 0x267   : > { %v2719_v32 = vadd.f32 %v2699_v35, %v2633_v43  ;;  %v2529_v29 = vpop.f32.mrf.mxu0  ;;  %v2785_v54 = vpop.f32.mrf.mxu3 }
 0x268   : > { %v2616_v24 = vpop.f32.mrf.mxu1  ;;  %v2547_v59 = vadd.f32 %v2529_v29, %v9570_v12 }
 0x269   : > { %v9712_v44 = vadd.f32 %v2785_v54, %v2719_v32  ;;  %v9729_v32 = vld [vmem:[%s8430_s14 + $0x50] sm:$0xff]  ;;  %v9732_v54 = vld [vmem:[%s8430_s14 + $0x100] sm:$0xff] }
 0x26a   : > { %7534 = vmatmul.msk.f32.gmra.mxu0 %vm246_vm1, %v9706_v4  ;;  %7552 = vmatmul.msk.f32.gmra.mxu1 %vm246_vm1, %v9709_v27  ;;  %v2634_v12 = vadd.f32 %v2616_v24, %v2547_v59  ;;  %11376 = vst [vmem:[#allocation3_spill] sm:$0xff] %v9729_v32  ;;  %v7669_v24 = vld [vmem:[%s11304_s3 + $0x68] sm:$0xf]  ;;  %v7641_v59 = vld [vmem:[%s11304_s3 + $0x60] sm:$0xf] }
 0x26b   : > { %7562 = vmatmul.msk.f32.gmra.mxu2 %vm246_vm1, %v9717_v36  ;;  %11377 = vst [vmem:[#allocation2_spill] sm:$0xff] %v9732_v54  ;;  %7642 = vmatpush.msk.msrb.mxu0 %vm271_vm0, %v7641_v59  ;;  %v9779_v59 = vld [vmem:[%s8430_s14 + $0x61] sm:$0xff] }
 0x26c   : > { %7572 = vmatmul.msk.f32.gmra.mxu3 %vm246_vm1, %v9724_v57  ;;  %7670 = vmatpush.msk.msrb.mxu2 %vm271_vm0, %v7669_v24  ;;  %11382 = vst [vmem:[#allocation18_spill] sm:$0xff] %v9779_v59  ;;  %v7615_v57 = vld [vmem:[%s8430_s14 + $0xc3] sm:$0xff] }
 0x26d   : > { %v9857_v27 = vld [vmem:[%s8430_s14 + $0x22] sm:$0xff] }
 0x26e   : > { %v2702_v53 = vpop.f32.mrf.mxu2  ;;  %11394 = vst [vmem:[#allocation30_spill] sm:$0xff] %v9857_v27 }
 0x26f   : > { %v2720_v52 = vadd.f32 %v2702_v53, %v2634_v12  ;;  %v2532_v43 = vpop.f32.mrf.mxu0  ;;  %v2788_v35 = vpop.f32.mrf.mxu3  ;;  %v7679_v12 = vld [vmem:[%s11304_s3 + $0x6c] sm:$0xf] }
 0x270   : > { %v2619_v29 = vpop.f32.mrf.mxu1  ;;  %v2548_v45 = vadd.f32 %v2532_v43, %v9603_v58  ;;  %v9751_v58 = vld [vmem:[%s8430_s14 + $0x101] sm:$0xff]  ;;  %7680 = vmatpush.msk.msrb.mxu3 %vm271_vm0, %v7679_v12  ;;  %v9786_v12 = vld [vmem:[%s8430_s14 + $0x111] sm:$0xff] }
 0x271   : > { %v9735_v55 = vadd.f32 %v2788_v35, %v2720_v52  ;;  %11379 = vst [vmem:[#allocation12_spill] sm:$0xff] %v9751_v58 }
 0x272   : > { %7535 = vmatmul.msk.f32.gmra.mxu0 %vm246_vm1, %v9729_v32  ;;  %7553 = vmatmul.msk.f32.gmra.mxu1 %vm246_vm1, %v9732_v54  ;;  %v2635_v53 = vadd.f32 %v2619_v29, %v2548_v45  ;;  %v7659_v54 = vld [vmem:[%s11304_s3 + $0x64] sm:$0xf]  ;;  %v9770_v32 = vld [vmem:[%s8430_s14 + $0x110] sm:$0xff]  ;;  %11383 = vst [vmem:[#allocation19_spill] sm:$0xff] %v9786_v12 }
 0x273   : > { %7563 = vmatmul.msk.f32.gmra.mxu2 %vm246_vm1, %v9740_v38  ;;  %11381 = vst [vmem:[#allocation17_spill] sm:$0xff] %v9770_v32  ;;  %7660 = vmatpush.msk.msrb.mxu1 %vm271_vm0, %v7659_v54 }
 0x274   : > { %7573 = vmatmul.msk.f32.gmra.mxu3 %vm246_vm1, %v9751_v58  ;;  %v9764_v58 = vld [vmem:[%s8430_s14 + $0x60] sm:$0xff] }
 0x275   : > { %11380 = vst [vmem:[#allocation16_spill] sm:$0xff] %v9764_v58 }
 0x276   : > { %v2705_v52 = vpop.f32.mrf.mxu2 }
 0x277   : > { %v2721_v43 = vadd.f32 %v2705_v52, %v2635_v53  ;;  %v2535_v35 = vpop.f32.mrf.mxu0  ;;  %v2791_v24 = vpop.f32.mrf.mxu3 }
 0x278   : > { %v2622_v38 = vpop.f32.mrf.mxu1  ;;  %v2549_v45 = vadd.f32 %v2535_v35, %v9620_v25  ;;  %v9791_v35 = vld [vmem:[%s8430_s14 + $0x70] sm:$0xff] }
 0x279   : > { %v9774_v29 = vadd.f32 %v2791_v24, %v2721_v43  ;;  %11384 = vst [vmem:[#allocation20_spill] sm:$0xff] %v9791_v35 }
 0x27a   : > { %7536 = vmatmul.msk.f32.gmra.mxu0 %vm246_vm1, %v9764_v58  ;;  %7554 = vmatmul.msk.f32.gmra.mxu1 %vm246_vm1, %v9770_v32  ;;  %v2636_v25 = vadd.f32 %v2622_v38, %v2549_v45  ;;  %v9794_v58 = vld [vmem:[%s8430_s14 + $0x120] sm:$0xff] }
 0x27b   : > { %7564 = vmatmul.msk.f32.gmra.mxu2 %vm246_vm1, %v9779_v59  ;;  %11385 = vst [vmem:[#allocation21_spill] sm:$0xff] %v9794_v58  ;;  %v9809_v38 = vld [vmem:[%s8430_s14 + $0x121] sm:$0xff] }
 0x27c   : > { %7574 = vmatmul.msk.f32.gmra.mxu3 %vm246_vm1, %v9786_v12  ;;  %v9802_v12 = vld [vmem:[%s8430_s14 + $0x71] sm:$0xff]  ;;  %11387 = vst [vmem:[#allocation23_spill] sm:$0xff] %v9809_v38 }
 0x27d   : > { %11386 = vst [vmem:[#allocation22_spill] sm:$0xff] %v9802_v12 }
 0x27e   : > { %v2708_v54 = vpop.f32.mrf.mxu2 }
 0x27f   : > { %v2722_v53 = vadd.f32 %v2708_v54, %v2636_v25  ;;  %v2538_v52 = vpop.f32.mrf.mxu0  ;;  %v2794_v43 = vpop.f32.mrf.mxu3 }
 0x280   : > { %v2625_v24 = vpop.f32.mrf.mxu1  ;;  %v2550_v32 = vadd.f32 %v2538_v52, %v9637_v6  ;;  %v9814_v52 = vld [vmem:[%s8430_s14 + $0x80] sm:$0xff] }
 0x281   : > { %v9797_v59 = vadd.f32 %v2794_v43, %v2722_v53  ;;  %11388 = vst [vmem:[#allocation24_spill] sm:$0xff] %v9814_v52 }
 0x282   : > { %7537 = vmatmul.msk.f32.gmra.mxu0 %vm246_vm1, %v9791_v35  ;;  %7555 = vmatmul.msk.f32.gmra.mxu1 %vm246_vm1, %v9794_v58  ;;  %v2637_v6 = vadd.f32 %v2625_v24, %v2550_v32  ;;  %v9817_v35 = vld [vmem:[%s8430_s14 + $0x130] sm:$0xff]  ;;  %v9825_v32 = vld [vmem:[%s8430_s14 + $0x81] sm:$0xff] }
 0x283   : > { %7565 = vmatmul.msk.f32.gmra.mxu2 %vm246_vm1, %v9802_v12  ;;  %11389 = vst [vmem:[#allocation25_spill] sm:$0xff] %v9817_v35  ;;  %v9832_v24 = vld [vmem:[%s8430_s14 + $0x131] sm:$0xff] }
 0x284   : > { %7575 = vmatmul.msk.f32.gmra.mxu3 %vm246_vm1, %v9809_v38  ;;  %11390 = vst [vmem:[#allocation26_spill] sm:$0xff] %v9825_v32 }
 0x285   : > { %11391 = vst [vmem:[#allocation27_spill] sm:$0xff] %v9832_v24 }
 0x286   : > { %v2711_v45 = vpop.f32.mrf.mxu2 }
 0x287   : > { %v2723_v25 = vadd.f32 %v2711_v45, %v2637_v6  ;;  %v2541_v54 = vpop.f32.mrf.mxu0  ;;  %v2797_v53 = vpop.f32.mrf.mxu3 }
 0x288   : > { %v2628_v43 = vpop.f32.mrf.mxu1  ;;  %v2551_v12 = vadd.f32 %v2541_v54, %v9650_v17 }
 0x289   : > { %v9820_v58 = vadd.f32 %v2797_v53, %v2723_v25  ;;  %v7597_v53 = vld [vmem:[%s8430_s14 + $0x13] sm:$0xff] }
 0x28a   : > { %7538 = vmatmul.msk.f32.gmra.mxu0 %vm246_vm1, %v9814_v52  ;;  %7556 = vmatmul.msk.f32.gmra.mxu1 %vm246_vm1, %v9817_v35  ;;  %v2638_v17 = vadd.f32 %v2628_v43, %v2551_v12  ;;  %v8288_v35 = vld [vmem:[%s8430_s14 + $0x12] sm:$0xff]  ;;  %v8289_v12 = vld [vmem:[%s8430_s14 + $0xc2] sm:$0xff] }
 0x28b   : > { %7566 = vmatmul.msk.f32.gmra.mxu2 %vm246_vm1, %v9825_v32 }
 0x28c   : > { %7576 = vmatmul.msk.f32.gmra.mxu3 %vm246_vm1, %v9832_v24 }
 0x28e   : > { %v2714_v6 = vpop.f32.mrf.mxu2 }
 0x28f   : > { %v2724_v45 = vadd.f32 %v2714_v6, %v2638_v17  ;;  %v2800_v25 = vpop.f32.mrf.mxu3  ;;  %v2865_v54 = vpop.f32.mrf.mxu0 }
 0x290   : > { %v2951_v52 = vpop.f32.mrf.mxu1  ;;  %v2889_v32 = vadd.f32 %v2865_v54, %v9666_v8  ;;  %v9848_v8 = vld [vmem:[%s8430_s14 + $0x23] sm:$0xff] }
 0x291   : > { %v9837_v38 = vadd.f32 %v2800_v25, %v2724_v45  ;;  %11392 = vst [vmem:[#allocation28_spill] sm:$0xff] %v9848_v8 }
 0x292   : > { %7579 = vmatmul.msk.f32.vlgmr.msra.gmra.mxu0 %vm246_vm1, %v8288_v35  ;;  %7589 = vmatmul.msk.f32.vlgmr.msra.gmra.mxu1 %vm246_vm1, %v8289_v12  ;;  %v2975_v43 = vadd.f32 %v2951_v52, %v2889_v32 }
 0x293   : > { %7607 = vmatmul.msk.f32.vlgmr.msra.gmra.mxu2 %vm246_vm1, %v7597_v53  ;;  %v9854_v53 = vld [vmem:[%s8430_s14 + $0xd3] sm:$0xff] }
 0x294   : > { %7625 = vmatmul.msk.f32.vlgmr.msra.gmra.mxu3 %vm246_vm1, %v7615_v57  ;;  %11393 = vst [vmem:[#allocation29_spill] sm:$0xff] %v9854_v53  ;;  %v9864_v57 = vld [vmem:[%s8430_s14 + $0xd2] sm:$0xff] }
 0x295   : > { %11395 = vst [vmem:[#allocation31_spill] sm:$0xff] %v9864_v57 }
 0x296   : > { %v3037_v17 = vpop.f32.mrf.mxu2 }
 0x297   : > { %v3061_v6 = vadd.f32 %v3037_v17, %v2975_v43  ;;  %v2868_v45 = vpop.f32.mrf.mxu0  ;;  %v3123_v25 = vpop.f32.mrf.mxu3  ;;  %v9871_v17 = vld [vmem:[%s8430_s14 + $0x33] sm:$0xff] }
 0x298   : > { %v2954_v54 = vpop.f32.mrf.mxu1  ;;  %v2890_v24 = vadd.f32 %v2868_v45, %v9689_v3  ;;  %11396 = vst [vmem:[#allocation32_spill] sm:$0xff] %v9871_v17 }
 0x299   : > { %v9851_v35 = vadd.f32 %v3123_v25, %v3061_v6 }
 0x29a   : > { %7580 = vmatmul.msk.f32.gmra.mxu0 %vm246_vm1, %v9857_v27  ;;  %7590 = vmatmul.msk.f32.gmra.mxu1 %vm246_vm1, %v9864_v57  ;;  %v2976_v3 = vadd.f32 %v2954_v54, %v2890_v24  ;;  %v9880_v57 = vld [vmem:[%s8430_s14 + $0x32] sm:$0xff]  ;;  %v9887_v24 = vld [vmem:[%s8430_s14 + $0xe2] sm:$0xff] }
 0x29b   : > { %7608 = vmatmul.msk.f32.gmra.mxu2 %vm246_vm1, %v9848_v8  ;;  %v9877_v8 = vld [vmem:[%s8430_s14 + $0xe3] sm:$0xff]  ;;  %11398 = vst [vmem:[#allocation34_spill] sm:$0xff] %v9880_v57  ;;  %v9926_v27 = vld [vmem:[%s8430_s14 + $0x52] sm:$0xff] }
 0x29c   : > { %7626 = vmatmul.msk.f32.gmra.mxu3 %vm246_vm1, %v9854_v53  ;;  %11397 = vst [vmem:[#allocation33_spill] sm:$0xff] %v9877_v8  ;;  %v9900_v53 = vld [vmem:[%s8430_s14 + $0xf3] sm:$0xff] }
 0x29d   : > { %11399 = vst [vmem:[#allocation35_spill] sm:$0xff] %v9887_v24 }
 0x29e   : > { %v3040_v52 = vpop.f32.mrf.mxu2  ;;  %11404 = vst [vmem:[#allocation40_spill] sm:$0xff] %v9926_v27 }
 0x29f   : > { %v3062_v32 = vadd.f32 %v3040_v52, %v2976_v3  ;;  %v2871_v12 = vpop.f32.mrf.mxu0  ;;  %v3126_v43 = vpop.f32.mrf.mxu3 }
 0x2a0   : > { %v2957_v6 = vpop.f32.mrf.mxu1  ;;  %v2891_v45 = vadd.f32 %v2871_v12, %v9712_v44  ;;  %v9894_v12 = vld [vmem:[%s8430_s14 + $0x43] sm:$0xff] }
 0x2a1   : > { %v9874_v25 = vadd.f32 %v3126_v43, %v3062_v32  ;;  %11400 = vst [vmem:[#allocation36_spill] sm:$0xff] %v9894_v12 }
 0x2a2   : > { %7581 = vmatmul.msk.f32.gmra.mxu0 %vm246_vm1, %v9880_v57  ;;  %7591 = vmatmul.msk.f32.gmra.mxu1 %vm246_vm1, %v9887_v24  ;;  %v2977_v44 = vadd.f32 %v2957_v6, %v2891_v45  ;;  %v9903_v24 = vld [vmem:[%s8430_s14 + $0x42] sm:$0xff]  ;;  %v9910_v6 = vld [vmem:[%s8430_s14 + $0xf2] sm:$0xff] }
 0x2a3   : > { %7609 = vmatmul.msk.f32.gmra.mxu2 %vm246_vm1, %v9871_v17  ;;  %11401 = vst [vmem:[#allocation37_spill] sm:$0xff] %v9903_v24 }
 0x2a4   : > { %7627 = vmatmul.msk.f32.gmra.mxu3 %vm246_vm1, %v9877_v8  ;;  %v9923_v8 = vld [vmem:[%s8430_s14 + $0x103] sm:$0xff] }
 0x2a5   : > { %11403 = vst [vmem:[#allocation39_spill] sm:$0xff] %v9923_v8 }
 0x2a6   : > { %v3043_v54 = vpop.f32.mrf.mxu2 }
 0x2a7   : > { %v3063_v3 = vadd.f32 %v3043_v54, %v2977_v44  ;;  %v2874_v52 = vpop.f32.mrf.mxu0  ;;  %v3129_v32 = vpop.f32.mrf.mxu3 }
 0x2a8   : > { %v2960_v43 = vpop.f32.mrf.mxu1  ;;  %v2892_v17 = vadd.f32 %v2874_v52, %v9735_v55  ;;  %v9917_v52 = vld [vmem:[%s8430_s14 + $0x53] sm:$0xff] }
 0x2a9   : > { %v9897_v57 = vadd.f32 %v3129_v32, %v3063_v3  ;;  %11402 = vst [vmem:[#allocation38_spill] sm:$0xff] %v9917_v52 }
 0x2aa   : > { %7582 = vmatmul.msk.f32.gmra.mxu0 %vm246_vm1, %v9903_v24  ;;  %7592 = vmatmul.msk.f32.gmra.mxu1 %vm246_vm1, %v9910_v6  ;;  %v2978_v55 = vadd.f32 %v2960_v43, %v2892_v17  ;;  %v7717_v17 = vld [vmem:[%s11304_s3 + $0x78] sm:$0xf]  ;;  %v9936_v43 = vld [vmem:[%s8430_s14 + $0x102] sm:$0xff] }
 0x2ab   : > { %7610 = vmatmul.msk.f32.gmra.mxu2 %vm246_vm1, %v9894_v12  ;;  %11405 = vst [vmem:[#allocation41_spill] sm:$0xff] %v9936_v43 }
 0x2ac   : > { %7628 = vmatmul.msk.f32.gmra.mxu3 %vm246_vm1, %v9900_v53  ;;  %7718 = vmatpush.msk.msra.mxu2 %vm271_vm0, %v7717_v17 }
 0x2ae   : > { %v3046_v45 = vpop.f32.mrf.mxu2 }
 0x2af   : > { %v3064_v44 = vadd.f32 %v3046_v45, %v2978_v55  ;;  %v2877_v54 = vpop.f32.mrf.mxu0  ;;  %v3132_v3 = vpop.f32.mrf.mxu3  ;;  %v7735_v55 = vld [vmem:[%s11304_s3 + $0x7c] sm:$0xf] }
 0x2b0   : > { %v2963_v32 = vpop.f32.mrf.mxu1  ;;  %v2893_v24 = vadd.f32 %v2877_v54, %v9774_v29  ;;  %v7689_v29 = vld [vmem:[%s11304_s3 + $0x70] sm:$0xf]  ;;  %7736 = vmatpush.msk.msra.mxu3 %vm271_vm0, %v7735_v55 }
 0x2b1   : > { %v9920_v12 = vadd.f32 %v3132_v3, %v3064_v44  ;;  %7690 = vmatpush.msk.msra.mxu0 %vm271_vm0, %v7689_v29 }
 0x2b2   : > { %7583 = vmatmul.msk.f32.gmra.mxu0 %vm246_vm1, %v9926_v27  ;;  %7593 = vmatmul.msk.f32.gmra.mxu1 %vm246_vm1, %v9936_v43  ;;  %v2979_v45 = vadd.f32 %v2963_v32, %v2893_v24  ;;  %v9959_v24 = vld [vmem:[%s8430_s14 + $0x62] sm:$0xff]  ;;  %v9966_v32 = vld [vmem:[%s8430_s14 + $0x112] sm:$0xff] }
 0x2b3   : > { %7611 = vmatmul.msk.f32.gmra.mxu2 %vm246_vm1, %v9917_v52 }
 0x2b4   : > { %7629 = vmatmul.msk.f32.gmra.mxu3 %vm246_vm1, %v9923_v8  ;;  %v7699_v8 = vld [vmem:[%s11304_s3 + $0x74] sm:$0xf] }
 0x2b5   : > { %7700 = vmatpush.msk.msra.mxu1 %vm271_vm0, %v7699_v8 }
 0x2b6   : > { %v3049_v44 = vpop.f32.mrf.mxu2 }
 0x2b7   : > { %v3065_v54 = vadd.f32 %v3049_v44, %v2979_v45  ;;  %v2880_v3 = vpop.f32.mrf.mxu0  ;;  %v3135_v17 = vpop.f32.mrf.mxu3 }
 0x2b8   : > { %v2966_v43 = vpop.f32.mrf.mxu1  ;;  %v2894_v52 = vadd.f32 %v2880_v3, %v9797_v59 }
 0x2b9   : > { %v9956_v27 = vadd.f32 %v3135_v17, %v3065_v54 }
 0x2ba   : > { %7584 = vmatmul.msk.f32.gmra.mxu0 %vm246_vm1, %v9959_v24  ;;  %7594 = vmatmul.msk.f32.gmra.mxu1 %vm246_vm1, %v9966_v32  ;;  %v2980_v59 = vadd.f32 %v2966_v43, %v2894_v52 }
 0x2bb   : > { %7612 = vmatmul.msk.f32.gmra.mxu2 %vm246_vm1, %v9326_v61  ;;  %v9976_v61 = vld [vmem:[%s8430_s14 + $0x72] sm:$0xff] }
 0x2bc   : > { %7630 = vmatmul.msk.f32.gmra.mxu3 %vm246_vm1, %v9331_v20  ;;  %11406 = vst [vmem:[#allocation42_spill] sm:$0xff] %v9976_v61  ;;  %v9983_v20 = vld [vmem:[%s8430_s14 + $0x122] sm:$0xff] }
 0x2be   : > { %v3052_v8 = vpop.f32.mrf.mxu2 }
 0x2bf   : > { %v3066_v29 = vadd.f32 %v3052_v8, %v2980_v59  ;;  %v2883_v55 = vpop.f32.mrf.mxu0  ;;  %v3138_v45 = vpop.f32.mrf.mxu3  ;;  %v9990_v8 = vld [vmem:[%s8430_s14 + $0x83] sm:$0xff] }
 0x2c0   : > { %v2969_v44 = vpop.f32.mrf.mxu1  ;;  %v2895_v54 = vadd.f32 %v2883_v55, %v9820_v58  ;;  %11407 = vst [vmem:[#allocation43_spill] sm:$0xff] %v9990_v8 }
 0x2c1   : > { %v9973_v3 = vadd.f32 %v3138_v45, %v3066_v29  ;;  %v9996_v45 = vld [vmem:[%s8430_s14 + $0x133] sm:$0xff] }
 0x2c2   : > { %7585 = vmatmul.msk.f32.gmra.mxu0 %vm246_vm1, %v9976_v61  ;;  %7595 = vmatmul.msk.f32.gmra.mxu1 %vm246_vm1, %v9983_v20  ;;  %v2981_v58 = vadd.f32 %v2969_v44, %v2895_v54  ;;  %11408 = vst [vmem:[#allocation44_spill] sm:$0xff] %v9996_v45  ;;  %v9999_v61 = vld [vmem:[%s8430_s14 + $0x82] sm:$0xff] }
 0x2c3   : > { %7613 = vmatmul.msk.f32.gmra.mxu2 %vm246_vm1, %v9344_v11 }
 0x2c4   : > { %7631 = vmatmul.msk.f32.gmra.mxu3 %vm246_vm1, %v9348_v50  ;;  %v10006_v50 = vld [vmem:[%s8430_s14 + $0x132] sm:$0xff] }
 0x2c6   : > { %v3055_v52 = vpop.f32.mrf.mxu2 }
 0x2c7   : > { %v3067_v43 = vadd.f32 %v3055_v52, %v2981_v58  ;;  %v2886_v17 = vpop.f32.mrf.mxu0  ;;  %v3141_v59 = vpop.f32.mrf.mxu3 }
 0x2c8   : > { %v2972_v29 = vpop.f32.mrf.mxu1  ;;  %v2896_v55 = vadd.f32 %v2886_v17, %v9837_v38 }
 0x2c9   : > { %v9993_v11 = vadd.f32 %v3141_v59, %v3067_v43 }
 0x2ca   : > { %7586 = vmatmul.msk.f32.gmra.mxu0 %vm246_vm1, %v9999_v61  ;;  %7596 = vmatmul.msk.f32.gmra.mxu1 %vm246_vm1, %v10006_v50  ;;  %v2982_v38 = vadd.f32 %v2972_v29, %v2896_v55  ;;  %v8305_v29 = vld [vmem:[%s8430_s14 + $0x221] sm:$0xff] }
 0x2cb   : > { %7614 = vmatmul.msk.f32.gmra.mxu2 %vm246_vm1, %v9990_v8  ;;  %v8304_v8 = vld [vmem:[%s8430_s14 + $0x171] sm:$0xff] }
 0x2cc   : > { %7632 = vmatmul.msk.f32.gmra.mxu3 %vm246_vm1, %v9996_v45 }
 0x2ce   : > { %v3058_v44 = vpop.f32.mrf.mxu2 }
 0x2cf   : > { %v3068_v54 = vadd.f32 %v3058_v44, %v2982_v38  ;;  %v3144_v58 = vpop.f32.mrf.mxu3  ;;  %v3209_v52 = vpop.f32.mrf.mxu0 }
 0x2d0   : > { %v3295_v43 = vpop.f32.mrf.mxu1  ;;  %v3233_v59 = vadd.f32 %v3209_v52, %v9851_v35 }
 0x2d1   : > { %v10012_v17 = vadd.f32 %v3144_v58, %v3068_v54 }
 0x2d2   : > { %7643 = vmatmul.msk.f32.vlgmr.msrb.gmra.mxu0 %vm246_vm1, %v9367_v31  ;;  %7661 = vmatmul.msk.f32.vlgmr.msrb.gmra.mxu1 %vm246_vm1, %v9373_v56  ;;  %v3319_v55 = vadd.f32 %v3295_v43, %v3233_v59  ;;  %v10029_v31 = vld [vmem:[%s8430_s14 + $0x181] sm:$0xff]  ;;  %v10036_v56 = vld [vmem:[%s8430_s14 + $0x231] sm:$0xff] }
 0x2d3   : > { %7671 = vmatmul.msk.f32.vlgmr.msrb.gmra.mxu2 %vm246_vm1, %v8304_v8 }
 0x2d4   : > { %7681 = vmatmul.msk.f32.vlgmr.msrb.gmra.mxu3 %vm246_vm1, %v8305_v29 }
 0x2d6   : > { %v3349_v38 = vpop.f32.mrf.mxu2 }
 0x2d7   : > { %v3373_v44 = vadd.f32 %v3349_v38, %v3319_v55  ;;  %v3212_v54 = vpop.f32.mrf.mxu0  ;;  %v3403_v58 = vpop.f32.mrf.mxu3 }
 0x2d8   : > { %v3298_v35 = vpop.f32.mrf.mxu1  ;;  %v3234_v52 = vadd.f32 %v3212_v54, %v9874_v25 }
 0x2d9   : > { %v10024_v45 = vadd.f32 %v3403_v58, %v3373_v44  ;;  %v10053_v44 = vld [vmem:[%s8430_s14 + $0x241] sm:$0xff] }
 0x2da   : > { %7644 = vmatmul.msk.f32.gmra.mxu0 %vm246_vm1, %v9383_v60  ;;  %7662 = vmatmul.msk.f32.gmra.mxu1 %vm246_vm1, %v9389_v33  ;;  %v3320_v25 = vadd.f32 %v3298_v35, %v3234_v52  ;;  %v10046_v33 = vld [vmem:[%s8430_s14 + $0x191] sm:$0xff] }
 0x2db   : > { %7672 = vmatmul.msk.f32.gmra.mxu2 %vm246_vm1, %v10029_v31 }
 0x2dc   : > { %7682 = vmatmul.msk.f32.gmra.mxu3 %vm246_vm1, %v10036_v56 }
 0x2de   : > { %v3352_v8 = vpop.f32.mrf.mxu2 }
 0x2df   : > { %v3374_v43 = vadd.f32 %v3352_v8, %v3320_v25  ;;  %v3215_v59 = vpop.f32.mrf.mxu0  ;;  %v3406_v29 = vpop.f32.mrf.mxu3 }
 0x2e0   : > { %v3301_v60 = vpop.f32.mrf.mxu1  ;;  %v3235_v55 = vadd.f32 %v3215_v59, %v9897_v57 }
 0x2e1   : > { %v10041_v38 = vadd.f32 %v3406_v29, %v3374_v43  ;;  %v10070_v43 = vld [vmem:[%s8430_s14 + $0x251] sm:$0xff] }
 0x2e2   : > { %7645 = vmatmul.msk.f32.gmra.mxu0 %vm246_vm1, %v9399_v5  ;;  %7663 = vmatmul.msk.f32.gmra.mxu1 %vm246_vm1, %v9405_v48  ;;  %v3321_v57 = vadd.f32 %v3301_v60, %v3235_v55  ;;  %v10063_v48 = vld [vmem:[%s8430_s14 + $0x1a1] sm:$0xff] }
 0x2e3   : > { %7673 = vmatmul.msk.f32.gmra.mxu2 %vm246_vm1, %v10046_v33 }
 0x2e4   : > { %7683 = vmatmul.msk.f32.gmra.mxu3 %vm246_vm1, %v10053_v44 }
 0x2e6   : > { %v3355_v54 = vpop.f32.mrf.mxu2 }
 0x2e7   : > { %v3375_v58 = vadd.f32 %v3355_v54, %v3321_v57  ;;  %v3218_v35 = vpop.f32.mrf.mxu0  ;;  %v3409_v52 = vpop.f32.mrf.mxu3 }
 0x2e8   : > { %v3304_v5 = vpop.f32.mrf.mxu1  ;;  %v3236_v25 = vadd.f32 %v3218_v35, %v9920_v12  ;;  %v7791_v35 = vld [vmem:[%s11304_s3 + $0x8c] sm:$0xf] }
 0x2e9   : > { %v10058_v8 = vadd.f32 %v3409_v52, %v3375_v58  ;;  %v7781_v58 = vld [vmem:[%s11304_s3 + $0x88] sm:$0xf]  ;;  %7792 = vmatpush.msk.msrb.mxu3 %vm271_vm0, %v7791_v35 }
 0x2ea   : > { %7646 = vmatmul.msk.f32.gmra.mxu0 %vm246_vm1, %v9415_v28  ;;  %7664 = vmatmul.msk.f32.gmra.mxu1 %vm246_vm1, %v9421_v47  ;;  %v3322_v12 = vadd.f32 %v3304_v5, %v3236_v25  ;;  %v10080_v47 = vld [vmem:[%s8430_s14 + $0x1b1] sm:$0xff] }
 0x2eb   : > { %7674 = vmatmul.msk.f32.gmra.mxu2 %vm246_vm1, %v10063_v48 }
 0x2ec   : > { %7684 = vmatmul.msk.f32.gmra.mxu3 %vm246_vm1, %v10070_v43  ;;  %7782 = vmatpush.msk.msrb.mxu2 %vm271_vm0, %v7781_v58 }
 0x2ee   : > { %v3358_v59 = vpop.f32.mrf.mxu2 }
 0x2ef   : > { %v3376_v29 = vadd.f32 %v3358_v59, %v3322_v12  ;;  %v3221_v60 = vpop.f32.mrf.mxu0  ;;  %v3412_v55 = vpop.f32.mrf.mxu3  ;;  %v7771_v59 = vld [vmem:[%s11304_s3 + $0x84] sm:$0xf] }
 0x2f0   : > { %v3307_v28 = vpop.f32.mrf.mxu1  ;;  %v3237_v57 = vadd.f32 %v3221_v60, %v9956_v27  ;;  %v10091_v27 = vld [vmem:[%s8430_s14 + $0x261] sm:$0xff]  ;;  %7772 = vmatpush.msk.msrb.mxu1 %vm271_vm0, %v7771_v59 }
 0x2f1   : > { %v10075_v54 = vadd.f32 %v3412_v55, %v3376_v29 }
 0x2f2   : > { %7647 = vmatmul.msk.f32.gmra.mxu0 %vm246_vm1, %v9443_v46  ;;  %7665 = vmatmul.msk.f32.gmra.mxu1 %vm246_vm1, %v9452_v9  ;;  %v7753_v46 = vld [vmem:[%s11304_s3 + $0x80] sm:$0xf]  ;;  %v3323_v52 = vadd.f32 %v3307_v28, %v3237_v57  ;;  %v10120_v57 = vld [vmem:[%s8430_s14 + $0x271] sm:$0xff] }
 0x2f3   : > { %7675 = vmatmul.msk.f32.gmra.mxu2 %vm246_vm1, %v10080_v47  ;;  %7754 = vmatpush.msk.msrb.mxu0 %vm271_vm0, %v7753_v46  ;;  %v10113_v28 = vld [vmem:[%s8430_s14 + $0x1c1] sm:$0xff] }
 0x2f4   : > { %7685 = vmatmul.msk.f32.gmra.mxu3 %vm246_vm1, %v10091_v27 }
 0x2f6   : > { %v3361_v9 = vpop.f32.mrf.mxu2 }
 0x2f7   : > { %v3377_v5 = vadd.f32 %v3361_v9, %v3323_v52  ;;  %v3224_v25 = vpop.f32.mrf.mxu0  ;;  %v3415_v12 = vpop.f32.mrf.mxu3 }
 0x2f8   : > { %v3310_v29 = vpop.f32.mrf.mxu1  ;;  %v3238_v60 = vadd.f32 %v3224_v25, %v9973_v3  ;;  %v10137_v25 = vld [vmem:[%s8430_s14 + $0x281] sm:$0xff] }
 0x2f9   : > { %v10108_v55 = vadd.f32 %v3415_v12, %v3377_v5 }
 0x2fa   : > { %7648 = vmatmul.msk.f32.gmra.mxu0 %vm246_vm1, %v9463_v30  ;;  %7666 = vmatmul.msk.f32.gmra.mxu1 %vm246_vm1, %v9469_v37  ;;  %v3324_v3 = vadd.f32 %v3310_v29, %v3238_v60  ;;  %v10130_v37 = vld [vmem:[%s8430_s14 + $0x1d1] sm:$0xff]  ;;  %v10142_v60 = vld [vmem:[%s8430_s14 + $0x1e0] sm:$0xff] }
 0x2fb   : > { %7676 = vmatmul.msk.f32.gmra.mxu2 %vm246_vm1, %v10113_v28 }
 0x2fc   : > { %7686 = vmatmul.msk.f32.gmra.mxu3 %vm246_vm1, %v10120_v57 }
 0x2fe   : > { %v3364_v58 = vpop.f32.mrf.mxu2 }
 0x2ff   : > { %v3378_v46 = vadd.f32 %v3364_v58, %v3324_v3  ;;  %v3227_v35 = vpop.f32.mrf.mxu0  ;;  %v3418_v30 = vpop.f32.mrf.mxu3  ;;  %v10145_v58 = vld [vmem:[%s8430_s14 + $0x290] sm:$0xff] }
 0x300   : > { %v3313_v52 = vpop.f32.mrf.mxu1  ;;  %v3239_v9 = vadd.f32 %v3227_v35, %v9993_v11  ;;  %11409 = vst [vmem:[#allocation45_spill] sm:$0xff] %v10145_v58  ;;  %v10153_v35 = vld [vmem:[%s8430_s14 + $0x1e1] sm:$0xff] }
 0x301   : > { %v10125_v5 = vadd.f32 %v3418_v30, %v3378_v46  ;;  %11410 = vst [vmem:[#allocation46_spill] sm:$0xff] %v10153_v35  ;;  %v10160_v30 = vld [vmem:[%s8430_s14 + $0x291] sm:$0xff] }
 0x302   : > { %7649 = vmatmul.msk.f32.gmra.mxu0 %vm246_vm1, %v9479_v22  ;;  %7667 = vmatmul.msk.f32.gmra.mxu1 %vm246_vm1, %v9485_v0  ;;  %v3325_v11 = vadd.f32 %v3313_v52, %v3239_v9 }
 0x303   : > { %7677 = vmatmul.msk.f32.gmra.mxu2 %vm246_vm1, %v10130_v37 }
 0x304   : > { %7687 = vmatmul.msk.f32.gmra.mxu3 %vm246_vm1, %v10137_v25 }
 0x306   : > { %v3367_v12 = vpop.f32.mrf.mxu2 }
 0x307   : > { %v3379_v59 = vadd.f32 %v3367_v12, %v3325_v11  ;;  %v3230_v29 = vpop.f32.mrf.mxu0  ;;  %v3421_v22 = vpop.f32.mrf.mxu3 }
 0x308   : > { %v3316_v3 = vpop.f32.mrf.mxu1  ;;  %v3240_v46 = vadd.f32 %v3230_v29, %v10012_v17 }
 0x309   : > { %v10148_v0 = vadd.f32 %v3421_v22, %v3379_v59 }
 0x30a   : > { %7650 = vmatmul.msk.f32.gmra.mxu0 %vm246_vm1, %v10142_v60  ;;  %7668 = vmatmul.msk.f32.gmra.mxu1 %vm246_vm1, %v10145_v58  ;;  %v3326_v17 = vadd.f32 %v3316_v3, %v3240_v46  ;;  %v8321_v58 = vld [vmem:[%s8430_s14 + $0x222] sm:$0xff] }
 0x30b   : > { %7678 = vmatmul.msk.f32.gmra.mxu2 %vm246_vm1, %v10153_v35  ;;  %v8320_v35 = vld [vmem:[%s8430_s14 + $0x172] sm:$0xff] }
 0x30c   : > { %7688 = vmatmul.msk.f32.gmra.mxu3 %vm246_vm1, %v10160_v30 }
 0x30e   : > { %v3370_v52 = vpop.f32.mrf.mxu2 }
 0x30f   : > { %v3380_v9 = vadd.f32 %v3370_v52, %v3326_v17  ;;  %v3424_v11 = vpop.f32.mrf.mxu3  ;;  %v3457_v12 = vpop.f32.mrf.mxu0 }
 0x310   : > { %v3511_v59 = vpop.f32.mrf.mxu1  ;;  %v3481_v22 = vadd.f32 %v3457_v12, %v10024_v45  ;;  %v10179_v12 = vld [vmem:[%s8430_s14 + $0x182] sm:$0xff] }
 0x311   : > { %v10164_v29 = vadd.f32 %v3424_v11, %v3380_v9 }
 0x312   : > { %7691 = vmatmul.msk.f32.vlgmr.msra.gmra.mxu0 %vm246_vm1, %v8320_v35  ;;  %7701 = vmatmul.msk.f32.vlgmr.msra.gmra.mxu1 %vm246_vm1, %v8321_v58  ;;  %v3535_v3 = vadd.f32 %v3511_v59, %v3481_v22 }
 0x313   : > { %7719 = vmatmul.msk.f32.vlgmr.msra.gmra.mxu2 %vm246_vm1, %v9511_v40  ;;  %v10186_v40 = vld [vmem:[%s8430_s14 + $0x232] sm:$0xff] }
 0x314   : > { %7737 = vmatmul.msk.f32.vlgmr.msra.gmra.mxu3 %vm246_vm1, %v9518_v23 }
 0x316   : > { %v3597_v46 = vpop.f32.mrf.mxu2 }
 0x317   : > { %v3621_v17 = vadd.f32 %v3597_v46, %v3535_v3  ;;  %v3460_v52 = vpop.f32.mrf.mxu0  ;;  %v3683_v9 = vpop.f32.mrf.mxu3 }
 0x318   : > { %v3514_v11 = vpop.f32.mrf.mxu1  ;;  %v3482_v45 = vadd.f32 %v3460_v52, %v10041_v38 }
 0x319   : > { %v10176_v35 = vadd.f32 %v3683_v9, %v3621_v17 }
 0x31a   : > { %7692 = vmatmul.msk.f32.gmra.mxu0 %vm246_vm1, %v10179_v12  ;;  %7702 = vmatmul.msk.f32.gmra.mxu1 %vm246_vm1, %v10186_v40  ;;  %v3536_v23 = vadd.f32 %v3514_v11, %v3482_v45 }
 0x31b   : > { %7720 = vmatmul.msk.f32.gmra.mxu2 %vm246_vm1, %v9532_v42  ;;  %v10196_v42 = vld [vmem:[%s8430_s14 + $0x192] sm:$0xff] }
 0x31c   : > { %7738 = vmatmul.msk.f32.gmra.mxu3 %vm246_vm1, %v9539_v41  ;;  %v10203_v41 = vld [vmem:[%s8430_s14 + $0x242] sm:$0xff] }
 0x31e   : > { %v3600_v38 = vpop.f32.mrf.mxu2 }
 0x31f   : > { %v3622_v58 = vadd.f32 %v3600_v38, %v3536_v23  ;;  %v3463_v59 = vpop.f32.mrf.mxu0  ;;  %v3686_v22 = vpop.f32.mrf.mxu3 }
 0x320   : > { %v3517_v3 = vpop.f32.mrf.mxu1  ;;  %v3483_v46 = vadd.f32 %v3463_v59, %v10058_v8 }
 0x321   : > { %v10193_v17 = vadd.f32 %v3686_v22, %v3622_v58 }
 0x322   : > { %7693 = vmatmul.msk.f32.gmra.mxu0 %vm246_vm1, %v10196_v42  ;;  %7703 = vmatmul.msk.f32.gmra.mxu1 %vm246_vm1, %v10203_v41  ;;  %v3537_v8 = vadd.f32 %v3517_v3, %v3483_v46 }
 0x323   : > { %7721 = vmatmul.msk.f32.gmra.mxu2 %vm246_vm1, %v9549_v18  ;;  %v10213_v18 = vld [vmem:[%s8430_s14 + $0x1a2] sm:$0xff] }
 0x324   : > { %7739 = vmatmul.msk.f32.gmra.mxu3 %vm246_vm1, %v9556_v51  ;;  %v10220_v51 = vld [vmem:[%s8430_s14 + $0x252] sm:$0xff] }
 0x326   : > { %v3603_v52 = vpop.f32.mrf.mxu2 }
 0x327   : > { %v3623_v9 = vadd.f32 %v3603_v52, %v3537_v8  ;;  %v3466_v11 = vpop.f32.mrf.mxu0  ;;  %v3689_v45 = vpop.f32.mrf.mxu3 }
 0x328   : > { %v3520_v23 = vpop.f32.mrf.mxu1  ;;  %v3484_v38 = vadd.f32 %v3466_v11, %v10075_v54  ;;  %v10240_v11 = vld [vmem:[%s8430_s14 + $0x262] sm:$0xff] }
 0x329   : > { %v10210_v58 = vadd.f32 %v3689_v45, %v3623_v9 }
 0x32a   : > { %7694 = vmatmul.msk.f32.gmra.mxu0 %vm246_vm1, %v10213_v18  ;;  %7704 = vmatmul.msk.f32.gmra.mxu1 %vm246_vm1, %v10220_v51  ;;  %v3538_v54 = vadd.f32 %v3520_v23, %v3484_v38 }
 0x32b   : > { %7722 = vmatmul.msk.f32.gmra.mxu2 %vm246_vm1, %v9566_v14  ;;  %v10230_v14 = vld [vmem:[%s8430_s14 + $0x1b2] sm:$0xff] }
 0x32c   : > { %7740 = vmatmul.msk.f32.gmra.mxu3 %vm246_vm1, %v9573_v15  ;;  %v7829_v15 = vld [vmem:[%s11304_s3 + $0x98] sm:$0xf] }
 0x32d   : > { %7830 = vmatpush.msk.msra.mxu2 %vm271_vm0, %v7829_v15 }
 0x32e   : > { %v3606_v59 = vpop.f32.mrf.mxu2 }
 0x32f   : > { %v3624_v22 = vadd.f32 %v3606_v59, %v3538_v54  ;;  %v3469_v3 = vpop.f32.mrf.mxu0  ;;  %v3692_v46 = vpop.f32.mrf.mxu3 }
 0x330   : > { %v3523_v8 = vpop.f32.mrf.mxu1  ;;  %v3485_v52 = vadd.f32 %v3469_v3, %v10108_v55  ;;  %v7801_v55 = vld [vmem:[%s11304_s3 + $0x90] sm:$0xf] }
 0x331   : > { %v10227_v9 = vadd.f32 %v3692_v46, %v3624_v22  ;;  %7802 = vmatpush.msk.msra.mxu0 %vm271_vm0, %v7801_v55 }
 0x332   : > { %7695 = vmatmul.msk.f32.gmra.mxu0 %vm246_vm1, %v10230_v14  ;;  %7705 = vmatmul.msk.f32.gmra.mxu1 %vm246_vm1, %v10240_v11  ;;  %v3539_v45 = vadd.f32 %v3523_v8, %v3485_v52  ;;  %v10263_v8 = vld [vmem:[%s8430_s14 + $0x1c2] sm:$0xff]  ;;  %v10270_v52 = vld [vmem:[%s8430_s14 + $0x272] sm:$0xff] }
 0x333   : > { %7723 = vmatmul.msk.f32.gmra.mxu2 %vm246_vm1, %v9595_v39  ;;  %v7847_v39 = vld [vmem:[%s11304_s3 + $0x9c] sm:$0xf] }
 0x334   : > { %7741 = vmatmul.msk.f32.gmra.mxu3 %vm246_vm1, %v9606_v63  ;;  %v7811_v63 = vld [vmem:[%s11304_s3 + $0x94] sm:$0xf] }
 0x335   : > { %7848 = vmatpush.msk.msra.mxu3 %vm271_vm0, %v7847_v39  ;;  %7812 = vmatpush.msk.msra.mxu1 %vm271_vm0, %v7811_v63 }
 0x336   : > { %v3609_v23 = vpop.f32.mrf.mxu2 }
 0x337   : > { %v3625_v38 = vadd.f32 %v3609_v23, %v3539_v45  ;;  %v3472_v54 = vpop.f32.mrf.mxu0  ;;  %v3695_v59 = vpop.f32.mrf.mxu3 }
 0x338   : > { %v3526_v22 = vpop.f32.mrf.mxu1  ;;  %v3486_v3 = vadd.f32 %v3472_v54, %v10125_v5 }
 0x339   : > { %v10260_v46 = vadd.f32 %v3695_v59, %v3625_v38 }
 0x33a   : > { %7696 = vmatmul.msk.f32.gmra.mxu0 %vm246_vm1, %v10263_v8  ;;  %7706 = vmatmul.msk.f32.gmra.mxu1 %vm246_vm1, %v10270_v52  ;;  %v3540_v5 = vadd.f32 %v3526_v22, %v3486_v3 }
 0x33b   : > { %7724 = vmatmul.msk.f32.gmra.mxu2 %vm246_vm1, %v9616_v26  ;;  %v10280_v26 = vld [vmem:[%s8430_s14 + $0x1d2] sm:$0xff] }
 0x33c   : > { %7742 = vmatmul.msk.f32.gmra.mxu3 %vm246_vm1, %v9623_v2  ;;  %v10287_v2 = vld [vmem:[%s8430_s14 + $0x282] sm:$0xff] }
 0x33e   : > { %v3612_v15 = vpop.f32.mrf.mxu2 }
 0x33f   : > { %v3626_v55 = vadd.f32 %v3612_v15, %v3540_v5  ;;  %v3475_v39 = vpop.f32.mrf.mxu0  ;;  %v3698_v45 = vpop.f32.mrf.mxu3  ;;  %v10294_v5 = vld [vmem:[%s8430_s14 + $0x1e3] sm:$0xff] }
 0x340   : > { %v3529_v23 = vpop.f32.mrf.mxu1  ;;  %v3487_v38 = vadd.f32 %v3475_v39, %v10148_v0  ;;  %v10300_v39 = vld [vmem:[%s8430_s14 + $0x293] sm:$0xff] }
 0x341   : > { %v10277_v54 = vadd.f32 %v3698_v45, %v3626_v55  ;;  %v10303_v45 = vld [vmem:[%s8430_s14 + $0x1e2] sm:$0xff] }
 0x342   : > { %7697 = vmatmul.msk.f32.gmra.mxu0 %vm246_vm1, %v10280_v26  ;;  %7707 = vmatmul.msk.f32.gmra.mxu1 %vm246_vm1, %v10287_v2  ;;  %v3541_v0 = vadd.f32 %v3529_v23, %v3487_v38 }
 0x343   : > { %7725 = vmatmul.msk.f32.gmra.mxu2 %vm246_vm1, %v9633_v21 }
 0x344   : > { %7743 = vmatmul.msk.f32.gmra.mxu3 %vm246_vm1, %v9640_v62  ;;  %v10310_v62 = vld [vmem:[%s8430_s14 + $0x292] sm:$0xff] }
 0x346   : > { %v3615_v59 = vpop.f32.mrf.mxu2 }
 0x347   : > { %v3627_v63 = vadd.f32 %v3615_v59, %v3541_v0  ;;  %v3478_v22 = vpop.f32.mrf.mxu0  ;;  %v3701_v3 = vpop.f32.mrf.mxu3 }
 0x348   : > { %v3532_v15 = vpop.f32.mrf.mxu1  ;;  %v3488_v55 = vadd.f32 %v3478_v22, %v10164_v29 }
 0x349   : > { %v10297_v21 = vadd.f32 %v3701_v3, %v3627_v63 }
 0x34a   : > { %7698 = vmatmul.msk.f32.gmra.mxu0 %vm246_vm1, %v10303_v45  ;;  %7708 = vmatmul.msk.f32.gmra.mxu1 %vm246_vm1, %v10310_v62  ;;  %v3542_v29 = vadd.f32 %v3532_v15, %v3488_v55 }
 0x34b   : > { %7726 = vmatmul.msk.f32.gmra.mxu2 %vm246_vm1, %v10294_v5 }
 0x34c   : > { %7744 = vmatmul.msk.f32.gmra.mxu3 %vm246_vm1, %v10300_v39 }
 0x34e   : > { %v3618_v23 = vpop.f32.mrf.mxu2 }
 0x34f   : > { %v3628_v38 = vadd.f32 %v3618_v23, %v3542_v29  ;;  %v3704_v0 = vpop.f32.mrf.mxu3  ;;  %v3769_v59 = vpop.f32.mrf.mxu0 }
 0x350   : > { %v3855_v63 = vpop.f32.mrf.mxu1  ;;  %v3793_v3 = vadd.f32 %v3769_v59, %v10176_v35 }
 0x351   : > { %v10316_v22 = vadd.f32 %v3704_v0, %v3628_v38 }
 0x352   : > { %7755 = vmatmul.msk.f32.vlgmr.msrb.gmra.mxu0 %vm246_vm1, %v9660_v10  ;;  %7773 = vmatmul.msk.f32.vlgmr.msrb.gmra.mxu1 %vm246_vm1, %v9663_v49  ;;  %v3879_v15 = vadd.f32 %v3855_v63, %v3793_v3 }
 0x353   : > { %7783 = vmatmul.msk.f32.vlgmr.msrb.gmra.mxu2 %vm246_vm1, %v9671_v16 }
 0x354   : > { %7793 = vmatmul.msk.f32.vlgmr.msrb.gmra.mxu3 %vm246_vm1, %v9678_v13 }
 0x356   : > { %v3909_v55 = vpop.f32.mrf.mxu2 }
 0x357   : > { %v3933_v29 = vadd.f32 %v3909_v55, %v3879_v15  ;;  %v3772_v23 = vpop.f32.mrf.mxu0  ;;  %v3963_v38 = vpop.f32.mrf.mxu3 }
 0x358   : > { %v3858_v0 = vpop.f32.mrf.mxu1  ;;  %v3794_v35 = vadd.f32 %v3772_v23, %v10193_v17 }
 0x359   : > { %v10328_v59 = vadd.f32 %v3963_v38, %v3933_v29 }
 0x35a   : > { %7756 = vmatmul.msk.f32.gmra.mxu0 %vm246_vm1, %v9683_v1  ;;  %7774 = vmatmul.msk.f32.gmra.mxu1 %vm246_vm1, %v9686_v34  ;;  %v3880_v10 = vadd.f32 %v3858_v0, %v3794_v35  ;;  %v11411_v1 = vld [vmem:[#allocation11_spill] sm:$0xff]  ;;  %v11412_v34 = vld [vmem:[#allocation14_spill] sm:$0xff] }
 0x35b   : > { %7784 = vmatmul.msk.f32.gmra.mxu2 %vm246_vm1, %v9694_v19  ;;  %v11415_v35 = vld [vmem:[#allocation2_spill] sm:$0xff] }
 0x35c   : > { %7794 = vmatmul.msk.f32.gmra.mxu3 %vm246_vm1, %v9701_v7 }
 0x35e   : > { %v3912_v49 = vpop.f32.mrf.mxu2 }
 0x35f   : > { %v3934_v16 = vadd.f32 %v3912_v49, %v3880_v10  ;;  %v3775_v13 = vpop.f32.mrf.mxu0  ;;  %v3966_v63 = vpop.f32.mrf.mxu3  ;;  %v11416_v10 = vld [vmem:[#allocation12_spill] sm:$0xff] }
 0x360   : > { %v3861_v17 = vpop.f32.mrf.mxu1  ;;  %v3795_v3 = vadd.f32 %v3775_v13, %v10210_v58 }
 0x361   : > { %v10339_v15 = vadd.f32 %v3966_v63, %v3934_v16 }
 0x362   : > { %7757 = vmatmul.msk.f32.gmra.mxu0 %vm246_vm1, %v9706_v4  ;;  %7775 = vmatmul.msk.f32.gmra.mxu1 %vm246_vm1, %v11411_v1  ;;  %v3881_v19 = vadd.f32 %v3861_v17, %v3795_v3  ;;  %v11413_v4 = vld [vmem:[#allocation3_spill] sm:$0xff] }
 0x363   : > { %7785 = vmatmul.msk.f32.gmra.mxu2 %vm246_vm1, %v9717_v36  ;;  %v11414_v36 = vld [vmem:[#allocation9_spill] sm:$0xff] }
 0x364   : > { %7795 = vmatmul.msk.f32.gmra.mxu3 %vm246_vm1, %v11412_v34  ;;  %v11417_v34 = vld [vmem:[#allocation16_spill] sm:$0xff] }
 0x366   : > { %v3915_v7 = vpop.f32.mrf.mxu2 }
 0x367   : > { %v3935_v55 = vadd.f32 %v3915_v7, %v3881_v19  ;;  %v3778_v29 = vpop.f32.mrf.mxu0  ;;  %v3969_v23 = vpop.f32.mrf.mxu3  ;;  %v11418_v19 = vld [vmem:[#allocation18_spill] sm:$0xff]  ;;  %v7893_v7 = vld [vmem:[%s11304_s3 + $0xa8] sm:$0xf] }
 0x368   : > { %v3864_v58 = vpop.f32.mrf.mxu1  ;;  %v3796_v38 = vadd.f32 %v3778_v29, %v10227_v9  ;;  %7894 = vmatpush.msk.msrb.mxu2 %vm271_vm0, %v7893_v7  ;;  %v11420_v29 = vld [vmem:[#allocation19_spill] sm:$0xff] }
 0x369   : > { %v10350_v0 = vadd.f32 %v3969_v23, %v3935_v55  ;;  %v11419_v55 = vld [vmem:[#allocation17_spill] sm:$0xff]  ;;  %v7903_v23 = vld [vmem:[%s11304_s3 + $0xac] sm:$0xf] }
 0x36a   : > { %7758 = vmatmul.msk.f32.gmra.mxu0 %vm246_vm1, %v11413_v4  ;;  %7776 = vmatmul.msk.f32.gmra.mxu1 %vm246_vm1, %v11415_v35  ;;  %v3882_v49 = vadd.f32 %v3864_v58, %v3796_v38 }
 0x36b   : > { %7786 = vmatmul.msk.f32.gmra.mxu2 %vm246_vm1, %v11414_v36  ;;  %7904 = vmatpush.msk.msrb.mxu3 %vm271_vm0, %v7903_v23 }
 0x36c   : > { %7796 = vmatmul.msk.f32.gmra.mxu3 %vm246_vm1, %v11416_v10  ;;  %v7883_v10 = vld [vmem:[%s11304_s3 + $0xa4] sm:$0xf] }
 0x36d   : > { %7884 = vmatpush.msk.msrb.mxu1 %vm271_vm0, %v7883_v10 }
 0x36e   : > { %v3918_v16 = vpop.f32.mrf.mxu2 }
 0x36f   : > { %v3936_v13 = vadd.f32 %v3918_v16, %v3882_v49  ;;  %v3781_v63 = vpop.f32.mrf.mxu0  ;;  %v3972_v17 = vpop.f32.mrf.mxu3 }
 0x370   : > { %v3867_v9 = vpop.f32.mrf.mxu1  ;;  %v3797_v3 = vadd.f32 %v3781_v63, %v10260_v46  ;;  %v7865_v46 = vld [vmem:[%s11304_s3 + $0xa0] sm:$0xf]  ;;  %v11421_v63 = vld [vmem:[#allocation20_spill] sm:$0xff] }
 0x371   : > { %v10361_v1 = vadd.f32 %v3972_v17, %v3936_v13  ;;  %7866 = vmatpush.msk.msrb.mxu0 %vm271_vm0, %v7865_v46  ;;  %v11422_v17 = vld [vmem:[#allocation22_spill] sm:$0xff] }
 0x372   : > { %7759 = vmatmul.msk.f32.gmra.mxu0 %vm246_vm1, %v11417_v34  ;;  %7777 = vmatmul.msk.f32.gmra.mxu1 %vm246_vm1, %v11419_v55  ;;  %v3883_v58 = vadd.f32 %v3867_v9, %v3797_v3  ;;  %v11423_v9 = vld [vmem:[#allocation21_spill] sm:$0xff]  ;;  %v11424_v3 = vld [vmem:[#allocation23_spill] sm:$0xff] }
 0x373   : > { %7787 = vmatmul.msk.f32.gmra.mxu2 %vm246_vm1, %v11418_v19 }
 0x374   : > { %7797 = vmatmul.msk.f32.gmra.mxu3 %vm246_vm1, %v11420_v29 }
 0x376   : > { %v3921_v38 = vpop.f32.mrf.mxu2 }
 0x377   : > { %v3937_v4 = vadd.f32 %v3921_v38, %v3883_v58  ;;  %v3784_v36 = vpop.f32.mrf.mxu0  ;;  %v3975_v35 = vpop.f32.mrf.mxu3  ;;  %v11425_v58 = vld [vmem:[#allocation24_spill] sm:$0xff]  ;;  %v11426_v38 = vld [vmem:[#allocation26_spill] sm:$0xff] }
 0x378   : > { %v3870_v49 = vpop.f32.mrf.mxu1  ;;  %v3798_v16 = vadd.f32 %v3784_v36, %v10277_v54  ;;  %v11428_v36 = vld [vmem:[#allocation27_spill] sm:$0xff] }
 0x379   : > { %v10388_v13 = vadd.f32 %v3975_v35, %v3937_v4  ;;  %v11427_v4 = vld [vmem:[#allocation25_spill] sm:$0xff] }
 0x37a   : > { %7760 = vmatmul.msk.f32.gmra.mxu0 %vm246_vm1, %v11421_v63  ;;  %7778 = vmatmul.msk.f32.gmra.mxu1 %vm246_vm1, %v11423_v9  ;;  %v3884_v34 = vadd.f32 %v3870_v49, %v3798_v16  ;;  %v10410_v63 = vld [vmem:[%s8430_s14 + $0x90] sm:$0xff]  ;;  %v10413_v9 = vld [vmem:[%s8430_s14 + $0x140] sm:$0xff] }
 0x37b   : > { %7788 = vmatmul.msk.f32.gmra.mxu2 %vm246_vm1, %v11422_v17 }
 0x37c   : > { %7798 = vmatmul.msk.f32.gmra.mxu3 %vm246_vm1, %v11424_v3 }
 0x37e   : > { %v3924_v19 = vpop.f32.mrf.mxu2 }
 0x37f   : > { %v3938_v7 = vadd.f32 %v3924_v19, %v3884_v34  ;;  %v3787_v55 = vpop.f32.mrf.mxu0  ;;  %v3978_v54 = vpop.f32.mrf.mxu3  ;;  %v8336_v19 = vld [vmem:[%s8430_s14 + $0x91] sm:$0xff] }
 0x380   : > { %v3873_v29 = vpop.f32.mrf.mxu1  ;;  %v3799_v46 = vadd.f32 %v3787_v55, %v10297_v21 }
 0x381   : > { %v10399_v23 = vadd.f32 %v3978_v54, %v3938_v7  ;;  %v8337_v7 = vld [vmem:[%s8430_s14 + $0x141] sm:$0xff] }
 0x382   : > { %7761 = vmatmul.msk.f32.gmra.mxu0 %vm246_vm1, %v11425_v58  ;;  %7779 = vmatmul.msk.f32.gmra.mxu1 %vm246_vm1, %v11427_v4  ;;  %v3885_v35 = vadd.f32 %v3873_v29, %v3799_v46 }
 0x383   : > { %7789 = vmatmul.msk.f32.gmra.mxu2 %vm246_vm1, %v11426_v38 }
 0x384   : > { %7799 = vmatmul.msk.f32.gmra.mxu3 %vm246_vm1, %v11428_v36  ;;  %v11429_v36 = vld [vmem:[#allocation30_spill] sm:$0xff] }
 0x386   : > { %v3927_v10 = vpop.f32.mrf.mxu2 }
 0x387   : > { %v3939_v49 = vadd.f32 %v3927_v10, %v3885_v35  ;;  %v3790_v21 = vpop.f32.mrf.mxu0  ;;  %v3981_v16 = vpop.f32.mrf.mxu3  ;;  %v11430_v35 = vld [vmem:[#allocation28_spill] sm:$0xff]  ;;  %v11431_v10 = vld [vmem:[#allocation31_spill] sm:$0xff] }
 0x388   : > { %v3876_v17 = vpop.f32.mrf.mxu1  ;;  %v3800_v3 = vadd.f32 %v3790_v21, %v10316_v22 }
 0x389   : > { %v10416_v34 = vadd.f32 %v3981_v16, %v3939_v49  ;;  %v11432_v49 = vld [vmem:[#allocation29_spill] sm:$0xff] }
 0x38a   : > { %7762 = vmatmul.msk.f32.gmra.mxu0 %vm246_vm1, %v10410_v63  ;;  %7780 = vmatmul.msk.f32.gmra.mxu1 %vm246_vm1, %v10413_v9  ;;  %v3886_v55 = vadd.f32 %v3876_v17, %v3800_v3 }
 0x38b   : > { %7790 = vmatmul.msk.f32.gmra.mxu2 %vm246_vm1, %v8336_v19 }
 0x38c   : > { %7800 = vmatmul.msk.f32.gmra.mxu3 %vm246_vm1, %v8337_v7 }
 0x38e   : > { %v3930_v54 = vpop.f32.mrf.mxu2 }
 0x38f   : > { %v3940_v29 = vadd.f32 %v3930_v54, %v3886_v55  ;;  %v3984_v46 = vpop.f32.mrf.mxu3  ;;  %v4017_v58 = vpop.f32.mrf.mxu0  ;;  %v11433_v54 = vld [vmem:[#allocation34_spill] sm:$0xff] }
 0x390   : > { %v4071_v22 = vpop.f32.mrf.mxu1  ;;  %v4041_v4 = vadd.f32 %v4017_v58, %v10328_v59  ;;  %v11436_v58 = vld [vmem:[#allocation33_spill] sm:$0xff] }
 0x391   : > { %v10426_v38 = vadd.f32 %v3984_v46, %v3940_v29  ;;  %v11434_v29 = vld [vmem:[#allocation32_spill] sm:$0xff]  ;;  %v11435_v46 = vld [vmem:[#allocation35_spill] sm:$0xff] }
 0x392   : > { %7803 = vmatmul.msk.f32.vlgmr.msra.gmra.mxu0 %vm246_vm1, %v11429_v36  ;;  %7813 = vmatmul.msk.f32.vlgmr.msra.gmra.mxu1 %vm246_vm1, %v11431_v10  ;;  %v4095_v21 = vadd.f32 %v4071_v22, %v4041_v4 }
 0x393   : > { %7831 = vmatmul.msk.f32.vlgmr.msra.gmra.mxu2 %vm246_vm1, %v11430_v35 }
 0x394   : > { %7849 = vmatmul.msk.f32.vlgmr.msra.gmra.mxu3 %vm246_vm1, %v11432_v49 }
 0x396   : > { %v4157_v16 = vpop.f32.mrf.mxu2 }
 0x397   : > { %v4181_v17 = vadd.f32 %v4157_v16, %v4095_v21  ;;  %v4020_v3 = vpop.f32.mrf.mxu0  ;;  %v4243_v19 = vpop.f32.mrf.mxu3  ;;  %v11437_v16 = vld [vmem:[#allocation37_spill] sm:$0xff] }
 0x398   : > { %v4074_v7 = vpop.f32.mrf.mxu1  ;;  %v4042_v59 = vadd.f32 %v4020_v3, %v10339_v15 }
 0x399   : > { %v10438_v55 = vadd.f32 %v4243_v19, %v4181_v17  ;;  %v11438_v17 = vld [vmem:[#allocation36_spill] sm:$0xff] }
 0x39a   : > { %7804 = vmatmul.msk.f32.gmra.mxu0 %vm246_vm1, %v11433_v54  ;;  %7814 = vmatmul.msk.f32.gmra.mxu1 %vm246_vm1, %v11435_v46  ;;  %v4096_v22 = vadd.f32 %v4074_v7, %v4042_v59 }
 0x39b   : > { %7832 = vmatmul.msk.f32.gmra.mxu2 %vm246_vm1, %v11434_v29 }
 0x39c   : > { %7850 = vmatmul.msk.f32.gmra.mxu3 %vm246_vm1, %v11436_v58  ;;  %v11439_v58 = vld [vmem:[#allocation40_spill] sm:$0xff] }
 0x39e   : > { %v4160_v4 = vpop.f32.mrf.mxu2 }
 0x39f   : > { %v4182_v36 = vadd.f32 %v4160_v4, %v4096_v22  ;;  %v4023_v35 = vpop.f32.mrf.mxu0  ;;  %v4246_v10 = vpop.f32.mrf.mxu3  ;;  %v11440_v22 = vld [vmem:[#allocation38_spill] sm:$0xff] }
 0x3a0   : > { %v4077_v15 = vpop.f32.mrf.mxu1  ;;  %v4043_v49 = vadd.f32 %v4023_v35, %v10350_v0 }
 0x3a1   : > { %v10449_v21 = vadd.f32 %v4246_v10, %v4182_v36 }
 0x3a2   : > { %7805 = vmatmul.msk.f32.gmra.mxu0 %vm246_vm1, %v11437_v16  ;;  %7815 = vmatmul.msk.f32.gmra.mxu1 %vm246_vm1, %v9910_v6  ;;  %v4097_v3 = vadd.f32 %v4077_v15, %v4043_v49  ;;  %v11441_v6 = vld [vmem:[#allocation41_spill] sm:$0xff] }
 0x3a3   : > { %7833 = vmatmul.msk.f32.gmra.mxu2 %vm246_vm1, %v11438_v17 }
 0x3a4   : > { %7851 = vmatmul.msk.f32.gmra.mxu3 %vm246_vm1, %v9900_v53  ;;  %v11442_v53 = vld [vmem:[#allocation39_spill] sm:$0xff] }
 0x3a6   : > { %v4163_v19 = vpop.f32.mrf.mxu2 }
 0x3a7   : > { %v4183_v7 = vadd.f32 %v4163_v19, %v4097_v3  ;;  %v4026_v59 = vpop.f32.mrf.mxu0  ;;  %v4249_v0 = vpop.f32.mrf.mxu3  ;;  %v10477_v3 = vld [vmem:[%s8430_s14 + $0x113] sm:$0xff] }
 0x3a8   : > { %v4080_v54 = vpop.f32.mrf.mxu1  ;;  %v4044_v29 = vadd.f32 %v4026_v59, %v10361_v1  ;;  %v10471_v1 = vld [vmem:[%s8430_s14 + $0x63] sm:$0xff]  ;;  %v7941_v19 = vld [vmem:[%s11304_s3 + $0xb8] sm:$0xf] }
 0x3a9   : > { %v10460_v46 = vadd.f32 %v4249_v0, %v4183_v7  ;;  %7942 = vmatpush.msk.msra.mxu2 %vm271_vm0, %v7941_v19 }
 0x3aa   : > { %7806 = vmatmul.msk.f32.gmra.mxu0 %vm246_vm1, %v11439_v58  ;;  %7816 = vmatmul.msk.f32.gmra.mxu1 %vm246_vm1, %v11441_v6  ;;  %v4098_v4 = vadd.f32 %v4080_v54, %v4044_v29  ;;  %v10500_v29 = vld [vmem:[%s8430_s14 + $0x73] sm:$0xff] }
 0x3ab   : > { %7834 = vmatmul.msk.f32.gmra.mxu2 %vm246_vm1, %v11440_v22  ;;  %v7923_v58 = vld [vmem:[%s11304_s3 + $0xb4] sm:$0xf] }
 0x3ac   : > { %7852 = vmatmul.msk.f32.gmra.mxu3 %vm246_vm1, %v11442_v53  ;;  %7924 = vmatpush.msk.msra.mxu1 %vm271_vm0, %v7923_v58 }
 0x3ae   : > { %v4166_v36 = vpop.f32.mrf.mxu2 }
 0x3af   : > { %v4184_v35 = vadd.f32 %v4166_v36, %v4098_v4  ;;  %v4029_v10 = vpop.f32.mrf.mxu0  ;;  %v4252_v15 = vpop.f32.mrf.mxu3  ;;  %v10510_v4 = vld [vmem:[%s8430_s14 + $0x123] sm:$0xff] }
 0x3b0   : > { %v4083_v49 = vpop.f32.mrf.mxu1  ;;  %v4045_v16 = vadd.f32 %v4029_v10, %v10388_v13  ;;  %v7959_v13 = vld [vmem:[%s11304_s3 + $0xbc] sm:$0xf]  ;;  %v11443_v36 = vld [vmem:[#allocation42_spill] sm:$0xff] }
 0x3b1   : > { %v10474_v17 = vadd.f32 %v4252_v15, %v4184_v35  ;;  %7960 = vmatpush.msk.msra.mxu3 %vm271_vm0, %v7959_v13  ;;  %v11445_v13 = vld [vmem:[#allocation44_spill] sm:$0xff] }
 0x3b2   : > { %7807 = vmatmul.msk.f32.gmra.mxu0 %vm246_vm1, %v9959_v24  ;;  %7817 = vmatmul.msk.f32.gmra.mxu1 %vm246_vm1, %v9966_v32  ;;  %v7913_v24 = vld [vmem:[%s11304_s3 + $0xb0] sm:$0xf]  ;;  %v4099_v7 = vadd.f32 %v4083_v49, %v4045_v16 }
 0x3b3   : > { %7835 = vmatmul.msk.f32.gmra.mxu2 %vm246_vm1, %v10471_v1  ;;  %7914 = vmatpush.msk.msra.mxu0 %vm271_vm0, %v7913_v24 }
 0x3b4   : > { %7853 = vmatmul.msk.f32.gmra.mxu3 %vm246_vm1, %v10477_v3 }
 0x3b6   : > { %v4169_v32 = vpop.f32.mrf.mxu2 }
 0x3b7   : > { %v4185_v59 = vadd.f32 %v4169_v32, %v4099_v7  ;;  %v4032_v0 = vpop.f32.mrf.mxu0  ;;  %v4255_v54 = vpop.f32.mrf.mxu3 }
 0x3b8   : > { %v4086_v22 = vpop.f32.mrf.mxu1  ;;  %v4046_v6 = vadd.f32 %v4032_v0, %v10399_v23 }
 0x3b9   : > { %v10507_v53 = vadd.f32 %v4255_v54, %v4185_v59  ;;  %v10532_v54 = vld [vmem:[%s8430_s14 + $0x93] sm:$0xff] }
 0x3ba   : > { %7808 = vmatmul.msk.f32.gmra.mxu0 %vm246_vm1, %v11443_v36  ;;  %7818 = vmatmul.msk.f32.gmra.mxu1 %vm246_vm1, %v9983_v20  ;;  %v4100_v35 = vadd.f32 %v4086_v22, %v4046_v6  ;;  %v11444_v20 = vld [vmem:[#allocation43_spill] sm:$0xff] }
 0x3bb   : > { %7836 = vmatmul.msk.f32.gmra.mxu2 %vm246_vm1, %v10500_v29  ;;  %v10538_v6 = vld [vmem:[%s8430_s14 + $0x143] sm:$0xff] }
 0x3bc   : > { %7854 = vmatmul.msk.f32.gmra.mxu3 %vm246_vm1, %v10510_v4  ;;  %v8339_v36 = vld [vmem:[%s8430_s14 + $0x142] sm:$0xff] }
 0x3be   : > { %v4172_v10 = vpop.f32.mrf.mxu2 }
 0x3bf   : > { %v4186_v23 = vadd.f32 %v4172_v10, %v4100_v35  ;;  %v4035_v15 = vpop.f32.mrf.mxu0  ;;  %v4258_v49 = vpop.f32.mrf.mxu3 }
 0x3c0   : > { %v4089_v16 = vpop.f32.mrf.mxu1  ;;  %v4047_v19 = vadd.f32 %v4035_v15, %v10416_v34 }
 0x3c1   : > { %v10521_v24 = vadd.f32 %v4258_v49, %v4186_v23  ;;  %v7857_v49 = vld [vmem:[%s8430_s14 + $0x180] sm:$0xff] }
 0x3c2   : > { %7809 = vmatmul.msk.f32.gmra.mxu0 %vm246_vm1, %v9999_v61  ;;  %7819 = vmatmul.msk.f32.gmra.mxu1 %vm246_vm1, %v10006_v50  ;;  %v4101_v7 = vadd.f32 %v4089_v16, %v4047_v19  ;;  %v8338_v50 = vld [vmem:[%s8430_s14 + $0x92] sm:$0xff] }
 0x3c3   : > { %7837 = vmatmul.msk.f32.gmra.mxu2 %vm246_vm1, %v11444_v20  ;;  %v7875_v19 = vld [vmem:[%s8430_s14 + $0x230] sm:$0xff] }
 0x3c4   : > { %7855 = vmatmul.msk.f32.gmra.mxu3 %vm246_vm1, %v11445_v13 }
 0x3c6   : > { %v4175_v32 = vpop.f32.mrf.mxu2 }
 0x3c7   : > { %v4187_v59 = vadd.f32 %v4175_v32, %v4101_v7  ;;  %v4038_v34 = vpop.f32.mrf.mxu0  ;;  %v4261_v0 = vpop.f32.mrf.mxu3 }
 0x3c8   : > { %v4092_v58 = vpop.f32.mrf.mxu1  ;;  %v4048_v61 = vadd.f32 %v4038_v34, %v10426_v38 }
 0x3c9   : > { %v10535_v22 = vadd.f32 %v4261_v0, %v4187_v59 }
 0x3ca   : > { %7810 = vmatmul.msk.f32.gmra.mxu0 %vm246_vm1, %v8338_v50  ;;  %7820 = vmatmul.msk.f32.gmra.mxu1 %vm246_vm1, %v8339_v36  ;;  %v4102_v35 = vadd.f32 %v4092_v58, %v4048_v61  ;;  %v10560_v58 = vld [vmem:[%s8430_s14 + $0x190] sm:$0xff]  ;;  %v10563_v61 = vld [vmem:[%s8430_s14 + $0x240] sm:$0xff] }
 0x3cb   : > { %7838 = vmatmul.msk.f32.gmra.mxu2 %vm246_vm1, %v10532_v54 }
 0x3cc   : > { %7856 = vmatmul.msk.f32.gmra.mxu3 %vm246_vm1, %v10538_v6 }
 0x3ce   : > { %v4178_v10 = vpop.f32.mrf.mxu2 }
 0x3cf   : > { %v4188_v38 = vadd.f32 %v4178_v10, %v4102_v35  ;;  %v4264_v23 = vpop.f32.mrf.mxu3  ;;  %v4329_v15 = vpop.f32.mrf.mxu0 }
 0x3d0   : > { %v4415_v16 = vpop.f32.mrf.mxu1  ;;  %v4353_v13 = vadd.f32 %v4329_v15, %v10438_v55  ;;  %v10580_v15 = vld [vmem:[%s8430_s14 + $0x250] sm:$0xff] }
 0x3d1   : > { %v10550_v20 = vadd.f32 %v4264_v23, %v4188_v38  ;;  %v10577_v38 = vld [vmem:[%s8430_s14 + $0x1a0] sm:$0xff] }
 0x3d2   : > { %7867 = vmatmul.msk.f32.vlgmr.msrb.gmra.mxu0 %vm246_vm1, %v7857_v49  ;;  %7885 = vmatmul.msk.f32.vlgmr.msrb.gmra.mxu1 %vm246_vm1, %v7875_v19  ;;  %v4439_v7 = vadd.f32 %v4415_v16, %v4353_v13 }
 0x3d3   : > { %7895 = vmatmul.msk.f32.vlgmr.msrb.gmra.mxu2 %vm246_vm1, %v10029_v31 }
 0x3d4   : > { %7905 = vmatmul.msk.f32.vlgmr.msrb.gmra.mxu3 %vm246_vm1, %v10036_v56 }
 0x3d6   : > { %v4469_v32 = vpop.f32.mrf.mxu2 }
 0x3d7   : > { %v4493_v59 = vadd.f32 %v4469_v32, %v4439_v7  ;;  %v4332_v34 = vpop.f32.mrf.mxu0  ;;  %v4523_v0 = vpop.f32.mrf.mxu3  ;;  %v10594_v7 = vld [vmem:[%s8430_s14 + $0x1b0] sm:$0xff] }
 0x3d8   : > { %v4418_v55 = vpop.f32.mrf.mxu1  ;;  %v4354_v50 = vadd.f32 %v4332_v34, %v10449_v21 }
 0x3d9   : > { %v10566_v31 = vadd.f32 %v4523_v0, %v4493_v59  ;;  %v10597_v59 = vld [vmem:[%s8430_s14 + $0x260] sm:$0xff] }
 0x3da   : > { %7868 = vmatmul.msk.f32.gmra.mxu0 %vm246_vm1, %v10560_v58  ;;  %7886 = vmatmul.msk.f32.gmra.mxu1 %vm246_vm1, %v10563_v61  ;;  %v4440_v56 = vadd.f32 %v4418_v55, %v4354_v50 }
 0x3db   : > { %7896 = vmatmul.msk.f32.gmra.mxu2 %vm246_vm1, %v10046_v33 }
 0x3dc   : > { %7906 = vmatmul.msk.f32.gmra.mxu3 %vm246_vm1, %v10053_v44 }
 0x3de   : > { %v4472_v36 = vpop.f32.mrf.mxu2 }
 0x3df   : > { %v4494_v35 = vadd.f32 %v4472_v36, %v4440_v56  ;;  %v4335_v10 = vpop.f32.mrf.mxu0  ;;  %v4526_v21 = vpop.f32.mrf.mxu3 }
 0x3e0   : > { %v4421_v23 = vpop.f32.mrf.mxu1  ;;  %v4355_v33 = vadd.f32 %v4335_v10, %v10460_v46 }
 0x3e1   : > { %v10583_v49 = vadd.f32 %v4526_v21, %v4494_v35  ;;  %v10614_v35 = vld [vmem:[%s8430_s14 + $0x270] sm:$0xff] }
 0x3e2   : > { %7869 = vmatmul.msk.f32.gmra.mxu0 %vm246_vm1, %v10577_v38  ;;  %7887 = vmatmul.msk.f32.gmra.mxu1 %vm246_vm1, %v10580_v15  ;;  %v4441_v44 = vadd.f32 %v4421_v23, %v4355_v33 }
 0x3e3   : > { %7897 = vmatmul.msk.f32.gmra.mxu2 %vm246_vm1, %v10063_v48 }
 0x3e4   : > { %7907 = vmatmul.msk.f32.gmra.mxu3 %vm246_vm1, %v10070_v43 }
 0x3e6   : > { %v4475_v16 = vpop.f32.mrf.mxu2 }
 0x3e7   : > { %v4495_v19 = vadd.f32 %v4475_v16, %v4441_v44  ;;  %v4338_v13 = vpop.f32.mrf.mxu0  ;;  %v4529_v46 = vpop.f32.mrf.mxu3 }
 0x3e8   : > { %v4424_v32 = vpop.f32.mrf.mxu1  ;;  %v4356_v48 = vadd.f32 %v4338_v13, %v10474_v17  ;;  %v10611_v17 = vld [vmem:[%s8430_s14 + $0x1c0] sm:$0xff] }
 0x3e9   : > { %v10600_v34 = vadd.f32 %v4529_v46, %v4495_v19  ;;  %v10640_v19 = vld [vmem:[%s8430_s14 + $0x1d0] sm:$0xff]  ;;  %v10646_v46 = vld [vmem:[%s8430_s14 + $0x280] sm:$0xff] }
 0x3ea   : > { %7870 = vmatmul.msk.f32.gmra.mxu0 %vm246_vm1, %v10594_v7  ;;  %7888 = vmatmul.msk.f32.gmra.mxu1 %vm246_vm1, %v10597_v59  ;;  %v4442_v43 = vadd.f32 %v4424_v32, %v4356_v48 }
 0x3eb   : > { %7898 = vmatmul.msk.f32.gmra.mxu2 %vm246_vm1, %v10080_v47  ;;  %v8013_v47 = vld [vmem:[%s11304_s3 + $0xc8] sm:$0xf] }
 0x3ec   : > { %7908 = vmatmul.msk.f32.gmra.mxu3 %vm246_vm1, %v10091_v27  ;;  %8014 = vmatpush.msk.msrb.mxu2 %vm271_vm0, %v8013_v47  ;;  %v7977_v27 = vld [vmem:[%s11304_s3 + $0xc0] sm:$0xf] }
 0x3ed   : > { %7978 = vmatpush.msk.msrb.mxu0 %vm271_vm0, %v7977_v27 }
 0x3ee   : > { %v4478_v0 = vpop.f32.mrf.mxu2 }
 0x3ef   : > { %v4496_v55 = vadd.f32 %v4478_v0, %v4442_v43  ;;  %v4341_v50 = vpop.f32.mrf.mxu0  ;;  %v4532_v56 = vpop.f32.mrf.mxu3 }
 0x3f0   : > { %v4427_v36 = vpop.f32.mrf.mxu1  ;;  %v4357_v10 = vadd.f32 %v4341_v50, %v10507_v53 }
 0x3f1   : > { %v10617_v21 = vadd.f32 %v4532_v56, %v4496_v55 }
 0x3f2   : > { %7871 = vmatmul.msk.f32.gmra.mxu0 %vm246_vm1, %v10611_v17  ;;  %7889 = vmatmul.msk.f32.gmra.mxu1 %vm246_vm1, %v10614_v35  ;;  %v4443_v53 = vadd.f32 %v4427_v36, %v4357_v10 }
 0x3f3   : > { %7899 = vmatmul.msk.f32.gmra.mxu2 %vm246_vm1, %v10113_v28  ;;  %v8031_v28 = vld [vmem:[%s11304_s3 + $0xcc] sm:$0xf] }
 0x3f4   : > { %7909 = vmatmul.msk.f32.gmra.mxu3 %vm246_vm1, %v10120_v57  ;;  %v7995_v57 = vld [vmem:[%s11304_s3 + $0xc4] sm:$0xf] }
 0x3f5   : > { %8032 = vmatpush.msk.msrb.mxu3 %vm271_vm0, %v8031_v28  ;;  %7996 = vmatpush.msk.msrb.mxu1 %vm271_vm0, %v7995_v57  ;;  %v8341_v57 = vld [vmem:[%s8430_s14 + $0x2a1] sm:$0xff] }
 0x3f6   : > { %v4481_v23 = vpop.f32.mrf.mxu2 }
 0x3f7   : > { %v4497_v33 = vadd.f32 %v4481_v23, %v4443_v53  ;;  %v4344_v44 = vpop.f32.mrf.mxu0  ;;  %v4535_v16 = vpop.f32.mrf.mxu3  ;;  %v10672_v23 = vld [vmem:[%s8430_s14 + $0x1f0] sm:$0xff] }
 0x3f8   : > { %v4430_v13 = vpop.f32.mrf.mxu1  ;;  %v4358_v32 = vadd.f32 %v4344_v44, %v10521_v24 }
 0x3f9   : > { %v10650_v48 = vadd.f32 %v4535_v16, %v4497_v33 }
 0x3fa   : > { %7872 = vmatmul.msk.f32.gmra.mxu0 %vm246_vm1, %v10640_v19  ;;  %7890 = vmatmul.msk.f32.gmra.mxu1 %vm246_vm1, %v10646_v46  ;;  %v4444_v43 = vadd.f32 %v4430_v13, %v4358_v32 }
 0x3fb   : > { %7900 = vmatmul.msk.f32.gmra.mxu2 %vm246_vm1, %v10130_v37  ;;  %v11446_v37 = vld [vmem:[#allocation46_spill] sm:$0xff] }
 0x3fc   : > { %7910 = vmatmul.msk.f32.gmra.mxu3 %vm246_vm1, %v10137_v25  ;;  %v11447_v25 = vld [vmem:[#allocation45_spill] sm:$0xff] }
 0x3fe   : > { %v4484_v0 = vpop.f32.mrf.mxu2 }
 0x3ff   : > { %v4498_v55 = vadd.f32 %v4484_v0, %v4444_v43  ;;  %v4347_v50 = vpop.f32.mrf.mxu0  ;;  %v4538_v24 = vpop.f32.mrf.mxu3 }
 0x400   : > { %v4433_v56 = vpop.f32.mrf.mxu1  ;;  %v4359_v36 = vadd.f32 %v4347_v50, %v10535_v22 }
 0x401   : > { %v10661_v10 = vadd.f32 %v4538_v24, %v4498_v55  ;;  %v7933_v55 = vld [vmem:[%s8430_s14 + $0x183] sm:$0xff] }
 0x402   : > { %7873 = vmatmul.msk.f32.gmra.mxu0 %vm246_vm1, %v10142_v60  ;;  %7891 = vmatmul.msk.f32.gmra.mxu1 %vm246_vm1, %v11447_v25  ;;  %v4445_v47 = vadd.f32 %v4433_v56, %v4359_v36  ;;  %v10675_v60 = vld [vmem:[%s8430_s14 + $0x2a0] sm:$0xff]  ;;  %v7951_v36 = vld [vmem:[%s8430_s14 + $0x233] sm:$0xff] }
 0x403   : > { %7901 = vmatmul.msk.f32.gmra.mxu2 %vm246_vm1, %v11446_v37 }
 0x404   : > { %7911 = vmatmul.msk.f32.gmra.mxu3 %vm246_vm1, %v10160_v30  ;;  %v8340_v30 = vld [vmem:[%s8430_s14 + $0x1f1] sm:$0xff] }
 0x406   : > { %v4487_v27 = vpop.f32.mrf.mxu2 }
 0x407   : > { %v4499_v28 = vadd.f32 %v4487_v27, %v4445_v47  ;;  %v4350_v22 = vpop.f32.mrf.mxu0  ;;  %v4541_v53 = vpop.f32.mrf.mxu3 }
 0x408   : > { %v4436_v33 = vpop.f32.mrf.mxu1  ;;  %v4360_v44 = vadd.f32 %v4350_v22, %v10550_v20  ;;  %v10700_v22 = vld [vmem:[%s8430_s14 + $0x193] sm:$0xff] }
 0x409   : > { %v10678_v16 = vadd.f32 %v4541_v53, %v4499_v28 }
 0x40a   : > { %7874 = vmatmul.msk.f32.gmra.mxu0 %vm246_vm1, %v10672_v23  ;;  %7892 = vmatmul.msk.f32.gmra.mxu1 %vm246_vm1, %v10675_v60  ;;  %v4446_v13 = vadd.f32 %v4436_v33, %v4360_v44  ;;  %v10706_v33 = vld [vmem:[%s8430_s14 + $0x243] sm:$0xff] }
 0x40b   : > { %7902 = vmatmul.msk.f32.gmra.mxu2 %vm246_vm1, %v8340_v30 }
 0x40c   : > { %7912 = vmatmul.msk.f32.gmra.mxu3 %vm246_vm1, %v8341_v57 }
 0x40e   : > { %v4490_v32 = vpop.f32.mrf.mxu2 }
 0x40f   : > { %v4500_v43 = vadd.f32 %v4490_v32, %v4446_v13  ;;  %v4544_v0 = vpop.f32.mrf.mxu3  ;;  %v4577_v20 = vpop.f32.mrf.mxu0  ;;  %v10717_v13 = vld [vmem:[%s8430_s14 + $0x1a3] sm:$0xff] }
 0x410   : > { %v4631_v50 = vpop.f32.mrf.mxu1  ;;  %v4601_v56 = vadd.f32 %v4577_v20, %v10566_v31 }
 0x411   : > { %v10689_v24 = vadd.f32 %v4544_v0, %v4500_v43  ;;  %v10723_v0 = vld [vmem:[%s8430_s14 + $0x253] sm:$0xff] }
 0x412   : > { %7915 = vmatmul.msk.f32.vlgmr.msra.gmra.mxu0 %vm246_vm1, %v10179_v12  ;;  %7925 = vmatmul.msk.f32.vlgmr.msra.gmra.mxu1 %vm246_vm1, %v10186_v40  ;;  %v4655_v37 = vadd.f32 %v4631_v50, %v4601_v56  ;;  %v10734_v56 = vld [vmem:[%s8430_s14 + $0x1b3] sm:$0xff] }
 0x413   : > { %7943 = vmatmul.msk.f32.vlgmr.msra.gmra.mxu2 %vm246_vm1, %v7933_v55 }
 0x414   : > { %7961 = vmatmul.msk.f32.vlgmr.msra.gmra.mxu3 %vm246_vm1, %v7951_v36 }
 0x416   : > { %v4717_v25 = vpop.f32.mrf.mxu2 }
 0x417   : > { %v4741_v47 = vadd.f32 %v4717_v25, %v4655_v37  ;;  %v4580_v27 = vpop.f32.mrf.mxu0  ;;  %v4803_v28 = vpop.f32.mrf.mxu3  ;;  %v10740_v25 = vld [vmem:[%s8430_s14 + $0x263] sm:$0xff] }
 0x418   : > { %v4634_v31 = vpop.f32.mrf.mxu1  ;;  %v4602_v53 = vadd.f32 %v4580_v27, %v10583_v49 }
 0x419   : > { %v10703_v12 = vadd.f32 %v4803_v28, %v4741_v47 }
 0x41a   : > { %7916 = vmatmul.msk.f32.gmra.mxu0 %vm246_vm1, %v10196_v42  ;;  %7926 = vmatmul.msk.f32.gmra.mxu1 %vm246_vm1, %v10203_v41  ;;  %v4656_v40 = vadd.f32 %v4634_v31, %v4602_v53  ;;  %v7937_v31 = vld [vmem:[%s8430_s14 + $0x1c3] sm:$0xff] }
 0x41b   : > { %7944 = vmatmul.msk.f32.gmra.mxu2 %vm246_vm1, %v10700_v22 }
 0x41c   : > { %7962 = vmatmul.msk.f32.gmra.mxu3 %vm246_vm1, %v10706_v33 }
 0x41e   : > { %v4720_v44 = vpop.f32.mrf.mxu2 }
 0x41f   : > { %v4742_v49 = vadd.f32 %v4720_v44, %v4656_v40  ;;  %v4583_v30 = vpop.f32.mrf.mxu0  ;;  %v4806_v57 = vpop.f32.mrf.mxu3 }
 0x420   : > { %v4637_v32 = vpop.f32.mrf.mxu1  ;;  %v4603_v42 = vadd.f32 %v4583_v30, %v10600_v34 }
 0x421   : > { %v10720_v43 = vadd.f32 %v4806_v57, %v4742_v49 }
 0x422   : > { %7917 = vmatmul.msk.f32.gmra.mxu0 %vm246_vm1, %v10213_v18  ;;  %7927 = vmatmul.msk.f32.gmra.mxu1 %vm246_vm1, %v10220_v51  ;;  %v4657_v41 = vadd.f32 %v4637_v32, %v4603_v42  ;;  %v7938_v42 = vld [vmem:[%s8430_s14 + $0x1d3] sm:$0xff] }
 0x423   : > { %7945 = vmatmul.msk.f32.gmra.mxu2 %vm246_vm1, %v10717_v13 }
 0x424   : > { %7963 = vmatmul.msk.f32.gmra.mxu3 %vm246_vm1, %v10723_v0 }
 0x426   : > { %v4723_v20 = vpop.f32.mrf.mxu2 }
 0x427   : > { %v4743_v34 = vadd.f32 %v4723_v20, %v4657_v41  ;;  %v4586_v55 = vpop.f32.mrf.mxu0  ;;  %v4809_v50 = vpop.f32.mrf.mxu3  ;;  %v8067_v41 = vld [vmem:[%s11304_s3 + $0xd4] sm:$0xf] }
 0x428   : > { %v4640_v36 = vpop.f32.mrf.mxu1  ;;  %v4604_v18 = vadd.f32 %v4586_v55, %v10617_v21  ;;  %8068 = vmatpush.msk.msra.mxu1 %vm271_vm0, %v8067_v41 }
 0x429   : > { %v10737_v37 = vadd.f32 %v4809_v50, %v4743_v34  ;;  %v7956_v50 = vld [vmem:[%s8430_s14 + $0x283] sm:$0xff] }
 0x42a   : > { %7918 = vmatmul.msk.f32.gmra.mxu0 %vm246_vm1, %v10230_v14  ;;  %7928 = vmatmul.msk.f32.gmra.mxu1 %vm246_vm1, %v10240_v11  ;;  %v4658_v51 = vadd.f32 %v4640_v36, %v4604_v18  ;;  %v7955_v14 = vld [vmem:[%s8430_s14 + $0x273] sm:$0xff] }
 0x42b   : > { %7946 = vmatmul.msk.f32.gmra.mxu2 %vm246_vm1, %v10734_v56  ;;  %v8085_v11 = vld [vmem:[%s11304_s3 + $0xd8] sm:$0xf] }
 0x42c   : > { %7964 = vmatmul.msk.f32.gmra.mxu3 %vm246_vm1, %v10740_v25  ;;  %8086 = vmatpush.msk.msra.mxu2 %vm271_vm0, %v8085_v11 }
 0x42e   : > { %v4726_v47 = vpop.f32.mrf.mxu2 }
 0x42f   : > { %v4744_v21 = vadd.f32 %v4726_v47, %v4658_v51  ;;  %v4589_v27 = vpop.f32.mrf.mxu0  ;;  %v4812_v28 = vpop.f32.mrf.mxu3 }
 0x430   : > { %v4643_v53 = vpop.f32.mrf.mxu1  ;;  %v4605_v40 = vadd.f32 %v4589_v27, %v10650_v48  ;;  %v8049_v48 = vld [vmem:[%s11304_s3 + $0xd0] sm:$0xf] }
 0x431   : > { %v10752_v44 = vadd.f32 %v4812_v28, %v4744_v21  ;;  %8050 = vmatpush.msk.msra.mxu0 %vm271_vm0, %v8049_v48  ;;  %v8342_v48 = vld [vmem:[%s8430_s14 + $0x1f2] sm:$0xff] }
 0x432   : > { %7919 = vmatmul.msk.f32.gmra.mxu0 %vm246_vm1, %v10263_v8  ;;  %7929 = vmatmul.msk.f32.gmra.mxu1 %vm246_vm1, %v10270_v52  ;;  %v8103_v8 = vld [vmem:[%s11304_s3 + $0xdc] sm:$0xf]  ;;  %v4659_v49 = vadd.f32 %v4643_v53, %v4605_v40  ;;  %v7940_v40 = vld [vmem:[%s8430_s14 + $0x1f3] sm:$0xff] }
 0x433   : > { %7947 = vmatmul.msk.f32.gmra.mxu2 %vm246_vm1, %v7937_v31  ;;  %8104 = vmatpush.msk.msra.mxu3 %vm271_vm0, %v8103_v8 }
 0x434   : > { %7965 = vmatmul.msk.f32.gmra.mxu3 %vm246_vm1, %v7955_v14 }
 0x436   : > { %v4729_v30 = vpop.f32.mrf.mxu2 }
 0x437   : > { %v4745_v52 = vadd.f32 %v4729_v30, %v4659_v49  ;;  %v4592_v57 = vpop.f32.mrf.mxu0  ;;  %v4815_v32 = vpop.f32.mrf.mxu3 }
 0x438   : > { %v4646_v20 = vpop.f32.mrf.mxu1  ;;  %v4606_v34 = vadd.f32 %v4592_v57, %v10661_v10  ;;  %v8005_v57 = vld [vmem:[%s8430_s14 + $0x31] sm:$0xff] }
 0x439   : > { %v10779_v55 = vadd.f32 %v4815_v32, %v4745_v52  ;;  %v7969_v52 = vld [vmem:[%s8430_s14 + $0x30] sm:$0xff] }
 0x43a   : > { %7920 = vmatmul.msk.f32.gmra.mxu0 %vm246_vm1, %v10280_v26  ;;  %7930 = vmatmul.msk.f32.gmra.mxu1 %vm246_vm1, %v10287_v2  ;;  %v4660_v36 = vadd.f32 %v4646_v20, %v4606_v34  ;;  %v8023_v34 = vld [vmem:[%s8430_s14 + $0xe1] sm:$0xff] }
 0x43b   : > { %7948 = vmatmul.msk.f32.gmra.mxu2 %vm246_vm1, %v7938_v42  ;;  %v7987_v42 = vld [vmem:[%s8430_s14 + $0xe0] sm:$0xff] }
 0x43c   : > { %7966 = vmatmul.msk.f32.gmra.mxu3 %vm246_vm1, %v7956_v50 }
 0x43e   : > { %v4732_v18 = vpop.f32.mrf.mxu2 }
 0x43f   : > { %v4746_v51 = vadd.f32 %v4732_v18, %v4660_v36  ;;  %v4595_v47 = vpop.f32.mrf.mxu0  ;;  %v4818_v21 = vpop.f32.mrf.mxu3 }
 0x440   : > { %v4649_v10 = vpop.f32.mrf.mxu1  ;;  %v4607_v27 = vadd.f32 %v4595_v47, %v10678_v16 }
 0x441   : > { %v10789_v28 = vadd.f32 %v4818_v21, %v4746_v51  ;;  %v7970_v21 = vld [vmem:[%s8430_s14 + $0x40] sm:$0xff] }
 0x442   : > { %7921 = vmatmul.msk.f32.gmra.mxu0 %vm246_vm1, %v10303_v45  ;;  %7931 = vmatmul.msk.f32.gmra.mxu1 %vm246_vm1, %v10310_v62  ;;  %v4661_v26 = vadd.f32 %v4649_v10, %v4607_v27  ;;  %v8006_v10 = vld [vmem:[%s8430_s14 + $0x41] sm:$0xff]  ;;  %v7988_v27 = vld [vmem:[%s8430_s14 + $0xf0] sm:$0xff] }
 0x443   : > { %7949 = vmatmul.msk.f32.gmra.mxu2 %vm246_vm1, %v10294_v5  ;;  %v7958_v5 = vld [vmem:[%s8430_s14 + $0x2a3] sm:$0xff] }
 0x444   : > { %7967 = vmatmul.msk.f32.gmra.mxu3 %vm246_vm1, %v10300_v39  ;;  %v8343_v39 = vld [vmem:[%s8430_s14 + $0x2a2] sm:$0xff] }
 0x446   : > { %v4735_v2 = vpop.f32.mrf.mxu2 }
 0x447   : > { %v4747_v31 = vadd.f32 %v4735_v2, %v4661_v26  ;;  %v4598_v16 = vpop.f32.mrf.mxu0  ;;  %v4821_v53 = vpop.f32.mrf.mxu3 }
 0x448   : > { %v4652_v14 = vpop.f32.mrf.mxu1  ;;  %v4608_v45 = vadd.f32 %v4598_v16, %v10689_v24 }
 0x449   : > { %v10801_v11 = vadd.f32 %v4821_v53, %v4747_v31  ;;  %v8024_v31 = vld [vmem:[%s8430_s14 + $0xf1] sm:$0xff] }
 0x44a   : > { %7922 = vmatmul.msk.f32.gmra.mxu0 %vm246_vm1, %v8342_v48  ;;  %7932 = vmatmul.msk.f32.gmra.mxu1 %vm246_vm1, %v8343_v39  ;;  %v4662_v62 = vadd.f32 %v4652_v14, %v4608_v45  ;;  %v7989_v39 = vld [vmem:[%s8430_s14 + $0x100] sm:$0xff] }
 0x44b   : > { %7950 = vmatmul.msk.f32.gmra.mxu2 %vm246_vm1, %v7940_v40 }
 0x44c   : > { %7968 = vmatmul.msk.f32.gmra.mxu3 %vm246_vm1, %v7958_v5  ;;  %v7971_v5 = vld [vmem:[%s8430_s14 + $0x50] sm:$0xff] }
 0x44e   : > { %v4738_v8 = vpop.f32.mrf.mxu2 }
 0x44f   : > { %v4748_v49 = vadd.f32 %v4738_v8, %v4662_v62  ;;  %v4824_v30 = vpop.f32.mrf.mxu3  ;;  %v4889_v24 = vpop.f32.mrf.mxu0 }
 0x450   : > { %v4975_v32 = vpop.f32.mrf.mxu1  ;;  %v4913_v20 = vadd.f32 %v4889_v24, %v10703_v12 }
 0x451   : > { %v10813_v41 = vadd.f32 %v4824_v30, %v4748_v49  ;;  %v8025_v49 = vld [vmem:[%s8430_s14 + $0x101] sm:$0xff] }
 0x452   : > { %7979 = vmatmul.msk.f32.vlgmr.msrb.gmra.mxu0 %vm246_vm1, %v7969_v52  ;;  %7997 = vmatmul.msk.f32.vlgmr.msrb.gmra.mxu1 %vm246_vm1, %v7987_v42  ;;  %v4999_v50 = vadd.f32 %v4975_v32, %v4913_v20  ;;  %v7972_v42 = vld [vmem:[%s8430_s14 + $0x60] sm:$0xff] }
 0x453   : > { %8015 = vmatmul.msk.f32.vlgmr.msrb.gmra.mxu2 %vm246_vm1, %v8005_v57 }
 0x454   : > { %8033 = vmatmul.msk.f32.vlgmr.msrb.gmra.mxu3 %vm246_vm1, %v8023_v34  ;;  %v7990_v34 = vld [vmem:[%s8430_s14 + $0x110] sm:$0xff] }
 0x456   : > { %v5029_v36 = vpop.f32.mrf.mxu2 }
 0x457   : > { %v5053_v18 = vadd.f32 %v5029_v36, %v4999_v50  ;;  %v4892_v51 = vpop.f32.mrf.mxu0  ;;  %v5083_v47 = vpop.f32.mrf.mxu3 }
 0x458   : > { %v4978_v12 = vpop.f32.mrf.mxu1  ;;  %v4914_v26 = vadd.f32 %v4892_v51, %v10720_v43  ;;  %v8007_v43 = vld [vmem:[%s8430_s14 + $0x51] sm:$0xff] }
 0x459   : > { %v10825_v2 = vadd.f32 %v5083_v47, %v5053_v18  ;;  %v8026_v18 = vld [vmem:[%s8430_s14 + $0x111] sm:$0xff] }
 0x45a   : > { %7980 = vmatmul.msk.f32.gmra.mxu0 %vm246_vm1, %v7970_v21  ;;  %7998 = vmatmul.msk.f32.gmra.mxu1 %vm246_vm1, %v7988_v27  ;;  %v5000_v16 = vadd.f32 %v4978_v12, %v4914_v26  ;;  %v7973_v27 = vld [vmem:[%s8430_s14 + $0x70] sm:$0xff] }
 0x45b   : > { %8016 = vmatmul.msk.f32.gmra.mxu2 %vm246_vm1, %v8006_v10  ;;  %v8009_v26 = vld [vmem:[%s8430_s14 + $0x71] sm:$0xff] }
 0x45c   : > { %8034 = vmatmul.msk.f32.gmra.mxu3 %vm246_vm1, %v8024_v31  ;;  %v7991_v31 = vld [vmem:[%s8430_s14 + $0x120] sm:$0xff] }
 0x45e   : > { %v5032_v53 = vpop.f32.mrf.mxu2 }
 0x45f   : > { %v5054_v40 = vadd.f32 %v5032_v53, %v5000_v16  ;;  %v4895_v14 = vpop.f32.mrf.mxu0  ;;  %v5086_v45 = vpop.f32.mrf.mxu3 }
 0x460   : > { %v4981_v48 = vpop.f32.mrf.mxu1  ;;  %v4915_v62 = vadd.f32 %v4895_v14, %v10737_v37  ;;  %v8008_v37 = vld [vmem:[%s8430_s14 + $0x61] sm:$0xff] }
 0x461   : > { %v10836_v8 = vadd.f32 %v5086_v45, %v5054_v40  ;;  %v8027_v40 = vld [vmem:[%s8430_s14 + $0x121] sm:$0xff]  ;;  %v8175_v45 = vld [vmem:[%s11304_s3 + $0xec] sm:$0xf] }
 0x462   : > { %7981 = vmatmul.msk.f32.gmra.mxu0 %vm246_vm1, %v7971_v5  ;;  %7999 = vmatmul.msk.f32.gmra.mxu1 %vm246_vm1, %v7989_v39  ;;  %v5001_v30 = vadd.f32 %v4981_v48, %v4915_v62  ;;  %v8157_v14 = vld [vmem:[%s11304_s3 + $0xe8] sm:$0xf] }
 0x463   : > { %8017 = vmatmul.msk.f32.gmra.mxu2 %vm246_vm1, %v8007_v43  ;;  %8176 = vmatpush.msk.msrb.mxu3 %vm271_vm0, %v8175_v45 }
 0x464   : > { %8035 = vmatmul.msk.f32.gmra.mxu3 %vm246_vm1, %v8025_v49  ;;  %8158 = vmatpush.msk.msrb.mxu2 %vm271_vm0, %v8157_v14  ;;  %v7974_v49 = vld [vmem:[%s8430_s14 + $0x80] sm:$0xff] }
 0x466   : > { %v5035_v24 = vpop.f32.mrf.mxu2 }
 0x467   : > { %v5055_v52 = vadd.f32 %v5035_v24, %v5001_v30  ;;  %v4898_v57 = vpop.f32.mrf.mxu0  ;;  %v5089_v32 = vpop.f32.mrf.mxu3  ;;  %v8010_v30 = vld [vmem:[%s8430_s14 + $0x81] sm:$0xff] }
 0x468   : > { %v4984_v20 = vpop.f32.mrf.mxu1  ;;  %v4916_v50 = vadd.f32 %v4898_v57, %v10752_v44  ;;  %v8139_v24 = vld [vmem:[%s11304_s3 + $0xe4] sm:$0xf]  ;;  %v7992_v57 = vld [vmem:[%s8430_s14 + $0x130] sm:$0xff] }
 0x469   : > { %v10847_v36 = vadd.f32 %v5089_v32, %v5055_v52  ;;  %8140 = vmatpush.msk.msrb.mxu1 %vm271_vm0, %v8139_v24  ;;  %v8059_v24 = vld [vmem:[%s8430_s14 + $0xe2] sm:$0xff] }
 0x46a   : > { %7982 = vmatmul.msk.f32.gmra.mxu0 %vm246_vm1, %v7972_v42  ;;  %8000 = vmatmul.msk.f32.gmra.mxu1 %vm246_vm1, %v7990_v34  ;;  %v5002_v51 = vadd.f32 %v4984_v20, %v4916_v50 }
 0x46b   : > { %8018 = vmatmul.msk.f32.gmra.mxu2 %vm246_vm1, %v8008_v37  ;;  %v8028_v37 = vld [vmem:[%s8430_s14 + $0x131] sm:$0xff] }
 0x46c   : > { %8036 = vmatmul.msk.f32.gmra.mxu3 %vm246_vm1, %v8026_v18 }
 0x46e   : > { %v5038_v47 = vpop.f32.mrf.mxu2 }
 0x46f   : > { %v5056_v21 = vadd.f32 %v5038_v47, %v5002_v51  ;;  %v4901_v10 = vpop.f32.mrf.mxu0  ;;  %v5092_v12 = vpop.f32.mrf.mxu3 }
 0x470   : > { %v4987_v44 = vpop.f32.mrf.mxu1  ;;  %v4917_v16 = vadd.f32 %v4901_v10, %v10779_v55  ;;  %v8121_v55 = vld [vmem:[%s11304_s3 + $0xe0] sm:$0xf] }
 0x471   : > { %v10858_v53 = vadd.f32 %v5092_v12, %v5056_v21  ;;  %8122 = vmatpush.msk.msrb.mxu0 %vm271_vm0, %v8121_v55  ;;  %v8029_v12 = vld [vmem:[%s8430_s14 + $0x141] sm:$0xff]  ;;  %v7994_v55 = vld [vmem:[%s8430_s14 + $0x150] sm:$0xff] }
 0x472   : > { %7983 = vmatmul.msk.f32.gmra.mxu0 %vm246_vm1, %v7973_v27  ;;  %8001 = vmatmul.msk.f32.gmra.mxu1 %vm246_vm1, %v7991_v31  ;;  %v5003_v5 = vadd.f32 %v4987_v44, %v4917_v16 }
 0x473   : > { %8019 = vmatmul.msk.f32.gmra.mxu2 %vm246_vm1, %v8009_v26 }
 0x474   : > { %8037 = vmatmul.msk.f32.gmra.mxu3 %vm246_vm1, %v8027_v40  ;;  %v8012_v40 = vld [vmem:[%s8430_s14 + $0xa1] sm:$0xff] }
 0x476   : > { %v5041_v43 = vpop.f32.mrf.mxu2 }
 0x477   : > { %v5057_v48 = vadd.f32 %v5041_v43, %v5003_v5  ;;  %v4904_v39 = vpop.f32.mrf.mxu0  ;;  %v5095_v62 = vpop.f32.mrf.mxu3  ;;  %v8030_v5 = vld [vmem:[%s8430_s14 + $0x151] sm:$0xff] }
 0x478   : > { %v4990_v52 = vpop.f32.mrf.mxu1  ;;  %v4918_v32 = vadd.f32 %v4904_v39, %v10789_v28  ;;  %v8011_v28 = vld [vmem:[%s8430_s14 + $0x91] sm:$0xff] }
 0x479   : > { %v10885_v42 = vadd.f32 %v5095_v62, %v5057_v48 }
 0x47a   : > { %7984 = vmatmul.msk.f32.gmra.mxu0 %vm246_vm1, %v7974_v49  ;;  %8002 = vmatmul.msk.f32.gmra.mxu1 %vm246_vm1, %v7992_v57  ;;  %v5004_v20 = vadd.f32 %v4990_v52, %v4918_v32  ;;  %v8041_v49 = vld [vmem:[%s8430_s14 + $0x32] sm:$0xff]  ;;  %v8095_v32 = vld [vmem:[%s8430_s14 + $0xe3] sm:$0xff] }
 0x47b   : > { %8020 = vmatmul.msk.f32.gmra.mxu2 %vm246_vm1, %v8010_v30 }
 0x47c   : > { %8038 = vmatmul.msk.f32.gmra.mxu3 %vm246_vm1, %v8028_v37 }
 0x47e   : > { %v5044_v34 = vpop.f32.mrf.mxu2 }
 0x47f   : > { %v5058_v50 = vadd.f32 %v5044_v34, %v5004_v20  ;;  %v4907_v18 = vpop.f32.mrf.mxu0  ;;  %v5098_v51 = vpop.f32.mrf.mxu3 }
 0x480   : > { %v4993_v47 = vpop.f32.mrf.mxu1  ;;  %v4919_v21 = vadd.f32 %v4907_v18, %v10801_v11  ;;  %v7976_v11 = vld [vmem:[%s8430_s14 + $0xa0] sm:$0xff] }
 0x481   : > { %v10894_v10 = vadd.f32 %v5098_v51, %v5058_v50  ;;  %v8042_v51 = vld [vmem:[%s8430_s14 + $0x42] sm:$0xff] }
 0x482   : > { %7985 = vmatmul.msk.f32.gmra.mxu0 %vm246_vm1, %v10410_v63  ;;  %8003 = vmatmul.msk.f32.gmra.mxu1 %vm246_vm1, %v10413_v9  ;;  %v5005_v27 = vadd.f32 %v4993_v47, %v4919_v21  ;;  %v8060_v47 = vld [vmem:[%s8430_s14 + $0xf2] sm:$0xff] }
 0x483   : > { %8021 = vmatmul.msk.f32.gmra.mxu2 %vm246_vm1, %v8011_v28  ;;  %v8078_v28 = vld [vmem:[%s8430_s14 + $0x43] sm:$0xff] }
 0x484   : > { %8039 = vmatmul.msk.f32.gmra.mxu3 %vm246_vm1, %v8029_v12 }
 0x486   : > { %v5047_v26 = vpop.f32.mrf.mxu2 }
 0x487   : > { %v5059_v44 = vadd.f32 %v5047_v26, %v5005_v27  ;;  %v4910_v31 = vpop.f32.mrf.mxu0  ;;  %v5101_v16 = vpop.f32.mrf.mxu3  ;;  %v8096_v27 = vld [vmem:[%s8430_s14 + $0xf3] sm:$0xff] }
 0x488   : > { %v4996_v14 = vpop.f32.mrf.mxu1  ;;  %v4920_v63 = vadd.f32 %v4910_v31, %v10813_v41  ;;  %v8077_v41 = vld [vmem:[%s8430_s14 + $0x33] sm:$0xff] }
 0x489   : > { %v10907_v45 = vadd.f32 %v5101_v16, %v5059_v44 }
 0x48a   : > { %7986 = vmatmul.msk.f32.gmra.mxu0 %vm246_vm1, %v7976_v11  ;;  %8004 = vmatmul.msk.f32.gmra.mxu1 %vm246_vm1, %v7994_v55  ;;  %v5006_v9 = vadd.f32 %v4996_v14, %v4920_v63  ;;  %v8061_v55 = vld [vmem:[%s8430_s14 + $0x102] sm:$0xff] }
 0x48b   : > { %8022 = vmatmul.msk.f32.gmra.mxu2 %vm246_vm1, %v8012_v40  ;;  %v8043_v40 = vld [vmem:[%s8430_s14 + $0x52] sm:$0xff] }
 0x48c   : > { %8040 = vmatmul.msk.f32.gmra.mxu3 %vm246_vm1, %v8030_v5 }
 0x48e   : > { %v5050_v43 = vpop.f32.mrf.mxu2 }
 0x48f   : > { %v5060_v48 = vadd.f32 %v5050_v43, %v5006_v9  ;;  %v5104_v39 = vpop.f32.mrf.mxu3  ;;  %v5137_v62 = vpop.f32.mrf.mxu0  ;;  %v8097_v9 = vld [vmem:[%s8430_s14 + $0x103] sm:$0xff] }
 0x490   : > { %v5191_v30 = vpop.f32.mrf.mxu1  ;;  %v5161_v57 = vadd.f32 %v5137_v62, %v10825_v2 }
 0x491   : > { %v10917_v52 = vadd.f32 %v5104_v39, %v5060_v48 }
 0x492   : > { %8051 = vmatmul.msk.f32.vlgmr.msra.gmra.mxu0 %vm246_vm1, %v8041_v49  ;;  %8069 = vmatmul.msk.f32.vlgmr.msra.gmra.mxu1 %vm246_vm1, %v8059_v24  ;;  %v5215_v37 = vadd.f32 %v5191_v30, %v5161_v57  ;;  %v8062_v30 = vld [vmem:[%s8430_s14 + $0x112] sm:$0xff] }
 0x493   : > { %8087 = vmatmul.msk.f32.vlgmr.msra.gmra.mxu2 %vm246_vm1, %v8077_v41  ;;  %v8044_v41 = vld [vmem:[%s8430_s14 + $0x62] sm:$0xff] }
 0x494   : > { %8105 = vmatmul.msk.f32.vlgmr.msra.gmra.mxu3 %vm246_vm1, %v8095_v32 }
 0x496   : > { %v5277_v20 = vpop.f32.mrf.mxu2 }
 0x497   : > { %v5301_v34 = vadd.f32 %v5277_v20, %v5215_v37  ;;  %v5140_v50 = vpop.f32.mrf.mxu0  ;;  %v5363_v18 = vpop.f32.mrf.mxu3 }
 0x498   : > { %v5194_v2 = vpop.f32.mrf.mxu1  ;;  %v5162_v21 = vadd.f32 %v5140_v50, %v10836_v8  ;;  %v8079_v8 = vld [vmem:[%s8430_s14 + $0x53] sm:$0xff] }
 0x499   : > { %v10929_v12 = vadd.f32 %v5363_v18, %v5301_v34  ;;  %v8045_v18 = vld [vmem:[%s8430_s14 + $0x72] sm:$0xff] }
 0x49a   : > { %8052 = vmatmul.msk.f32.gmra.mxu0 %vm246_vm1, %v8042_v51  ;;  %8070 = vmatmul.msk.f32.gmra.mxu1 %vm246_vm1, %v8060_v47  ;;  %v5216_v26 = vadd.f32 %v5194_v2, %v5162_v21 }
 0x49b   : > { %8088 = vmatmul.msk.f32.gmra.mxu2 %vm246_vm1, %v8078_v28 }
 0x49c   : > { %8106 = vmatmul.msk.f32.gmra.mxu3 %vm246_vm1, %v8096_v27 }
 0x49e   : > { %v5280_v44 = vpop.f32.mrf.mxu2 }
 0x49f   : > { %v5302_v31 = vadd.f32 %v5280_v44, %v5216_v26  ;;  %v5143_v16 = vpop.f32.mrf.mxu0  ;;  %v5366_v11 = vpop.f32.mrf.mxu3  ;;  %v8046_v44 = vld [vmem:[%s8430_s14 + $0x82] sm:$0xff] }
 0x4a0   : > { %v5197_v14 = vpop.f32.mrf.mxu1  ;;  %v5163_v63 = vadd.f32 %v5143_v16, %v10847_v36 }
 0x4a1   : > { %v10940_v5 = vadd.f32 %v5366_v11, %v5302_v31  ;;  %v8211_v31 = vld [vmem:[%s11304_s3 + $0xf4] sm:$0xf] }
 0x4a2   : > { %8053 = vmatmul.msk.f32.gmra.mxu0 %vm246_vm1, %v8043_v40  ;;  %8071 = vmatmul.msk.f32.gmra.mxu1 %vm246_vm1, %v8061_v55  ;;  %v5217_v43 = vadd.f32 %v5197_v14, %v5163_v63  ;;  %v8064_v11 = vld [vmem:[%s8430_s14 + $0x132] sm:$0xff] }
 0x4a3   : > { %8089 = vmatmul.msk.f32.gmra.mxu2 %vm246_vm1, %v8079_v8  ;;  %8212 = vmatpush.msk.msra.mxu1 %vm271_vm0, %v8211_v31  ;;  %v8100_v14 = vld [vmem:[%s8430_s14 + $0x133] sm:$0xff] }
 0x4a4   : > { %8107 = vmatmul.msk.f32.gmra.mxu3 %vm246_vm1, %v8097_v9 }
 0x4a6   : > { %v5283_v48 = vpop.f32.mrf.mxu2 }
 0x4a7   : > { %v5303_v39 = vadd.f32 %v5283_v48, %v5217_v43  ;;  %v5146_v62 = vpop.f32.mrf.mxu0  ;;  %v5369_v49 = vpop.f32.mrf.mxu3 }
 0x4a8   : > { %v5200_v36 = vpop.f32.mrf.mxu1  ;;  %v5164_v24 = vadd.f32 %v5146_v62, %v10858_v53  ;;  %v8063_v53 = vld [vmem:[%s8430_s14 + $0x122] sm:$0xff] }
 0x4a9   : > { %v10950_v57 = vadd.f32 %v5369_v49, %v5303_v39  ;;  %v8047_v39 = vld [vmem:[%s8430_s14 + $0x92] sm:$0xff]  ;;  %v8065_v62 = vld [vmem:[%s8430_s14 + $0x142] sm:$0xff] }
 0x4aa   : > { %8054 = vmatmul.msk.f32.gmra.mxu0 %vm246_vm1, %v8044_v41  ;;  %8072 = vmatmul.msk.f32.gmra.mxu1 %vm246_vm1, %v8062_v30  ;;  %v5218_v32 = vadd.f32 %v5200_v36, %v5164_v24 }
 0x4ab   : > { %8090 = vmatmul.msk.f32.gmra.mxu2 %vm246_vm1, %v10471_v1  ;;  %v8229_v1 = vld [vmem:[%s11304_s3 + $0xf8] sm:$0xf] }
 0x4ac   : > { %8108 = vmatmul.msk.f32.gmra.mxu3 %vm246_vm1, %v10477_v3  ;;  %8230 = vmatpush.msk.msra.mxu2 %vm271_vm0, %v8229_v1  ;;  %v8193_v3 = vld [vmem:[%s11304_s3 + $0xf0] sm:$0xf] }
 0x4ad   : > { %8194 = vmatpush.msk.msra.mxu0 %vm271_vm0, %v8193_v3 }
 0x4ae   : > { %v5286_v37 = vpop.f32.mrf.mxu2 }
 0x4af   : > { %v5304_v20 = vadd.f32 %v5286_v37, %v5218_v32  ;;  %v5149_v34 = vpop.f32.mrf.mxu0  ;;  %v5372_v50 = vpop.f32.mrf.mxu3 }
 0x4b0   : > { %v5203_v51 = vpop.f32.mrf.mxu1  ;;  %v5165_v28 = vadd.f32 %v5149_v34, %v10885_v42 }
 0x4b1   : > { %v10961_v2 = vadd.f32 %v5372_v50, %v5304_v20  ;;  %v8048_v20 = vld [vmem:[%s8430_s14 + $0xa2] sm:$0xff]  ;;  %v8066_v50 = vld [vmem:[%s8430_s14 + $0x152] sm:$0xff] }
 0x4b2   : > { %8055 = vmatmul.msk.f32.gmra.mxu0 %vm246_vm1, %v8045_v18  ;;  %8073 = vmatmul.msk.f32.gmra.mxu1 %vm246_vm1, %v8063_v53  ;;  %v5219_v42 = vadd.f32 %v5203_v51, %v5165_v28 }
 0x4b3   : > { %8091 = vmatmul.msk.f32.gmra.mxu2 %vm246_vm1, %v10500_v29  ;;  %v8247_v29 = vld [vmem:[%s11304_s3 + $0xfc] sm:$0xf] }
 0x4b4   : > { %8109 = vmatmul.msk.f32.gmra.mxu3 %vm246_vm1, %v10510_v4  ;;  %v8082_v4 = vld [vmem:[%s8430_s14 + $0x83] sm:$0xff] }
 0x4b5   : > { %8248 = vmatpush.msk.msra.mxu3 %vm271_vm0, %v8247_v29  ;;  %v8149_v29 = vld [vmem:[%s8430_s14 + $0x191] sm:$0xff] }
 0x4b6   : > { %v5289_v47 = vpop.f32.mrf.mxu2 }
 0x4b7   : > { %v5305_v21 = vadd.f32 %v5289_v47, %v5219_v42  ;;  %v5152_v27 = vpop.f32.mrf.mxu0  ;;  %v5375_v26 = vpop.f32.mrf.mxu3 }
 0x4b8   : > { %v5206_v16 = vpop.f32.mrf.mxu1  ;;  %v5166_v40 = vadd.f32 %v5152_v27, %v10894_v10 }
 0x4b9   : > { %v10989_v8 = vadd.f32 %v5375_v26, %v5305_v21  ;;  %v8167_v21 = vld [vmem:[%s8430_s14 + $0x241] sm:$0xff] }
 0x4ba   : > { %8056 = vmatmul.msk.f32.gmra.mxu0 %vm246_vm1, %v8046_v44  ;;  %8074 = vmatmul.msk.f32.gmra.mxu1 %vm246_vm1, %v8064_v11  ;;  %v5220_v55 = vadd.f32 %v5206_v16, %v5166_v40  ;;  %v8150_v16 = vld [vmem:[%s8430_s14 + $0x1a1] sm:$0xff] }
 0x4bb   : > { %8092 = vmatmul.msk.f32.gmra.mxu2 %vm246_vm1, %v8082_v4 }
 0x4bc   : > { %8110 = vmatmul.msk.f32.gmra.mxu3 %vm246_vm1, %v8100_v14 }
 0x4be   : > { %v5292_v63 = vpop.f32.mrf.mxu2 }
 0x4bf   : > { %v5306_v9 = vadd.f32 %v5292_v63, %v5220_v55  ;;  %v5155_v43 = vpop.f32.mrf.mxu0  ;;  %v5378_v48 = vpop.f32.mrf.mxu3 }
 0x4c0   : > { %v5209_v10 = vpop.f32.mrf.mxu1  ;;  %v5167_v49 = vadd.f32 %v5155_v43, %v10907_v45  ;;  %v8084_v45 = vld [vmem:[%s8430_s14 + $0xa3] sm:$0xff] }
 0x4c1   : > { %v10999_v41 = vadd.f32 %v5378_v48, %v5306_v9  ;;  %v8151_v9 = vld [vmem:[%s8430_s14 + $0x1b1] sm:$0xff] }
 0x4c2   : > { %8057 = vmatmul.msk.f32.gmra.mxu0 %vm246_vm1, %v8047_v39  ;;  %8075 = vmatmul.msk.f32.gmra.mxu1 %vm246_vm1, %v8065_v62  ;;  %v5221_v36 = vadd.f32 %v5209_v10, %v5167_v49 }
 0x4c3   : > { %8093 = vmatmul.msk.f32.gmra.mxu2 %vm246_vm1, %v10532_v54  ;;  %v8102_v54 = vld [vmem:[%s8430_s14 + $0x153] sm:$0xff] }
 0x4c4   : > { %8111 = vmatmul.msk.f32.gmra.mxu3 %vm246_vm1, %v10538_v6 }
 0x4c6   : > { %v5295_v30 = vpop.f32.mrf.mxu2 }
 0x4c7   : > { %v5307_v24 = vadd.f32 %v5295_v30, %v5221_v36  ;;  %v5158_v32 = vpop.f32.mrf.mxu0  ;;  %v5381_v37 = vpop.f32.mrf.mxu3  ;;  %v8152_v36 = vld [vmem:[%s8430_s14 + $0x1c1] sm:$0xff] }
 0x4c8   : > { %v5212_v34 = vpop.f32.mrf.mxu1  ;;  %v5168_v18 = vadd.f32 %v5158_v32, %v10917_v52 }
 0x4c9   : > { %v11011_v51 = vadd.f32 %v5381_v37, %v5307_v24 }
 0x4ca   : > { %8058 = vmatmul.msk.f32.gmra.mxu0 %vm246_vm1, %v8048_v20  ;;  %8076 = vmatmul.msk.f32.gmra.mxu1 %vm246_vm1, %v8066_v50  ;;  %v5222_v6 = vadd.f32 %v5212_v34, %v5168_v18  ;;  %v8153_v34 = vld [vmem:[%s8430_s14 + $0x1d1] sm:$0xff] }
 0x4cb   : > { %8094 = vmatmul.msk.f32.gmra.mxu2 %vm246_vm1, %v8084_v45 }
 0x4cc   : > { %8112 = vmatmul.msk.f32.gmra.mxu3 %vm246_vm1, %v8102_v54  ;;  %v8171_v54 = vld [vmem:[%s8430_s14 + $0x281] sm:$0xff] }
 0x4ce   : > { %v5298_v53 = vpop.f32.mrf.mxu2 }
 0x4cf   : > { %v5308_v28 = vadd.f32 %v5298_v53, %v5222_v6  ;;  %v5384_v1 = vpop.f32.mrf.mxu3  ;;  %v5450_v3 = vpop.f32.mrf.mxu0 }
 0x4d0   : > { %v5537_v52 = vpop.f32.mrf.mxu1  ;;  %v5474_v47 = vadd.f32 %v5450_v3, %v10929_v12  ;;  %v8154_v3 = vld [vmem:[%s8430_s14 + $0x1e1] sm:$0xff] }
 0x4d1   : > { %v11019_v42 = vadd.f32 %v5384_v1, %v5308_v28 }
 0x4d2   : > { %8123 = vmatmul.msk.f32.vlgmr.msrb.gmra.mxu0 %vm246_vm1, %v10560_v58  ;;  %8141 = vmatmul.msk.f32.vlgmr.msrb.gmra.mxu1 %vm246_vm1, %v10563_v61  ;;  %v5561_v27 = vadd.f32 %v5537_v52, %v5474_v47  ;;  %v8168_v58 = vld [vmem:[%s8430_s14 + $0x251] sm:$0xff] }
 0x4d3   : > { %8159 = vmatmul.msk.f32.vlgmr.msrb.gmra.mxu2 %vm246_vm1, %v8149_v29  ;;  %v8136_v52 = vld [vmem:[%s8430_s14 + $0x290] sm:$0xff] }
 0x4d4   : > { %8177 = vmatmul.msk.f32.vlgmr.msrb.gmra.mxu3 %vm246_vm1, %v8167_v21  ;;  %v8172_v21 = vld [vmem:[%s8430_s14 + $0x291] sm:$0xff] }
 0x4d6   : > { %v5623_v26 = vpop.f32.mrf.mxu2 }
 0x4d7   : > { %v5647_v44 = vadd.f32 %v5623_v26, %v5561_v27  ;;  %v5453_v4 = vpop.f32.mrf.mxu0  ;;  %v5709_v31 = vpop.f32.mrf.mxu3 }
 0x4d8   : > { %v5540_v11 = vpop.f32.mrf.mxu1  ;;  %v5475_v12 = vadd.f32 %v5453_v4, %v10940_v5 }
 0x4d9   : > { %v11031_v40 = vadd.f32 %v5709_v31, %v5647_v44 }
 0x4da   : > { %8124 = vmatmul.msk.f32.gmra.mxu0 %vm246_vm1, %v10577_v38  ;;  %8142 = vmatmul.msk.f32.gmra.mxu1 %vm246_vm1, %v10580_v15  ;;  %v5562_v61 = vadd.f32 %v5540_v11, %v5475_v12  ;;  %v8169_v38 = vld [vmem:[%s8430_s14 + $0x261] sm:$0xff] }
 0x4db   : > { %8160 = vmatmul.msk.f32.gmra.mxu2 %vm246_vm1, %v8150_v16  ;;  %v8173_v12 = vld [vmem:[%s8430_s14 + $0x2a1] sm:$0xff] }
 0x4dc   : > { %8178 = vmatmul.msk.f32.gmra.mxu3 %vm246_vm1, %v8168_v58 }
 0x4de   : > { %v5626_v14 = vpop.f32.mrf.mxu2 }
 0x4df   : > { %v5648_v55 = vadd.f32 %v5626_v14, %v5562_v61  ;;  %v5456_v63 = vpop.f32.mrf.mxu0  ;;  %v5712_v5 = vpop.f32.mrf.mxu3 }
 0x4e0   : > { %v5543_v43 = vpop.f32.mrf.mxu1  ;;  %v5476_v48 = vadd.f32 %v5456_v63, %v10950_v57 }
 0x4e1   : > { %v11042_v39 = vadd.f32 %v5712_v5, %v5648_v55  ;;  %v8156_v5 = vld [vmem:[%s8430_s14 + $0x201] sm:$0xff] }
 0x4e2   : > { %8125 = vmatmul.msk.f32.gmra.mxu0 %vm246_vm1, %v10594_v7  ;;  %8143 = vmatmul.msk.f32.gmra.mxu1 %vm246_vm1, %v10597_v59  ;;  %v5563_v15 = vadd.f32 %v5543_v43, %v5476_v48  ;;  %v8170_v7 = vld [vmem:[%s8430_s14 + $0x271] sm:$0xff] }
 0x4e3   : > { %8161 = vmatmul.msk.f32.gmra.mxu2 %vm246_vm1, %v8151_v9  ;;  %v8138_v43 = vld [vmem:[%s8430_s14 + $0x2b0] sm:$0xff] }
 0x4e4   : > { %8179 = vmatmul.msk.f32.gmra.mxu3 %vm246_vm1, %v8169_v38  ;;  %v8174_v38 = vld [vmem:[%s8430_s14 + $0x2b1] sm:$0xff] }
 0x4e6   : > { %v5629_v10 = vpop.f32.mrf.mxu2 }
 0x4e7   : > { %v5649_v62 = vadd.f32 %v5629_v10, %v5563_v15  ;;  %v5459_v49 = vpop.f32.mrf.mxu0  ;;  %v5715_v57 = vpop.f32.mrf.mxu3 }
 0x4e8   : > { %v5546_v30 = vpop.f32.mrf.mxu1  ;;  %v5477_v24 = vadd.f32 %v5459_v49, %v10961_v2 }
 0x4e9   : > { %v11053_v32 = vadd.f32 %v5715_v57, %v5649_v62  ;;  %v8185_v57 = vld [vmem:[%s8430_s14 + $0x192] sm:$0xff] }
 0x4ea   : > { %8126 = vmatmul.msk.f32.gmra.mxu0 %vm246_vm1, %v10611_v17  ;;  %8144 = vmatmul.msk.f32.gmra.mxu1 %vm246_vm1, %v10614_v35  ;;  %v5564_v59 = vadd.f32 %v5546_v30, %v5477_v24  ;;  %v8203_v30 = vld [vmem:[%s8430_s14 + $0x242] sm:$0xff] }
 0x4eb   : > { %8162 = vmatmul.msk.f32.gmra.mxu2 %vm246_vm1, %v8152_v36 }
 0x4ec   : > { %8180 = vmatmul.msk.f32.gmra.mxu3 %vm246_vm1, %v8170_v7 }
 0x4ee   : > { %v5632_v37 = vpop.f32.mrf.mxu2 }
 0x4ef   : > { %v5650_v20 = vadd.f32 %v5632_v37, %v5564_v59  ;;  %v5462_v45 = vpop.f32.mrf.mxu0  ;;  %v5718_v2 = vpop.f32.mrf.mxu3 }
 0x4f0   : > { %v5549_v50 = vpop.f32.mrf.mxu1  ;;  %v5478_v18 = vadd.f32 %v5462_v45, %v10989_v8  ;;  %v8118_v8 = vld [vmem:[%s8430_s14 + $0x1e0] sm:$0xff] }
 0x4f1   : > { %v11064_v17 = vadd.f32 %v5718_v2, %v5650_v20  ;;  %v8186_v45 = vld [vmem:[%s8430_s14 + $0x1a2] sm:$0xff] }
 0x4f2   : > { %8127 = vmatmul.msk.f32.gmra.mxu0 %vm246_vm1, %v10640_v19  ;;  %8145 = vmatmul.msk.f32.gmra.mxu1 %vm246_vm1, %v10646_v46  ;;  %v5565_v35 = vadd.f32 %v5549_v50, %v5478_v18  ;;  %v8204_v50 = vld [vmem:[%s8430_s14 + $0x252] sm:$0xff] }
 0x4f3   : > { %8163 = vmatmul.msk.f32.gmra.mxu2 %vm246_vm1, %v8153_v34 }
 0x4f4   : > { %8181 = vmatmul.msk.f32.gmra.mxu3 %vm246_vm1, %v8171_v54 }
 0x4f6   : > { %v5635_v6 = vpop.f32.mrf.mxu2 }
 0x4f7   : > { %v5651_v53 = vadd.f32 %v5635_v6, %v5565_v35  ;;  %v5465_v28 = vpop.f32.mrf.mxu0  ;;  %v5721_v1 = vpop.f32.mrf.mxu3  ;;  %v8187_v6 = vld [vmem:[%s8430_s14 + $0x1b2] sm:$0xff] }
 0x4f8   : > { %v5552_v29 = vpop.f32.mrf.mxu1  ;;  %v5479_v47 = vadd.f32 %v5465_v28, %v10999_v41  ;;  %v8155_v41 = vld [vmem:[%s8430_s14 + $0x1f1] sm:$0xff] }
 0x4f9   : > { %v11077_v19 = vadd.f32 %v5721_v1, %v5651_v53  ;;  %v8205_v1 = vld [vmem:[%s8430_s14 + $0x262] sm:$0xff] }
 0x4fa   : > { %8128 = vmatmul.msk.f32.gmra.mxu0 %vm246_vm1, %v8118_v8  ;;  %8146 = vmatmul.msk.f32.gmra.mxu1 %vm246_vm1, %v8136_v52  ;;  %v5566_v46 = vadd.f32 %v5552_v29, %v5479_v47  ;;  %v8188_v52 = vld [vmem:[%s8430_s14 + $0x1c2] sm:$0xff] }
 0x4fb   : > { %8164 = vmatmul.msk.f32.gmra.mxu2 %vm246_vm1, %v8154_v3  ;;  %v8224_v47 = vld [vmem:[%s8430_s14 + $0x1c3] sm:$0xff] }
 0x4fc   : > { %8182 = vmatmul.msk.f32.gmra.mxu3 %vm246_vm1, %v8172_v21 }
 0x4fe   : > { %v5638_v27 = vpop.f32.mrf.mxu2 }
 0x4ff   : > { %v5652_v26 = vadd.f32 %v5638_v27, %v5566_v46  ;;  %v5468_v44 = vpop.f32.mrf.mxu0  ;;  %v5724_v4 = vpop.f32.mrf.mxu3  ;;  %v8206_v27 = vld [vmem:[%s8430_s14 + $0x272] sm:$0xff] }
 0x500   : > { %v5555_v31 = vpop.f32.mrf.mxu1  ;;  %v5480_v16 = vadd.f32 %v5468_v44, %v11011_v51  ;;  %v8120_v51 = vld [vmem:[%s8430_s14 + $0x200] sm:$0xff] }
 0x501   : > { %v11086_v11 = vadd.f32 %v5724_v4, %v5652_v26 }
 0x502   : > { %8129 = vmatmul.msk.f32.gmra.mxu0 %vm246_vm1, %v10672_v23  ;;  %8147 = vmatmul.msk.f32.gmra.mxu1 %vm246_vm1, %v10675_v60  ;;  %v5567_v58 = vadd.f32 %v5555_v31, %v5480_v16  ;;  %v8189_v31 = vld [vmem:[%s8430_s14 + $0x1d2] sm:$0xff] }
 0x503   : > { %8165 = vmatmul.msk.f32.gmra.mxu2 %vm246_vm1, %v8155_v41  ;;  %v8225_v16 = vld [vmem:[%s8430_s14 + $0x1d3] sm:$0xff] }
 0x504   : > { %8183 = vmatmul.msk.f32.gmra.mxu3 %vm246_vm1, %v8173_v12 }
 0x506   : > { %v5641_v61 = vpop.f32.mrf.mxu2 }
 0x507   : > { %v5653_v14 = vadd.f32 %v5641_v61, %v5567_v58  ;;  %v5471_v55 = vpop.f32.mrf.mxu0  ;;  %v5727_v63 = vpop.f32.mrf.mxu3  ;;  %v8207_v61 = vld [vmem:[%s8430_s14 + $0x282] sm:$0xff] }
 0x508   : > { %v5558_v9 = vpop.f32.mrf.mxu1  ;;  %v5481_v23 = vadd.f32 %v5471_v55, %v11019_v42  ;;  %v8243_v55 = vld [vmem:[%s8430_s14 + $0x283] sm:$0xff] }
 0x509   : > { %v11099_v48 = vadd.f32 %v5727_v63, %v5653_v14 }
 0x50a   : > { %8130 = vmatmul.msk.f32.gmra.mxu0 %vm246_vm1, %v8120_v51  ;;  %8148 = vmatmul.msk.f32.gmra.mxu1 %vm246_vm1, %v8138_v43  ;;  %v5568_v60 = vadd.f32 %v5558_v9, %v5481_v23  ;;  %v8190_v43 = vld [vmem:[%s8430_s14 + $0x1e2] sm:$0xff] }
 0x50b   : > { %8166 = vmatmul.msk.f32.gmra.mxu2 %vm246_vm1, %v8156_v5  ;;  %v8226_v23 = vld [vmem:[%s8430_s14 + $0x1e3] sm:$0xff] }
 0x50c   : > { %8184 = vmatmul.msk.f32.gmra.mxu3 %vm246_vm1, %v8174_v38 }
 0x50e   : > { %v5644_v15 = vpop.f32.mrf.mxu2 }
 0x50f   : > { %v5654_v10 = vadd.f32 %v5644_v15, %v5568_v60  ;;  %v5730_v62 = vpop.f32.mrf.mxu3  ;;  %v5795_v49 = vpop.f32.mrf.mxu0  ;;  %v8208_v15 = vld [vmem:[%s8430_s14 + $0x292] sm:$0xff] }
 0x510   : > { %v5819_v42 = vadd.f32 %v5795_v49, %v11031_v40  ;;  %v5881_v36 = vpop.f32.mrf.mxu1 }
 0x511   : > { %v11109_v24 = vadd.f32 %v5730_v62, %v5654_v10  ;;  %v8244_v62 = vld [vmem:[%s8430_s14 + $0x293] sm:$0xff] }
 0x512   : > { %v5905_v7 = vadd.f32 %v5881_v36, %v5819_v42  ;;  %8195 = vmatmul.msk.f32.vlgmr.msra.gmra.mxu0 %vm246_vm1, %v8185_v57  ;;  %8213 = vmatmul.msk.f32.vlgmr.msra.gmra.mxu1 %vm246_vm1, %v8203_v30  ;;  %v8191_v30 = vld [vmem:[%s8430_s14 + $0x1f2] sm:$0xff] }
 0x513   : > { %8231 = vmatmul.msk.f32.vlgmr.msra.gmra.mxu2 %vm246_vm1, %v10700_v22 }
 0x514   : > { %8249 = vmatmul.msk.f32.vlgmr.msra.gmra.mxu3 %vm246_vm1, %v10706_v33 }
 0x516   : > { %v5967_v59 = vpop.f32.mrf.mxu2 }
 0x517   : > { %v5991_v37 = vadd.f32 %v5967_v59, %v5905_v7  ;;  %v5798_v20 = vpop.f32.mrf.mxu0  ;;  %v6053_v40 = vpop.f32.mrf.mxu3  ;;  %v8227_v7 = vld [vmem:[%s8430_s14 + $0x1f3] sm:$0xff] }
 0x518   : > { %v5820_v2 = vadd.f32 %v5798_v20, %v11042_v39  ;;  %v5884_v34 = vpop.f32.mrf.mxu1  ;;  %v8209_v20 = vld [vmem:[%s8430_s14 + $0x2a2] sm:$0xff] }
 0x519   : > { %v11120_v18 = vadd.f32 %v6053_v40, %v5991_v37 }
 0x51a   : > { %v5906_v54 = vadd.f32 %v5884_v34, %v5820_v2  ;;  %8196 = vmatmul.msk.f32.gmra.mxu0 %vm246_vm1, %v8186_v45  ;;  %8214 = vmatmul.msk.f32.gmra.mxu1 %vm246_vm1, %v8204_v50  ;;  %v8245_v45 = vld [vmem:[%s8430_s14 + $0x2a3] sm:$0xff] }
 0x51b   : > { %8232 = vmatmul.msk.f32.gmra.mxu2 %vm246_vm1, %v10717_v13 }
 0x51c   : > { %8250 = vmatmul.msk.f32.gmra.mxu3 %vm246_vm1, %v10723_v0 }
 0x51e   : > { %v5970_v22 = vpop.f32.mrf.mxu2 }
 0x51f   : > { %v5992_v33 = vadd.f32 %v5970_v22, %v5906_v54  ;;  %v5801_v35 = vpop.f32.mrf.mxu0  ;;  %v6056_v39 = vpop.f32.mrf.mxu3  ;;  %v8192_v22 = vld [vmem:[%s8430_s14 + $0x202] sm:$0xff] }
 0x520   : > { %v5821_v53 = vadd.f32 %v5801_v35, %v11053_v32  ;;  %v5887_v28 = vpop.f32.mrf.mxu1 }
 0x521   : > { %v11131_v8 = vadd.f32 %v6056_v39, %v5992_v33  ;;  %v8228_v33 = vld [vmem:[%s8430_s14 + $0x203] sm:$0xff] }
 0x522   : > { %v5907_v13 = vadd.f32 %v5887_v28, %v5821_v53  ;;  %8197 = vmatmul.msk.f32.gmra.mxu0 %vm246_vm1, %v8187_v6  ;;  %8215 = vmatmul.msk.f32.gmra.mxu1 %vm246_vm1, %v8205_v1  ;;  %v8210_v6 = vld [vmem:[%s8430_s14 + $0x2b2] sm:$0xff] }
 0x523   : > { %8233 = vmatmul.msk.f32.gmra.mxu2 %vm246_vm1, %v10734_v56  ;;  %v8242_v56 = vld [vmem:[%s8430_s14 + $0x273] sm:$0xff] }
 0x524   : > { %8251 = vmatmul.msk.f32.gmra.mxu3 %vm246_vm1, %v10740_v25  ;;  %v8246_v28 = vld [vmem:[%s8430_s14 + $0x2b3] sm:$0xff]  ;;  %s8353_s14 = smov 6  }
 0x526   : > { %v5973_v0 = vpop.f32.mrf.mxu2 }
 0x527   : > { %v5993_v3 = vadd.f32 %v5973_v0, %v5907_v13  ;;  %v5804_v32 = vpop.f32.mrf.mxu0  ;;  %v6059_v29 = vpop.f32.mrf.mxu3 }
 0x528   : > { %v5822_v21 = vadd.f32 %v5804_v32, %v11064_v17  ;;  %v5890_v46 = vpop.f32.mrf.mxu1 }
 0x529   : > { %v11143_v26 = vadd.f32 %v6059_v29, %v5993_v3 }
 0x52a   : > { %v5908_v44 = vadd.f32 %v5890_v46, %v5822_v21  ;;  %8198 = vmatmul.msk.f32.gmra.mxu0 %vm246_vm1, %v8188_v52  ;;  %8216 = vmatmul.msk.f32.gmra.mxu1 %vm246_vm1, %v8206_v27 }
 0x52b   : > { %8234 = vmatmul.msk.f32.gmra.mxu2 %vm246_vm1, %v8224_v47 }
 0x52c   : > { %8252 = vmatmul.msk.f32.gmra.mxu3 %vm246_vm1, %v8242_v56 }
 0x52e   : > { %v5976_v25 = vpop.f32.mrf.mxu2 }
 0x52f   : > { %v5994_v4 = vadd.f32 %v5976_v25, %v5908_v44  ;;  %v5807_v41 = vpop.f32.mrf.mxu0  ;;  %v6062_v17 = vpop.f32.mrf.mxu3 }
 0x530   : > { %v5823_v12 = vadd.f32 %v5807_v41, %v11077_v19  ;;  %v5893_v58 = vpop.f32.mrf.mxu1 }
 0x531   : > { %v11154_v14 = vadd.f32 %v6062_v17, %v5994_v4 }
 0x532   : > { %v5909_v63 = vadd.f32 %v5893_v58, %v5823_v12  ;;  %8199 = vmatmul.msk.f32.gmra.mxu0 %vm246_vm1, %v8189_v31  ;;  %8217 = vmatmul.msk.f32.gmra.mxu1 %vm246_vm1, %v8207_v61 }
 0x533   : > { %8235 = vmatmul.msk.f32.gmra.mxu2 %vm246_vm1, %v8225_v16 }
 0x534   : > { %8253 = vmatmul.msk.f32.gmra.mxu3 %vm246_vm1, %v8243_v55 }
 0x536   : > { %v5979_v51 = vpop.f32.mrf.mxu2 }
 0x537   : > { %v5995_v5 = vadd.f32 %v5979_v51, %v5909_v63  ;;  %v5810_v9 = vpop.f32.mrf.mxu0  ;;  %v6065_v19 = vpop.f32.mrf.mxu3 }
 0x538   : > { %v5824_v38 = vadd.f32 %v5810_v9, %v11086_v11  ;;  %v5896_v60 = vpop.f32.mrf.mxu1 }
 0x539   : > { %v11165_v10 = vadd.f32 %v6065_v19, %v5995_v5 }
 0x53a   : > { %v5910_v49 = vadd.f32 %v5896_v60, %v5824_v38  ;;  %8200 = vmatmul.msk.f32.gmra.mxu0 %vm246_vm1, %v8190_v43  ;;  %8218 = vmatmul.msk.f32.gmra.mxu1 %vm246_vm1, %v8208_v15 }
 0x53b   : > { %8236 = vmatmul.msk.f32.gmra.mxu2 %vm246_vm1, %v8226_v23 }
 0x53c   : > { %8254 = vmatmul.msk.f32.gmra.mxu3 %vm246_vm1, %v8244_v62 }
 0x53e   : > { %v5982_v57 = vpop.f32.mrf.mxu2 }
 0x53f   : > { %v5996_v42 = vadd.f32 %v5982_v57, %v5910_v49  ;;  %v5813_v36 = vpop.f32.mrf.mxu0  ;;  %v6068_v11 = vpop.f32.mrf.mxu3 }
 0x540   : > { %v5825_v59 = vadd.f32 %v5813_v36, %v11099_v48  ;;  %v5899_v37 = vpop.f32.mrf.mxu1 }
 0x541   : > { %v11176_v40 = vadd.f32 %v6068_v11, %v5996_v42 }
 0x542   : > { %v5911_v2 = vadd.f32 %v5899_v37, %v5825_v59  ;;  %8201 = vmatmul.msk.f32.gmra.mxu0 %vm246_vm1, %v8191_v30  ;;  %8219 = vmatmul.msk.f32.gmra.mxu1 %vm246_vm1, %v8209_v20 }
 0x543   : > { %8237 = vmatmul.msk.f32.gmra.mxu2 %vm246_vm1, %v8227_v7 }
 0x544   : > { %8255 = vmatmul.msk.f32.gmra.mxu3 %vm246_vm1, %v8245_v45 }
 0x546   : > { %v5985_v34 = vpop.f32.mrf.mxu2 }
 0x547   : > { %v5997_v50 = vadd.f32 %v5985_v34, %v5911_v2  ;;  %v5816_v54 = vpop.f32.mrf.mxu0  ;;  %v6071_v48 = vpop.f32.mrf.mxu3 }
 0x548   : > { %v5826_v35 = vadd.f32 %v5816_v54, %v11109_v24  ;;  %v5902_v39 = vpop.f32.mrf.mxu1 }
 0x549   : > { %v11187_v53 = vadd.f32 %v6071_v48, %v5997_v50 }
 0x54a   : > { %v5912_v1 = vadd.f32 %v5902_v39, %v5826_v35  ;;  %8202 = vmatmul.msk.f32.gmra.mxu0 %vm246_vm1, %v8192_v22  ;;  %8220 = vmatmul.msk.f32.gmra.mxu1 %vm246_vm1, %v8210_v6 }
 0x54b   : > { %8238 = vmatmul.msk.f32.gmra.mxu2 %vm246_vm1, %v8228_v33 }
 0x54c   : > { %8256 = vmatmul.msk.f32.gmra.mxu3 %vm246_vm1, %v8246_v28 }
 0x54e   : > { %v5988_v13 = vpop.f32.mrf.mxu2 }
 0x54f   : > { %v5998_v0 = vadd.f32 %v5988_v13, %v5912_v1  ;;  %v6074_v3 = vpop.f32.mrf.mxu3  ;;  %v6140_v32 = vpop.f32.mrf.mxu0 }
 0x550   : > { %v6227_v29 = vpop.f32.mrf.mxu1  ;;  %v6164_v38 = vadd.f32 %v6140_v32, %v11120_v18 }
 0x551   : > { %v11194_v24 = vadd.f32 %v6074_v3, %v5998_v0 }
 0x552   : > { %v6251_v57 = vadd.f32 %v6227_v29, %v6164_v38 }
 0x556   : > { %v6313_v52 = vpop.f32.mrf.mxu2 }
 0x557   : > { %v6143_v47 = vpop.f32.mrf.mxu0  ;;  %v6399_v21 = vpop.f32.mrf.mxu3  ;;  %v6337_v42 = vadd.f32 %v6313_v52, %v6251_v57 }
 0x558   : > { %v6230_v46 = vpop.f32.mrf.mxu1  ;;  %v6165_v36 = vadd.f32 %v6143_v47, %v11131_v8 }
 0x559   : > { %v6423_v30 = vadd.f32 %v6399_v21, %v6337_v42 }
 0x55a   : > { %v6252_v18 = vadd.f32 %v6230_v46, %v6165_v36 }
 0x55e   : > { %v6316_v27 = vpop.f32.mrf.mxu2 }
 0x55f   : > { %v6146_v56 = vpop.f32.mrf.mxu0  ;;  %v6402_v44 = vpop.f32.mrf.mxu3  ;;  %v6338_v45 = vadd.f32 %v6316_v27, %v6252_v18 }
 0x560   : > { %v6233_v25 = vpop.f32.mrf.mxu1  ;;  %v6166_v2 = vadd.f32 %v6146_v56, %v11143_v26 }
 0x561   : > { %v6424_v54 = vadd.f32 %v6402_v44, %v6338_v45 }
 0x562   : > { %v6253_v8 = vadd.f32 %v6233_v25, %v6166_v2 }
 0x566   : > { %v6319_v4 = vpop.f32.mrf.mxu2 }
 0x567   : > { %v6149_v41 = vpop.f32.mrf.mxu0  ;;  %v6405_v17 = vpop.f32.mrf.mxu3  ;;  %v6339_v28 = vadd.f32 %v6319_v4, %v6253_v8 }
 0x568   : > { %v6236_v31 = vpop.f32.mrf.mxu1  ;;  %v6167_v1 = vadd.f32 %v6149_v41, %v11154_v14 }
 0x569   : > { %v6425_v3 = vadd.f32 %v6405_v17, %v6339_v28 }
 0x56a   : > { %v6254_v47 = vadd.f32 %v6236_v31, %v6167_v1 }
 0x56e   : > { %v6322_v16 = vpop.f32.mrf.mxu2 }
 0x56f   : > { %v6152_v12 = vpop.f32.mrf.mxu0  ;;  %v6408_v58 = vpop.f32.mrf.mxu3  ;;  %v6340_v27 = vadd.f32 %v6322_v16, %v6254_v47 }
 0x570   : > { %v6239_v61 = vpop.f32.mrf.mxu1  ;;  %v6168_v56 = vadd.f32 %v6152_v12, %v11165_v10 }
 0x571   : > { %v6426_v4 = vadd.f32 %v6408_v58, %v6340_v27  ;;  %v6784_v27 = vpop.permute.xlu0 %6783 }
 0x572   : > { %v6255_v17 = vadd.f32 %v6239_v61, %v6168_v56  ;;  %v11448_v56 = vld [vmem:[#allocation4_spill] sm:$0xff] }
 0x576   : > { %v6325_v55 = vpop.f32.mrf.mxu2 }
 0x577   : > { %v11196_v63 = vpop.f32.mrf.mxu0  ;;  %v11198_v51 = vpop.f32.mrf.mxu3 }
 0x578   : > { %v11200_v5 = vpop.f32.mrf.mxu1  ;;  %v6169_v31 = vadd.f32 %v11196_v63, %v11176_v40 }
 0x57e   : > { %v11202_v9 = vpop.f32.mrf.mxu2 }
 0x57f   : > { %v11204_v19 = vpop.f32.mrf.mxu0  ;;  %v11206_v43 = vpop.f32.mrf.mxu3 }
 0x580   : > { %v11208_v23 = vpop.f32.mrf.mxu1 }
 0x586   : > { %v11211_v60 = vpop.f32.mrf.mxu2 }
 0x587   : > { %v11213_v15 = vpop.f32.mrf.mxu0  ;;  %v11215_v62 = vpop.f32.mrf.mxu3 }
 0x588   : > { %v11217_v49 = vpop.f32.mrf.mxu1 }
 0x58e   : > { %v11220_v11 = vpop.f32.mrf.mxu2 }
 0x58f   : > { %v11222_v7 = vpop.f32.mrf.mxu3  ;;  %v6485_v59 = vpop.f32.mrf.mxu0 }
 0x590   : > { %v6571_v37 = vpop.f32.mrf.mxu1  ;;  %v6509_v20 = vadd.f32 %v6485_v59, %v6423_v30  ;;  %v6341_v30 = vadd.f32 %v6325_v55, %v6255_v17  ;;  %v6170_v55 = vadd.f32 %v11204_v19, %v11187_v53  ;;  %v11449_v17 = vld [vmem:[#allocation7_spill] sm:$0xff] }
 0x592   : > { %v6595_v34 = vadd.f32 %v6571_v37, %v6509_v20  ;;  %v6427_v10 = vadd.f32 %v11198_v51, %v6341_v30  ;;  %v6256_v20 = vadd.f32 %v11200_v5, %v6169_v31 }
 0x594   : > { %v6342_v2 = vadd.f32 %v11202_v9, %v6256_v20  ;;  %v6171_v9 = vadd.f32 %v11213_v15, %v11194_v24  ;;  %v11451_v20 = vld [vmem:[#allocation6_spill] sm:$0xff] }
 0x596   : > { %v6657_v50 = vpop.f32.mrf.mxu2  ;;  %v6258_v1 = vadd.f32 %v11217_v49, %v6171_v9 }
 0x597   : > { %v6681_v48 = vadd.f32 %v6657_v50, %v6595_v34  ;;  %v6488_v22 = vpop.f32.mrf.mxu0  ;;  %v6743_v33 = vpop.f32.mrf.mxu3  ;;  %v6428_v34 = vadd.f32 %v11206_v43, %v6342_v2 }
 0x598   : > { %v6574_v35 = vpop.f32.mrf.mxu1  ;;  %v6510_v39 = vadd.f32 %v6488_v22, %v6424_v54  ;;  %v6257_v22 = vadd.f32 %v11208_v23, %v6170_v55 }
 0x599   : > { %v6767_v6 = vadd.f32 %v6743_v33, %v6681_v48 }
 0x59a   : > { %v6596_v13 = vadd.f32 %v6574_v35, %v6510_v39  ;;  %v6343_v35 = vadd.f32 %v11211_v60, %v6257_v22 }
 0x59b   : > { %6815 = vrot.lane.b32.xlu2 %v6767_v6, %s8353_s14 }
 0x59c   : > { %v6429_v8 = vadd.f32 %v11215_v62, %v6343_v35  ;;  %v11454_v35 = vld [vmem:[#allocation10_spill] sm:$0xff] }
 0x59e   : > { %v6660_v0 = vpop.f32.mrf.mxu2 }
 0x59f   : > { %v6682_v26 = vadd.f32 %v6660_v0, %v6596_v13  ;;  %v6491_v32 = vpop.f32.mrf.mxu0  ;;  %v6746_v29 = vpop.f32.mrf.mxu3  ;;  %v6344_v0 = vadd.f32 %v11220_v11, %v6258_v1 }
 0x5a0   : > { %v6577_v52 = vpop.f32.mrf.mxu1  ;;  %v6511_v21 = vadd.f32 %v6491_v32, %v6425_v3 }
 0x5a1   : > { %v6768_v46 = vadd.f32 %v6746_v29, %v6682_v26  ;;  %v6430_v24 = vadd.f32 %v11222_v7, %v6344_v0  ;;  %v8271_v7 = vld [vmem:[%s11305_s4] ss:$0 sm:$0xff] }
 0x5a2   : > { %v6597_v44 = vadd.f32 %v6577_v52, %v6511_v21 }
 0x5a3   : > { %6817 = vrot.lane.b32.xlu0 %v6768_v46, %s8353_s14 }
 0x5a6   : > { %v6663_v25 = vpop.f32.mrf.mxu2 }
 0x5a7   : > { %v6683_v38 = vadd.f32 %v6663_v25, %v6597_v44  ;;  %v6494_v14 = vpop.f32.mrf.mxu0  ;;  %v6749_v41 = vpop.f32.mrf.mxu3  ;;  %v6839_v44 = vsel %vm246_vm1, %v11448_v56, %v6784_v27 }
 0x5a8   : > { %v6580_v57 = vpop.f32.mrf.mxu1  ;;  %v6512_v42 = vadd.f32 %v6494_v14, %v6426_v4  ;;  %v6788_v14 = vpop.permute.xlu1 %6787 }
 0x5a9   : > { %v6769_v36 = vadd.f32 %v6749_v41, %v6683_v38  ;;  %v6786_v41 = vpop.permute.xlu0 %6785 }
 0x5aa   : > { %v6598_v16 = vadd.f32 %v6580_v57, %v6512_v42 }
 0x5ab   : > { %6819 = vrot.lane.b32.xlu1 %v6769_v36, %s8353_s14 }
 0x5ae   : > { %v6666_v59 = vpop.f32.mrf.mxu2 }
 0x5af   : > { %v6684_v12 = vadd.f32 %v6666_v59, %v6598_v16  ;;  %v6497_v37 = vpop.f32.mrf.mxu0  ;;  %v6752_v58 = vpop.f32.mrf.mxu3  ;;  %v11450_v59 = vld [vmem:[#allocation5_spill] sm:$0xff] }
 0x5b0   : > { %v6583_v18 = vpop.f32.mrf.mxu1  ;;  %v6513_v45 = vadd.f32 %v6497_v37, %v6427_v10  ;;  %v6790_v57 = vpop.permute.xlu1 %6789  ;;  %v6840_v10 = vsel %vm246_vm1, %v11450_v59, %v6786_v41 }
 0x5b1   : > { %v6770_v61 = vadd.f32 %v6752_v58, %v6684_v12  ;;  %v6842_v42 = vsel %vm246_vm1, %v11449_v17, %v6790_v57  ;;  %v6796_v36 = vpop.permute.xlu0 %6795 }
 0x5b2   : > { %v6599_v40 = vadd.f32 %v6583_v18, %v6513_v45  ;;  %v6841_v45 = vsel %vm246_vm1, %v11451_v20, %v6788_v14 }
 0x5b3   : > { %6821 = vrot.lane.b32.xlu2 %v6770_v61, %s8353_s14 }
 0x5b6   : > { %v6669_v63 = vpop.f32.mrf.mxu2 }
 0x5b7   : > { %v6685_v51 = vadd.f32 %v6669_v63, %v6599_v40  ;;  %v6500_v50 = vpop.f32.mrf.mxu0  ;;  %v6755_v54 = vpop.f32.mrf.mxu3  ;;  %v11452_v40 = vld [vmem:[#allocation13_spill] sm:$0xff] }
 0x5b8   : > { %v6586_v48 = vpop.f32.mrf.mxu1  ;;  %v6514_v5 = vadd.f32 %v6500_v50, %v6428_v34  ;;  %v6798_v12 = vpop.permute.xlu1 %6797  ;;  %v6845_v63 = vsel %vm246_vm1, %v11452_v40, %v6796_v36 }
 0x5b9   : > { %v6771_v33 = vadd.f32 %v6755_v54, %v6685_v51 }
 0x5ba   : > { %v6600_v53 = vadd.f32 %v6586_v48, %v6514_v5  ;;  %v11453_v48 = vld [vmem:[#allocation8_spill] sm:$0xff] }
 0x5bb   : > { %6823 = vrot.lane.b32.xlu0 %v6771_v33, %s8353_s14 }
 0x5be   : > { %v6672_v19 = vpop.f32.mrf.mxu2 }
 0x5bf   : > { %v6686_v43 = vadd.f32 %v6672_v19, %v6600_v53  ;;  %v6503_v39 = vpop.f32.mrf.mxu0  ;;  %v6758_v6 = vpop.f32.mrf.mxu3  ;;  %v11455_v19 = vld [vmem:[#allocation15_spill] sm:$0xff] }
 0x5c0   : > { %v6589_v28 = vpop.f32.mrf.mxu1  ;;  %v6515_v23 = vadd.f32 %v6503_v39, %v6429_v8  ;;  %v6846_v8 = vsel %vm246_vm1, %v11455_v19, %v6798_v12 }
 0x5c1   : > { %v6772_v13 = vadd.f32 %v6758_v6, %v6686_v43 }
 0x5c2   : > { %v6601_v60 = vadd.f32 %v6589_v28, %v6515_v23 }
 0x5c3   : > { %6825 = vrot.lane.b32.xlu1 %v6772_v13, %s8353_s14 }
 0x5c6   : > { %v6675_v3 = vpop.f32.mrf.mxu2 }
 0x5c7   : > { %v6687_v15 = vadd.f32 %v6675_v3, %v6601_v60  ;;  %v6506_v26 = vpop.f32.mrf.mxu0  ;;  %v6761_v62 = vpop.f32.mrf.mxu3 }
 0x5c8   : > { %v6516_v32 = vadd.f32 %v6506_v26, %v6430_v24  ;;  %v6592_v52 = vpop.f32.mrf.mxu1 }
 0x5c9   : > { %v6773_v29 = vadd.f32 %v6761_v62, %v6687_v15 }
 0x5ca   : > { %v6602_v49 = vadd.f32 %v6592_v52, %v6516_v32 }
 0x5cb   : > { %6827 = vrot.lane.b32.xlu2 %v6773_v29, %s8353_s14 }
 0x5ce   : > { %v6678_v47 = vpop.f32.mrf.mxu2 }
 0x5cf   : > { %v6688_v21 = vadd.f32 %v6678_v47, %v6602_v49  ;;  %v6764_v46 = vpop.f32.mrf.mxu3 }
 0x5d1   : > { %v6774_v11 = vadd.f32 %v6764_v46, %v6688_v21 }
 0x5d3   : > { %6829 = vrot.lane.b32.xlu0 %v6774_v11, %s8353_s14 }
 0x5f5   : > { %v6816_v25 = vpop.permute.xlu2 %6815 }
 0x5f6   : > { %v6848_v4 = vsel %vm6847_vm2, %v6839_v44, %v6816_v25 }
 0x5f7   : > { %v6860_v38 = vadd.f32 %v8271_v7, %v6848_v4 }
 0x5f9   : > { %6869 = vst.msk [vmem:[%s11260_s21] sm:$0xff] %vm6868_vm3, %v6860_v38 }
 0x60d   : > { %v6822_v30 = vpop.permute.xlu2 %6821 }
 0x60e   : > { %v6851_v31 = vsel %vm6847_vm2, %v6842_v42, %v6822_v30 }
 0x60f   : > { %v6863_v16 = vadd.f32 %v8271_v7, %v6851_v31 }
 0x611   : > { %6872 = vst.msk [vmem:[%s11260_s21 + $0x18] sm:$0xff] %vm6868_vm3, %v6863_v16 }
 0x615   : > { %v6818_v37 = vpop.permute.xlu0 %6817 }
 0x616   : > { %v6849_v58 = vsel %vm6847_vm2, %v6840_v10, %v6818_v37 }
 0x617   : > { %v6861_v18 = vadd.f32 %v8271_v7, %v6849_v58 }
 0x619   : > { %6870 = vst.msk [vmem:[%s11260_s21 + $0x8] sm:$0xff] %vm6868_vm3, %v6861_v18 }
 0x61d   : > { %v6820_v61 = vpop.permute.xlu1 %6819 }
 0x61e   : > { %v6850_v2 = vsel %vm6847_vm2, %v6841_v45, %v6820_v61 }
 0x61f   : > { %v6862_v55 = vadd.f32 %v8271_v7, %v6850_v2 }
 0x621   : > { %6871 = vst.msk [vmem:[%s11260_s21 + $0x10] sm:$0xff] %vm6868_vm3, %v6862_v55 }
 0x625   : > { %v6828_v34 = vpop.permute.xlu2 %6827 }
 0x626   : > { %v6854_v51 = vsel %vm6847_vm2, %v6845_v63, %v6828_v34 }
 0x627   : > { %v6866_v50 = vadd.f32 %v8271_v7, %v6854_v51 }
 0x629   : > { %6875 = vst.msk [vmem:[%s11260_s21 + $0x30] sm:$0xff] %vm6868_vm3, %v6866_v50 }
 0x62d   : > { %v6824_v54 = vpop.permute.xlu0 %6823 }
 0x62e   : > { %v6852_v22 = vsel %vm6847_vm2, %v11453_v48, %v6824_v54 }
 0x62f   : > { %v6864_v5 = vadd.f32 %v8271_v7, %v6852_v22 }
 0x631   : > { %6873 = vst.msk [vmem:[%s11260_s21 + $0x20] sm:$0xff] %vm6868_vm3, %v6864_v5 }
 0x635   : > { %v6826_v33 = vpop.permute.xlu1 %6825 }
 0x636   : > { %v6853_v9 = vsel %vm6847_vm2, %v11454_v35, %v6826_v33 }
 0x637   : > { %v6865_v53 = vadd.f32 %v8271_v7, %v6853_v9 }
 0x639   : > { %6874 = vst.msk [vmem:[%s11260_s21 + $0x28] sm:$0xff] %vm6868_vm3, %v6865_v53 }
 0x645   : > { %v6830_v43 = vpop.permute.xlu0 %6829 }
 0x646   : > { %v6855_v39 = vsel %vm6847_vm2, %v6846_v8, %v6830_v43 }
 0x647   : > { %v6867_v6 = vadd.f32 %v8271_v7, %v6855_v39 }
 0x649   : > { %6876 = vst.msk [vmem:[%s11260_s21 + $0x38] sm:$0xff] %vm6868_vm3, %v6867_v6 }
 0x64a PF: > { %s15_s18 = sadd.s32 1, %s8350_s18  }
 0x64b   : > { %p12_p4 = scmp.ge.s32.totalorder %s15_s18, 4  }
 0x64d   :  { %14 = sbr.rel (!%p12_p4) target bundleno = 1 (0x1), region = 166 }

</bundles_post_ra>
